<compile_context>
chip_gen: v6e
topology: v6e:2x2x1
jax: 0.10.0
libtpu: 0.0.40
codegen_flags: <defaults>
</compile_context>

<pallas_src>
import functools
import math

import jax
import jax.numpy as jnp
from jax import lax
from jax.experimental import pallas as pl
from jax.experimental.pallas import tpu as pltpu

N_EMBD = 64
N_HEAD = 8
HEAD_DIM = N_EMBD // N_HEAD
BLOCK_SIZE = 33          # max sequence length supported by the causal mask
LN_EPS = 1e-5
MAX_B_TILE = 32          # bounds the per-step batch unroll / score temporaries
                         # (working set is only a few MiB -- far below VMEM)


def _round_up(x, m):
    return ((x + m - 1) // m) * m


def _num_tensorcores():
    """Best-effort TensorCore count of the local chip (v5e/v6e: 1, v7x: 2)."""
    try:
        d = jax.devices()[0]
        n = getattr(d, "num_cores", None)
        if isinstance(n, int) and n >= 1:
            return n
        kind = str(getattr(d, "device_kind", "")).lower()
        return 2 if "v7" in kind else 1
    except Exception:
        return 1


def _pick_b_tile(batch, t_pad, n_cores):
    """Core-count-aware tile: single-TC chips get one wide step, multi-TC chips
    keep G >= n_cores when the batch allows; b_tile is rounded so that
    n_tok = b_tile * t_pad is a multiple of 128 (lane-dense stores)."""
    lane_mult = 128 // math.gcd(t_pad, 128)          # t_pad is a multiple of 8
    per_core = pl.cdiv(batch, n_cores) if n_cores > 1 else batch
    b = min(max(per_core, 1), MAX_B_TILE)
    b = min(_round_up(b, lane_mult), MAX_B_TILE)
    return max(b, 1)


def _layernorm_t(xT):
    """LayerNorm (no affine -- gamma/beta are folded into the next matmul) over
    the feature axis for feature-major (C, N) activations.  Two-pass variance."""
    inv_c = 1.0 / xT.shape[0]
    mu = jnp.sum(xT, axis=0, keepdims=True) * inv_c          # (1, N)
    xc = xT - mu
    var = jnp.sum(xc * xc, axis=0, keepdims=True) * inv_c    # (1, N)
    return xc * lax.rsqrt(var + LN_EPS)


def _block_kernel(b_tile, t_pad, t_real,
                  x_ref,
                  qkv_w_ref, qkv_b_ref,
                  out_w_ref, out_b_ref,
                  fc1_w_ref, fc1_b_ref,
                  fc2_w_ref, fc2_b_ref,
                  o_ref,
                  attn_ref):
    C, H, D = N_EMBD, N_HEAD, HEAD_DIM
    n_tok = b_tile * t_pad

    xT = x_ref[0].astype(jnp.float32)                        # (C, n_tok) feature-major

    # ---------------- self-attention branch ----------------
    hT = _layernorm_t(xT)                                    # LN1 affine folded into qkv_w/b
    qkvT = jnp.dot(qkv_w_ref[...], hT.astype(jnp.bfloat16),
                   preferred_element_type=jnp.float32) + qkv_b_ref[...]    # (3C, n_tok)

    # Head split as reshape views of the sublane axis (no per-head stacks/copies).
    def _heads(lo):
        return qkvT[lo:lo + C].reshape(H, D, n_tok)
    # Two bulk transposes put D on lanes so the batched score einsum is the
    # canonical contraction-on-last-dim form (safe, well-supported lowering).
    q_hnd = jnp.swapaxes(_heads(0), 1, 2).astype(jnp.bfloat16)      # (H, n_tok, D)
    k_hnd = jnp.swapaxes(_heads(C), 1, 2).astype(jnp.bfloat16)      # (H, n_tok, D)
    v_hdn = _heads(2 * C).astype(jnp.bfloat16)                      # (H, D, n_tok)

    # Additive causal mask built once; also masks padded key columns (col >= T).
    row = lax.broadcasted_iota(jnp.int32, (t_pad, t_pad), 0)
    col = lax.broadcasted_iota(jnp.int32, (t_pad, t_pad), 1)
    bias = jnp.where((row >= col) & (col < t_real),
                     0.0, -1e30).astype(jnp.float32)          # finite: no NaNs on pads

    # Short fully-unrolled per-batch loop; every iteration retires its result
    # into the VMEM scratch, so no values stay live across iterations and the
    # old list + concatenate assembly is gone.  (1/sqrt(D) folded into Q.)
    for b in range(b_tile):
        sl = slice(b * t_pad, (b + 1) * t_pad)
        qb = q_hnd[:, sl, :]                                  # (H, T, D) sublane slice
        kb = k_hnd[:, sl, :]                                  # (H, T, D)
        vb = v_hdn[:, :, sl]                                  # (H, D, T)
        s = jnp.einsum('hqd,hkd->hqk', qb, kb,
                       preferred_element_type=jnp.float32) + bias
        s = s - jnp.max(s, axis=-1, keepdims=True)
        p = jnp.exp(s)
        p = p * pl.reciprocal(jnp.sum(p, axis=-1, keepdims=True), approx=True)
        # TODO(synk): attention-weight dropout (p=0.2) omitted -- eval-mode identity.
        ob = jnp.einsum('hdk,hqk->hdq', vb, p.astype(jnp.bfloat16),
                        preferred_element_type=jnp.float32)   # (H, D, T)
        attn_ref[:, sl] = ob.reshape(C, t_pad)                # free head merge

    # Fused MHA out_proj + Block.proj (folded offline on the host).
    saT = jnp.dot(out_w_ref[...], attn_ref[...].astype(jnp.bfloat16),
                  preferred_element_type=jnp.float32) + out_b_ref[...]
    x1T = xT + saT                                            # residual 1

    # ---------------- feed-forward branch ----------------
    h2T = _layernorm_t(x1T)                                   # LN2 affine folded into fc1_w/b
    f = jnp.dot(fc1_w_ref[...], h2T.astype(jnp.bfloat16),
                preferred_element_type=jnp.float32) + fc1_b_ref[...]       # (4C, n_tok)
    f = jnp.maximum(f, 0.0)
    f = jnp.dot(fc2_w_ref[...], f.astype(jnp.bfloat16),
                preferred_element_type=jnp.float32) + fc2_b_ref[...]       # (C, n_tok)
    # TODO(synk): MLP output dropout (p=0.2) omitted -- eval-mode identity.
    o_ref[0] = (x1T + f).astype(o_ref.dtype)                  # residual 2


KERNEL_PARAM_ORDER = ("qkv_w", "qkv_b",
                      "out_w", "out_b",
                      "fc1_w", "fc1_b",
                      "fc2_w", "fc2_b")


def init_params(key, n_embd=N_EMBD):
    """Parameters in the original PyTorch layout (nn.Linear: (out, in))."""
    ks = jax.random.split(key, 10)
    s = 0.02
    return {
        "ln1_g": jnp.ones((n_embd,), jnp.float32),
        "ln1_b": jnp.zeros((n_embd,), jnp.float32),
        "in_proj_w": s * jax.random.normal(ks[0], (3 * n_embd, n_embd), jnp.float32),
        "in_proj_b": s * jax.random.normal(ks[1], (3 * n_embd,), jnp.float32),
        "attn_out_w": s * jax.random.normal(ks[2], (n_embd, n_embd), jnp.float32),
        "attn_out_b": s * jax.random.normal(ks[3], (n_embd,), jnp.float32),
        "proj_w": s * jax.random.normal(ks[4], (n_embd, n_embd), jnp.float32),
        "proj_b": s * jax.random.normal(ks[5], (n_embd,), jnp.float32),
        "ln2_g": jnp.ones((n_embd,), jnp.float32),
        "ln2_b": jnp.zeros((n_embd,), jnp.float32),
        "fc1_w": s * jax.random.normal(ks[6], (4 * n_embd, n_embd), jnp.float32),
        "fc1_b": s * jax.random.normal(ks[7], (4 * n_embd,), jnp.float32),
        "fc2_w": s * jax.random.normal(ks[8], (n_embd, 4 * n_embd), jnp.float32),
        "fc2_b": s * jax.random.normal(ks[9], (n_embd,), jnp.float32),
    }


def prepare_params(p):
    """One-time host-side prep (hoisted out of every forward trace):
       * fold LN1 gamma/beta into qkv_w/qkv_b and LN2 gamma/beta into fc1_w/fc1_b,
       * fold the 1/sqrt(head_dim) score scale into the Q rows,
       * fuse MHA out_proj with the Block's extra `proj` Linear,
       * biases/LN as (rows,1) columns for the feature-major layout,
       * matmul weights cast to bf16 for the MXU."""
    col = lambda v: v.reshape(-1, 1).astype(jnp.float32)

    # LN1 fold: Linear(LN(x)) = (W * g) @ xn + (b + W @ beta)
    qkv_w = p["in_proj_w"] * p["ln1_g"][None, :]
    qkv_b = p["in_proj_b"] + p["in_proj_w"] @ p["ln1_b"]
    # fold 1/sqrt(D) into the Q third of the projection
    q_scale = 1.0 / math.sqrt(HEAD_DIM)
    scale_vec = jnp.concatenate(
        [jnp.full((N_EMBD,), q_scale, jnp.float32),
         jnp.ones((2 * N_EMBD,), jnp.float32)])
    qkv_w = qkv_w * scale_vec[:, None]
    qkv_b = qkv_b * scale_vec

    # y = ((A @ Wo.T + bo) @ Wp.T + bp) == A @ (Wp@Wo).T + (bo @ Wp.T + bp)
    out_w = p["proj_w"] @ p["attn_out_w"]
    out_b = p["attn_out_b"] @ p["proj_w"].T + p["proj_b"]

    # LN2 fold into fc1
    fc1_w = p["fc1_w"] * p["ln2_g"][None, :]
    fc1_b = p["fc1_b"] + p["fc1_w"] @ p["ln2_b"]

    return {
        "qkv_w": qkv_w.astype(jnp.bfloat16), "qkv_b": col(qkv_b),
        "out_w": out_w.astype(jnp.bfloat16), "out_b": col(out_b),
        "fc1_w": fc1_w.astype(jnp.bfloat16), "fc1_b": col(fc1_b),
        "fc2_w": p["fc2_w"].astype(jnp.bfloat16), "fc2_b": col(p["fc2_b"]),
    }


def block_forward(x, prep, b_tile=None):
    """Forward pass.  `prep` must come from prepare_params() (called once)."""
    B, T, C = x.shape
    assert C == N_EMBD and T <= BLOCK_SIZE

    t_pad = _round_up(T, 8)                  # clean sublane splits / slices
    n_cores = _num_tensorcores()
    if b_tile is None:
        b_tile = _pick_b_tile(B, t_pad, n_cores)
    G = pl.cdiv(B, b_tile)
    B_pad = G * b_tile
    n_tok = b_tile * t_pad                   # lane width per grid step

    xp = x
    if B_pad != B or t_pad != T:
        xp = jnp.pad(x, ((0, B_pad - B), (0, t_pad - T), (0, 0)))

    # Lane-dense, feature-major layout: (G, C, b_tile*t_pad).  Done once in XLA.
    xt = xp.reshape(G, n_tok, C).transpose(0, 2, 1)

    plist = [prep[k] for k in KERNEL_PARAM_ORDER]

    def full_spec(a):
        nd = a.ndim
        return pl.BlockSpec(a.shape, lambda g, _nd=nd: (0,) * _nd)

    kernel = functools.partial(_block_kernel, b_tile, t_pad, T)
    out_t = pl.pallas_call(
        kernel,
        out_shape=jax.ShapeDtypeStruct((G, C, n_tok), x.dtype),
        grid=(G,),
        in_specs=[pl.BlockSpec((1, C, n_tok), lambda g: (g, 0, 0))]
                 + [full_spec(a) for a in plist],
        out_specs=pl.BlockSpec((1, C, n_tok), lambda g: (g, 0, 0)),
        scratch_shapes=[pltpu.VMEM((C, n_tok), jnp.float32)],
        compiler_params=pltpu.CompilerParams(
            dimension_semantics=("parallel",)),
    )(xt, *plist)

    out = out_t.transpose(0, 2, 1).reshape(B_pad, t_pad, C)
    return out[:B, :T]


def block_reference(x, p):
    """Pure-JAX reference with the original (unfused) PyTorch math, for checking."""
    def ln(v, g, b):
        mu = v.mean(-1, keepdims=True)
        var = ((v - mu) ** 2).mean(-1, keepdims=True)
        return (v - mu) / jnp.sqrt(var + LN_EPS) * g + b

    B, T, C = x.shape
    h = ln(x, p["ln1_g"], p["ln1_b"])
    qkv = h @ p["in_proj_w"].T + p["in_proj_b"]
    q, k, v = jnp.split(qkv, 3, axis=-1)

    def heads(t):
        return t.reshape(B, T, N_HEAD, HEAD_DIM).transpose(0, 2, 1, 3)

    qh, kh, vh = heads(q), heads(k), heads(v)
    s = jnp.einsum("bhqd,bhkd->bhqk", qh, kh) / math.sqrt(HEAD_DIM)
    mask = jnp.tril(jnp.ones((T, T), bool))
    s = jnp.where(mask, s, -jnp.inf)
    a = jax.nn.softmax(s, axis=-1)
    o = jnp.einsum("bhqk,bhkd->bhqd", a, vh).transpose(0, 2, 1, 3).reshape(B, T, C)
    o = o @ p["attn_out_w"].T + p["attn_out_b"]
    sa = o @ p["proj_w"].T + p["proj_b"]
    x1 = x + sa
    h2 = ln(x1, p["ln2_g"], p["ln2_b"])
    f = jnp.maximum(h2 @ p["fc1_w"].T + p["fc1_b"], 0.0)
    f = f @ p["fc2_w"].T + p["fc2_b"]
    return x1 + f


if __name__ == "__main__":
    key = jax.random.PRNGKey(0)
    k_x, k_p = jax.random.split(key)
    B, T = 2, 8
    x = jax.random.normal(k_x, (B, T, N_EMBD), jnp.float32)
    params = init_params(k_p)
    prep = prepare_params(params)            # hoisted: one-time param prep

    fwd = jax.jit(block_forward)
    out = jax.block_until_ready(fwd(x, prep))
    assert out.shape == (B, T, N_EMBD)

    ref = block_reference(x, params)
    err = float(jnp.max(jnp.abs(out - ref)))
    assert err < 2e-2, f"max abs error too large: {err}"

    print("KERNEL_OK")
</pallas_src>

<mosaic_0001>
module attributes {stable_mosaic.version = 11 : i64} {
  func.func @_block_kernel(%arg0: i32, %arg1: memref<1x64x128xf32, #tpu.memory_space<vmem>>, %arg2: memref<192x64xbf16, #tpu.memory_space<vmem>>, %arg3: memref<192x1xf32, #tpu.memory_space<vmem>>, %arg4: memref<64x64xbf16, #tpu.memory_space<vmem>>, %arg5: memref<64x1xf32, #tpu.memory_space<vmem>>, %arg6: memref<256x64xbf16, #tpu.memory_space<vmem>>, %arg7: memref<256x1xf32, #tpu.memory_space<vmem>>, %arg8: memref<64x256xbf16, #tpu.memory_space<vmem>>, %arg9: memref<64x1xf32, #tpu.memory_space<vmem>>, %arg10: memref<1x64x128xf32, #tpu.memory_space<vmem>>, %arg11: memref<64x128xf32, #tpu.memory_space<vmem>>) attributes {dimension_semantics = [#tpu.dimension_semantics<parallel>], iteration_bounds = array<i64: 1>, scalar_prefetch = 0 : i64, scratch_operands = 1 : i64, tpu.core_type = #tpu.core_type<tc>, window_params = [{transform_indices = @transform_0, window_bounds = array<i64: 1, 64, 128>}, {pipeline_mode = #tpu.pipeline_mode<synchronous>, transform_indices = @transform_1, window_bounds = array<i64: 192, 64>}, {pipeline_mode = #tpu.pipeline_mode<synchronous>, transform_indices = @transform_2, window_bounds = array<i64: 192, 1>}, {pipeline_mode = #tpu.pipeline_mode<synchronous>, transform_indices = @transform_3, window_bounds = array<i64: 64, 64>}, {pipeline_mode = #tpu.pipeline_mode<synchronous>, transform_indices = @transform_4, window_bounds = array<i64: 64, 1>}, {pipeline_mode = #tpu.pipeline_mode<synchronous>, transform_indices = @transform_5, window_bounds = array<i64: 256, 64>}, {pipeline_mode = #tpu.pipeline_mode<synchronous>, transform_indices = @transform_6, window_bounds = array<i64: 256, 1>}, {pipeline_mode = #tpu.pipeline_mode<synchronous>, transform_indices = @transform_7, window_bounds = array<i64: 64, 256>}, {pipeline_mode = #tpu.pipeline_mode<synchronous>, transform_indices = @transform_8, window_bounds = array<i64: 64, 1>}, {transform_indices = @transform_9, window_bounds = array<i64: 1, 64, 128>}]} {
    %c0 = arith.constant 0 : index
    %c0_0 = arith.constant 0 : index
    %c0_1 = arith.constant 0 : index
    %0 = vector.load %arg1[%c0, %c0_0, %c0_1] : memref<1x64x128xf32, #tpu.memory_space<vmem>>, vector<1x64x128xf32>
    %1 = vector.shape_cast %0 : vector<1x64x128xf32> to vector<64x128xf32>
    %cst = arith.constant dense<0.000000e+00> : vector<128xf32>
    %2 = vector.multi_reduction <add>, %1, %cst [0] : vector<64x128xf32> to vector<128xf32>
    %3 = vector.shape_cast %2 : vector<128xf32> to vector<1x128xf32>
    %cst_2 = arith.constant 1.562500e-02 : f32
    %4 = vector.broadcast %cst_2 : f32 to vector<1x128xf32>
    %5 = arith.mulf %3, %4 : vector<1x128xf32>
    %6 = vector.broadcast %5 : vector<1x128xf32> to vector<64x128xf32>
    %7 = arith.subf %1, %6 : vector<64x128xf32>
    %8 = arith.mulf %7, %7 : vector<64x128xf32>
    %cst_3 = arith.constant dense<0.000000e+00> : vector<128xf32>
    %9 = vector.multi_reduction <add>, %8, %cst_3 [0] : vector<64x128xf32> to vector<128xf32>
    %10 = vector.shape_cast %9 : vector<128xf32> to vector<1x128xf32>
    %cst_4 = arith.constant 1.562500e-02 : f32
    %11 = vector.broadcast %cst_4 : f32 to vector<1x128xf32>
    %12 = arith.mulf %10, %11 : vector<1x128xf32>
    %cst_5 = arith.constant 9.99999974E-6 : f32
    %13 = vector.broadcast %cst_5 : f32 to vector<1x128xf32>
    %14 = arith.addf %12, %13 : vector<1x128xf32>
    %15 = math.rsqrt %14 : vector<1x128xf32>
    %16 = vector.broadcast %15 : vector<1x128xf32> to vector<64x128xf32>
    %17 = arith.mulf %7, %16 : vector<64x128xf32>
    %c0_6 = arith.constant 0 : index
    %c0_7 = arith.constant 0 : index
    %18 = vector.load %arg2[%c0_6, %c0_7] : memref<192x64xbf16, #tpu.memory_space<vmem>>, vector<192x64xbf16>
    %19 = arith.truncf %17 : vector<64x128xf32> to vector<64x128xbf16>
    %cst_8 = arith.constant dense<0.000000e+00> : vector<192x128xf32>
    %20 = tpu.matmul %18, %19, %cst_8 {dimension_numbers = #tpu.dot_dimension_numbers<[1], [0], [0], [1], [0, 0, 1, 1], [], []>} : vector<192x64xbf16>, vector<64x128xbf16>, vector<192x128xf32> -> vector<192x128xf32>
    %c0_9 = arith.constant 0 : index
    %c0_10 = arith.constant 0 : index
    %21 = vector.load %arg3[%c0_9, %c0_10] : memref<192x1xf32, #tpu.memory_space<vmem>>, vector<192x1xf32>
    %22 = vector.broadcast %21 : vector<192x1xf32> to vector<192x128xf32>
    %23 = arith.addf %20, %22 : vector<192x128xf32>
    %24 = vector.extract_strided_slice %23 {offsets = [0, 0], sizes = [64, 128], strides = [1, 1]} : vector<192x128xf32> to vector<64x128xf32>
    %25 = vector.shape_cast %24 : vector<64x128xf32> to vector<8x8x128xf32>
    %26 = tpu.transpose %25, [0, 2, 1] : vector<8x8x128xf32> -> vector<8x128x8xf32>
    %27 = arith.truncf %26 : vector<8x128x8xf32> to vector<8x128x8xbf16>
    %28 = vector.extract_strided_slice %23 {offsets = [64, 0], sizes = [64, 128], strides = [1, 1]} : vector<192x128xf32> to vector<64x128xf32>
    %29 = vector.shape_cast %28 : vector<64x128xf32> to vector<8x8x128xf32>
    %30 = tpu.transpose %29, [0, 2, 1] : vector<8x8x128xf32> -> vector<8x128x8xf32>
    %31 = arith.truncf %30 : vector<8x128x8xf32> to vector<8x128x8xbf16>
    %32 = vector.extract_strided_slice %23 {offsets = [128, 0], sizes = [64, 128], strides = [1, 1]} : vector<192x128xf32> to vector<64x128xf32>
    %33 = vector.shape_cast %32 : vector<64x128xf32> to vector<8x8x128xf32>
    %34 = arith.truncf %33 : vector<8x8x128xf32> to vector<8x8x128xbf16>
    %35 = tpu.iota {dimensions = array<i32: 0>} : vector<8x8xi32>
    %36 = tpu.iota {dimensions = array<i32: 1>} : vector<8x8xi32>
    %37 = arith.cmpi sge, %35, %36 : vector<8x8xi32>
    %c8_i32 = arith.constant 8 : i32
    %38 = vector.broadcast %c8_i32 : i32 to vector<8x8xi32>
    %39 = arith.cmpi slt, %36, %38 : vector<8x8xi32>
    %40 = arith.andi %37, %39 : vector<8x8xi1>
    %cst_11 = arith.constant 0.000000e+00 : f32
    %cst_12 = arith.constant -1.000000e+30 : f32
    %41 = vector.broadcast %cst_11 : f32 to vector<8x8xf32>
    %42 = vector.broadcast %cst_12 : f32 to vector<8x8xf32>
    %43 = arith.select %40, %41, %42 : vector<8x8xi1>, vector<8x8xf32>
    %44 = vector.extract_strided_slice %27 {offsets = [0, 0, 0], sizes = [8, 8, 8], strides = [1, 1, 1]} : vector<8x128x8xbf16> to vector<8x8x8xbf16>
    %45 = vector.extract_strided_slice %31 {offsets = [0, 0, 0], sizes = [8, 8, 8], strides = [1, 1, 1]} : vector<8x128x8xbf16> to vector<8x8x8xbf16>
    %46 = vector.extract_strided_slice %34 {offsets = [0, 0, 0], sizes = [8, 8, 8], strides = [1, 1, 1]} : vector<8x8x128xbf16> to vector<8x8x8xbf16>
    "tpu.trace_start"() <{level = 10 : i32, message = "hqd,hkd->hqk"}> : () -> ()
    %cst_13 = arith.constant dense<0.000000e+00> : vector<8x8x8xf32>
    %47 = tpu.matmul %44, %45, %cst_13 {dimension_numbers = #tpu.dot_dimension_numbers<[2], [2], [1], [1], [0, 0, 0, 1, 1, 1], [0], [0]>} : vector<8x8x8xbf16>, vector<8x8x8xbf16>, vector<8x8x8xf32> -> vector<8x8x8xf32>
    "tpu.trace_stop"() : () -> ()
    %48 = vector.shape_cast %43 : vector<8x8xf32> to vector<1x8x8xf32>
    %49 = vector.broadcast %48 : vector<1x8x8xf32> to vector<8x8x8xf32>
    %50 = arith.addf %47, %49 : vector<8x8x8xf32>
    %cst_14 = arith.constant dense<0xFF800000> : vector<8x8xf32>
    %51 = vector.multi_reduction <maximumf>, %50, %cst_14 [2] : vector<8x8x8xf32> to vector<8x8xf32>
    %52 = vector.shape_cast %51 : vector<8x8xf32> to vector<8x8x1xf32>
    %53 = vector.broadcast %52 : vector<8x8x1xf32> to vector<8x8x8xf32>
    %54 = arith.subf %50, %53 : vector<8x8x8xf32>
    %55 = math.exp %54 : vector<8x8x8xf32>
    %cst_15 = arith.constant dense<0.000000e+00> : vector<8x8xf32>
    %56 = vector.multi_reduction <add>, %55, %cst_15 [2] : vector<8x8x8xf32> to vector<8x8xf32>
    %57 = vector.shape_cast %56 : vector<8x8xf32> to vector<8x8x1xf32>
    %58 = tpu.reciprocal %57 {approx = true} : vector<8x8x1xf32> -> vector<8x8x1xf32>
    %59 = vector.broadcast %58 : vector<8x8x1xf32> to vector<8x8x8xf32>
    %60 = arith.mulf %55, %59 : vector<8x8x8xf32>
    %61 = arith.truncf %60 : vector<8x8x8xf32> to vector<8x8x8xbf16>
    "tpu.trace_start"() <{level = 10 : i32, message = "hdk,hqk->hdq"}> : () -> ()
    %cst_16 = arith.constant dense<0.000000e+00> : vector<8x8x8xf32>
    %62 = tpu.matmul %46, %61, %cst_16 {dimension_numbers = #tpu.dot_dimension_numbers<[2], [2], [1], [1], [0, 0, 0, 1, 1, 1], [0], [0]>} : vector<8x8x8xbf16>, vector<8x8x8xbf16>, vector<8x8x8xf32> -> vector<8x8x8xf32>
    "tpu.trace_stop"() : () -> ()
    %63 = vector.shape_cast %62 : vector<8x8x8xf32> to vector<64x8xf32>
    %c0_17 = arith.constant 0 : index
    %c0_18 = arith.constant 0 : index
    %64 = vector.load %arg11[%c0_17, %c0_18] : memref<64x128xf32, #tpu.memory_space<vmem>>, vector<64x8xf32>
    tpu.vector_store %arg11[%c0_17, %c0_18], %63 {strides = array<i32>} : memref<64x128xf32, #tpu.memory_space<vmem>>, vector<64x8xf32>,
    %65 = vector.extract_strided_slice %27 {offsets = [0, 8, 0], sizes = [8, 8, 8], strides = [1, 1, 1]} : vector<8x128x8xbf16> to vector<8x8x8xbf16>
    %66 = vector.extract_strided_slice %31 {offsets = [0, 8, 0], sizes = [8, 8, 8], strides = [1, 1, 1]} : vector<8x128x8xbf16> to vector<8x8x8xbf16>
    %67 = vector.extract_strided_slice %34 {offsets = [0, 0, 8], sizes = [8, 8, 8], strides = [1, 1, 1]} : vector<8x8x128xbf16> to vector<8x8x8xbf16>
    "tpu.trace_start"() <{level = 10 : i32, message = "hqd,hkd->hqk"}> : () -> ()
    %cst_19 = arith.constant dense<0.000000e+00> : vector<8x8x8xf32>
    %68 = tpu.matmul %65, %66, %cst_19 {dimension_numbers = #tpu.dot_dimension_numbers<[2], [2], [1], [1], [0, 0, 0, 1, 1, 1], [0], [0]>} : vector<8x8x8xbf16>, vector<8x8x8xbf16>, vector<8x8x8xf32> -> vector<8x8x8xf32>
    "tpu.trace_stop"() : () -> ()
    %69 = vector.shape_cast %43 : vector<8x8xf32> to vector<1x8x8xf32>
    %70 = vector.broadcast %69 : vector<1x8x8xf32> to vector<8x8x8xf32>
    %71 = arith.addf %68, %70 : vector<8x8x8xf32>
    %cst_20 = arith.constant dense<0xFF800000> : vector<8x8xf32>
    %72 = vector.multi_reduction <maximumf>, %71, %cst_20 [2] : vector<8x8x8xf32> to vector<8x8xf32>
    %73 = vector.shape_cast %72 : vector<8x8xf32> to vector<8x8x1xf32>
    %74 = vector.broadcast %73 : vector<8x8x1xf32> to vector<8x8x8xf32>
    %75 = arith.subf %71, %74 : vector<8x8x8xf32>
    %76 = math.exp %75 : vector<8x8x8xf32>
    %cst_21 = arith.constant dense<0.000000e+00> : vector<8x8xf32>
    %77 = vector.multi_reduction <add>, %76, %cst_21 [2] : vector<8x8x8xf32> to vector<8x8xf32>
    %78 = vector.shape_cast %77 : vector<8x8xf32> to vector<8x8x1xf32>
    %79 = tpu.reciprocal %78 {approx = true} : vector<8x8x1xf32> -> vector<8x8x1xf32>
    %80 = vector.broadcast %79 : vector<8x8x1xf32> to vector<8x8x8xf32>
    %81 = arith.mulf %76, %80 : vector<8x8x8xf32>
    %82 = arith.truncf %81 : vector<8x8x8xf32> to vector<8x8x8xbf16>
    "tpu.trace_start"() <{level = 10 : i32, message = "hdk,hqk->hdq"}> : () -> ()
    %cst_22 = arith.constant dense<0.000000e+00> : vector<8x8x8xf32>
    %83 = tpu.matmul %67, %82, %cst_22 {dimension_numbers = #tpu.dot_dimension_numbers<[2], [2], [1], [1], [0, 0, 0, 1, 1, 1], [0], [0]>} : vector<8x8x8xbf16>, vector<8x8x8xbf16>, vector<8x8x8xf32> -> vector<8x8x8xf32>
    "tpu.trace_stop"() : () -> ()
    %84 = vector.shape_cast %83 : vector<8x8x8xf32> to vector<64x8xf32>
    %c0_23 = arith.constant 0 : index
    %c8 = arith.constant 8 : index
    %85 = vector.load %arg11[%c0_23, %c8] : memref<64x128xf32, #tpu.memory_space<vmem>>, vector<64x8xf32>
    tpu.vector_store %arg11[%c0_23, %c8], %84 {strides = array<i32>} : memref<64x128xf32, #tpu.memory_space<vmem>>, vector<64x8xf32>,
    %86 = vector.extract_strided_slice %27 {offsets = [0, 16, 0], sizes = [8, 8, 8], strides = [1, 1, 1]} : vector<8x128x8xbf16> to vector<8x8x8xbf16>
    %87 = vector.extract_strided_slice %31 {offsets = [0, 16, 0], sizes = [8, 8, 8], strides = [1, 1, 1]} : vector<8x128x8xbf16> to vector<8x8x8xbf16>
    %88 = vector.extract_strided_slice %34 {offsets = [0, 0, 16], sizes = [8, 8, 8], strides = [1, 1, 1]} : vector<8x8x128xbf16> to vector<8x8x8xbf16>
    "tpu.trace_start"() <{level = 10 : i32, message = "hqd,hkd->hqk"}> : () -> ()
    %cst_24 = arith.constant dense<0.000000e+00> : vector<8x8x8xf32>
    %89 = tpu.matmul %86, %87, %cst_24 {dimension_numbers = #tpu.dot_dimension_numbers<[2], [2], [1], [1], [0, 0, 0, 1, 1, 1], [0], [0]>} : vector<8x8x8xbf16>, vector<8x8x8xbf16>, vector<8x8x8xf32> -> vector<8x8x8xf32>
    "tpu.trace_stop"() : () -> ()
    %90 = vector.shape_cast %43 : vector<8x8xf32> to vector<1x8x8xf32>
    %91 = vector.broadcast %90 : vector<1x8x8xf32> to vector<8x8x8xf32>
    %92 = arith.addf %89, %91 : vector<8x8x8xf32>
    %cst_25 = arith.constant dense<0xFF800000> : vector<8x8xf32>
    %93 = vector.multi_reduction <maximumf>, %92, %cst_25 [2] : vector<8x8x8xf32> to vector<8x8xf32>
    %94 = vector.shape_cast %93 : vector<8x8xf32> to vector<8x8x1xf32>
    %95 = vector.broadcast %94 : vector<8x8x1xf32> to vector<8x8x8xf32>
    %96 = arith.subf %92, %95 : vector<8x8x8xf32>
    %97 = math.exp %96 : vector<8x8x8xf32>
    %cst_26 = arith.constant dense<0.000000e+00> : vector<8x8xf32>
    %98 = vector.multi_reduction <add>, %97, %cst_26 [2] : vector<8x8x8xf32> to vector<8x8xf32>
    %99 = vector.shape_cast %98 : vector<8x8xf32> to vector<8x8x1xf32>
    %100 = tpu.reciprocal %99 {approx = true} : vector<8x8x1xf32> -> vector<8x8x1xf32>
    %101 = vector.broadcast %100 : vector<8x8x1xf32> to vector<8x8x8xf32>
    %102 = arith.mulf %97, %101 : vector<8x8x8xf32>
    %103 = arith.truncf %102 : vector<8x8x8xf32> to vector<8x8x8xbf16>
    "tpu.trace_start"() <{level = 10 : i32, message = "hdk,hqk->hdq"}> : () -> ()
    %cst_27 = arith.constant dense<0.000000e+00> : vector<8x8x8xf32>
    %104 = tpu.matmul %88, %103, %cst_27 {dimension_numbers = #tpu.dot_dimension_numbers<[2], [2], [1], [1], [0, 0, 0, 1, 1, 1], [0], [0]>} : vector<8x8x8xbf16>, vector<8x8x8xbf16>, vector<8x8x8xf32> -> vector<8x8x8xf32>
    "tpu.trace_stop"() : () -> ()
    %105 = vector.shape_cast %104 : vector<8x8x8xf32> to vector<64x8xf32>
    %c0_28 = arith.constant 0 : index
    %c16 = arith.constant 16 : index
    %106 = vector.load %arg11[%c0_28, %c16] : memref<64x128xf32, #tpu.memory_space<vmem>>, vector<64x8xf32>
    tpu.vector_store %arg11[%c0_28, %c16], %105 {strides = array<i32>} : memref<64x128xf32, #tpu.memory_space<vmem>>, vector<64x8xf32>,
    %107 = vector.extract_strided_slice %27 {offsets = [0, 24, 0], sizes = [8, 8, 8], strides = [1, 1, 1]} : vector<8x128x8xbf16> to vector<8x8x8xbf16>
    %108 = vector.extract_strided_slice %31 {offsets = [0, 24, 0], sizes = [8, 8, 8], strides = [1, 1, 1]} : vector<8x128x8xbf16> to vector<8x8x8xbf16>
    %109 = vector.extract_strided_slice %34 {offsets = [0, 0, 24], sizes = [8, 8, 8], strides = [1, 1, 1]} : vector<8x8x128xbf16> to vector<8x8x8xbf16>
    "tpu.trace_start"() <{level = 10 : i32, message = "hqd,hkd->hqk"}> : () -> ()
    %cst_29 = arith.constant dense<0.000000e+00> : vector<8x8x8xf32>
    %110 = tpu.matmul %107, %108, %cst_29 {dimension_numbers = #tpu.dot_dimension_numbers<[2], [2], [1], [1], [0, 0, 0, 1, 1, 1], [0], [0]>} : vector<8x8x8xbf16>, vector<8x8x8xbf16>, vector<8x8x8xf32> -> vector<8x8x8xf32>
    "tpu.trace_stop"() : () -> ()
    %111 = vector.shape_cast %43 : vector<8x8xf32> to vector<1x8x8xf32>
    %112 = vector.broadcast %111 : vector<1x8x8xf32> to vector<8x8x8xf32>
    %113 = arith.addf %110, %112 : vector<8x8x8xf32>
    %cst_30 = arith.constant dense<0xFF800000> : vector<8x8xf32>
    %114 = vector.multi_reduction <maximumf>, %113, %cst_30 [2] : vector<8x8x8xf32> to vector<8x8xf32>
    %115 = vector.shape_cast %114 : vector<8x8xf32> to vector<8x8x1xf32>
    %116 = vector.broadcast %115 : vector<8x8x1xf32> to vector<8x8x8xf32>
    %117 = arith.subf %113, %116 : vector<8x8x8xf32>
    %118 = math.exp %117 : vector<8x8x8xf32>
    %cst_31 = arith.constant dense<0.000000e+00> : vector<8x8xf32>
    %119 = vector.multi_reduction <add>, %118, %cst_31 [2] : vector<8x8x8xf32> to vector<8x8xf32>
    %120 = vector.shape_cast %119 : vector<8x8xf32> to vector<8x8x1xf32>
    %121 = tpu.reciprocal %120 {approx = true} : vector<8x8x1xf32> -> vector<8x8x1xf32>
    %122 = vector.broadcast %121 : vector<8x8x1xf32> to vector<8x8x8xf32>
    %123 = arith.mulf %118, %122 : vector<8x8x8xf32>
    %124 = arith.truncf %123 : vector<8x8x8xf32> to vector<8x8x8xbf16>
    "tpu.trace_start"() <{level = 10 : i32, message = "hdk,hqk->hdq"}> : () -> ()
    %cst_32 = arith.constant dense<0.000000e+00> : vector<8x8x8xf32>
    %125 = tpu.matmul %109, %124, %cst_32 {dimension_numbers = #tpu.dot_dimension_numbers<[2], [2], [1], [1], [0, 0, 0, 1, 1, 1], [0], [0]>} : vector<8x8x8xbf16>, vector<8x8x8xbf16>, vector<8x8x8xf32> -> vector<8x8x8xf32>
    "tpu.trace_stop"() : () -> ()
    %126 = vector.shape_cast %125 : vector<8x8x8xf32> to vector<64x8xf32>
    %c0_33 = arith.constant 0 : index
    %c24 = arith.constant 24 : index
    %127 = vector.load %arg11[%c0_33, %c24] : memref<64x128xf32, #tpu.memory_space<vmem>>, vector<64x8xf32>
    tpu.vector_store %arg11[%c0_33, %c24], %126 {strides = array<i32>} : memref<64x128xf32, #tpu.memory_space<vmem>>, vector<64x8xf32>,
    %128 = vector.extract_strided_slice %27 {offsets = [0, 32, 0], sizes = [8, 8, 8], strides = [1, 1, 1]} : vector<8x128x8xbf16> to vector<8x8x8xbf16>
    %129 = vector.extract_strided_slice %31 {offsets = [0, 32, 0], sizes = [8, 8, 8], strides = [1, 1, 1]} : vector<8x128x8xbf16> to vector<8x8x8xbf16>
    %130 = vector.extract_strided_slice %34 {offsets = [0, 0, 32], sizes = [8, 8, 8], strides = [1, 1, 1]} : vector<8x8x128xbf16> to vector<8x8x8xbf16>
    "tpu.trace_start"() <{level = 10 : i32, message = "hqd,hkd->hqk"}> : () -> ()
    %cst_34 = arith.constant dense<0.000000e+00> : vector<8x8x8xf32>
    %131 = tpu.matmul %128, %129, %cst_34 {dimension_numbers = #tpu.dot_dimension_numbers<[2], [2], [1], [1], [0, 0, 0, 1, 1, 1], [0], [0]>} : vector<8x8x8xbf16>, vector<8x8x8xbf16>, vector<8x8x8xf32> -> vector<8x8x8xf32>
    "tpu.trace_stop"() : () -> ()
    %132 = vector.shape_cast %43 : vector<8x8xf32> to vector<1x8x8xf32>
    %133 = vector.broadcast %132 : vector<1x8x8xf32> to vector<8x8x8xf32>
    %134 = arith.addf %131, %133 : vector<8x8x8xf32>
    %cst_35 = arith.constant dense<0xFF800000> : vector<8x8xf32>
    %135 = vector.multi_reduction <maximumf>, %134, %cst_35 [2] : vector<8x8x8xf32> to vector<8x8xf32>
    %136 = vector.shape_cast %135 : vector<8x8xf32> to vector<8x8x1xf32>
    %137 = vector.broadcast %136 : vector<8x8x1xf32> to vector<8x8x8xf32>
    %138 = arith.subf %134, %137 : vector<8x8x8xf32>
    %139 = math.exp %138 : vector<8x8x8xf32>
    %cst_36 = arith.constant dense<0.000000e+00> : vector<8x8xf32>
    %140 = vector.multi_reduction <add>, %139, %cst_36 [2] : vector<8x8x8xf32> to vector<8x8xf32>
    %141 = vector.shape_cast %140 : vector<8x8xf32> to vector<8x8x1xf32>
    %142 = tpu.reciprocal %141 {approx = true} : vector<8x8x1xf32> -> vector<8x8x1xf32>
    %143 = vector.broadcast %142 : vector<8x8x1xf32> to vector<8x8x8xf32>
    %144 = arith.mulf %139, %143 : vector<8x8x8xf32>
    %145 = arith.truncf %144 : vector<8x8x8xf32> to vector<8x8x8xbf16>
    "tpu.trace_start"() <{level = 10 : i32, message = "hdk,hqk->hdq"}> : () -> ()
    %cst_37 = arith.constant dense<0.000000e+00> : vector<8x8x8xf32>
    %146 = tpu.matmul %130, %145, %cst_37 {dimension_numbers = #tpu.dot_dimension_numbers<[2], [2], [1], [1], [0, 0, 0, 1, 1, 1], [0], [0]>} : vector<8x8x8xbf16>, vector<8x8x8xbf16>, vector<8x8x8xf32> -> vector<8x8x8xf32>
    "tpu.trace_stop"() : () -> ()
    %147 = vector.shape_cast %146 : vector<8x8x8xf32> to vector<64x8xf32>
    %c0_38 = arith.constant 0 : index
    %c32 = arith.constant 32 : index
    %148 = vector.load %arg11[%c0_38, %c32] : memref<64x128xf32, #tpu.memory_space<vmem>>, vector<64x8xf32>
    tpu.vector_store %arg11[%c0_38, %c32], %147 {strides = array<i32>} : memref<64x128xf32, #tpu.memory_space<vmem>>, vector<64x8xf32>,
    %149 = vector.extract_strided_slice %27 {offsets = [0, 40, 0], sizes = [8, 8, 8], strides = [1, 1, 1]} : vector<8x128x8xbf16> to vector<8x8x8xbf16>
    %150 = vector.extract_strided_slice %31 {offsets = [0, 40, 0], sizes = [8, 8, 8], strides = [1, 1, 1]} : vector<8x128x8xbf16> to vector<8x8x8xbf16>
    %151 = vector.extract_strided_slice %34 {offsets = [0, 0, 40], sizes = [8, 8, 8], strides = [1, 1, 1]} : vector<8x8x128xbf16> to vector<8x8x8xbf16>
    "tpu.trace_start"() <{level = 10 : i32, message = "hqd,hkd->hqk"}> : () -> ()
    %cst_39 = arith.constant dense<0.000000e+00> : vector<8x8x8xf32>
    %152 = tpu.matmul %149, %150, %cst_39 {dimension_numbers = #tpu.dot_dimension_numbers<[2], [2], [1], [1], [0, 0, 0, 1, 1, 1], [0], [0]>} : vector<8x8x8xbf16>, vector<8x8x8xbf16>, vector<8x8x8xf32> -> vector<8x8x8xf32>
    "tpu.trace_stop"() : () -> ()
    %153 = vector.shape_cast %43 : vector<8x8xf32> to vector<1x8x8xf32>
    %154 = vector.broadcast %153 : vector<1x8x8xf32> to vector<8x8x8xf32>
    %155 = arith.addf %152, %154 : vector<8x8x8xf32>
    %cst_40 = arith.constant dense<0xFF800000> : vector<8x8xf32>
    %156 = vector.multi_reduction <maximumf>, %155, %cst_40 [2] : vector<8x8x8xf32> to vector<8x8xf32>
    %157 = vector.shape_cast %156 : vector<8x8xf32> to vector<8x8x1xf32>
    %158 = vector.broadcast %157 : vector<8x8x1xf32> to vector<8x8x8xf32>
    %159 = arith.subf %155, %158 : vector<8x8x8xf32>
    %160 = math.exp %159 : vector<8x8x8xf32>
    %cst_41 = arith.constant dense<0.000000e+00> : vector<8x8xf32>
    %161 = vector.multi_reduction <add>, %160, %cst_41 [2] : vector<8x8x8xf32> to vector<8x8xf32>
    %162 = vector.shape_cast %161 : vector<8x8xf32> to vector<8x8x1xf32>
    %163 = tpu.reciprocal %162 {approx = true} : vector<8x8x1xf32> -> vector<8x8x1xf32>
    %164 = vector.broadcast %163 : vector<8x8x1xf32> to vector<8x8x8xf32>
    %165 = arith.mulf %160, %164 : vector<8x8x8xf32>
    %166 = arith.truncf %165 : vector<8x8x8xf32> to vector<8x8x8xbf16>
    "tpu.trace_start"() <{level = 10 : i32, message = "hdk,hqk->hdq"}> : () -> ()
    %cst_42 = arith.constant dense<0.000000e+00> : vector<8x8x8xf32>
    %167 = tpu.matmul %151, %166, %cst_42 {dimension_numbers = #tpu.dot_dimension_numbers<[2], [2], [1], [1], [0, 0, 0, 1, 1, 1], [0], [0]>} : vector<8x8x8xbf16>, vector<8x8x8xbf16>, vector<8x8x8xf32> -> vector<8x8x8xf32>
    "tpu.trace_stop"() : () -> ()
    %168 = vector.shape_cast %167 : vector<8x8x8xf32> to vector<64x8xf32>
    %c0_43 = arith.constant 0 : index
    %c40 = arith.constant 40 : index
    %169 = vector.load %arg11[%c0_43, %c40] : memref<64x128xf32, #tpu.memory_space<vmem>>, vector<64x8xf32>
    tpu.vector_store %arg11[%c0_43, %c40], %168 {strides = array<i32>} : memref<64x128xf32, #tpu.memory_space<vmem>>, vector<64x8xf32>,
    %170 = vector.extract_strided_slice %27 {offsets = [0, 48, 0], sizes = [8, 8, 8], strides = [1, 1, 1]} : vector<8x128x8xbf16> to vector<8x8x8xbf16>
    %171 = vector.extract_strided_slice %31 {offsets = [0, 48, 0], sizes = [8, 8, 8], strides = [1, 1, 1]} : vector<8x128x8xbf16> to vector<8x8x8xbf16>
    %172 = vector.extract_strided_slice %34 {offsets = [0, 0, 48], sizes = [8, 8, 8], strides = [1, 1, 1]} : vector<8x8x128xbf16> to vector<8x8x8xbf16>
    "tpu.trace_start"() <{level = 10 : i32, message = "hqd,hkd->hqk"}> : () -> ()
    %cst_44 = arith.constant dense<0.000000e+00> : vector<8x8x8xf32>
    %173 = tpu.matmul %170, %171, %cst_44 {dimension_numbers = #tpu.dot_dimension_numbers<[2], [2], [1], [1], [0, 0, 0, 1, 1, 1], [0], [0]>} : vector<8x8x8xbf16>, vector<8x8x8xbf16>, vector<8x8x8xf32> -> vector<8x8x8xf32>
    "tpu.trace_stop"() : () -> ()
    %174 = vector.shape_cast %43 : vector<8x8xf32> to vector<1x8x8xf32>
    %175 = vector.broadcast %174 : vector<1x8x8xf32> to vector<8x8x8xf32>
    %176 = arith.addf %173, %175 : vector<8x8x8xf32>
    %cst_45 = arith.constant dense<0xFF800000> : vector<8x8xf32>
    %177 = vector.multi_reduction <maximumf>, %176, %cst_45 [2] : vector<8x8x8xf32> to vector<8x8xf32>
    %178 = vector.shape_cast %177 : vector<8x8xf32> to vector<8x8x1xf32>
    %179 = vector.broadcast %178 : vector<8x8x1xf32> to vector<8x8x8xf32>
    %180 = arith.subf %176, %179 : vector<8x8x8xf32>
    %181 = math.exp %180 : vector<8x8x8xf32>
    %cst_46 = arith.constant dense<0.000000e+00> : vector<8x8xf32>
    %182 = vector.multi_reduction <add>, %181, %cst_46 [2] : vector<8x8x8xf32> to vector<8x8xf32>
    %183 = vector.shape_cast %182 : vector<8x8xf32> to vector<8x8x1xf32>
    %184 = tpu.reciprocal %183 {approx = true} : vector<8x8x1xf32> -> vector<8x8x1xf32>
    %185 = vector.broadcast %184 : vector<8x8x1xf32> to vector<8x8x8xf32>
    %186 = arith.mulf %181, %185 : vector<8x8x8xf32>
    %187 = arith.truncf %186 : vector<8x8x8xf32> to vector<8x8x8xbf16>
    "tpu.trace_start"() <{level = 10 : i32, message = "hdk,hqk->hdq"}> : () -> ()
    %cst_47 = arith.constant dense<0.000000e+00> : vector<8x8x8xf32>
    %188 = tpu.matmul %172, %187, %cst_47 {dimension_numbers = #tpu.dot_dimension_numbers<[2], [2], [1], [1], [0, 0, 0, 1, 1, 1], [0], [0]>} : vector<8x8x8xbf16>, vector<8x8x8xbf16>, vector<8x8x8xf32> -> vector<8x8x8xf32>
    "tpu.trace_stop"() : () -> ()
    %189 = vector.shape_cast %188 : vector<8x8x8xf32> to vector<64x8xf32>
    %c0_48 = arith.constant 0 : index
    %c48 = arith.constant 48 : index
    %190 = vector.load %arg11[%c0_48, %c48] : memref<64x128xf32, #tpu.memory_space<vmem>>, vector<64x8xf32>
    tpu.vector_store %arg11[%c0_48, %c48], %189 {strides = array<i32>} : memref<64x128xf32, #tpu.memory_space<vmem>>, vector<64x8xf32>,
    %191 = vector.extract_strided_slice %27 {offsets = [0, 56, 0], sizes = [8, 8, 8], strides = [1, 1, 1]} : vector<8x128x8xbf16> to vector<8x8x8xbf16>
    %192 = vector.extract_strided_slice %31 {offsets = [0, 56, 0], sizes = [8, 8, 8], strides = [1, 1, 1]} : vector<8x128x8xbf16> to vector<8x8x8xbf16>
    %193 = vector.extract_strided_slice %34 {offsets = [0, 0, 56], sizes = [8, 8, 8], strides = [1, 1, 1]} : vector<8x8x128xbf16> to vector<8x8x8xbf16>
    "tpu.trace_start"() <{level = 10 : i32, message = "hqd,hkd->hqk"}> : () -> ()
    %cst_49 = arith.constant dense<0.000000e+00> : vector<8x8x8xf32>
    %194 = tpu.matmul %191, %192, %cst_49 {dimension_numbers = #tpu.dot_dimension_numbers<[2], [2], [1], [1], [0, 0, 0, 1, 1, 1], [0], [0]>} : vector<8x8x8xbf16>, vector<8x8x8xbf16>, vector<8x8x8xf32> -> vector<8x8x8xf32>
    "tpu.trace_stop"() : () -> ()
    %195 = vector.shape_cast %43 : vector<8x8xf32> to vector<1x8x8xf32>
    %196 = vector.broadcast %195 : vector<1x8x8xf32> to vector<8x8x8xf32>
    %197 = arith.addf %194, %196 : vector<8x8x8xf32>
    %cst_50 = arith.constant dense<0xFF800000> : vector<8x8xf32>
    %198 = vector.multi_reduction <maximumf>, %197, %cst_50 [2] : vector<8x8x8xf32> to vector<8x8xf32>
    %199 = vector.shape_cast %198 : vector<8x8xf32> to vector<8x8x1xf32>
    %200 = vector.broadcast %199 : vector<8x8x1xf32> to vector<8x8x8xf32>
    %201 = arith.subf %197, %200 : vector<8x8x8xf32>
    %202 = math.exp %201 : vector<8x8x8xf32>
    %cst_51 = arith.constant dense<0.000000e+00> : vector<8x8xf32>
    %203 = vector.multi_reduction <add>, %202, %cst_51 [2] : vector<8x8x8xf32> to vector<8x8xf32>
    %204 = vector.shape_cast %203 : vector<8x8xf32> to vector<8x8x1xf32>
    %205 = tpu.reciprocal %204 {approx = true} : vector<8x8x1xf32> -> vector<8x8x1xf32>
    %206 = vector.broadcast %205 : vector<8x8x1xf32> to vector<8x8x8xf32>
    %207 = arith.mulf %202, %206 : vector<8x8x8xf32>
    %208 = arith.truncf %207 : vector<8x8x8xf32> to vector<8x8x8xbf16>
    "tpu.trace_start"() <{level = 10 : i32, message = "hdk,hqk->hdq"}> : () -> ()
    %cst_52 = arith.constant dense<0.000000e+00> : vector<8x8x8xf32>
    %209 = tpu.matmul %193, %208, %cst_52 {dimension_numbers = #tpu.dot_dimension_numbers<[2], [2], [1], [1], [0, 0, 0, 1, 1, 1], [0], [0]>} : vector<8x8x8xbf16>, vector<8x8x8xbf16>, vector<8x8x8xf32> -> vector<8x8x8xf32>
    "tpu.trace_stop"() : () -> ()
    %210 = vector.shape_cast %209 : vector<8x8x8xf32> to vector<64x8xf32>
    %c0_53 = arith.constant 0 : index
    %c56 = arith.constant 56 : index
    %211 = vector.load %arg11[%c0_53, %c56] : memref<64x128xf32, #tpu.memory_space<vmem>>, vector<64x8xf32>
    tpu.vector_store %arg11[%c0_53, %c56], %210 {strides = array<i32>} : memref<64x128xf32, #tpu.memory_space<vmem>>, vector<64x8xf32>,
    %212 = vector.extract_strided_slice %27 {offsets = [0, 64, 0], sizes = [8, 8, 8], strides = [1, 1, 1]} : vector<8x128x8xbf16> to vector<8x8x8xbf16>
    %213 = vector.extract_strided_slice %31 {offsets = [0, 64, 0], sizes = [8, 8, 8], strides = [1, 1, 1]} : vector<8x128x8xbf16> to vector<8x8x8xbf16>
    %214 = vector.extract_strided_slice %34 {offsets = [0, 0, 64], sizes = [8, 8, 8], strides = [1, 1, 1]} : vector<8x8x128xbf16> to vector<8x8x8xbf16>
    "tpu.trace_start"() <{level = 10 : i32, message = "hqd,hkd->hqk"}> : () -> ()
    %cst_54 = arith.constant dense<0.000000e+00> : vector<8x8x8xf32>
    %215 = tpu.matmul %212, %213, %cst_54 {dimension_numbers = #tpu.dot_dimension_numbers<[2], [2], [1], [1], [0, 0, 0, 1, 1, 1], [0], [0]>} : vector<8x8x8xbf16>, vector<8x8x8xbf16>, vector<8x8x8xf32> -> vector<8x8x8xf32>
    "tpu.trace_stop"() : () -> ()
    %216 = vector.shape_cast %43 : vector<8x8xf32> to vector<1x8x8xf32>
    %217 = vector.broadcast %216 : vector<1x8x8xf32> to vector<8x8x8xf32>
    %218 = arith.addf %215, %217 : vector<8x8x8xf32>
    %cst_55 = arith.constant dense<0xFF800000> : vector<8x8xf32>
    %219 = vector.multi_reduction <maximumf>, %218, %cst_55 [2] : vector<8x8x8xf32> to vector<8x8xf32>
    %220 = vector.shape_cast %219 : vector<8x8xf32> to vector<8x8x1xf32>
    %221 = vector.broadcast %220 : vector<8x8x1xf32> to vector<8x8x8xf32>
    %222 = arith.subf %218, %221 : vector<8x8x8xf32>
    %223 = math.exp %222 : vector<8x8x8xf32>
    %cst_56 = arith.constant dense<0.000000e+00> : vector<8x8xf32>
    %224 = vector.multi_reduction <add>, %223, %cst_56 [2] : vector<8x8x8xf32> to vector<8x8xf32>
    %225 = vector.shape_cast %224 : vector<8x8xf32> to vector<8x8x1xf32>
    %226 = tpu.reciprocal %225 {approx = true} : vector<8x8x1xf32> -> vector<8x8x1xf32>
    %227 = vector.broadcast %226 : vector<8x8x1xf32> to vector<8x8x8xf32>
    %228 = arith.mulf %223, %227 : vector<8x8x8xf32>
    %229 = arith.truncf %228 : vector<8x8x8xf32> to vector<8x8x8xbf16>
    "tpu.trace_start"() <{level = 10 : i32, message = "hdk,hqk->hdq"}> : () -> ()
    %cst_57 = arith.constant dense<0.000000e+00> : vector<8x8x8xf32>
    %230 = tpu.matmul %214, %229, %cst_57 {dimension_numbers = #tpu.dot_dimension_numbers<[2], [2], [1], [1], [0, 0, 0, 1, 1, 1], [0], [0]>} : vector<8x8x8xbf16>, vector<8x8x8xbf16>, vector<8x8x8xf32> -> vector<8x8x8xf32>
    "tpu.trace_stop"() : () -> ()
    %231 = vector.shape_cast %230 : vector<8x8x8xf32> to vector<64x8xf32>
    %c0_58 = arith.constant 0 : index
    %c64 = arith.constant 64 : index
    %232 = vector.load %arg11[%c0_58, %c64] : memref<64x128xf32, #tpu.memory_space<vmem>>, vector<64x8xf32>
    tpu.vector_store %arg11[%c0_58, %c64], %231 {strides = array<i32>} : memref<64x128xf32, #tpu.memory_space<vmem>>, vector<64x8xf32>,
    %233 = vector.extract_strided_slice %27 {offsets = [0, 72, 0], sizes = [8, 8, 8], strides = [1, 1, 1]} : vector<8x128x8xbf16> to vector<8x8x8xbf16>
    %234 = vector.extract_strided_slice %31 {offsets = [0, 72, 0], sizes = [8, 8, 8], strides = [1, 1, 1]} : vector<8x128x8xbf16> to vector<8x8x8xbf16>
    %235 = vector.extract_strided_slice %34 {offsets = [0, 0, 72], sizes = [8, 8, 8], strides = [1, 1, 1]} : vector<8x8x128xbf16> to vector<8x8x8xbf16>
    "tpu.trace_start"() <{level = 10 : i32, message = "hqd,hkd->hqk"}> : () -> ()
    %cst_59 = arith.constant dense<0.000000e+00> : vector<8x8x8xf32>
    %236 = tpu.matmul %233, %234, %cst_59 {dimension_numbers = #tpu.dot_dimension_numbers<[2], [2], [1], [1], [0, 0, 0, 1, 1, 1], [0], [0]>} : vector<8x8x8xbf16>, vector<8x8x8xbf16>, vector<8x8x8xf32> -> vector<8x8x8xf32>
    "tpu.trace_stop"() : () -> ()
    %237 = vector.shape_cast %43 : vector<8x8xf32> to vector<1x8x8xf32>
    %238 = vector.broadcast %237 : vector<1x8x8xf32> to vector<8x8x8xf32>
    %239 = arith.addf %236, %238 : vector<8x8x8xf32>
    %cst_60 = arith.constant dense<0xFF800000> : vector<8x8xf32>
    %240 = vector.multi_reduction <maximumf>, %239, %cst_60 [2] : vector<8x8x8xf32> to vector<8x8xf32>
    %241 = vector.shape_cast %240 : vector<8x8xf32> to vector<8x8x1xf32>
    %242 = vector.broadcast %241 : vector<8x8x1xf32> to vector<8x8x8xf32>
    %243 = arith.subf %239, %242 : vector<8x8x8xf32>
    %244 = math.exp %243 : vector<8x8x8xf32>
    %cst_61 = arith.constant dense<0.000000e+00> : vector<8x8xf32>
    %245 = vector.multi_reduction <add>, %244, %cst_61 [2] : vector<8x8x8xf32> to vector<8x8xf32>
    %246 = vector.shape_cast %245 : vector<8x8xf32> to vector<8x8x1xf32>
    %247 = tpu.reciprocal %246 {approx = true} : vector<8x8x1xf32> -> vector<8x8x1xf32>
    %248 = vector.broadcast %247 : vector<8x8x1xf32> to vector<8x8x8xf32>
    %249 = arith.mulf %244, %248 : vector<8x8x8xf32>
    %250 = arith.truncf %249 : vector<8x8x8xf32> to vector<8x8x8xbf16>
    "tpu.trace_start"() <{level = 10 : i32, message = "hdk,hqk->hdq"}> : () -> ()
    %cst_62 = arith.constant dense<0.000000e+00> : vector<8x8x8xf32>
    %251 = tpu.matmul %235, %250, %cst_62 {dimension_numbers = #tpu.dot_dimension_numbers<[2], [2], [1], [1], [0, 0, 0, 1, 1, 1], [0], [0]>} : vector<8x8x8xbf16>, vector<8x8x8xbf16>, vector<8x8x8xf32> -> vector<8x8x8xf32>
    "tpu.trace_stop"() : () -> ()
    %252 = vector.shape_cast %251 : vector<8x8x8xf32> to vector<64x8xf32>
    %c0_63 = arith.constant 0 : index
    %c72 = arith.constant 72 : index
    %253 = vector.load %arg11[%c0_63, %c72] : memref<64x128xf32, #tpu.memory_space<vmem>>, vector<64x8xf32>
    tpu.vector_store %arg11[%c0_63, %c72], %252 {strides = array<i32>} : memref<64x128xf32, #tpu.memory_space<vmem>>, vector<64x8xf32>,
    %254 = vector.extract_strided_slice %27 {offsets = [0, 80, 0], sizes = [8, 8, 8], strides = [1, 1, 1]} : vector<8x128x8xbf16> to vector<8x8x8xbf16>
    %255 = vector.extract_strided_slice %31 {offsets = [0, 80, 0], sizes = [8, 8, 8], strides = [1, 1, 1]} : vector<8x128x8xbf16> to vector<8x8x8xbf16>
    %256 = vector.extract_strided_slice %34 {offsets = [0, 0, 80], sizes = [8, 8, 8], strides = [1, 1, 1]} : vector<8x8x128xbf16> to vector<8x8x8xbf16>
    "tpu.trace_start"() <{level = 10 : i32, message = "hqd,hkd->hqk"}> : () -> ()
    %cst_64 = arith.constant dense<0.000000e+00> : vector<8x8x8xf32>
    %257 = tpu.matmul %254, %255, %cst_64 {dimension_numbers = #tpu.dot_dimension_numbers<[2], [2], [1], [1], [0, 0, 0, 1, 1, 1], [0], [0]>} : vector<8x8x8xbf16>, vector<8x8x8xbf16>, vector<8x8x8xf32> -> vector<8x8x8xf32>
    "tpu.trace_stop"() : () -> ()
    %258 = vector.shape_cast %43 : vector<8x8xf32> to vector<1x8x8xf32>
    %259 = vector.broadcast %258 : vector<1x8x8xf32> to vector<8x8x8xf32>
    %260 = arith.addf %257, %259 : vector<8x8x8xf32>
    %cst_65 = arith.constant dense<0xFF800000> : vector<8x8xf32>
    %261 = vector.multi_reduction <maximumf>, %260, %cst_65 [2] : vector<8x8x8xf32> to vector<8x8xf32>
    %262 = vector.shape_cast %261 : vector<8x8xf32> to vector<8x8x1xf32>
    %263 = vector.broadcast %262 : vector<8x8x1xf32> to vector<8x8x8xf32>
    %264 = arith.subf %260, %263 : vector<8x8x8xf32>
    %265 = math.exp %264 : vector<8x8x8xf32>
    %cst_66 = arith.constant dense<0.000000e+00> : vector<8x8xf32>
    %266 = vector.multi_reduction <add>, %265, %cst_66 [2] : vector<8x8x8xf32> to vector<8x8xf32>
    %267 = vector.shape_cast %266 : vector<8x8xf32> to vector<8x8x1xf32>
    %268 = tpu.reciprocal %267 {approx = true} : vector<8x8x1xf32> -> vector<8x8x1xf32>
    %269 = vector.broadcast %268 : vector<8x8x1xf32> to vector<8x8x8xf32>
    %270 = arith.mulf %265, %269 : vector<8x8x8xf32>
    %271 = arith.truncf %270 : vector<8x8x8xf32> to vector<8x8x8xbf16>
    "tpu.trace_start"() <{level = 10 : i32, message = "hdk,hqk->hdq"}> : () -> ()
    %cst_67 = arith.constant dense<0.000000e+00> : vector<8x8x8xf32>
    %272 = tpu.matmul %256, %271, %cst_67 {dimension_numbers = #tpu.dot_dimension_numbers<[2], [2], [1], [1], [0, 0, 0, 1, 1, 1], [0], [0]>} : vector<8x8x8xbf16>, vector<8x8x8xbf16>, vector<8x8x8xf32> -> vector<8x8x8xf32>
    "tpu.trace_stop"() : () -> ()
    %273 = vector.shape_cast %272 : vector<8x8x8xf32> to vector<64x8xf32>
    %c0_68 = arith.constant 0 : index
    %c80 = arith.constant 80 : index
    %274 = vector.load %arg11[%c0_68, %c80] : memref<64x128xf32, #tpu.memory_space<vmem>>, vector<64x8xf32>
    tpu.vector_store %arg11[%c0_68, %c80], %273 {strides = array<i32>} : memref<64x128xf32, #tpu.memory_space<vmem>>, vector<64x8xf32>,
    %275 = vector.extract_strided_slice %27 {offsets = [0, 88, 0], sizes = [8, 8, 8], strides = [1, 1, 1]} : vector<8x128x8xbf16> to vector<8x8x8xbf16>
    %276 = vector.extract_strided_slice %31 {offsets = [0, 88, 0], sizes = [8, 8, 8], strides = [1, 1, 1]} : vector<8x128x8xbf16> to vector<8x8x8xbf16>
    %277 = vector.extract_strided_slice %34 {offsets = [0, 0, 88], sizes = [8, 8, 8], strides = [1, 1, 1]} : vector<8x8x128xbf16> to vector<8x8x8xbf16>
    "tpu.trace_start"() <{level = 10 : i32, message = "hqd,hkd->hqk"}> : () -> ()
    %cst_69 = arith.constant dense<0.000000e+00> : vector<8x8x8xf32>
    %278 = tpu.matmul %275, %276, %cst_69 {dimension_numbers = #tpu.dot_dimension_numbers<[2], [2], [1], [1], [0, 0, 0, 1, 1, 1], [0], [0]>} : vector<8x8x8xbf16>, vector<8x8x8xbf16>, vector<8x8x8xf32> -> vector<8x8x8xf32>
    "tpu.trace_stop"() : () -> ()
    %279 = vector.shape_cast %43 : vector<8x8xf32> to vector<1x8x8xf32>
    %280 = vector.broadcast %279 : vector<1x8x8xf32> to vector<8x8x8xf32>
    %281 = arith.addf %278, %280 : vector<8x8x8xf32>
    %cst_70 = arith.constant dense<0xFF800000> : vector<8x8xf32>
    %282 = vector.multi_reduction <maximumf>, %281, %cst_70 [2] : vector<8x8x8xf32> to vector<8x8xf32>
    %283 = vector.shape_cast %282 : vector<8x8xf32> to vector<8x8x1xf32>
    %284 = vector.broadcast %283 : vector<8x8x1xf32> to vector<8x8x8xf32>
    %285 = arith.subf %281, %284 : vector<8x8x8xf32>
    %286 = math.exp %285 : vector<8x8x8xf32>
    %cst_71 = arith.constant dense<0.000000e+00> : vector<8x8xf32>
    %287 = vector.multi_reduction <add>, %286, %cst_71 [2] : vector<8x8x8xf32> to vector<8x8xf32>
    %288 = vector.shape_cast %287 : vector<8x8xf32> to vector<8x8x1xf32>
    %289 = tpu.reciprocal %288 {approx = true} : vector<8x8x1xf32> -> vector<8x8x1xf32>
    %290 = vector.broadcast %289 : vector<8x8x1xf32> to vector<8x8x8xf32>
    %291 = arith.mulf %286, %290 : vector<8x8x8xf32>
    %292 = arith.truncf %291 : vector<8x8x8xf32> to vector<8x8x8xbf16>
    "tpu.trace_start"() <{level = 10 : i32, message = "hdk,hqk->hdq"}> : () -> ()
    %cst_72 = arith.constant dense<0.000000e+00> : vector<8x8x8xf32>
    %293 = tpu.matmul %277, %292, %cst_72 {dimension_numbers = #tpu.dot_dimension_numbers<[2], [2], [1], [1], [0, 0, 0, 1, 1, 1], [0], [0]>} : vector<8x8x8xbf16>, vector<8x8x8xbf16>, vector<8x8x8xf32> -> vector<8x8x8xf32>
    "tpu.trace_stop"() : () -> ()
    %294 = vector.shape_cast %293 : vector<8x8x8xf32> to vector<64x8xf32>
    %c0_73 = arith.constant 0 : index
    %c88 = arith.constant 88 : index
    %295 = vector.load %arg11[%c0_73, %c88] : memref<64x128xf32, #tpu.memory_space<vmem>>, vector<64x8xf32>
    tpu.vector_store %arg11[%c0_73, %c88], %294 {strides = array<i32>} : memref<64x128xf32, #tpu.memory_space<vmem>>, vector<64x8xf32>,
    %296 = vector.extract_strided_slice %27 {offsets = [0, 96, 0], sizes = [8, 8, 8], strides = [1, 1, 1]} : vector<8x128x8xbf16> to vector<8x8x8xbf16>
    %297 = vector.extract_strided_slice %31 {offsets = [0, 96, 0], sizes = [8, 8, 8], strides = [1, 1, 1]} : vector<8x128x8xbf16> to vector<8x8x8xbf16>
    %298 = vector.extract_strided_slice %34 {offsets = [0, 0, 96], sizes = [8, 8, 8], strides = [1, 1, 1]} : vector<8x8x128xbf16> to vector<8x8x8xbf16>
    "tpu.trace_start"() <{level = 10 : i32, message = "hqd,hkd->hqk"}> : () -> ()
    %cst_74 = arith.constant dense<0.000000e+00> : vector<8x8x8xf32>
    %299 = tpu.matmul %296, %297, %cst_74 {dimension_numbers = #tpu.dot_dimension_numbers<[2], [2], [1], [1], [0, 0, 0, 1, 1, 1], [0], [0]>} : vector<8x8x8xbf16>, vector<8x8x8xbf16>, vector<8x8x8xf32> -> vector<8x8x8xf32>
    "tpu.trace_stop"() : () -> ()
    %300 = vector.shape_cast %43 : vector<8x8xf32> to vector<1x8x8xf32>
    %301 = vector.broadcast %300 : vector<1x8x8xf32> to vector<8x8x8xf32>
    %302 = arith.addf %299, %301 : vector<8x8x8xf32>
    %cst_75 = arith.constant dense<0xFF800000> : vector<8x8xf32>
    %303 = vector.multi_reduction <maximumf>, %302, %cst_75 [2] : vector<8x8x8xf32> to vector<8x8xf32>
    %304 = vector.shape_cast %303 : vector<8x8xf32> to vector<8x8x1xf32>
    %305 = vector.broadcast %304 : vector<8x8x1xf32> to vector<8x8x8xf32>
    %306 = arith.subf %302, %305 : vector<8x8x8xf32>
    %307 = math.exp %306 : vector<8x8x8xf32>
    %cst_76 = arith.constant dense<0.000000e+00> : vector<8x8xf32>
    %308 = vector.multi_reduction <add>, %307, %cst_76 [2] : vector<8x8x8xf32> to vector<8x8xf32>
    %309 = vector.shape_cast %308 : vector<8x8xf32> to vector<8x8x1xf32>
    %310 = tpu.reciprocal %309 {approx = true} : vector<8x8x1xf32> -> vector<8x8x1xf32>
    %311 = vector.broadcast %310 : vector<8x8x1xf32> to vector<8x8x8xf32>
    %312 = arith.mulf %307, %311 : vector<8x8x8xf32>
    %313 = arith.truncf %312 : vector<8x8x8xf32> to vector<8x8x8xbf16>
    "tpu.trace_start"() <{level = 10 : i32, message = "hdk,hqk->hdq"}> : () -> ()
    %cst_77 = arith.constant dense<0.000000e+00> : vector<8x8x8xf32>
    %314 = tpu.matmul %298, %313, %cst_77 {dimension_numbers = #tpu.dot_dimension_numbers<[2], [2], [1], [1], [0, 0, 0, 1, 1, 1], [0], [0]>} : vector<8x8x8xbf16>, vector<8x8x8xbf16>, vector<8x8x8xf32> -> vector<8x8x8xf32>
    "tpu.trace_stop"() : () -> ()
    %315 = vector.shape_cast %314 : vector<8x8x8xf32> to vector<64x8xf32>
    %c0_78 = arith.constant 0 : index
    %c96 = arith.constant 96 : index
    %316 = vector.load %arg11[%c0_78, %c96] : memref<64x128xf32, #tpu.memory_space<vmem>>, vector<64x8xf32>
    tpu.vector_store %arg11[%c0_78, %c96], %315 {strides = array<i32>} : memref<64x128xf32, #tpu.memory_space<vmem>>, vector<64x8xf32>,
    %317 = vector.extract_strided_slice %27 {offsets = [0, 104, 0], sizes = [8, 8, 8], strides = [1, 1, 1]} : vector<8x128x8xbf16> to vector<8x8x8xbf16>
    %318 = vector.extract_strided_slice %31 {offsets = [0, 104, 0], sizes = [8, 8, 8], strides = [1, 1, 1]} : vector<8x128x8xbf16> to vector<8x8x8xbf16>
    %319 = vector.extract_strided_slice %34 {offsets = [0, 0, 104], sizes = [8, 8, 8], strides = [1, 1, 1]} : vector<8x8x128xbf16> to vector<8x8x8xbf16>
    "tpu.trace_start"() <{level = 10 : i32, message = "hqd,hkd->hqk"}> : () -> ()
    %cst_79 = arith.constant dense<0.000000e+00> : vector<8x8x8xf32>
    %320 = tpu.matmul %317, %318, %cst_79 {dimension_numbers = #tpu.dot_dimension_numbers<[2], [2], [1], [1], [0, 0, 0, 1, 1, 1], [0], [0]>} : vector<8x8x8xbf16>, vector<8x8x8xbf16>, vector<8x8x8xf32> -> vector<8x8x8xf32>
    "tpu.trace_stop"() : () -> ()
    %321 = vector.shape_cast %43 : vector<8x8xf32> to vector<1x8x8xf32>
    %322 = vector.broadcast %321 : vector<1x8x8xf32> to vector<8x8x8xf32>
    %323 = arith.addf %320, %322 : vector<8x8x8xf32>
    %cst_80 = arith.constant dense<0xFF800000> : vector<8x8xf32>
    %324 = vector.multi_reduction <maximumf>, %323, %cst_80 [2] : vector<8x8x8xf32> to vector<8x8xf32>
    %325 = vector.shape_cast %324 : vector<8x8xf32> to vector<8x8x1xf32>
    %326 = vector.broadcast %325 : vector<8x8x1xf32> to vector<8x8x8xf32>
    %327 = arith.subf %323, %326 : vector<8x8x8xf32>
    %328 = math.exp %327 : vector<8x8x8xf32>
    %cst_81 = arith.constant dense<0.000000e+00> : vector<8x8xf32>
    %329 = vector.multi_reduction <add>, %328, %cst_81 [2] : vector<8x8x8xf32> to vector<8x8xf32>
    %330 = vector.shape_cast %329 : vector<8x8xf32> to vector<8x8x1xf32>
    %331 = tpu.reciprocal %330 {approx = true} : vector<8x8x1xf32> -> vector<8x8x1xf32>
    %332 = vector.broadcast %331 : vector<8x8x1xf32> to vector<8x8x8xf32>
    %333 = arith.mulf %328, %332 : vector<8x8x8xf32>
    %334 = arith.truncf %333 : vector<8x8x8xf32> to vector<8x8x8xbf16>
    "tpu.trace_start"() <{level = 10 : i32, message = "hdk,hqk->hdq"}> : () -> ()
    %cst_82 = arith.constant dense<0.000000e+00> : vector<8x8x8xf32>
    %335 = tpu.matmul %319, %334, %cst_82 {dimension_numbers = #tpu.dot_dimension_numbers<[2], [2], [1], [1], [0, 0, 0, 1, 1, 1], [0], [0]>} : vector<8x8x8xbf16>, vector<8x8x8xbf16>, vector<8x8x8xf32> -> vector<8x8x8xf32>
    "tpu.trace_stop"() : () -> ()
    %336 = vector.shape_cast %335 : vector<8x8x8xf32> to vector<64x8xf32>
    %c0_83 = arith.constant 0 : index
    %c104 = arith.constant 104 : index
    %337 = vector.load %arg11[%c0_83, %c104] : memref<64x128xf32, #tpu.memory_space<vmem>>, vector<64x8xf32>
    tpu.vector_store %arg11[%c0_83, %c104], %336 {strides = array<i32>} : memref<64x128xf32, #tpu.memory_space<vmem>>, vector<64x8xf32>,
    %338 = vector.extract_strided_slice %27 {offsets = [0, 112, 0], sizes = [8, 8, 8], strides = [1, 1, 1]} : vector<8x128x8xbf16> to vector<8x8x8xbf16>
    %339 = vector.extract_strided_slice %31 {offsets = [0, 112, 0], sizes = [8, 8, 8], strides = [1, 1, 1]} : vector<8x128x8xbf16> to vector<8x8x8xbf16>
    %340 = vector.extract_strided_slice %34 {offsets = [0, 0, 112], sizes = [8, 8, 8], strides = [1, 1, 1]} : vector<8x8x128xbf16> to vector<8x8x8xbf16>
    "tpu.trace_start"() <{level = 10 : i32, message = "hqd,hkd->hqk"}> : () -> ()
    %cst_84 = arith.constant dense<0.000000e+00> : vector<8x8x8xf32>
    %341 = tpu.matmul %338, %339, %cst_84 {dimension_numbers = #tpu.dot_dimension_numbers<[2], [2], [1], [1], [0, 0, 0, 1, 1, 1], [0], [0]>} : vector<8x8x8xbf16>, vector<8x8x8xbf16>, vector<8x8x8xf32> -> vector<8x8x8xf32>
    "tpu.trace_stop"() : () -> ()
    %342 = vector.shape_cast %43 : vector<8x8xf32> to vector<1x8x8xf32>
    %343 = vector.broadcast %342 : vector<1x8x8xf32> to vector<8x8x8xf32>
    %344 = arith.addf %341, %343 : vector<8x8x8xf32>
    %cst_85 = arith.constant dense<0xFF800000> : vector<8x8xf32>
    %345 = vector.multi_reduction <maximumf>, %344, %cst_85 [2] : vector<8x8x8xf32> to vector<8x8xf32>
    %346 = vector.shape_cast %345 : vector<8x8xf32> to vector<8x8x1xf32>
    %347 = vector.broadcast %346 : vector<8x8x1xf32> to vector<8x8x8xf32>
    %348 = arith.subf %344, %347 : vector<8x8x8xf32>
    %349 = math.exp %348 : vector<8x8x8xf32>
    %cst_86 = arith.constant dense<0.000000e+00> : vector<8x8xf32>
    %350 = vector.multi_reduction <add>, %349, %cst_86 [2] : vector<8x8x8xf32> to vector<8x8xf32>
    %351 = vector.shape_cast %350 : vector<8x8xf32> to vector<8x8x1xf32>
    %352 = tpu.reciprocal %351 {approx = true} : vector<8x8x1xf32> -> vector<8x8x1xf32>
    %353 = vector.broadcast %352 : vector<8x8x1xf32> to vector<8x8x8xf32>
    %354 = arith.mulf %349, %353 : vector<8x8x8xf32>
    %355 = arith.truncf %354 : vector<8x8x8xf32> to vector<8x8x8xbf16>
    "tpu.trace_start"() <{level = 10 : i32, message = "hdk,hqk->hdq"}> : () -> ()
    %cst_87 = arith.constant dense<0.000000e+00> : vector<8x8x8xf32>
    %356 = tpu.matmul %340, %355, %cst_87 {dimension_numbers = #tpu.dot_dimension_numbers<[2], [2], [1], [1], [0, 0, 0, 1, 1, 1], [0], [0]>} : vector<8x8x8xbf16>, vector<8x8x8xbf16>, vector<8x8x8xf32> -> vector<8x8x8xf32>
    "tpu.trace_stop"() : () -> ()
    %357 = vector.shape_cast %356 : vector<8x8x8xf32> to vector<64x8xf32>
    %c0_88 = arith.constant 0 : index
    %c112 = arith.constant 112 : index
    %358 = vector.load %arg11[%c0_88, %c112] : memref<64x128xf32, #tpu.memory_space<vmem>>, vector<64x8xf32>
    tpu.vector_store %arg11[%c0_88, %c112], %357 {strides = array<i32>} : memref<64x128xf32, #tpu.memory_space<vmem>>, vector<64x8xf32>,
    %359 = vector.extract_strided_slice %27 {offsets = [0, 120, 0], sizes = [8, 8, 8], strides = [1, 1, 1]} : vector<8x128x8xbf16> to vector<8x8x8xbf16>
    %360 = vector.extract_strided_slice %31 {offsets = [0, 120, 0], sizes = [8, 8, 8], strides = [1, 1, 1]} : vector<8x128x8xbf16> to vector<8x8x8xbf16>
    %361 = vector.extract_strided_slice %34 {offsets = [0, 0, 120], sizes = [8, 8, 8], strides = [1, 1, 1]} : vector<8x8x128xbf16> to vector<8x8x8xbf16>
    "tpu.trace_start"() <{level = 10 : i32, message = "hqd,hkd->hqk"}> : () -> ()
    %cst_89 = arith.constant dense<0.000000e+00> : vector<8x8x8xf32>
    %362 = tpu.matmul %359, %360, %cst_89 {dimension_numbers = #tpu.dot_dimension_numbers<[2], [2], [1], [1], [0, 0, 0, 1, 1, 1], [0], [0]>} : vector<8x8x8xbf16>, vector<8x8x8xbf16>, vector<8x8x8xf32> -> vector<8x8x8xf32>
    "tpu.trace_stop"() : () -> ()
    %363 = vector.shape_cast %43 : vector<8x8xf32> to vector<1x8x8xf32>
    %364 = vector.broadcast %363 : vector<1x8x8xf32> to vector<8x8x8xf32>
    %365 = arith.addf %362, %364 : vector<8x8x8xf32>
    %cst_90 = arith.constant dense<0xFF800000> : vector<8x8xf32>
    %366 = vector.multi_reduction <maximumf>, %365, %cst_90 [2] : vector<8x8x8xf32> to vector<8x8xf32>
    %367 = vector.shape_cast %366 : vector<8x8xf32> to vector<8x8x1xf32>
    %368 = vector.broadcast %367 : vector<8x8x1xf32> to vector<8x8x8xf32>
    %369 = arith.subf %365, %368 : vector<8x8x8xf32>
    %370 = math.exp %369 : vector<8x8x8xf32>
    %cst_91 = arith.constant dense<0.000000e+00> : vector<8x8xf32>
    %371 = vector.multi_reduction <add>, %370, %cst_91 [2] : vector<8x8x8xf32> to vector<8x8xf32>
    %372 = vector.shape_cast %371 : vector<8x8xf32> to vector<8x8x1xf32>
    %373 = tpu.reciprocal %372 {approx = true} : vector<8x8x1xf32> -> vector<8x8x1xf32>
    %374 = vector.broadcast %373 : vector<8x8x1xf32> to vector<8x8x8xf32>
    %375 = arith.mulf %370, %374 : vector<8x8x8xf32>
    %376 = arith.truncf %375 : vector<8x8x8xf32> to vector<8x8x8xbf16>
    "tpu.trace_start"() <{level = 10 : i32, message = "hdk,hqk->hdq"}> : () -> ()
    %cst_92 = arith.constant dense<0.000000e+00> : vector<8x8x8xf32>
    %377 = tpu.matmul %361, %376, %cst_92 {dimension_numbers = #tpu.dot_dimension_numbers<[2], [2], [1], [1], [0, 0, 0, 1, 1, 1], [0], [0]>} : vector<8x8x8xbf16>, vector<8x8x8xbf16>, vector<8x8x8xf32> -> vector<8x8x8xf32>
    "tpu.trace_stop"() : () -> ()
    %378 = vector.shape_cast %377 : vector<8x8x8xf32> to vector<64x8xf32>
    %c0_93 = arith.constant 0 : index
    %c120 = arith.constant 120 : index
    %379 = vector.load %arg11[%c0_93, %c120] : memref<64x128xf32, #tpu.memory_space<vmem>>, vector<64x8xf32>
    tpu.vector_store %arg11[%c0_93, %c120], %378 {strides = array<i32>} : memref<64x128xf32, #tpu.memory_space<vmem>>, vector<64x8xf32>,
    %c0_94 = arith.constant 0 : index
    %c0_95 = arith.constant 0 : index
    %380 = vector.load %arg4[%c0_94, %c0_95] : memref<64x64xbf16, #tpu.memory_space<vmem>>, vector<64x64xbf16>
    %c0_96 = arith.constant 0 : index
    %c0_97 = arith.constant 0 : index
    %381 = vector.load %arg11[%c0_96, %c0_97] : memref<64x128xf32, #tpu.memory_space<vmem>>, vector<64x128xf32>
    %382 = arith.truncf %381 : vector<64x128xf32> to vector<64x128xbf16>
    %cst_98 = arith.constant dense<0.000000e+00> : vector<64x128xf32>
    %383 = tpu.matmul %380, %382, %cst_98 {dimension_numbers = #tpu.dot_dimension_numbers<[1], [0], [0], [1], [0, 0, 1, 1], [], []>} : vector<64x64xbf16>, vector<64x128xbf16>, vector<64x128xf32> -> vector<64x128xf32>
    %c0_99 = arith.constant 0 : index
    %c0_100 = arith.constant 0 : index
    %384 = vector.load %arg5[%c0_99, %c0_100] : memref<64x1xf32, #tpu.memory_space<vmem>>, vector<64x1xf32>
    %385 = vector.broadcast %384 : vector<64x1xf32> to vector<64x128xf32>
    %386 = arith.addf %383, %385 : vector<64x128xf32>
    %387 = arith.addf %1, %386 : vector<64x128xf32>
    %cst_101 = arith.constant dense<0.000000e+00> : vector<128xf32>
    %388 = vector.multi_reduction <add>, %387, %cst_101 [0] : vector<64x128xf32> to vector<128xf32>
    %389 = vector.shape_cast %388 : vector<128xf32> to vector<1x128xf32>
    %cst_102 = arith.constant 1.562500e-02 : f32
    %390 = vector.broadcast %cst_102 : f32 to vector<1x128xf32>
    %391 = arith.mulf %389, %390 : vector<1x128xf32>
    %392 = vector.broadcast %391 : vector<1x128xf32> to vector<64x128xf32>
    %393 = arith.subf %387, %392 : vector<64x128xf32>
    %394 = arith.mulf %393, %393 : vector<64x128xf32>
    %cst_103 = arith.constant dense<0.000000e+00> : vector<128xf32>
    %395 = vector.multi_reduction <add>, %394, %cst_103 [0] : vector<64x128xf32> to vector<128xf32>
    %396 = vector.shape_cast %395 : vector<128xf32> to vector<1x128xf32>
    %cst_104 = arith.constant 1.562500e-02 : f32
    %397 = vector.broadcast %cst_104 : f32 to vector<1x128xf32>
    %398 = arith.mulf %396, %397 : vector<1x128xf32>
    %cst_105 = arith.constant 9.99999974E-6 : f32
    %399 = vector.broadcast %cst_105 : f32 to vector<1x128xf32>
    %400 = arith.addf %398, %399 : vector<1x128xf32>
    %401 = math.rsqrt %400 : vector<1x128xf32>
    %402 = vector.broadcast %401 : vector<1x128xf32> to vector<64x128xf32>
    %403 = arith.mulf %393, %402 : vector<64x128xf32>
    %c0_106 = arith.constant 0 : index
    %c0_107 = arith.constant 0 : index
    %404 = vector.load %arg6[%c0_106, %c0_107] : memref<256x64xbf16, #tpu.memory_space<vmem>>, vector<256x64xbf16>
    %405 = arith.truncf %403 : vector<64x128xf32> to vector<64x128xbf16>
    %cst_108 = arith.constant dense<0.000000e+00> : vector<256x128xf32>
    %406 = tpu.matmul %404, %405, %cst_108 {dimension_numbers = #tpu.dot_dimension_numbers<[1], [0], [0], [1], [0, 0, 1, 1], [], []>} : vector<256x64xbf16>, vector<64x128xbf16>, vector<256x128xf32> -> vector<256x128xf32>
    %c0_109 = arith.constant 0 : index
    %c0_110 = arith.constant 0 : index
    %407 = vector.load %arg7[%c0_109, %c0_110] : memref<256x1xf32, #tpu.memory_space<vmem>>, vector<256x1xf32>
    %408 = vector.broadcast %407 : vector<256x1xf32> to vector<256x128xf32>
    %409 = arith.addf %406, %408 : vector<256x128xf32>
    %cst_111 = arith.constant 0.000000e+00 : f32
    %410 = vector.broadcast %cst_111 : f32 to vector<256x128xf32>
    %411 = arith.maximumf %409, %410 : vector<256x128xf32>
    %c0_112 = arith.constant 0 : index
    %c0_113 = arith.constant 0 : index
    %412 = vector.load %arg8[%c0_112, %c0_113] : memref<64x256xbf16, #tpu.memory_space<vmem>>, vector<64x256xbf16>
    %413 = arith.truncf %411 : vector<256x128xf32> to vector<256x128xbf16>
    %cst_114 = arith.constant dense<0.000000e+00> : vector<64x128xf32>
    %414 = tpu.matmul %412, %413, %cst_114 {dimension_numbers = #tpu.dot_dimension_numbers<[1], [0], [0], [1], [0, 0, 1, 1], [], []>} : vector<64x256xbf16>, vector<256x128xbf16>, vector<64x128xf32> -> vector<64x128xf32>
    %c0_115 = arith.constant 0 : index
    %c0_116 = arith.constant 0 : index
    %415 = vector.load %arg9[%c0_115, %c0_116] : memref<64x1xf32, #tpu.memory_space<vmem>>, vector<64x1xf32>
    %416 = vector.broadcast %415 : vector<64x1xf32> to vector<64x128xf32>
    %417 = arith.addf %414, %416 : vector<64x128xf32>
    %418 = arith.addf %387, %417 : vector<64x128xf32>
    %c0_117 = arith.constant 0 : index
    %c0_118 = arith.constant 0 : index
    %c0_119 = arith.constant 0 : index
    %419 = vector.load %arg10[%c0_117, %c0_118, %c0_119] : memref<1x64x128xf32, #tpu.memory_space<vmem>>, vector<1x64x128xf32>
    %420 = vector.shape_cast %419 : vector<1x64x128xf32> to vector<64x128xf32>
    %421 = vector.shape_cast %418 : vector<64x128xf32> to vector<1x64x128xf32>
    tpu.vector_store %arg10[%c0_117, %c0_118, %c0_119], %421 {strides = array<i32>} : memref<1x64x128xf32, #tpu.memory_space<vmem>>, vector<1x64x128xf32>,
    return
  }
  func.func @transform_0(%arg0: i32) -> (i32, i32, i32) {
    %c0_i32 = arith.constant 0 : i32
    %c0_i32_0 = arith.constant 0 : i32
    %c0_i32_1 = arith.constant 0 : i32
    return %arg0, %c0_i32, %c0_i32_0 : i32, i32, i32
  }
  func.func @transform_1(%arg0: i32) -> (i32, i32) {
    %c0_i32 = arith.constant 0 : i32
    %c0_i32_0 = arith.constant 0 : i32
    %c0_i32_1 = arith.constant 0 : i32
    return %c0_i32, %c0_i32_0 : i32, i32
  }
  func.func @transform_2(%arg0: i32) -> (i32, i32) {
    %c0_i32 = arith.constant 0 : i32
    %c0_i32_0 = arith.constant 0 : i32
    %c0_i32_1 = arith.constant 0 : i32
    return %c0_i32, %c0_i32_0 : i32, i32
  }
  func.func @transform_3(%arg0: i32) -> (i32, i32) {
    %c0_i32 = arith.constant 0 : i32
    %c0_i32_0 = arith.constant 0 : i32
    %c0_i32_1 = arith.constant 0 : i32
    return %c0_i32, %c0_i32_0 : i32, i32
  }
  func.func @transform_4(%arg0: i32) -> (i32, i32) {
    %c0_i32 = arith.constant 0 : i32
    %c0_i32_0 = arith.constant 0 : i32
    %c0_i32_1 = arith.constant 0 : i32
    return %c0_i32, %c0_i32_0 : i32, i32
  }
  func.func @transform_5(%arg0: i32) -> (i32, i32) {
    %c0_i32 = arith.constant 0 : i32
    %c0_i32_0 = arith.constant 0 : i32
    %c0_i32_1 = arith.constant 0 : i32
    return %c0_i32, %c0_i32_0 : i32, i32
  }
  func.func @transform_6(%arg0: i32) -> (i32, i32) {
    %c0_i32 = arith.constant 0 : i32
    %c0_i32_0 = arith.constant 0 : i32
    %c0_i32_1 = arith.constant 0 : i32
    return %c0_i32, %c0_i32_0 : i32, i32
  }
  func.func @transform_7(%arg0: i32) -> (i32, i32) {
    %c0_i32 = arith.constant 0 : i32
    %c0_i32_0 = arith.constant 0 : i32
    %c0_i32_1 = arith.constant 0 : i32
    return %c0_i32, %c0_i32_0 : i32, i32
  }
  func.func @transform_8(%arg0: i32) -> (i32, i32) {
    %c0_i32 = arith.constant 0 : i32
    %c0_i32_0 = arith.constant 0 : i32
    %c0_i32_1 = arith.constant 0 : i32
    return %c0_i32, %c0_i32_0 : i32, i32
  }
  func.func @transform_9(%arg0: i32) -> (i32, i32, i32) {
    %c0_i32 = arith.constant 0 : i32
    %c0_i32_0 = arith.constant 0 : i32
    %c0_i32_1 = arith.constant 0 : i32
    return %arg0, %c0_i32, %c0_i32_0 : i32, i32, i32
  }
}

</mosaic_0001>

<bundles_post_ra>
// kernel: block_forward.1
= control target key start
LH: loop header
LB: loop body
LE: loop exit
PB: predicated region body
PF: predicated region fallthrough
CT: control target
= control target key end

     0   :  { %v20355_v3 = vmov 0   ;;  %vm327_vm0 = vcmask 523264   ;;  %vm20357_vm1 = vmmov 0   ;;  %vm1149_vm2 = vcmask 64512   ;;  %s20360_s12 = smov 112   ;;  %s20361_s13 = smov 104   ;;  %s24841_s0 = inlined_call_operand.vmem [shape: f32[1,64,128], index: 0, kind: input, shape index: {}]   ;;  %s24842_s1 = inlined_call_operand.vmem [shape: bf16[192,64], index: 1, kind: input, shape index: {}]   ;;  %s24843_s2 = inlined_call_operand.vmem [shape: f32[192,1], index: 2, kind: input, shape index: {}]   ;;  %s24844_s4 = inlined_call_operand.vmem [shape: f32[64,1], index: 4, kind: input, shape index: {}]   ;;  %s24845_s3 = inlined_call_operand.vmem [shape: bf16[64,64], index: 3, kind: input, shape index: {}]   ;;  %s24846_s6 = inlined_call_operand.vmem [shape: f32[256,1], index: 6, kind: input, shape index: {}]   ;;  %s24847_s8 = inlined_call_operand.vmem [shape: f32[64,1], index: 8, kind: input, shape index: {}]   ;;  %s24848_s5 = inlined_call_operand.vmem [shape: bf16[256,64], index: 5, kind: input, shape index: {}]   ;;  %s24849_s7 = inlined_call_operand.vmem [shape: bf16[64,256], index: 7, kind: input, shape index: {}]   ;;  %s24850_s9 = inlined_call_operand.vmem [shape: f32[1,64,128], index: 9, kind: output, shape index: {}]  }
   0x1   :  { %v33_v0 = vld [vmem:[%s24841_s0] sm:$0xff]  ;;  %v34_v1 = vld [vmem:[%s24841_s0 + $0x8] sm:$0xff]  ;;  %v35_v2 = vld [vmem:[%s24841_s0 + $0x10] sm:$0xff]  ;;  %19130 = vset.pattern.permute.xlu1 %v20355_v3  ;;  %19129 = vset.pattern.permute.xlu0 %v20355_v3  ;;  %s20362_s14 = smov 96   ;;  %s20363_s15 = smov 88   ;;  %vm2910_vm6 = vcmask 130112  }
   0x2   :  { %v41_v4 = vadd.f32 %v34_v1, %v33_v0  ;;  %v36_v5 = vld [vmem:[%s24841_s0 + $0x18] sm:$0xff]  ;;  %v19787_v7 = vld [vmem:[%s24842_s1] sm:$0xff]   ;;  %v38_v10 = vld [vmem:[%s24841_s0 + $0x28] sm:$0xff]  ;;  %s20364_s16 = smov 80   ;;  %s20365_s17 = smov 72   ;;  %vm3799_vm7 = vcmask 195712  }
   0x3   :  { %v37_v8 = vld [vmem:[%s24841_s0 + $0x20] sm:$0xff]  ;;  %17494 = vmatprep.mubr.msk.bf16.mxu0 %vm327_vm0, %v19787_v7  ;;  %v39_v12 = vld [vmem:[%s24841_s0 + $0x30] sm:$0xff]  ;;  %v40_v14 = vld [vmem:[%s24841_s0 + $0x38] sm:$0xff]  ;;  %s20367_s18 = smov 56   ;;  %s20368_s19 = smov 48   ;;  %vm4720_vm8 = vcmask 261312  }
   0x4   :  { %v42_v6 = vadd.f32 %v41_v4, %v35_v2  ;;  %v132_v15 = vld [vmem:[%s24843_s2 + $0x48] sm:$0xff]  ;;  %v131_v17 = vld [vmem:[%s24843_s2 + $0x40] sm:$0xff]  ;;  %v125_v22 = vld [vmem:[%s24843_s2 + $0x10] sm:$0xff]  ;;  %s20369_s20 = smov 40   ;;  %s20370_s21 = smov 32   ;;  %vm5609_vm9 = vcmask 326912  }
   0x5   :  { %194 = vperm.xlu1 %19130, %v132_v15   ;;  %189 = vperm.xlu0 %19129, %v131_v17   ;;  %v124_v18 = vld [vmem:[%s24843_s2 + $0x8] sm:$0xff]  ;;  %v123_v20 = vld [vmem:[%s24843_s2] sm:$0xff]  ;;  %v133_v23 = vld [vmem:[%s24843_s2 + $0x50] sm:$0xff]  ;;  %s20371_s22 = smov 24   ;;  %s20372_s23 = smov 16   ;;  %vm6530_vm10 = vcmask 392512  }
   0x6   :  { %v43_v9 = vadd.f32 %v42_v6, %v36_v5  ;;  %v126_v26 = vld [vmem:[%s24843_s2 + $0x18] sm:$0xff]  ;;  %v127_v30 = vld [vmem:[%s24843_s2 + $0x20] sm:$0xff]  ;;  %v128_v34 = vld [vmem:[%s24843_s2 + $0x28] sm:$0xff]  ;;  %s20373_s24 = smov 8   ;;  %vm7419_vm11 = vcmask 458112   ;;  %vm8340_vm12 = vcmask 523712  }
   0x7   :  { %v134_v28 = vld [vmem:[%s24843_s2 + $0x58] sm:$0xff]  ;;  %v135_v32 = vld [vmem:[%s24843_s2 + $0x60] sm:$0xff]  ;;  %v136_v39 = vld [vmem:[%s24843_s2 + $0x68] sm:$0xff]  ;;  %vm9229_vm13 = vcmask 589312   ;;  %vm10150_vm14 = vcmask 654912   ;;  %vm11039_vm15 = vcmask 720512  }
   0x8   :  { %v44_v11 = vadd.f32 %v43_v9, %v37_v8  ;;  %v138_v44 = vld [vmem:[%s24843_s2 + $0x78] sm:$0xff]  ;;  %v137_v48 = vld [vmem:[%s24843_s2 + $0x70] sm:$0xff] }
   0x9   :  { %154 = vperm.xlu1 %19130, %v124_v18   ;;  %149 = vperm.xlu0 %19129, %v123_v20   ;;  %v130_v52 = vld [vmem:[%s24843_s2 + $0x38] sm:$0xff]  ;;  %v129_v56 = vld [vmem:[%s24843_s2 + $0x30] sm:$0xff]  ;;  %v19788_v20 = vld [vmem:[%s24842_s1 + $0x8] sm:$0xff]  }
   0xa   :  { %v45_v13 = vadd.f32 %v44_v11, %v38_v10 }
   0xc   :  { %v46_v16 = vadd.f32 %v45_v13, %v39_v12 }
   0xd   :  { %159 = vperm.xlu1 %19130, %v125_v22   ;;  %199 = vperm.xlu0 %19129, %v133_v23   ;;  %v19790_v22 = vld [vmem:[%s24842_s1 + $0x18] sm:$0xff]   ;;  %v19791_v23 = vld [vmem:[%s24842_s1 + $0x20] sm:$0xff]  }
   0xe   :  { %v47_v19 = vadd.f32 %v46_v16, %v40_v14 }
  0x10   :  { %v48_v21 = vrot.slane %v47_v19, 4 }
  0x11   :  { %164 = vperm.xlu1 %19130, %v126_v26   ;;  %204 = vperm.xlu0 %19129, %v134_v28   ;;  %v19794_v26 = vld [vmem:[%s24842_s1 + $0x38] sm:$0xff]  }
  0x12   :  { %v49_v24 = vadd.f32 %v48_v21, %v47_v19  ;;  %v19789_v21 = vld [vmem:[%s24842_s1 + $0x10] sm:$0xff]  }
  0x14   :  { %v50_v25 = vrot.slane %v49_v24, 2 }
  0x15   :  { %169 = vperm.xlu1 %19130, %v127_v30   ;;  %209 = vperm.xlu0 %19129, %v135_v32  }
  0x16   :  { %v51_v27 = vadd.f32 %v50_v25, %v49_v24  ;;  %v19792_v24 = vld [vmem:[%s24842_s1 + $0x28] sm:$0xff]   ;;  %v19793_v25 = vld [vmem:[%s24842_s1 + $0x30] sm:$0xff]  }
  0x18   :  { %v52_v29 = vrot.slane %v51_v27, 1 }
  0x19   :  { %174 = vperm.xlu1 %19130, %v128_v34   ;;  %214 = vperm.xlu0 %19129, %v136_v39  }
  0x1a   :  { %v53_v31 = vadd.f32 %v52_v29, %v51_v27 }
  0x1c   :  { %v54_v33 = vmul.f32 0.015625, %v53_v31 }
  0x1d   :  { %224 = vperm.xlu1 %19130, %v138_v44   ;;  %219 = vperm.xlu0 %19129, %v137_v48  }
  0x1e   :  { %v55_v35 = vsub.f32 %v33_v0, %v54_v33  ;;  %v56_v36 = vsub.f32 %v34_v1, %v54_v33  ;;  %v57_v37 = vsub.f32 %v35_v2, %v54_v33  ;;  %v58_v38 = vsub.f32 %v36_v5, %v54_v33 }
  0x1f   :  { %v59_v40 = vsub.f32 %v37_v8, %v54_v33  ;;  %v60_v45 = vsub.f32 %v38_v10, %v54_v33  ;;  %v61_v49 = vsub.f32 %v39_v12, %v54_v33  ;;  %v62_v53 = vsub.f32 %v40_v14, %v54_v33 }
  0x20   :  { %v63_v41 = vmul.f32 %v55_v35, %v55_v35  ;;  %v64_v42 = vmul.f32 %v56_v36, %v56_v36  ;;  %v65_v43 = vmul.f32 %v57_v37, %v57_v37  ;;  %v66_v46 = vmul.f32 %v58_v38, %v58_v38 }
  0x21   :  { %v67_v50 = vmul.f32 %v59_v40, %v59_v40  ;;  %v68_v54 = vmul.f32 %v60_v45, %v60_v45  ;;  %v69_v57 = vmul.f32 %v61_v49, %v61_v49  ;;  %184 = vperm.xlu1 %19130, %v130_v52   ;;  %179 = vperm.xlu0 %19129, %v129_v56  }
  0x22   :  { %v71_v47 = vadd.f32 %v64_v42, %v63_v41  ;;  %v70_v59 = vmul.f32 %v62_v53, %v62_v53 }
  0x24   :  { %v72_v51 = vadd.f32 %v71_v47, %v65_v43 }
  0x26   :  { %v73_v55 = vadd.f32 %v72_v51, %v66_v46 }
  0x28   :  { %v74_v58 = vadd.f32 %v73_v55, %v67_v50 }
  0x2a   :  { %v75_v60 = vadd.f32 %v74_v58, %v68_v54 }
  0x2c   :  { %v76_v61 = vadd.f32 %v75_v60, %v69_v57 }
  0x2e   :  { %v77_v62 = vadd.f32 %v76_v61, %v70_v59 }
  0x30   :  { %v78_v63 = vrot.slane %v77_v62, 4 }
  0x32   :  { %v79_v0 = vadd.f32 %v78_v63, %v77_v62 }
  0x34   :  { %v80_v1 = vrot.slane %v79_v0, 2 }
  0x36   :  { %v81_v2 = vadd.f32 %v80_v1, %v79_v0 }
  0x38   :  { %v82_v3 = vrot.slane %v81_v2, 1 }
  0x3a   :  { %v83_v4 = vadd.f32 %v82_v3, %v81_v2 }
  0x3c   :  { %v84_v5 = vmul.f32 0.015625, %v83_v4 }
  0x3e   :  { %v85_v6 = vadd.f32 1e-05, %v84_v5 }
  0x40   :  { %19831 = vrsqrt.f32 %v85_v6  ;;  %v24851_v6 = vmov 0.0  }
  0x41   :  { %17518 = vmatprep.subr.bf16.mxu1 %v24851_v6  ;;  %17520 = vmatprep.mubr.msk.bf16.mxu1 %vm20357_vm1, %v24851_v6 }
  0x4d   :  { %v19832_v7 = vpop.eup %19831 }
  0x4e   :  { %v93_v8 = vmul.f32 %v19832_v7, %v61_v49  ;;  %v94_v9 = vmul.f32 %v19832_v7, %v62_v53  ;;  %v91_v10 = vmul.f32 %v19832_v7, %v59_v40  ;;  %v92_v11 = vmul.f32 %v19832_v7, %v60_v45 }
  0x4f   :  { %v89_v14 = vmul.f32 %v19832_v7, %v57_v37  ;;  %v90_v15 = vmul.f32 %v19832_v7, %v58_v38  ;;  %v87_v17 = vmul.f32 %v19832_v7, %v55_v35  ;;  %v88_v18 = vmul.f32 %v19832_v7, %v56_v36 }
  0x50   :  { %v122_v12 = vpack.c.bf16 %v94_v9, %v93_v8  ;;  %v121_v13 = vpack.c.bf16 %v92_v11, %v91_v10 }
  0x51   :  { %v120_v16 = vpack.c.bf16 %v90_v15, %v89_v14  ;;  %v119_v19 = vpack.c.bf16 %v88_v18, %v87_v17 }
  0x52   :  { %17486 = vmatprep.subr.bf16.mxu0 %v122_v12 }
  0x53   :  { %17487 = vmatpush3.bf16.msra.mxu0 %v122_v12 }
  0x54   :  { %17488 = vmatprep.subr.bf16.mxu0 %v121_v13 }
  0x57   :  { %17489 = vmatpush3.bf16.msra.mxu0 %v121_v13 }
  0x58   :  { %17490 = vmatprep.subr.bf16.mxu0 %v120_v16 }
  0x5b   :  { %17491 = vmatpush3.bf16.msra.mxu0 %v120_v16 }
  0x5c   :  { %17492 = vmatprep.subr.bf16.mxu0 %v119_v19 }
  0x5f   :  { %17493 = vmatpush3.bf16.msra.mxu0 %v119_v19 }
  0x60   :  { %17560 = vmatprep.subr.bf16.mxu0 %v24851_v6 }
  0x62   :  { %17495 = vmatmul.mubr.msk.bf16.vlgmr.msra.gmra.mxu0 %vm327_vm0, %v19788_v20 }
  0x63   :  { %17498 = vmatprep.mubr.msk.bf16.mxu0 %vm327_vm0, %v19789_v21 }
  0x6a   :  { %17499 = vmatmul.mubr.msk.bf16.gmra.mxu0 %vm327_vm0, %v19790_v22 }
  0x6b   :  { %17502 = vmatprep.mubr.msk.bf16.mxu0 %vm327_vm0, %v19791_v23 }
  0x72   :  { %17503 = vmatmul.mubr.msk.bf16.gmra.mxu0 %vm327_vm0, %v19792_v24 }
  0x73   :  { %17506 = vmatprep.mubr.msk.bf16.mxu0 %vm327_vm0, %v19793_v25 }
  0x7a   :  { %17507 = vmatmul.mubr.msk.bf16.gmra.mxu0 %vm327_vm0, %v19794_v26 }
  0x80   :  { %v190_v27 = vpop.permute.xlu0 %189  ;;  %v195_v28 = vpop.permute.xlu1 %194 }
  0x84   :  { %v150_v29 = vpop.permute.xlu0 %149  ;;  %v155_v30 = vpop.permute.xlu1 %154 }
  0x88   :  { %v200_v31 = vpop.permute.xlu0 %199  ;;  %v160_v32 = vpop.permute.xlu1 %159 }
  0x8c   :  { %v205_v33 = vpop.permute.xlu0 %204  ;;  %v165_v34 = vpop.permute.xlu1 %164 }
  0x90   :  { %v210_v35 = vpop.permute.xlu0 %209  ;;  %v170_v36 = vpop.permute.xlu1 %169 }
  0x94   :  { %v215_v37 = vpop.permute.xlu0 %214  ;;  %v175_v38 = vpop.permute.xlu1 %174 }
  0x98   :  { %v20528_v42 = vpop.permute.xlu0 %219  ;;  %v20530_v44 = vpop.permute.xlu1 %224 }
  0x9c   :  { %v180_v47 = vpop.permute.xlu0 %179  ;;  %v185_v49 = vpop.permute.xlu1 %184 }
 0x122   :  { %v17496_v39 = vpop.f32.mrf.mxu0 }
 0x123   :  { %v407_v56 = vadd.f32 %v17496_v39, %v160_v32 }
 0x124   :  { %v398_v40 = vpop.f32.mrf.mxu0 }
 0x125   :  { %v399_v41 = vadd.f32 %v398_v40, %v150_v29 }
 0x126   :  { %v17497_v43 = vpop.f32.mrf.mxu0 }
 0x127   :  { %v410_v61 = vadd.f32 %v17497_v43, %v165_v34 }
 0x128   :  { %v401_v45 = vpop.f32.mrf.mxu0 }
 0x129   :  { %v402_v4 = vadd.f32 %v401_v45, %v155_v30 }
 0x12a   :  { %v17500_v46 = vpop.f32.mrf.mxu0 }
 0x12b   :  { %v20532_v51 = vadd.f32 %v17500_v46, %v180_v47 }
 0x12c   :  { %v414_v48 = vpop.f32.mrf.mxu0 }
 0x12d   :  { %v415_v12 = vadd.f32 %v414_v48, %v170_v36 }
 0x12e   :  { %v17501_v50 = vpop.f32.mrf.mxu0 }
 0x12f   :  { %v20534_v52 = vadd.f32 %v17501_v50, %v185_v49 }
 0x130   :  { %v417_v53 = vpop.f32.mrf.mxu0 }
 0x131   :  { %v19705_v54 = vpack.i.bf16 %v20534_v52, %v20532_v51  ;;  %v418_v15 = vadd.f32 %v417_v53, %v175_v38  ;;  %v19798_v52 = vld [vmem:[%s24842_s1 + $0x58] sm:$0xff]  }
 0x132   :  { %v17504_v55 = vpop.f32.mrf.mxu0 }
 0x133   :  { %v439_v57 = vadd.f32 %v17504_v55, %v200_v31 }
 0x134   :  { %v430_v58 = vpop.f32.mrf.mxu0 }
 0x135   :  { %v19131_v59 = vpack.i.bf16 %v407_v56, %v439_v57  ;;  %v431_v0 = vadd.f32 %v430_v58, %v190_v27 }
 0x136   :  { %v17505_v60 = vpop.f32.mrf.mxu0 }
 0x137   :  { %v442_v62 = vadd.f32 %v17505_v60, %v205_v33  ;;  %19132 = vxpose.xlu0.b32.start.end [1/1] (short) %v19131_v59, 128  ;;  %v19213_v2 = vpack.i.bf16 %v399_v41, %v431_v0 }
 0x138   :  { %v433_v1 = vpop.f32.mrf.mxu0 }
 0x139   :  { %v19295_v63 = vpack.i.bf16 %v410_v61, %v442_v62  ;;  %v434_v3 = vadd.f32 %v433_v1, %v195_v28 }
 0x13a   :  { %v20542_v7 = vpop.f32.mrf.mxu0 }
 0x13b   :  { %19296 = vxpose.xlu1.b32.start.end [1/1] (short) %v19295_v63, 128  ;;  %v19377_v5 = vpack.i.bf16 %v402_v4, %v434_v3 }
 0x13c   :  { %v446_v8 = vpop.f32.mrf.mxu0 }
 0x13d   :  { %v447_v10 = vadd.f32 %v446_v8, %v210_v35 }
 0x13e   :  { %v20544_v9 = vpop.f32.mrf.mxu0 }
 0x13f   :  { %v19459_v13 = vpack.i.bf16 %v415_v12, %v447_v10 }
 0x140   :  { %v449_v11 = vpop.f32.mrf.mxu0 }
 0x141   :  { %v450_v14 = vadd.f32 %v449_v11, %v215_v37 }
 0x143   :  { %v19623_v16 = vpack.i.bf16 %v418_v15, %v450_v14 }
 0x174   :  { %19214 = vxpose.xlu0.b32.start.end [1/1] (short) %v19213_v2, 128 }
 0x178   :  { %19378 = vxpose.xlu1.b32.start.end [1/1] (short) %v19377_v5, 128 }
 0x1b1   :  { %19460 = vxpose.xlu0.b32.start.end [1/1] (short) %v19459_v13, 128 }
 0x1b3   :  { %v19133_v17 = vpop.trf.xlu0 }
 0x1b4   :  { %v19137_v18 = vunpack.i.h.bf16 %v19133_v17  ;;  %v19134_v19 = vunpack.i.l.bf16 %v19133_v17 }
 0x1b5   :  { %19624 = vxpose.xlu1.b32.start.end [1/1] (short) %v19623_v16, 128 }
 0x1b7   :  { %v19138_v20 = vpop.trf.xlu0  ;;  %v19297_v21 = vpop.trf.xlu1 }
 0x1b8   :  { %v19142_v22 = vunpack.i.h.bf16 %v19138_v20  ;;  %v19139_v23 = vunpack.i.l.bf16 %v19138_v20  ;;  %v19301_v26 = vunpack.i.h.bf16 %v19297_v21  ;;  %v19298_v30 = vunpack.i.l.bf16 %v19297_v21 }
 0x1ba   :  { %v20546_v24 = vpack.c.bf16 %v19142_v22, %v19137_v18  ;;  %v20548_v25 = vpack.c.bf16 %v19139_v23, %v19134_v19 }
 0x1bb   :  { %v19143_v27 = vpop.trf.xlu0  ;;  %v19302_v28 = vpop.trf.xlu1 }
 0x1bc   :  { %v19306_v29 = vunpack.i.h.bf16 %v19302_v28  ;;  %v19303_v31 = vunpack.i.l.bf16 %v19302_v28  ;;  %v19147_v32 = vunpack.i.h.bf16 %v19143_v27  ;;  %v19144_v38 = vunpack.i.l.bf16 %v19143_v27 }
 0x1be   :  { %v20550_v33 = vpack.c.bf16 %v19306_v29, %v19301_v26  ;;  %v20554_v40 = vpack.c.bf16 %v19303_v31, %v19298_v30 }
 0x1bf   :  { %v19148_v34 = vpop.trf.xlu0  ;;  %v19307_v35 = vpop.trf.xlu1 }
 0x1c0   :  { %v19152_v36 = vunpack.i.h.bf16 %v19148_v34  ;;  %v19149_v37 = vunpack.i.l.bf16 %v19148_v34  ;;  %v19311_v41 = vunpack.i.h.bf16 %v19307_v35  ;;  %v19308_v48 = vunpack.i.l.bf16 %v19307_v35 }
 0x1c2   :  { %v20552_v39 = vpack.c.bf16 %v19152_v36, %v19147_v32  ;;  %v20556_v46 = vpack.c.bf16 %v19149_v37, %v19144_v38 }
 0x1c3   :  { %v19153_v43 = vpop.trf.xlu0  ;;  %v19312_v45 = vpop.trf.xlu1 }
 0x1c4   :  { %v19316_v47 = vunpack.i.h.bf16 %v19312_v45  ;;  %v19313_v49 = vunpack.i.l.bf16 %v19312_v45  ;;  %v19157_v50 = vunpack.i.h.bf16 %v19153_v43  ;;  %v19154_v59 = vunpack.i.l.bf16 %v19153_v43 }
 0x1c6   :  { %v20558_v53 = vpack.c.bf16 %v19316_v47, %v19311_v41  ;;  %v20562_v61 = vpack.c.bf16 %v19313_v49, %v19308_v48 }
 0x1c7   :  { %v19158_v55 = vpop.trf.xlu0  ;;  %v19317_v56 = vpop.trf.xlu1 }
 0x1c8   :  { %v19162_v57 = vunpack.i.h.bf16 %v19158_v55  ;;  %v19159_v58 = vunpack.i.l.bf16 %v19158_v55  ;;  %v19321_v62 = vunpack.i.h.bf16 %v19317_v56  ;;  %v19318_v3 = vunpack.i.l.bf16 %v19317_v56 }
 0x1ca   :  { %v20560_v60 = vpack.c.bf16 %v19162_v57, %v19157_v50  ;;  %v20564_v1 = vpack.c.bf16 %v19159_v58, %v19154_v59 }
 0x1cb   :  { %v19163_v63 = vpop.trf.xlu0  ;;  %v19322_v0 = vpop.trf.xlu1 }
 0x1cc   :  { %24956 = vst [vmem:[#allocation3_spill] sm:$0xff] %v20560_v60  ;;  %24957 = vst [vmem:[#allocation4_spill] sm:$0xff] %v20564_v1  ;;  %v19326_v2 = vunpack.i.h.bf16 %v19322_v0  ;;  %v19323_v4 = vunpack.i.l.bf16 %v19322_v0  ;;  %v19167_v5 = vunpack.i.h.bf16 %v19163_v63  ;;  %v19164_v14 = vunpack.i.l.bf16 %v19163_v63 }
 0x1ce   :  { %v20566_v8 = vpack.c.bf16 %v19326_v2, %v19321_v62  ;;  %v20570_v16 = vpack.c.bf16 %v19323_v4, %v19318_v3 }
 0x1cf   :  { %v19168_v10 = vpop.trf.xlu0  ;;  %v19327_v11 = vpop.trf.xlu1 }
 0x1d0   :  { %24958 = vst [vmem:[#allocation5_spill] sm:$0xff] %v20566_v8  ;;  %v19172_v12 = vunpack.i.h.bf16 %v19168_v10  ;;  %v19169_v13 = vunpack.i.l.bf16 %v19168_v10  ;;  %24960 = vst [vmem:[#allocation7_spill] sm:$0xff] %v20570_v16  ;;  %v19331_v17 = vunpack.i.h.bf16 %v19327_v11  ;;  %v19328_v22 = vunpack.i.l.bf16 %v19327_v11 }
 0x1d1   :  { %v458_v11 = vadd.f32 %v20544_v9, %v20530_v44 }
 0x1d2   :  { %v20568_v15 = vpack.c.bf16 %v19172_v12, %v19167_v5  ;;  %v20572_v20 = vpack.c.bf16 %v19169_v13, %v19164_v14 }
 0x1d3   :  { %v19173_v18 = vpop.trf.xlu0  ;;  %v19332_v19 = vpop.trf.xlu1 }
 0x1d4   :  { %24959 = vst [vmem:[#allocation6_spill] sm:$0xff] %v20568_v15  ;;  %24961 = vst [vmem:[#allocation8_spill] sm:$0xff] %v20572_v20  ;;  %v19336_v21 = vunpack.i.h.bf16 %v19332_v19  ;;  %v19333_v23 = vunpack.i.l.bf16 %v19332_v19  ;;  %v19177_v26 = vunpack.i.h.bf16 %v19173_v18  ;;  %v19174_v32 = vunpack.i.l.bf16 %v19173_v18 }
 0x1d5   :  { %v1141_v20 = vlaneseq }
 0x1d6   :  { %v20574_v27 = vpack.c.bf16 %v19336_v21, %v19331_v17  ;;  %v20578_v35 = vpack.c.bf16 %v19333_v23, %v19328_v22  ;;  %v455_v22 = vadd.f32 %v20542_v7, %v20528_v42 }
 0x1d7   :  { %v19178_v28 = vpop.trf.xlu0  ;;  %v19337_v29 = vpop.trf.xlu1 }
 0x1d8   :  { %24962 = vst [vmem:[#allocation9_spill] sm:$0xff] %v20574_v27  ;;  %v19182_v30 = vunpack.i.h.bf16 %v19178_v28  ;;  %v19179_v31 = vunpack.i.l.bf16 %v19178_v28  ;;  %24964 = vst [vmem:[#allocation11_spill] sm:$0xff] %v20578_v35  ;;  %v19341_v36 = vunpack.i.h.bf16 %v19337_v29  ;;  %v19338_v45 = vunpack.i.l.bf16 %v19337_v29 }
 0x1d9   :  { %v1144_v35 = vand.u32 127, %v1141_v20 }
 0x1da   :  { %v20576_v34 = vpack.c.bf16 %v19182_v30, %v19177_v26  ;;  %v20580_v41 = vpack.c.bf16 %v19179_v31, %v19174_v32  ;;  %v19541_v31 = vpack.i.bf16 %v458_v11, %v455_v22 }
 0x1db   :  { %v19183_v37 = vpop.trf.xlu0  ;;  %v19342_v38 = vpop.trf.xlu1  ;;  %vm1146_vm4 = vcmp.lt.s32.totalorder %v1144_v35, 8 }
 0x1dc   :  { %24963 = vst [vmem:[#allocation10_spill] sm:$0xff] %v20576_v34  ;;  %24965 = vst [vmem:[#allocation12_spill] sm:$0xff] %v20580_v41  ;;  %v19346_v43 = vunpack.i.h.bf16 %v19342_v38  ;;  %v19343_v47 = vunpack.i.l.bf16 %v19342_v38  ;;  %v19187_v48 = vunpack.i.h.bf16 %v19183_v37  ;;  %v19184_v58 = vunpack.i.l.bf16 %v19183_v37 }
 0x1de   :  { %v20582_v49 = vpack.c.bf16 %v19346_v43, %v19341_v36  ;;  %v20586_v62 = vpack.c.bf16 %v19343_v47, %v19338_v45  ;;  %v19795_v43 = vld [vmem:[%s24842_s1 + $0x40] sm:$0xff]   ;;  %v19796_v45 = vld [vmem:[%s24842_s1 + $0x48] sm:$0xff]  }
 0x1df   :  { %v19188_v50 = vpop.trf.xlu0  ;;  %v19347_v55 = vpop.trf.xlu1  ;;  %17510 = vmatprep.mubr.msk.bf16.mxu0 %vm327_vm0, %v19795_v43  ;;  %v1246_v43 = vsel %vm1149_vm2, %v20548_v25, 0 }
 0x1e0   :  { %24966 = vst [vmem:[#allocation13_spill] sm:$0xff] %v20582_v49  ;;  %v19192_v56 = vunpack.i.h.bf16 %v19188_v50  ;;  %v19189_v57 = vunpack.i.l.bf16 %v19188_v50  ;;  %24968 = vst [vmem:[#allocation15_spill] sm:$0xff] %v20586_v62  ;;  %v19351_v63 = vunpack.i.h.bf16 %v19347_v55  ;;  %v19348_v5 = vunpack.i.l.bf16 %v19347_v55  ;;  %17511 = vmatmul.mubr.msk.bf16.gmra.mxu0 %vm327_vm0, %v19796_v45 }
 0x1e2   :  { %v20584_v59 = vpack.c.bf16 %v19192_v56, %v19187_v48  ;;  %v20588_v3 = vpack.c.bf16 %v19189_v57, %v19184_v58  ;;  %v19797_v56 = vld [vmem:[%s24842_s1 + $0x50] sm:$0xff]   ;;  %s20366_s1 = smov 64  }
 0x1e3   :  { %v19193_v0 = vpop.trf.xlu0  ;;  %v19352_v2 = vpop.trf.xlu1  ;;  %17514 = vmatprep.mubr.msk.bf16.mxu0 %vm327_vm0, %v19797_v56  ;;  %v1292_v56 = vsel %vm1149_vm2, %v20554_v40, 0 }
 0x1e4   :  { %24967 = vst [vmem:[#allocation14_spill] sm:$0xff] %v20584_v59  ;;  %24969 = vst [vmem:[#allocation16_spill] sm:$0xff] %v20588_v3  ;;  %v19356_v4 = vunpack.i.h.bf16 %v19352_v2  ;;  %v19353_v10 = vunpack.i.l.bf16 %v19352_v2  ;;  %v19197_v12 = vunpack.i.h.bf16 %v19193_v0  ;;  %v19194_v21 = vunpack.i.l.bf16 %v19193_v0 }
 0x1e6   :  { %v20592_v13 = vpack.c.bf16 %v19356_v4, %v19351_v63  ;;  %v20598_v26 = vpack.c.bf16 %v19353_v10, %v19348_v5 }
 0x1e7   :  { %v19198_v14 = vpop.trf.xlu0  ;;  %v19357_v17 = vpop.trf.xlu1 }
 0x1e8   :  { %24970 = vst [vmem:[#allocation17_spill] sm:$0xff] %v20592_v13  ;;  %v19202_v18 = vunpack.i.h.bf16 %v19198_v14  ;;  %v19199_v19 = vunpack.i.l.bf16 %v19198_v14  ;;  %24972 = vst [vmem:[#allocation19_spill] sm:$0xff] %v20598_v26  ;;  %v19361_v28 = vunpack.i.h.bf16 %v19357_v17  ;;  %v19358_v29 = vunpack.i.l.bf16 %v19357_v17  ;;  %17515 = vmatmul.mubr.msk.bf16.gmra.mxu0 %vm327_vm0, %v19798_v52 }
 0x1e9   :  { %17562 = vmatprep.mubr.msk.bf16.mxu0 %vm20357_vm1, %v24851_v6 }
 0x1ea   :  { %v20596_v23 = vpack.c.bf16 %v19202_v18, %v19197_v12  ;;  %v20602_v9 = vpack.c.bf16 %v19199_v19, %v19194_v21 }
 0x1eb   :  { %v20600_v30 = vpop.trf.xlu0  ;;  %v19362_v44 = vpop.trf.xlu1 }
 0x1ec   :  { %24971 = vst [vmem:[#allocation18_spill] sm:$0xff] %v20596_v23  ;;  %24973 = vst [vmem:[#allocation20_spill] sm:$0xff] %v20600_v30  ;;  %v19366_v32 = vunpack.i.h.bf16 %v19362_v44  ;;  %v19363_v36 = vunpack.i.l.bf16 %v19362_v44 }
 0x1ed   :  { %24974 = vst [vmem:[#allocation21_spill] sm:$0xff] %v20602_v9 }
 0x1ee   :  { %19542 = vxpose.xlu0.b32.start.end [1/1] (short) %v19541_v31, 128  ;;  %v20604_v37 = vpack.c.bf16 %v19366_v32, %v19361_v28  ;;  %v20610_v7 = vpack.c.bf16 %v19363_v36, %v19358_v29 }
 0x1ef   :  { %v20606_v38 = vpop.trf.xlu0  ;;  %v20608_v42 = vpop.trf.xlu1 }
 0x1f0   :  { %24975 = vst [vmem:[#allocation22_spill] sm:$0xff] %v20604_v37  ;;  %24976 = vst [vmem:[#allocation23_spill] sm:$0xff] %v20606_v38 }
 0x1f1   :  { %24977 = vst [vmem:[#allocation24_spill] sm:$0xff] %v20608_v42  ;;  %24978 = vst [vmem:[#allocation25_spill] sm:$0xff] %v20610_v7 }
 0x1f2   :  { %19706 = vxpose.xlu1.b32.start.end [1/1] (short) %v19705_v54, 128 }
 0x1f3   :  { %v19215_v47 = vpop.trf.xlu0  ;;  %v20621_v48 = vpop.trf.xlu1 }
 0x1f4   :  { %24979 = vst [vmem:[#allocation26_spill] sm:$0xff] %v20621_v48  ;;  %v19216_v51 = vunpack.i.l.bf16 %v19215_v47  ;;  %v19219_v12 = vunpack.i.h.bf16 %v19215_v47 }
 0x1f7   :  { %v19220_v50 = vpop.trf.xlu0  ;;  %v19379_v55 = vpop.trf.xlu1 }
 0x1f8   :  { %v19221_v57 = vunpack.i.l.bf16 %v19220_v50  ;;  %v19380_v2 = vunpack.i.l.bf16 %v19379_v55  ;;  %v19224_v5 = vunpack.i.h.bf16 %v19220_v50  ;;  %v19383_v22 = vunpack.i.h.bf16 %v19379_v55 }
 0x1fa   :  { %v20634_v58 = vpack.c.bf16 %v19221_v57, %v19216_v51  ;;  %v20650_v18 = vpack.c.bf16 %v19224_v5, %v19219_v12 }
 0x1fb   :  { %v20632_v54 = vpop.trf.xlu0  ;;  %v19384_v63 = vpop.trf.xlu1 }
 0x1fc   :  { %v1154_v0 = vsel %vm1149_vm2, %v20634_v58, 0  ;;  %v19385_v4 = vunpack.i.l.bf16 %v19384_v63  ;;  %v19388_v28 = vunpack.i.h.bf16 %v19384_v63 }
 0x1fd   :  { %17519 = vmatpush3.bf16.xpose.msra.mxu1 %v1154_v0 }
 0x1fe   :  { %17524 = vmatprep.subr.bf16.mxu1 %v24851_v6  ;;  %v20646_v14 = vpack.c.bf16 %v19385_v4, %v19380_v2  ;;  %v20665_v31 = vpack.c.bf16 %v19388_v28, %v19383_v22 }
 0x1ff   :  { %v20641_v10 = vpop.trf.xlu0  ;;  %v20643_v11 = vpop.trf.xlu1 }
 0x200   :  { %v1200_v21 = vsel %vm1149_vm2, %v20646_v14, 0 }
 0x203   :  { %v20648_v17 = vpop.trf.xlu0  ;;  %v20652_v19 = vpop.trf.xlu1 }
 0x204   :  { %24980 = vst [vmem:[#allocation27_spill] sm:$0xff] %v20648_v17  ;;  %17521 = vmatmul.mubr.msk.bf16.vlgmr.msra.gmra.mxu1 %vm1149_vm2, %v20650_v18 }
 0x205   :  { %17525 = vmatpush3.bf16.xpose.msra.mxu1 %v1200_v21  ;;  %17526 = vmatprep.mubr.msk.bf16.mxu1 %vm20357_vm1, %v24851_v6 }
 0x206   :  { %17530 = vmatprep.subr.bf16.mxu1 %v24851_v6 }
 0x207   :  { %v20660_v29 = vpop.trf.xlu0  ;;  %v20662_v44 = vpop.trf.xlu1 }
 0x208   :  { %24981 = vst [vmem:[#allocation28_spill] sm:$0xff] %v20660_v29  ;;  %24982 = vst [vmem:[#allocation29_spill] sm:$0xff] %v20662_v44 }
 0x20b   :  { %v20667_v32 = vpop.trf.xlu0  ;;  %v20669_v36 = vpop.trf.xlu1 }
 0x20c   :  { %24983 = vst [vmem:[#allocation30_spill] sm:$0xff] %v20667_v32  ;;  %24984 = vst [vmem:[#allocation31_spill] sm:$0xff] %v20669_v36  ;;  %17527 = vmatmul.mubr.msk.bf16.vlgmr.msra.gmra.mxu1 %vm1149_vm2, %v20665_v31 }
 0x20d   :  { %17531 = vmatpush3.bf16.xpose.msra.mxu1 %v1246_v43  ;;  %17532 = vmatprep.mubr.msk.bf16.mxu1 %vm20357_vm1, %v24851_v6 }
 0x20e   :  { %17536 = vmatprep.subr.bf16.mxu1 %v24851_v6 }
 0x20f   :  { %v20677_v45 = vpop.trf.xlu0  ;;  %v20679_v47 = vpop.trf.xlu1 }
 0x210   :  { %24985 = vst [vmem:[#allocation32_spill] sm:$0xff] %v20677_v45  ;;  %24986 = vst [vmem:[#allocation33_spill] sm:$0xff] %v20679_v47 }
 0x213   :  { %v20682_v50 = vpop.trf.xlu0  ;;  %v20684_v55 = vpop.trf.xlu1 }
 0x214   :  { %24987 = vst [vmem:[#allocation34_spill] sm:$0xff] %v20682_v50  ;;  %24988 = vst [vmem:[#allocation35_spill] sm:$0xff] %v20684_v55  ;;  %17533 = vmatmul.mubr.msk.bf16.vlgmr.msra.gmra.mxu1 %vm1149_vm2, %v20546_v24 }
 0x215   :  { %17537 = vmatpush3.bf16.xpose.msra.mxu1 %v1292_v56  ;;  %17538 = vmatprep.mubr.msk.bf16.mxu1 %vm20357_vm1, %v24851_v6 }
 0x216   :  { %17542 = vmatprep.subr.bf16.mxu1 %v24851_v6 }
 0x217   :  { %v20692_v57 = vpop.trf.xlu0  ;;  %v20694_v51 = vpop.trf.xlu1 }
 0x218   :  { %24989 = vst [vmem:[#allocation36_spill] sm:$0xff] %v20692_v57  ;;  %24990 = vst [vmem:[#allocation37_spill] sm:$0xff] %v20694_v51 }
 0x21b   :  { %v20697_v52 = vpop.trf.xlu0  ;;  %v20699_v63 = vpop.trf.xlu1 }
 0x21c   :  { %24991 = vst [vmem:[#allocation38_spill] sm:$0xff] %v20697_v52  ;;  %24992 = vst [vmem:[#allocation39_spill] sm:$0xff] %v20699_v63  ;;  %17539 = vmatmul.mubr.msk.bf16.vlgmr.msra.gmra.mxu1 %vm1149_vm2, %v20550_v33 }
 0x21d   :  { %17544 = vmatprep.mubr.msk.bf16.mxu1 %vm20357_vm1, %v24851_v6 }
 0x21f   :  { %v20705_v0 = vpop.trf.xlu0  ;;  %v20707_v2 = vpop.trf.xlu1 }
 0x220   :  { %24993 = vst [vmem:[#allocation40_spill] sm:$0xff] %v20705_v0  ;;  %24994 = vst [vmem:[#allocation41_spill] sm:$0xff] %v20707_v2 }
 0x223   :  { %v20709_v4 = vpop.trf.xlu0  ;;  %v20711_v5 = vpop.trf.xlu1 }
 0x224   :  { %24995 = vst [vmem:[#allocation42_spill] sm:$0xff] %v20709_v4  ;;  %24996 = vst [vmem:[#allocation43_spill] sm:$0xff] %v20711_v5 }
 0x227   :  { %v20713_v12 = vpop.trf.xlu0  ;;  %v20715_v21 = vpop.trf.xlu1 }
 0x228   :  { %24997 = vst [vmem:[#allocation44_spill] sm:$0xff] %v20713_v12  ;;  %24998 = vst [vmem:[#allocation45_spill] sm:$0xff] %v20715_v21 }
 0x22b   :  { %v20717_v22 = vpop.trf.xlu0  ;;  %v20719_v28 = vpop.trf.xlu1 }
 0x22c   :  { %24999 = vst [vmem:[#allocation46_spill] sm:$0xff] %v20717_v22  ;;  %25000 = vst [vmem:[#allocation47_spill] sm:$0xff] %v20719_v28 }
 0x22f   :  { %v20721_v43 = vpop.trf.xlu0  ;;  %v20723_v56 = vpop.trf.xlu1 }
 0x230   :  { %25001 = vst [vmem:[#allocation48_spill] sm:$0xff] %v20721_v43  ;;  %25002 = vst [vmem:[#allocation49_spill] sm:$0xff] %v20723_v56 }
 0x233   :  { %v19461_v6 = vpop.trf.xlu0  ;;  %v20725_v30 = vpop.trf.xlu1 }
 0x234   :  { %25003 = vst [vmem:[#allocation50_spill] sm:$0xff] %v20725_v30  ;;  %v19462_v23 = vunpack.i.l.bf16 %v19461_v6  ;;  %v25004_v30 = vmov 0.0   ;;  %v19465_v28 = vunpack.i.h.bf16 %v19461_v6 }
 0x237   :  { %v19466_v38 = vpop.trf.xlu0  ;;  %v19625_v42 = vpop.trf.xlu1 }
 0x238   :  { %v19467_v48 = vunpack.i.l.bf16 %v19466_v38  ;;  %v19626_v4 = vunpack.i.l.bf16 %v19625_v42  ;;  %v19470_v43 = vunpack.i.h.bf16 %v19466_v38 }
 0x23a   :  { %v20729_v9 = vpack.c.bf16 %v19467_v48, %v19462_v23  ;;  %v20740_v13 = vpack.c.bf16 %v19470_v43, %v19465_v28 }
 0x23b   :  { %v20727_v37 = vpop.trf.xlu0  ;;  %v19630_v7 = vpop.trf.xlu1 }
 0x23c   :  { %v1338_v22 = vsel %vm1149_vm2, %v20729_v9, 0  ;;  %v19631_v12 = vunpack.i.l.bf16 %v19630_v7  ;;  %v19634_v6 = vunpack.i.h.bf16 %v19630_v7 }
 0x23d   :  { %17543 = vmatpush3.bf16.xpose.msra.mxu1 %v1338_v22  ;;  %v19629_v22 = vunpack.i.h.bf16 %v19625_v42 }
 0x23e   :  { %17548 = vmatprep.subr.bf16.mxu1 %v25004_v30  ;;  %v20738_v59 = vpack.c.bf16 %v19631_v12, %v19626_v4 }
 0x23f   :  { %v20733_v56 = vpop.trf.xlu0  ;;  %v20735_v21 = vpop.trf.xlu1  ;;  %v20757_v28 = vpack.c.bf16 %v19634_v6, %v19629_v22 }
 0x240   :  { %v1384_v38 = vsel %vm1149_vm2, %v20738_v59, 0 }
 0x243   :  { %v20742_v23 = vpop.trf.xlu0  ;;  %v20744_v48 = vpop.trf.xlu1 }
 0x244   :  { %25005 = vst [vmem:[#allocation51_spill] sm:$0xff] %v20742_v23  ;;  %17545 = vmatmul.mubr.msk.bf16.vlgmr.msra.gmra.mxu1 %vm1149_vm2, %v20740_v13 }
 0x245   :  { %17549 = vmatpush3.bf16.xpose.msra.mxu1 %v1384_v38  ;;  %17550 = vmatprep.mubr.msk.bf16.mxu1 %vm20357_vm1, %v25004_v30 }
 0x246   :  { %17554 = vmatprep.subr.bf16.mxu1 %v25004_v30 }
 0x247   :  { %v20752_v4 = vpop.trf.xlu0  ;;  %v20754_v12 = vpop.trf.xlu1 }
 0x248   :  { %25006 = vst [vmem:[#allocation52_spill] sm:$0xff] %v20752_v4  ;;  %25007 = vst [vmem:[#allocation53_spill] sm:$0xff] %v20754_v12 }
 0x24b   :  { %v20759_v43 = vpop.trf.xlu0  ;;  %v20761_v3 = vpop.trf.xlu1 }
 0x24c   :  { %25008 = vst [vmem:[#allocation54_spill] sm:$0xff] %v20759_v43  ;;  %25009 = vst [vmem:[#allocation55_spill] sm:$0xff] %v20761_v3  ;;  %17551 = vmatmul.mubr.msk.bf16.vlgmr.msra.gmra.mxu1 %vm1149_vm2, %v20757_v28 }
 0x24d   :  { %17556 = vmatprep.mubr.msk.bf16.mxu1 %vm20357_vm1, %v25004_v30 }
 0x24f   :  { %v20767_v42 = vpop.trf.xlu0  ;;  %v20769_v7 = vpop.trf.xlu1 }
 0x250   :  { %25010 = vst [vmem:[#allocation56_spill] sm:$0xff] %v20767_v42  ;;  %25011 = vst [vmem:[#allocation57_spill] sm:$0xff] %v20769_v7 }
 0x253   :  { %v20771_v38 = vpop.trf.xlu0  ;;  %v20773_v26 = vpop.trf.xlu1 }
 0x254   :  { %25012 = vst [vmem:[#allocation58_spill] sm:$0xff] %v20771_v38  ;;  %25013 = vst [vmem:[#allocation59_spill] sm:$0xff] %v20773_v26 }
 0x257   :  { %v20775_v22 = vpop.trf.xlu0  ;;  %v20777_v6 = vpop.trf.xlu1 }
 0x258   :  { %25014 = vst [vmem:[#allocation60_spill] sm:$0xff] %v20775_v22  ;;  %25015 = vst [vmem:[#allocation61_spill] sm:$0xff] %v20777_v6 }
 0x25b   :  { %v20779_v52 = vpop.trf.xlu0  ;;  %v20781_v0 = vpop.trf.xlu1 }
 0x25c   :  { %25016 = vst [vmem:[#allocation62_spill] sm:$0xff] %v20779_v52  ;;  %25017 = vst [vmem:[#allocation63_spill] sm:$0xff] %v20781_v0 }
 0x25f   :  { %v20783_v2 = vpop.trf.xlu0  ;;  %v20785_v5 = vpop.trf.xlu1 }
 0x260   :  { %25018 = vst [vmem:[#allocation64_spill] sm:$0xff] %v20783_v2  ;;  %25019 = vst [vmem:[#allocation65_spill] sm:$0xff] %v20785_v5 }
 0x263   :  { %v20787_v34 = vpop.trf.xlu0  ;;  %v20789_v49 = vpop.trf.xlu1 }
 0x264   :  { %25020 = vst [vmem:[#allocation66_spill] sm:$0xff] %v20787_v34  ;;  %25021 = vst [vmem:[#allocation67_spill] sm:$0xff] %v20789_v49 }
 0x267   :  { %v20791_v41 = vpop.trf.xlu0  ;;  %v20793_v38 = vpop.trf.xlu1 }
 0x268   :  { %25022 = vst [vmem:[#allocation68_spill] sm:$0xff] %v20791_v41  ;;  %25023 = vst [vmem:[#allocation69_spill] sm:$0xff] %v20793_v38 }
 0x26b   :  { %v20795_v62 = vpop.trf.xlu0  ;;  %v20797_v22 = vpop.trf.xlu1 }
 0x26c   :  { %25024 = vst [vmem:[#allocation70_spill] sm:$0xff] %v20795_v62  ;;  %25025 = vst [vmem:[#allocation71_spill] sm:$0xff] %v20797_v22 }
 0x26f   :  { %v20799_v6 = vpop.trf.xlu0  ;;  %v20801_v52 = vpop.trf.xlu1 }
 0x270   :  { %25026 = vst [vmem:[#allocation72_spill] sm:$0xff] %v20799_v6  ;;  %25027 = vst [vmem:[#allocation73_spill] sm:$0xff] %v20801_v52 }
 0x273   :  { %v19543_v0 = vpop.trf.xlu0  ;;  %v20803_v2 = vpop.trf.xlu1 }
 0x274   :  { %25028 = vst [vmem:[#allocation74_spill] sm:$0xff] %v20803_v2  ;;  %v19544_v57 = vunpack.i.l.bf16 %v19543_v0  ;;  %v19547_v51 = vunpack.i.h.bf16 %v19543_v0 }
 0x277   :  { %v19548_v5 = vpop.trf.xlu0  ;;  %v19707_v50 = vpop.trf.xlu1 }
 0x278   :  { %v19549_v34 = vunpack.i.l.bf16 %v19548_v5  ;;  %v19552_v49 = vunpack.i.h.bf16 %v19548_v5  ;;  %v19708_v52 = vunpack.i.l.bf16 %v19707_v50  ;;  %v19711_v22 = vunpack.i.h.bf16 %v19707_v50 }
 0x27a   :  { %v20805_v41 = vpack.c.bf16 %v19549_v34, %v19544_v57  ;;  %v20807_v63 = vpack.c.bf16 %v19552_v49, %v19547_v51 }
 0x27b   :  { %v19712_v38 = vpop.trf.xlu1 }
 0x27c   :  { %v1430_v62 = vsel %vm1149_vm2, %v20805_v41, 0  ;;  %v1476_v6 = vsel %vm1149_vm2, %v20807_v63, 0  ;;  %v19713_v2 = vunpack.i.l.bf16 %v19712_v38  ;;  %v19716_v5 = vunpack.i.h.bf16 %v19712_v38 }
 0x27d   :  { %17555 = vmatpush3.bf16.xpose.msra.mxu1 %v1430_v62  ;;  %17561 = vmatpush3.bf16.xpose.msra.mxu0 %v1476_v6  ;;  %v20827_v62 = vpop.trf.xlu0 }
 0x27e   :  { %17566 = vmatprep.subr.bf16.mxu1 %v25004_v30  ;;  %17572 = vmatprep.subr.bf16.mxu0 %v25004_v30  ;;  %v20815_v34 = vpack.c.bf16 %v19713_v2, %v19708_v52  ;;  %v20817_v49 = vpack.c.bf16 %v19716_v5, %v19711_v22 }
 0x27f   :  { %v20831_v57 = vpop.trf.xlu1 }
 0x281   :  { %v20829_v50 = vpop.trf.xlu0 }
 0x283   :  { %v20835_v52 = vpop.trf.xlu1 }
 0x284   :  { %17557 = vmatmul.mubr.msk.bf16.vlgmr.msra.gmra.mxu1 %vm1149_vm2, %v20815_v34  ;;  %17563 = vmatmul.mubr.msk.bf16.vlgmr.msra.gmra.mxu0 %vm1149_vm2, %v20817_v49  ;;  %25030 = vst [vmem:[#allocation76_spill] sm:$0xff] %v20835_v52 }
 0x285   :  { %17568 = vmatprep.mubr.msk.bf16.mxu1 %vm20357_vm1, %v25004_v30  ;;  %17574 = vmatprep.mubr.msk.bf16.mxu0 %vm20357_vm1, %v25004_v30  ;;  %v20833_v51 = vpop.trf.xlu0 }
 0x286   :  { %25029 = vst [vmem:[#allocation75_spill] sm:$0xff] %v20833_v51 }
 0x287   :  { %v20839_v2 = vpop.trf.xlu1 }
 0x288   :  { %25032 = vst [vmem:[#allocation78_spill] sm:$0xff] %v20839_v2 }
 0x289   :  { %v20837_v0 = vpop.trf.xlu0 }
 0x28a   :  { %25031 = vst [vmem:[#allocation77_spill] sm:$0xff] %v20837_v0 }
 0x28b   :  { %v20843_v22 = vpop.trf.xlu1 }
 0x28c   :  { %25034 = vst [vmem:[#allocation80_spill] sm:$0xff] %v20843_v22 }
 0x28d   :  { %v20841_v38 = vpop.trf.xlu0 }
 0x28e   :  { %25033 = vst [vmem:[#allocation79_spill] sm:$0xff] %v20841_v38  ;;  %v1142_v38 = vshrl.u32 %v1141_v20, 7 }
 0x28f   :  { %v20847_v5 = vpop.trf.xlu1 }
 0x290   :  { %25036 = vst [vmem:[#allocation82_spill] sm:$0xff] %v20847_v5  ;;  %vm1145_vm3 = vcmp.ge.s32.totalorder %v1142_v38, %v1144_v35 }
 0x291   :  { %v20845_v6 = vpop.trf.xlu0  ;;  %vm1147_vm5 = vmand %vm1145_vm3, %vm1146_vm4  ;;  %vm13770_vm3 = vcmask 917312   ;;  %vm14659_vm4 = vcmask 982912  }
 0x292   :  { %25035 = vst [vmem:[#allocation81_spill] sm:$0xff] %v20845_v6 }
 0x293   :  { %v20851_v27 = vpop.trf.xlu1 }
 0x294   :  { %25038 = vst [vmem:[#allocation84_spill] sm:$0xff] %v20851_v27  ;;  %v20358_v27 = vmov -1e+30  }
 0x295   :  { %v20849_v15 = vpop.trf.xlu0 }
 0x296   :  { %25037 = vst [vmem:[#allocation83_spill] sm:$0xff] %v20849_v15 }
 0x297   :  { %v20855_v42 = vpop.trf.xlu1 }
 0x298   :  { %25040 = vst [vmem:[#allocation86_spill] sm:$0xff] %v20855_v42 }
 0x299   :  { %v20853_v43 = vpop.trf.xlu0 }
 0x29a   :  { %25039 = vst [vmem:[#allocation85_spill] sm:$0xff] %v20853_v43  ;;  %v20867_v43 = vsel %vm1147_vm5, 0.0, %v20358_v27  ;;  %vm15580_vm5 = vcmask 1048512  }
 0x29b   :  { %v20859_v26 = vpop.trf.xlu1 }
 0x29c   :  { %25042 = vst [vmem:[#allocation88_spill] sm:$0xff] %v20859_v26 }
 0x29d   :  { %v20857_v7 = vpop.trf.xlu0 }
 0x29e   :  { %25041 = vst [vmem:[#allocation87_spill] sm:$0xff] %v20857_v7 }
 0x29f   :  { %v20863_v6 = vpop.trf.xlu1 }
 0x2a0   :  { %25044 = vst [vmem:[#allocation90_spill] sm:$0xff] %v20863_v6 }
 0x2a1   :  { %v20861_v32 = vpop.trf.xlu0 }
 0x2a2   :  { %25043 = vst [vmem:[#allocation89_spill] sm:$0xff] %v20861_v32 }
 0x2a3   :  { %v20872_v26 = vpop.trf.xlu1 }
 0x2a4   :  { %25046 = vst [vmem:[#allocation92_spill] sm:$0xff] %v20872_v26 }
 0x2a5   :  { %v20865_v15 = vpop.trf.xlu0 }
 0x2a6   :  { %25045 = vst [vmem:[#allocation91_spill] sm:$0xff] %v20865_v15 }
 0x2a7   :  { %v20878_v15 = vpop.trf.xlu1 }
 0x2a8   :  { %25048 = vst [vmem:[#allocation94_spill] sm:$0xff] %v20878_v15 }
 0x2a9   :  { %v20876_v32 = vpop.trf.xlu0 }
 0x2aa   :  { %25047 = vst [vmem:[#allocation93_spill] sm:$0xff] %v20876_v32 }
 0x2ad   :  { %v20880_v6 = vpop.trf.xlu0 }
 0x2ae   :  { %25049 = vst [vmem:[#allocation95_spill] sm:$0xff] %v20880_v6 }
 0x2b1   :  { %v20889_v47 = vpop.trf.xlu0 }
 0x2b2   :  { %25051 = vst [vmem:[#allocation97_spill] sm:$0xff] %v20889_v47 }
 0x2c4   :  { %v1190_v42 = vpop.f32.mrf.mxu1 }
 0x2c5   :  { %v20870_v5 = vadd.f32 %v1190_v42, %v20867_v43 }
 0x2c6   :  { %v17522_v7 = vpop.f32.mrf.mxu1 }
 0x2c7   :  { %v1518_v20 = vsel %vm1149_vm2, %v20870_v5, -inf  ;;  %v20885_v7 = vpop.trf.xlu1 }
 0x2c8   :  { %1519 = vmax.xlane.f32.xlu0 %v1518_v20  ;;  %v1193_v35 = vpop.f32.mrf.mxu1  ;;  %25050 = vst [vmem:[#allocation96_spill] sm:$0xff] %v20885_v7 }
 0x2ca   :  { %v17523_v38 = vpop.f32.mrf.mxu1 }
 0x2cb   :  { %v20891_v38 = vpop.trf.xlu1 }
 0x2cc   :  { %v1236_v27 = vpop.f32.mrf.mxu1  ;;  %25052 = vst [vmem:[#allocation98_spill] sm:$0xff] %v20891_v38 }
 0x2cd   :  { %v20883_v45 = vadd.f32 %v1236_v27, %v20867_v43 }
 0x2ce   :  { %v17528_v42 = vpop.f32.mrf.mxu1 }
 0x2cf   :  { %v1521_v26 = vsel %vm1149_vm2, %v20883_v45, -inf  ;;  %v20896_v27 = vpop.trf.xlu1 }
 0x2d0   :  { %1522 = vmax.xlane.f32.xlu1 %v1521_v26  ;;  %v1239_v20 = vpop.f32.mrf.mxu1  ;;  %25053 = vst [vmem:[#allocation99_spill] sm:$0xff] %v20896_v27 }
 0x2d2   :  { %v17529_v35 = vpop.f32.mrf.mxu1 }
 0x2d4   :  { %v1282_v15 = vpop.f32.mrf.mxu1 }
 0x2d5   :  { %v20894_v6 = vadd.f32 %v1282_v15, %v20867_v43 }
 0x2d6   :  { %v17534_v32 = vpop.f32.mrf.mxu1 }
 0x2d7   :  { %v1524_v42 = vsel %vm1149_vm2, %v20894_v6, -inf }
 0x2d8   :  { %1525 = vmax.xlane.f32.xlu0 %v1524_v42  ;;  %v1285_v7 = vpop.f32.mrf.mxu1 }
 0x2da   :  { %v17535_v55 = vpop.f32.mrf.mxu1 }
 0x2dc   :  { %v1328_v22 = vpop.f32.mrf.mxu1 }
 0x2dd   :  { %v20901_v26 = vadd.f32 %v1328_v22, %v20867_v43 }
 0x2de   :  { %v17540_v20 = vpop.f32.mrf.mxu1 }
 0x2df   :  { %v1527_v35 = vsel %vm1149_vm2, %v20901_v26, -inf }
 0x2e0   :  { %1528 = vmax.xlane.f32.xlu0 %v1527_v35  ;;  %v1331_v15 = vpop.f32.mrf.mxu1 }
 0x2e2   :  { %v17541_v38 = vpop.f32.mrf.mxu1 }
 0x304   :  { %v1374_v32 = vpop.f32.mrf.mxu1 }
 0x305   :  { %v20906_v27 = vadd.f32 %v1374_v32, %v20867_v43  ;;  %v20918_v32 = vpop.f32.mrf.mxu0 }
 0x306   :  { %v17546_v47 = vpop.f32.mrf.mxu1 }
 0x307   :  { %v1530_v7 = vsel %vm1149_vm2, %v20906_v27, -inf  ;;  %v139_v47 = vld [vmem:[%s24843_s2 + $0x80] sm:$0xff] }
 0x308   :  { %1531 = vmax.xlane.f32.xlu1 %v1530_v7  ;;  %v1377_v55 = vpop.f32.mrf.mxu1  ;;  %v20920_v7 = vpop.f32.mrf.mxu0 }
 0x30a   :  { %v17547_v42 = vpop.f32.mrf.mxu1  ;;  %v20922_v55 = vpop.f32.mrf.mxu0 }
 0x30c   :  { %v1420_v22 = vpop.f32.mrf.mxu1  ;;  %v20924_v42 = vpop.f32.mrf.mxu0 }
 0x30d   :  { %v20911_v20 = vadd.f32 %v1420_v22, %v20867_v43 }
 0x30e   :  { %v17552_v2 = vpop.f32.mrf.mxu1 }
 0x30f   :  { %v1533_v35 = vsel %vm1149_vm2, %v20911_v20, -inf  ;;  %v20926_v2 = vpop.f32.mrf.mxu0 }
 0x310   :  { %1534 = vmax.xlane.f32.xlu0 %v1533_v35  ;;  %v1423_v38 = vpop.f32.mrf.mxu1 }
 0x311   :  { %v20928_v22 = vpop.f32.mrf.mxu0 }
 0x312   :  { %v17553_v15 = vpop.f32.mrf.mxu1 }
 0x313   :  { %v20930_v35 = vpop.f32.mrf.mxu0 }
 0x315   :  { %v20932_v38 = vpop.f32.mrf.mxu0 }
 0x319   :  { %229 = vperm.xlu1 %19130, %v139_v47  }
 0x344   :  { %v1466_v15 = vpop.f32.mrf.mxu1  ;;  %v1512_v47 = vpop.f32.mrf.mxu0 }
 0x345   :  { %v1467_v60 = vadd.f32 %v1466_v15, %v20867_v43  ;;  %v1513_v51 = vadd.f32 %v1512_v47, %v20867_v43 }
 0x346   :  { %v17558_v0 = vpop.f32.mrf.mxu1  ;;  %v17564_v23 = vpop.f32.mrf.mxu0 }
 0x347   :  { %v1536_v8 = vsel %vm1149_vm2, %v1467_v60, -inf  ;;  %v1539_v4 = vsel %vm1149_vm2, %v1513_v51, -inf }
 0x348   :  { %1537 = vmax.xlane.f32.xlu1 %v1536_v8  ;;  %v1469_v1 = vpop.f32.mrf.mxu1  ;;  %1540 = vmax.xlane.f32.xlu0 %v1539_v4  ;;  %v1515_v12 = vpop.f32.mrf.mxu0 }
 0x34a   :  { %v17559_v3 = vpop.f32.mrf.mxu1  ;;  %v17565_v16 = vpop.f32.mrf.mxu0 }
 0x351   :  { %v1520_v17 = vpop.xlane.xlu0 %1519 }
 0x352   :  { %v1542_v29 = vsub.f32 %v20870_v5, %v1520_v17 }
 0x354   :  { %v1550_v44 = vmul.f32 1.442695, %v1542_v29 }
 0x356   :  { %19833 = vpow2.f32 %v1550_v44  ;;  %v141_v44 = vld [vmem:[%s24843_s2 + $0x90] sm:$0xff] }
 0x359   :  { %v1523_v15 = vpop.xlane.xlu1 %1522 }
 0x35a   :  { %v1543_v47 = vsub.f32 %v20883_v45, %v1523_v15  ;;  %v144_v15 = vld [vmem:[%s24843_s2 + $0xa8] sm:$0xff] }
 0x35c   :  { %v1552_v0 = vmul.f32 1.442695, %v1543_v47 }
 0x35e   :  { %19835 = vpow2.f32 %v1552_v0 }
 0x361   :  { %v1526_v36 = vpop.xlane.xlu0 %1525 }
 0x362   :  { %v1544_v23 = vsub.f32 %v20894_v6, %v1526_v36  ;;  %v142_v36 = vld [vmem:[%s24843_s2 + $0x98] sm:$0xff] }
 0x363   :  { %v19834_v52 = vpop.eup %19833 }
 0x364   :  { %v1554_v8 = vmul.f32 1.442695, %v1544_v23  ;;  %v1566_v1 = vsel %vm1149_vm2, %v19834_v52, 0.0 }
 0x365   :  { %1567 = vadd.xlane.f32.xlu1 %v1566_v1 }
 0x366   :  { %19837 = vpow2.f32 %v1554_v8 }
 0x369   :  { %v1529_v47 = vpop.xlane.xlu0 %1528 }
 0x36a   :  { %v1545_v8 = vsub.f32 %v20901_v26, %v1529_v47  ;;  %v146_v47 = vld [vmem:[%s24843_s2 + $0xb8] sm:$0xff] }
 0x36b   :  { %v19836_v16 = vpop.eup %19835 }
 0x36c   :  { %v1569_v3 = vsel %vm1149_vm2, %v19836_v16, 0.0 }
 0x36d   :  { %1570 = vadd.xlane.f32.xlu0 %v1569_v3 }
 0x373   :  { %v20943_v17 = vpop.eup %19837 }
 0x374   :  { %v1572_v29 = vsel %vm1149_vm2, %v20943_v17, 0.0 }
 0x375   :  { %1573 = vadd.xlane.f32.xlu1 %v1572_v29 }
 0x386   :  { %239 = vperm.xlu1 %19130, %v141_v44  }
 0x38a   :  { %244 = vperm.xlu1 %19130, %v142_v36   ;;  %v1556_v36 = vmul.f32 1.442695, %v1545_v8 }
 0x391   :  { %v1532_v45 = vpop.xlane.xlu1 %1531 }
 0x392   :  { %v1546_v4 = vsub.f32 %v20906_v27, %v1532_v45 }
 0x394   :  { %v1558_v12 = vmul.f32 1.442695, %v1546_v4 }
 0x395   :  { %v230_v0 = vpop.permute.xlu1 %229 }
 0x396   :  { %19839 = vpow2.f32 %v1558_v12 }
 0x399   :  { %v1535_v23 = vpop.xlane.xlu0 %1534 }
 0x3a3   :  { %v20954_v6 = vpop.eup %19839 }
 0x3a4   :  { %v1578_v5 = vsel %vm1149_vm2, %v20954_v6, 0.0 }
 0x3ae   :  { %1579 = vadd.xlane.f32.xlu1 %v1578_v5 }
 0x3bf   :  { %254 = vperm.xlu1 %19130, %v144_v15  }
 0x3d1   :  { %v1538_v1 = vpop.xlane.xlu1 %1537  ;;  %v1541_v27 = vpop.xlane.xlu0 %1540 }
 0x3d2   :  { %v1548_v3 = vsub.f32 %v1467_v60, %v1538_v1  ;;  %v1549_v29 = vsub.f32 %v1513_v51, %v1541_v27  ;;  %v140_v27 = vld [vmem:[%s24843_s2 + $0x88] sm:$0xff] }
 0x3d4   :  { %v1562_v44 = vmul.f32 1.442695, %v1548_v3  ;;  %v1564_v45 = vmul.f32 1.442695, %v1549_v29 }
 0x3d6   :  { %19841 = vpow2.f32 %v1562_v44 }
 0x3d7   :  { %19843 = vpow2.f32 %v1564_v45  ;;  %v463_v45 = vadd.f32 %v20920_v7, %v230_v0 }
 0x3d8   :  { %19845 = vpow2.f32 %v1556_v36 }
 0x3e3   :  { %v20962_v4 = vpop.eup %19841 }
 0x3e4   :  { %v20964_v12 = vpop.eup %19843  ;;  %v1584_v5 = vsel %vm1149_vm2, %v20962_v4, 0.0 }
 0x3e5   :  { %v1587_v26 = vsel %vm1149_vm2, %v20964_v12, 0.0  ;;  %1585 = vadd.xlane.f32.xlu1 %v1584_v5  ;;  %v20970_v15 = vpop.eup %19845 }
 0x3e6   :  { %1588 = vadd.xlane.f32.xlu0 %v1587_v26  ;;  %v1575_v60 = vsel %vm1149_vm2, %v20970_v15, 0.0 }
 0x3ea   :  { %1576 = vadd.xlane.f32.xlu0 %v1575_v60  ;;  %v1547_v60 = vsub.f32 %v20911_v20, %v1535_v23 }
 0x3ee   :  { %v1568_v51 = vpop.xlane.xlu1 %1567 }
 0x3ef   :  { %19847 = vrcp.f32 %v1568_v51  ;;  %v20984_v51 = vpack.c.bf16 %v463_v45, %v463_v45 }
 0x3f6   :  { %v1571_v8 = vpop.xlane.xlu0 %1570  ;;  %264 = vperm.xlu1 %19130, %v146_v47  }
 0x3f7   :  { %19849 = vrcp.f32 %v1571_v8  ;;  %v1560_v8 = vmul.f32 1.442695, %v1547_v60 }
 0x3fc   :  { %v19848_v1 = vpop.eup %19847 }
 0x3fd   :  { %v1598_v3 = vmul.f32 %v19848_v1, %v19834_v52 }
 0x3fe   :  { %v1574_v29 = vpop.xlane.xlu1 %1573 }
 0x3ff   :  { %19851 = vrcp.f32 %v1574_v29  ;;  %v1606_v44 = vpack.c.bf16 %v1598_v3, %v1598_v3  ;;  %v143_v29 = vld [vmem:[%s24843_s2 + $0xa0] sm:$0xff] }
 0x400   :  { %234 = vperm.xlu0 %19129, %v140_v27   ;;  %19853 = vpow2.f32 %v1560_v8 }
 0x401   :  { %v1618_v36 = vsel %vm1149_vm2, %v1606_v44, 0 }
 0x402   :  { %17567 = vmatpush3.bf16.xpose.msra.mxu1 %v1618_v36  ;;  %v240_v0 = vpop.permute.xlu1 %239 }
 0x403   :  { %17578 = vmatprep.subr.bf16.mxu1 %v25004_v30  ;;  %v471_v1 = vadd.f32 %v20918_v32, %v240_v0  ;;  %v145_v32 = vld [vmem:[%s24843_s2 + $0xb0] sm:$0xff]  ;;  %s20359_s2 = smov 120  }
 0x404   :  { %v19850_v5 = vpop.eup %19849 }
 0x405   :  { %v1599_v26 = vmul.f32 %v19850_v5, %v19836_v16  ;;  %v20996_v27 = vpack.c.bf16 %v471_v1, %v471_v1 }
 0x406   :  { %v245_v44 = vpop.permute.xlu1 %244 }
 0x407   :  { %v1607_v47 = vpack.c.bf16 %v1599_v26, %v1599_v26  ;;  %v474_v1 = vadd.f32 %v20922_v55, %v245_v44 }
 0x409   :  { %17569 = vmatmul.mubr.msk.bf16.vlgmr.msra.gmra.mxu1 %vm1149_vm2, %v20984_v51  ;;  %v1664_v52 = vsel %vm1149_vm2, %v1607_v47, 0 }
 0x40a   :  { %17573 = vmatpush3.bf16.xpose.msra.mxu0 %v1664_v52  ;;  %17580 = vmatprep.mubr.msk.bf16.mxu1 %vm20357_vm1, %v25004_v30 }
 0x40b   :  { %17584 = vmatprep.subr.bf16.mxu0 %v25004_v30 }
 0x40c   :  { %v19852_v7 = vpop.eup %19851 }
 0x40d   :  { %v1600_v16 = vmul.f32 %v19852_v7, %v20943_v17  ;;  %v19854_v3 = vpop.eup %19853 }
 0x40e   :  { %v1581_v17 = vsel %vm1149_vm2, %v19854_v3, 0.0 }
 0x40f   :  { %v1608_v20 = vpack.c.bf16 %v1600_v16, %v1600_v16 }
 0x411   :  { %v1710_v23 = vsel %vm1149_vm2, %v1608_v20, 0 }
 0x412   :  { %17579 = vmatpush3.bf16.xpose.msra.mxu1 %v1710_v23 }
 0x413   :  { %17590 = vmatprep.subr.bf16.mxu1 %v25004_v30 }
 0x419   :  { %17581 = vmatmul.mubr.msk.bf16.vlgmr.msra.gmra.mxu1 %vm1149_vm2, %v20996_v27 }
 0x41a   :  { %17592 = vmatprep.mubr.msk.bf16.mxu1 %vm20357_vm1, %v25004_v30 }
 0x41f   :  { %1582 = vadd.xlane.f32.xlu0 %v1581_v17 }
 0x435   :  { %249 = vperm.xlu0 %19129, %v143_v29  }
 0x437   :  { %v1580_v36 = vpop.xlane.xlu1 %1579 }
 0x438   :  { %19855 = vrcp.f32 %v1580_v36 }
 0x439   :  { %259 = vperm.xlu0 %19129, %v145_v32  }
 0x43b   :  { %v255_v17 = vpop.permute.xlu1 %254 }
 0x445   :  { %v19856_v45 = vpop.eup %19855 }
 0x446   :  { %v1602_v5 = vmul.f32 %v19856_v45, %v20954_v6 }
 0x448   :  { %v1610_v26 = vpack.c.bf16 %v1602_v5, %v1602_v5 }
 0x44a   :  { %v1802_v60 = vsel %vm1149_vm2, %v1610_v26, 0 }
 0x44b   :  { %17591 = vmatpush3.bf16.xpose.msra.mxu1 %v1802_v60 }
 0x44c   :  { %17602 = vmatprep.subr.bf16.mxu1 %v25004_v30 }
 0x46e   :  { %v1586_v29 = vpop.xlane.xlu1 %1585 }
 0x46f   :  { %v1589_v47 = vpop.xlane.xlu0 %1588 }
 0x473   :  { %v1577_v52 = vpop.xlane.xlu0 %1576 }
 0x474   :  { %19857 = vrcp.f32 %v1577_v52 }
 0x475   :  { %19859 = vrcp.f32 %v1586_v29 }
 0x47b   :  { %v235_v8 = vpop.permute.xlu0 %234 }
 0x47c   :  { %v466_v7 = vadd.f32 %v20924_v42, %v235_v8  ;;  %v21023_v42 = vpack.c.bf16 %v474_v1, %v474_v1  ;;  %v1993_v8 = vrot.slane %v20634_v58, 4  ;;  %v265_v1 = vpop.permute.xlu1 %264 }
 0x47d   :  { %v490_v29 = vadd.f32 %v20930_v35, %v265_v1  ;;  %v2091_v35 = vrot.slane %v20546_v24, 4 }
 0x47e   :  { %v21013_v16 = vpack.c.bf16 %v466_v7, %v466_v7 }
 0x480   :  { %17575 = vmatmul.mubr.msk.bf16.vlgmr.msra.gmra.mxu0 %vm1149_vm2, %v21013_v16 }
 0x481   :  { %v19858_v20 = vpop.eup %19857  ;;  %17586 = vmatprep.mubr.msk.bf16.mxu0 %vm20357_vm1, %v25004_v30 }
 0x482   :  { %v1601_v6 = vmul.f32 %v19858_v20, %v20970_v15  ;;  %v19860_v32 = vpop.eup %19859 }
 0x483   :  { %v1604_v36 = vmul.f32 %v19860_v32, %v20962_v4 }
 0x484   :  { %v1609_v0 = vpack.c.bf16 %v1601_v6, %v1601_v6 }
 0x485   :  { %v1612_v45 = vpack.c.bf16 %v1604_v36, %v1604_v36  ;;  %v2193_v36 = vrot.slane %v20729_v9, 4  ;;  %v2143_v9 = vrot.slane %v20554_v40, 4 }
 0x486   :  { %v1756_v23 = vsel %vm1149_vm2, %v1609_v0, 0 }
 0x487   :  { %17585 = vmatpush3.bf16.xpose.msra.mxu0 %v1756_v23  ;;  %v1894_v60 = vsel %vm1149_vm2, %v1612_v45, 0  ;;  %v482_v23 = vadd.f32 %v20932_v38, %v255_v17  ;;  %v1991_v38 = vrot.slane %v20650_v18, 4  ;;  %v21070_v18 = vpack.c.bf16 %v490_v29, %v490_v29 }
 0x488   :  { %17596 = vmatprep.subr.bf16.mxu0 %v25004_v30 }
 0x48e   :  { %17587 = vmatmul.mubr.msk.bf16.vlgmr.msra.gmra.mxu0 %vm1149_vm2, %v21023_v42 }
 0x48f   :  { %17598 = vmatprep.mubr.msk.bf16.mxu0 %vm20357_vm1, %v25004_v30 }
 0x4a8   :  { %v1583_v15 = vpop.xlane.xlu0 %1582 }
 0x4a9   :  { %19861 = vrcp.f32 %v1583_v15 }
 0x4aa   :  { %19863 = vrcp.f32 %v1589_v47 }
 0x4b0   :  { %v250_v55 = vpop.permute.xlu0 %249 }
 0x4b1   :  { %v479_v44 = vadd.f32 %v20928_v22, %v250_v55 }
 0x4b3   :  { %v21031_v5 = vpack.c.bf16 %v479_v44, %v479_v44 }
 0x4b4   :  { %v260_v26 = vpop.permute.xlu0 %259 }
 0x4b5   :  { %17593 = vmatmul.mubr.msk.bf16.vlgmr.msra.gmra.mxu1 %vm1149_vm2, %v21031_v5  ;;  %v487_v47 = vadd.f32 %v20926_v2, %v260_v26  ;;  %v1998_v2 = vsel %vm1149_vm2, %v1993_v8, 0  ;;  %v2041_v26 = vrot.slane %v20665_v31, 4  ;;  %v2291_v8 = vrot.slane %v20815_v34, 4 }
 0x4b6   :  { %v19862_v52 = vpop.eup %19861  ;;  %17603 = vmatpush3.bf16.xpose.msra.mxu1 %v1894_v60  ;;  %17604 = vmatprep.mubr.msk.bf16.mxu1 %vm20357_vm1, %v25004_v30  ;;  %v2293_v60 = vrot.slane %v20805_v41, 4  ;;  %v2243_v41 = vrot.slane %v20738_v59, 4 }
 0x4b7   :  { %v1603_v4 = vmul.f32 %v19862_v52, %v19854_v3  ;;  %17614 = vmatprep.subr.bf16.mxu1 %v25004_v30  ;;  %v19864_v22 = vpop.eup %19863  ;;  %v21041_v20 = vpack.c.bf16 %v487_v47, %v487_v47  ;;  %v21053_v3 = vpack.c.bf16 %v482_v23, %v482_v23  ;;  %v2148_v52 = vsel %vm1149_vm2, %v2143_v9, 0 }
 0x4b8   :  { %v1605_v0 = vmul.f32 %v19864_v22, %v20964_v12  ;;  %v2093_v12 = vrot.slane %v20548_v25, 4  ;;  %v2043_v25 = vrot.slane %v20646_v14, 4  ;;  %v2198_v14 = vsel %vm1149_vm2, %v2193_v36, 0 }
 0x4b9   :  { %v1611_v7 = vpack.c.bf16 %v1603_v4, %v1603_v4  ;;  %v2191_v47 = vrot.slane %v20740_v13, 4  ;;  %v2298_v40 = vsel %vm1149_vm2, %v2293_v60, 0  ;;  %v2141_v13 = vrot.slane %v20550_v33, 4 }
 0x4ba   :  { %v1613_v58 = vpack.c.bf16 %v1605_v0, %v1605_v0  ;;  %v2098_v15 = vsel %vm1149_vm2, %v2093_v12, 0  ;;  %v2048_v44 = vsel %vm1149_vm2, %v2043_v25, 0  ;;  %v2248_v22 = vsel %vm1149_vm2, %v2243_v41, 0 }
 0x4bb   :  { %v1848_v6 = vsel %vm1149_vm2, %v1611_v7, 0  ;;  %v2343_v7 = vrot.slane %v20807_v63, 4  ;;  %v2341_v0 = vrot.slane %v20817_v49, 4 }
 0x4bc   :  { %17597 = vmatpush3.bf16.xpose.msra.mxu0 %v1848_v6  ;;  %v1940_v17 = vsel %vm1149_vm2, %v1613_v58, 0  ;;  %v2241_v6 = vrot.slane %v20757_v28, 4 }
 0x4bd   :  { %17605 = vmatmul.mubr.msk.bf16.vlgmr.msra.gmra.mxu1 %vm1149_vm2, %v21041_v20  ;;  %17608 = vmatprep.subr.bf16.mxu0 %v25004_v30  ;;  %v2348_v34 = vsel %vm1149_vm2, %v2343_v7, 0 }
 0x4be   :  { %17615 = vmatpush3.bf16.xpose.msra.mxu1 %v1998_v2  ;;  %17616 = vmatprep.mubr.msk.bf16.mxu1 %vm20357_vm1, %v25004_v30 }
 0x4bf   :  { %17626 = vmatprep.subr.bf16.mxu1 %v25004_v30 }
 0x4c3   :  { %17599 = vmatmul.mubr.msk.bf16.vlgmr.msra.gmra.mxu0 %vm1149_vm2, %v21053_v3 }
 0x4c4   :  { %17609 = vmatpush3.bf16.xpose.msra.mxu0 %v1940_v17  ;;  %17610 = vmatprep.mubr.msk.bf16.mxu0 %vm20357_vm1, %v25004_v30 }
 0x4c5   :  { %17617 = vmatmul.mubr.msk.bf16.vlgmr.msra.gmra.mxu1 %vm1149_vm2, %v1991_v38  ;;  %17620 = vmatprep.subr.bf16.mxu0 %v25004_v30 }
 0x4c6   :  { %17627 = vmatpush3.bf16.xpose.msra.mxu1 %v2098_v15  ;;  %17628 = vmatprep.mubr.msk.bf16.mxu1 %vm20357_vm1, %v25004_v30 }
 0x4c7   :  { %17638 = vmatprep.subr.bf16.mxu1 %v25004_v30 }
 0x4c9   :  { %v1654_v32 = vpop.f32.mrf.mxu1 }
 0x4ca   :  { %1982 = vst.msk [vmem:[#allocation2] sm:$0xff] %vm1149_vm2, %v1654_v32 }
 0x4cb   :  { %17611 = vmatmul.mubr.msk.bf16.vlgmr.msra.gmra.mxu0 %vm1149_vm2, %v21070_v18  ;;  %v17570_v55 = vpop.f32.mrf.mxu1 }
 0x4cc   :  { %17621 = vmatpush3.bf16.xpose.msra.mxu0 %v2048_v44  ;;  %17622 = vmatprep.mubr.msk.bf16.mxu0 %vm20357_vm1, %v25004_v30 }
 0x4cd   :  { %17629 = vmatmul.mubr.msk.bf16.vlgmr.msra.gmra.mxu1 %vm1149_vm2, %v2091_v35  ;;  %v1657_v45 = vpop.f32.mrf.mxu1  ;;  %17632 = vmatprep.subr.bf16.mxu0 %v25004_v30 }
 0x4ce   :  { %17639 = vmatpush3.bf16.xpose.msra.mxu1 %v2198_v14  ;;  %17640 = vmatprep.mubr.msk.bf16.mxu1 %vm20357_vm1, %v25004_v30 }
 0x4cf   :  { %v17571_v24 = vpop.f32.mrf.mxu1  ;;  %17650 = vmatprep.subr.bf16.mxu1 %v25004_v30 }
 0x4d3   :  { %17623 = vmatmul.mubr.msk.bf16.vlgmr.msra.gmra.mxu0 %vm1149_vm2, %v2041_v26 }
 0x4d4   :  { %17633 = vmatpush3.bf16.xpose.msra.mxu0 %v2148_v52  ;;  %17634 = vmatprep.mubr.msk.bf16.mxu0 %vm20357_vm1, %v25004_v30 }
 0x4d5   :  { %17641 = vmatmul.mubr.msk.bf16.vlgmr.msra.gmra.mxu1 %vm1149_vm2, %v2191_v47  ;;  %17644 = vmatprep.subr.bf16.mxu0 %v25004_v30 }
 0x4d6   :  { %17651 = vmatpush3.bf16.xpose.msra.mxu1 %v2298_v40  ;;  %17652 = vmatprep.mubr.msk.bf16.mxu1 %vm20357_vm1, %v25004_v30 }
 0x4d7   :  { %17662 = vmatprep.subr.bf16.mxu1 %v25004_v30 }
 0x4d9   :  { %v1746_v31 = vpop.f32.mrf.mxu1 }
 0x4da   :  { %1984 = vst.msk [vmem:[#allocation2 + $0x10] sm:$0xff] %vm1149_vm2, %v1746_v31 }
 0x4db   :  { %17635 = vmatmul.mubr.msk.bf16.vlgmr.msra.gmra.mxu0 %vm1149_vm2, %v2141_v13  ;;  %v17582_v4 = vpop.f32.mrf.mxu1 }
 0x4dc   :  { %17645 = vmatpush3.bf16.xpose.msra.mxu0 %v2248_v22  ;;  %17646 = vmatprep.mubr.msk.bf16.mxu0 %vm20357_vm1, %v25004_v30 }
 0x4dd   :  { %17653 = vmatmul.mubr.msk.bf16.vlgmr.msra.gmra.mxu1 %vm1149_vm2, %v2291_v8  ;;  %v1749_v59 = vpop.f32.mrf.mxu1  ;;  %17656 = vmatprep.subr.bf16.mxu0 %v25004_v30 }
 0x4de   :  { %17664 = vmatprep.mubr.msk.bf16.mxu1 %vm20357_vm1, %v25004_v30 }
 0x4df   :  { %v17583_v33 = vpop.f32.mrf.mxu1 }
 0x4e3   :  { %17647 = vmatmul.mubr.msk.bf16.vlgmr.msra.gmra.mxu0 %vm1149_vm2, %v2241_v6 }
 0x4e4   :  { %17657 = vmatpush3.bf16.xpose.msra.mxu0 %v2348_v34  ;;  %17658 = vmatprep.mubr.msk.bf16.mxu0 %vm20357_vm1, %v25004_v30 }
 0x4e5   :  { %17668 = vmatprep.subr.bf16.mxu0 %v25004_v30 }
 0x4eb   :  { %17659 = vmatmul.mubr.msk.bf16.vlgmr.msra.gmra.mxu0 %vm1149_vm2, %v2341_v0 }
 0x4ec   :  { %17670 = vmatprep.mubr.msk.bf16.mxu0 %vm20357_vm1, %v25004_v30 }
 0x540   :  { %v1700_v63 = vpop.f32.mrf.mxu0 }
 0x541   :  { %1983 = vst.msk [vmem:[#allocation2 + $0x8] sm:$0xff] %vm1149_vm2, %v1700_v63 }
 0x542   :  { %v17576_v28 = vpop.f32.mrf.mxu0 }
 0x544   :  { %v1703_v23 = vpop.f32.mrf.mxu0 }
 0x546   :  { %v17577_v2 = vpop.f32.mrf.mxu0 }
 0x54e   :  { %v1792_v58 = vpop.f32.mrf.mxu0 }
 0x54f   :  { %1985 = vst.msk [vmem:[#allocation2 + $0x18] sm:$0xff] %vm1149_vm2, %v1792_v58 }
 0x550   :  { %v17588_v12 = vpop.f32.mrf.mxu0 }
 0x552   :  { %v1795_v1 = vpop.f32.mrf.mxu0 }
 0x554   :  { %v17589_v38 = vpop.f32.mrf.mxu0 }
 0x575   :  { %v1838_v17 = vpop.f32.mrf.mxu1 }
 0x576   :  { %1986 = vst.msk [vmem:[#allocation2 + $0x20] sm:$0xff] %vm1149_vm2, %v1838_v17 }
 0x577   :  { %v17594_v49 = vpop.f32.mrf.mxu1 }
 0x579   :  { %v1841_v29 = vpop.f32.mrf.mxu1 }
 0x57b   :  { %v17595_v15 = vpop.f32.mrf.mxu1 }
 0x57d   :  { %v1930_v25 = vpop.f32.mrf.mxu1 }
 0x57e   :  { %1988 = vst.msk [vmem:[#allocation2 + $0x30] sm:$0xff] %vm1149_vm2, %v1930_v25 }
 0x57f   :  { %v17606_v32 = vpop.f32.mrf.mxu1 }
 0x581   :  { %v1933_v36 = vpop.f32.mrf.mxu1 }
 0x583   :  { %v1884_v35 = vpop.f32.mrf.mxu0  ;;  %v17607_v55 = vpop.f32.mrf.mxu1 }
 0x584   :  { %1987 = vst.msk [vmem:[#allocation2 + $0x28] sm:$0xff] %vm1149_vm2, %v1884_v35 }
 0x585   :  { %v17600_v44 = vpop.f32.mrf.mxu0  ;;  %v2034_v14 = vpop.f32.mrf.mxu1 }
 0x586   :  { %v21129_v45 = vadd.f32 %v2034_v14, %v20867_v43 }
 0x587   :  { %v1887_v24 = vpop.f32.mrf.mxu0  ;;  %v17618_v9 = vpop.f32.mrf.mxu1 }
 0x588   :  { %v2390_v26 = vsel %vm1149_vm2, %v21129_v45, -inf }
 0x589   :  { %v17601_v60 = vpop.f32.mrf.mxu0  ;;  %2391 = vmax.xlane.f32.xlu0 %v2390_v26  ;;  %v2037_v52 = vpop.f32.mrf.mxu1 }
 0x58b   :  { %v1976_v47 = vpop.f32.mrf.mxu0  ;;  %v17619_v40 = vpop.f32.mrf.mxu1 }
 0x58c   :  { %1989 = vst.msk [vmem:[#allocation2 + $0x38] sm:$0xff] %vm1149_vm2, %v1976_v47 }
 0x58d   :  { %v17612_v41 = vpop.f32.mrf.mxu0  ;;  %v2134_v13 = vpop.f32.mrf.mxu1 }
 0x58e   :  { %v2135_v31 = vadd.f32 %v2134_v13, %v20867_v43 }
 0x58f   :  { %v1979_v4 = vpop.f32.mrf.mxu0  ;;  %v17630_v22 = vpop.f32.mrf.mxu1 }
 0x590   :  { %v2396_v8 = vsel %vm1149_vm2, %v2135_v31, -inf }
 0x591   :  { %v17613_v59 = vpop.f32.mrf.mxu0  ;;  %2397 = vmax.xlane.f32.xlu0 %v2396_v8  ;;  %v2137_v33 = vpop.f32.mrf.mxu1 }
 0x593   :  { %v2084_v7 = vpop.f32.mrf.mxu0  ;;  %v17631_v6 = vpop.f32.mrf.mxu1 }
 0x594   :  { %v2085_v34 = vadd.f32 %v2084_v7, %v20867_v43 }
 0x595   :  { %v17624_v0 = vpop.f32.mrf.mxu0  ;;  %v2234_v63 = vpop.f32.mrf.mxu1 }
 0x596   :  { %v2235_v28 = vadd.f32 %v2234_v63, %v20867_v43  ;;  %v2393_v23 = vsel %vm1149_vm2, %v2085_v34, -inf }
 0x597   :  { %2394 = vmax.xlane.f32.xlu1 %v2393_v23  ;;  %v2087_v2 = vpop.f32.mrf.mxu0  ;;  %v17642_v58 = vpop.f32.mrf.mxu1 }
 0x598   :  { %v2402_v38 = vsel %vm1149_vm2, %v2235_v28, -inf }
 0x599   :  { %v17625_v12 = vpop.f32.mrf.mxu0  ;;  %v2237_v1 = vpop.f32.mrf.mxu1 }
 0x59b   :  { %v2184_v17 = vpop.f32.mrf.mxu0  ;;  %2403 = vmax.xlane.f32.xlu1 %v2402_v38  ;;  %v17643_v49 = vpop.f32.mrf.mxu1 }
 0x59c   :  { %v2185_v29 = vadd.f32 %v2184_v17, %v20867_v43 }
 0x59d   :  { %v17636_v15 = vpop.f32.mrf.mxu0  ;;  %v2334_v25 = vpop.f32.mrf.mxu1 }
 0x59e   :  { %v21142_v32 = vadd.f32 %v2334_v25, %v20867_v43  ;;  %v2399_v36 = vsel %vm1149_vm2, %v2185_v29, -inf }
 0x59f   :  { %v2187_v35 = vpop.f32.mrf.mxu0  ;;  %2400 = vmax.xlane.f32.xlu0 %v2399_v36  ;;  %v17654_v55 = vpop.f32.mrf.mxu1 }
 0x5a0   :  { %v2408_v44 = vsel %vm1149_vm2, %v21142_v32, -inf }
 0x5a1   :  { %v17637_v14 = vpop.f32.mrf.mxu0  ;;  %2409 = vmax.xlane.f32.xlu1 %v2408_v44  ;;  %v2337_v24 = vpop.f32.mrf.mxu1 }
 0x5a3   :  { %v2284_v9 = vpop.f32.mrf.mxu0  ;;  %v17655_v26 = vpop.f32.mrf.mxu1 }
 0x5a4   :  { %v2285_v60 = vadd.f32 %v2284_v9, %v20867_v43 }
 0x5a5   :  { %v17648_v52 = vpop.f32.mrf.mxu0 }
 0x5a6   :  { %v2405_v47 = vsel %vm1149_vm2, %v2285_v60, -inf }
 0x5a7   :  { %v2287_v40 = vpop.f32.mrf.mxu0  ;;  %2406 = vmax.xlane.f32.xlu0 %v2405_v47 }
 0x5a9   :  { %v17649_v41 = vpop.f32.mrf.mxu0 }
 0x5ab   :  { %v2384_v13 = vpop.f32.mrf.mxu0 }
 0x5ac   :  { %v2385_v4 = vadd.f32 %v2384_v13, %v20867_v43 }
 0x5ad   :  { %v17660_v22 = vpop.f32.mrf.mxu0 }
 0x5ae   :  { %v2411_v8 = vsel %vm1149_vm2, %v2385_v4, -inf }
 0x5af   :  { %v2387_v59 = vpop.f32.mrf.mxu0  ;;  %2412 = vmax.xlane.f32.xlu0 %v2411_v8 }
 0x5b1   :  { %v17661_v33 = vpop.f32.mrf.mxu0 }
 0x5b2   :  { %2487 = vrot.lane.b32.xlu1 %v20984_v51, %s20359_s2 }
 0x612   :  { %v2392_v7 = vpop.xlane.xlu0 %2391 }
 0x613   :  { %v2414_v6 = vsub.f32 %v21129_v45, %v2392_v7 }
 0x615   :  { %v2422_v0 = vmul.f32 1.442695, %v2414_v6 }
 0x617   :  { %19865 = vpow2.f32 %v2422_v0 }
 0x61a   :  { %v2398_v63 = vpop.xlane.xlu0 %2397 }
 0x61b   :  { %v2416_v23 = vsub.f32 %v2135_v31, %v2398_v63 }
 0x61d   :  { %v2426_v2 = vmul.f32 1.442695, %v2416_v23 }
 0x61f   :  { %19867 = vpow2.f32 %v2426_v2 }
 0x620   :  { %v2395_v58 = vpop.xlane.xlu1 %2394 }
 0x621   :  { %v2415_v12 = vsub.f32 %v2085_v34, %v2395_v58 }
 0x623   :  { %v2424_v1 = vmul.f32 1.442695, %v2415_v12 }
 0x624   :  { %v19866_v38 = vpop.eup %19865  ;;  %v2404_v17 = vpop.xlane.xlu1 %2403 }
 0x625   :  { %19869 = vpow2.f32 %v2424_v1  ;;  %v2418_v49 = vsub.f32 %v2235_v28, %v2404_v17  ;;  %v2438_v15 = vsel %vm1149_vm2, %v19866_v38, 0.0 }
 0x626   :  { %2439 = vadd.xlane.f32.xlu1 %v2438_v15 }
 0x627   :  { %v2430_v25 = vmul.f32 1.442695, %v2418_v49 }
 0x628   :  { %v2401_v36 = vpop.xlane.xlu0 %2400 }
 0x629   :  { %19871 = vpow2.f32 %v2430_v25  ;;  %v2417_v45 = vsub.f32 %v2185_v29, %v2401_v36 }
 0x62a   :  { %v2410_v40 = vpop.xlane.xlu1 %2409 }
 0x62b   :  { %v2428_v35 = vmul.f32 1.442695, %v2417_v45  ;;  %v2420_v41 = vsub.f32 %v21142_v32, %v2410_v40 }
 0x62c   :  { %v19868_v55 = vpop.eup %19867 }
 0x62d   :  { %19873 = vpow2.f32 %v2428_v35  ;;  %v2444_v31 = vsel %vm1149_vm2, %v19868_v55, 0.0  ;;  %v2434_v13 = vmul.f32 1.442695, %v2420_v41 }
 0x62e   :  { %2445 = vadd.xlane.f32.xlu1 %v2444_v31 }
 0x630   :  { %v2407_v44 = vpop.xlane.xlu0 %2406 }
 0x631   :  { %v2419_v34 = vsub.f32 %v2285_v60, %v2407_v44 }
 0x632   :  { %v19870_v14 = vpop.eup %19869 }
 0x633   :  { %v2432_v24 = vmul.f32 1.442695, %v2419_v34  ;;  %v2441_v9 = vsel %vm1149_vm2, %v19870_v14, 0.0 }
 0x634   :  { %2442 = vadd.xlane.f32.xlu0 %v2441_v9 }
 0x635   :  { %19875 = vpow2.f32 %v2432_v24 }
 0x636   :  { %v19872_v28 = vpop.eup %19871  ;;  %19877 = vpow2.f32 %v2434_v13 }
 0x637   :  { %v2450_v26 = vsel %vm1149_vm2, %v19872_v28, 0.0 }
 0x638   :  { %2451 = vadd.xlane.f32.xlu1 %v2450_v26  ;;  %v2413_v22 = vpop.xlane.xlu0 %2412 }
 0x639   :  { %v2421_v8 = vsub.f32 %v2385_v4, %v2413_v22  ;;  %v2488_v4 = vpop.permute.xlu1 %2487 }
 0x63a   :  { %v21158_v52 = vpop.eup %19873 }
 0x63b   :  { %v2447_v29 = vsel %vm1149_vm2, %v21158_v52, 0.0  ;;  %v2436_v59 = vmul.f32 1.442695, %v2421_v8 }
 0x63c   :  { %2448 = vadd.xlane.f32.xlu0 %v2447_v29 }
 0x63d   :  { %19879 = vpow2.f32 %v2436_v59 }
 0x642   :  { %v21162_v47 = vpop.eup %19875 }
 0x643   :  { %v2453_v60 = vsel %vm1149_vm2, %v21162_v47, 0.0  ;;  %v21173_v33 = vpop.eup %19877 }
 0x644   :  { %2454 = vadd.xlane.f32.xlu0 %v2453_v60  ;;  %v2456_v7 = vsel %vm1149_vm2, %v21173_v33, 0.0 }
 0x649   :  { %2585 = vrot.lane.b32.xlu1 %v20996_v27, %s20359_s2 }
 0x64a   :  { %v21177_v6 = vpop.eup %19879 }
 0x64b   :  { %v2459_v32 = vsel %vm1149_vm2, %v21177_v6, 0.0 }
 0x64d   :  { %2634 = vrot.lane.b32.xlu1 %v21023_v42, %s20359_s2 }
 0x65a   :  { %2536 = vrot.lane.b32.xlu0 %v21013_v16, %s20359_s2 }
 0x671   :  { %2457 = vadd.xlane.f32.xlu1 %v2456_v7 }
 0x679   :  { %2460 = vadd.xlane.f32.xlu0 %v2459_v32 }
 0x682   :  { %2732 = vrot.lane.b32.xlu1 %v21053_v3, %s20359_s2 }
 0x686   :  { %2830 = vrot.lane.b32.xlu1 %v21070_v18, %s20359_s2 }
 0x68f   :  { %2683 = vrot.lane.b32.xlu0 %v21031_v5, %s20359_s2 }
 0x693   :  { %2781 = vrot.lane.b32.xlu0 %v21041_v20, %s20359_s2 }
 0x6af   :  { %v2440_v0 = vpop.xlane.xlu1 %2439 }
 0x6b0   :  { %19881 = vrcp.f32 %v2440_v0 }
 0x6b7   :  { %v2446_v63 = vpop.xlane.xlu1 %2445 }
 0x6b8   :  { %19883 = vrcp.f32 %v2446_v63 }
 0x6bd   :  { %v19882_v23 = vpop.eup %19881  ;;  %v2443_v2 = vpop.xlane.xlu0 %2442 }
 0x6be   :  { %19885 = vrcp.f32 %v2443_v2  ;;  %v2470_v58 = vmul.f32 %v19882_v23, %v19866_v38 }
 0x6c0   :  { %v2478_v12 = vpack.c.bf16 %v2470_v58, %v2470_v58  ;;  %v19231_v58 = vunpack.i.l.bf16 %v20641_v10 }
 0x6c1   :  { %v2452_v1 = vpop.xlane.xlu1 %2451 }
 0x6c2   :  { %19887 = vrcp.f32 %v2452_v1  ;;  %v2493_v17 = vsel %vm1149_vm2, %v2478_v12, 0  ;;  %v19226_v12 = vunpack.i.l.bf16 %v20632_v54 }
 0x6c3   :  { %17663 = vmatpush3.bf16.xpose.msra.mxu1 %v2493_v17 }
 0x6c4   :  { %17674 = vmatprep.subr.bf16.mxu1 %v25004_v30 }
 0x6c5   :  { %v19884_v49 = vpop.eup %19883  ;;  %v2449_v15 = vpop.xlane.xlu0 %2448 }
 0x6c6   :  { %19889 = vrcp.f32 %v2449_v15  ;;  %v2472_v25 = vmul.f32 %v19884_v49, %v19868_v55  ;;  %v2586_v9 = vpop.permute.xlu1 %2585  ;;  %v21227_v49 = vpack.c.bf16 %v19231_v58, %v19226_v12 }
 0x6c8   :  { %v2480_v36 = vpack.c.bf16 %v2472_v25, %v2472_v25 }
 0x6ca   :  { %17665 = vmatmul.mubr.msk.bf16.vlgmr.msra.gmra.mxu1 %vm1149_vm2, %v2488_v4  ;;  %v2591_v45 = vsel %vm1149_vm2, %v2480_v36, 0  ;;  %v2923_v36 = vsel %vm1149_vm2, %v21227_v49, 0 }
 0x6cb   :  { %v19886_v35 = vpop.eup %19885  ;;  %17675 = vmatpush3.bf16.xpose.msra.mxu1 %v2591_v45  ;;  %17676 = vmatprep.mubr.msk.bf16.mxu1 %vm20357_vm1, %v25004_v30  ;;  %v19395_v45 = vunpack.i.l.bf16 %v20652_v19 }
 0x6cc   :  { %v2471_v38 = vmul.f32 %v19886_v35, %v19870_v14  ;;  %17686 = vmatprep.subr.bf16.mxu1 %v25004_v30  ;;  %v19390_v35 = vunpack.i.l.bf16 %v20643_v11 }
 0x6cd   :  { %v2455_v31 = vpop.xlane.xlu0 %2454 }
 0x6ce   :  { %19891 = vrcp.f32 %v2455_v31  ;;  %v2479_v44 = vpack.c.bf16 %v2471_v38, %v2471_v38  ;;  %v19234_v38 = vunpack.i.h.bf16 %v20641_v10  ;;  %v21241_v31 = vpack.c.bf16 %v19395_v45, %v19390_v35 }
 0x6cf   :  { %v19888_v34 = vpop.eup %19887 }
 0x6d0   :  { %v2542_v24 = vsel %vm1149_vm2, %v2479_v44, 0  ;;  %v2474_v55 = vmul.f32 %v19888_v34, %v19872_v28  ;;  %v2969_v10 = vsel %vm1149_vm2, %v21241_v31, 0 }
 0x6d1   :  { %17669 = vmatpush3.bf16.xpose.msra.mxu0 %v2542_v24  ;;  %v2537_v28 = vpop.permute.xlu0 %2536  ;;  %v3015_v24 = vsel %vm1149_vm2, %v20556_v46, 0 }
 0x6d2   :  { %17677 = vmatmul.mubr.msk.bf16.vlgmr.msra.gmra.mxu1 %vm1149_vm2, %v2586_v9  ;;  %v2482_v26 = vpack.c.bf16 %v2474_v55, %v2474_v55  ;;  %17680 = vmatprep.subr.bf16.mxu0 %v25004_v30  ;;  %v19477_v55 = vunpack.i.l.bf16 %v20733_v56  ;;  %v19398_v9 = vunpack.i.h.bf16 %v20652_v19  ;;  %v19636_v19 = vunpack.i.l.bf16 %v20735_v21 }
 0x6d3   :  { %v19890_v29 = vpop.eup %19889  ;;  %17688 = vmatprep.mubr.msk.bf16.mxu1 %vm20357_vm1, %v25004_v30 }
 0x6d4   :  { %v2689_v14 = vsel %vm1149_vm2, %v2482_v26, 0  ;;  %v2473_v60 = vmul.f32 %v19890_v29, %v21158_v52  ;;  %v2635_v52 = vpop.permute.xlu1 %2634  ;;  %v19472_v26 = vunpack.i.l.bf16 %v20727_v37 }
 0x6d5   :  { %17687 = vmatpush3.bf16.xpose.msra.mxu1 %v2689_v14 }
 0x6d6   :  { %v2481_v40 = vpack.c.bf16 %v2473_v60, %v2473_v60  ;;  %17698 = vmatprep.subr.bf16.mxu1 %v25004_v30  ;;  %v21262_v29 = vpack.c.bf16 %v19477_v55, %v19472_v26 }
 0x6d8   :  { %17671 = vmatmul.mubr.msk.bf16.vlgmr.msra.gmra.mxu0 %vm1149_vm2, %v2537_v28  ;;  %v2640_v41 = vsel %vm1149_vm2, %v2481_v40, 0  ;;  %v3107_v60 = vsel %vm1149_vm2, %v21262_v29, 0  ;;  %v19641_v40 = vunpack.i.l.bf16 %v20744_v48  ;;  %v19559_v28 = vunpack.i.l.bf16 %v20829_v50 }
 0x6d9   :  { %17681 = vmatpush3.bf16.xpose.msra.mxu0 %v2640_v41  ;;  %17682 = vmatprep.mubr.msk.bf16.mxu0 %vm20357_vm1, %v25004_v30  ;;  %v19554_v41 = vunpack.i.l.bf16 %v20827_v62 }
 0x6da   :  { %17692 = vmatprep.subr.bf16.mxu0 %v25004_v30 }
 0x6db   :  { %v19892_v13 = vpop.eup %19891 }
 0x6dc   :  { %v2475_v22 = vmul.f32 %v19892_v13, %v21162_v47  ;;  %v19480_v13 = vunpack.i.h.bf16 %v20733_v56 }
 0x6de   :  { %v2483_v8 = vpack.c.bf16 %v2475_v22, %v2475_v22  ;;  %v19475_v22 = vunpack.i.h.bf16 %v20727_v37  ;;  %v19562_v37 = vunpack.i.h.bf16 %v20829_v50 }
 0x6e0   :  { %17683 = vmatmul.mubr.msk.bf16.vlgmr.msra.gmra.mxu0 %vm1149_vm2, %v2635_v52  ;;  %v2738_v59 = vsel %vm1149_vm2, %v2483_v8, 0  ;;  %v21286_v8 = vpack.c.bf16 %v19641_v40, %v19636_v19  ;;  %v21288_v52 = vpack.c.bf16 %v19559_v28, %v19554_v41 }
 0x6e1   :  { %17693 = vmatpush3.bf16.xpose.msra.mxu0 %v2738_v59  ;;  %17694 = vmatprep.mubr.msk.bf16.mxu0 %vm20357_vm1, %v25004_v30  ;;  %v21290_v59 = vpack.c.bf16 %v19480_v13, %v19475_v22 }
 0x6e2   :  { %17704 = vmatprep.subr.bf16.mxu0 %v25004_v30  ;;  %v3153_v56 = vsel %vm1149_vm2, %v21286_v8, 0 }
 0x6fa   :  { %v2458_v7 = vpop.xlane.xlu1 %2457 }
 0x6fb   :  { %19893 = vrcp.f32 %v2458_v7  ;;  %v3199_v7 = vsel %vm1149_vm2, %v21288_v52, 0 }
 0x6fe   :  { %v2733_v32 = vpop.permute.xlu1 %2732 }
 0x6ff   :  { %17695 = vmatmul.mubr.msk.bf16.vlgmr.msra.gmra.mxu0 %vm1149_vm2, %v2733_v32  ;;  %v19557_v32 = vunpack.i.h.bf16 %v20827_v62 }
 0x700   :  { %17706 = vmatprep.mubr.msk.bf16.mxu0 %vm20357_vm1, %v25004_v30 }
 0x701   :  { %v21312_v62 = vpack.c.bf16 %v19562_v37, %v19557_v32 }
 0x702   :  { %v2461_v47 = vpop.xlane.xlu0 %2460  ;;  %v2831_v34 = vpop.permute.xlu1 %2830 }
 0x703   :  { %19895 = vrcp.f32 %v2461_v47  ;;  %v19639_v47 = vunpack.i.h.bf16 %v20735_v21 }
 0x706   :  { %v2684_v4 = vpop.permute.xlu0 %2683 }
 0x707   :  { %17689 = vmatmul.mubr.msk.bf16.vlgmr.msra.gmra.mxu1 %vm1149_vm2, %v2684_v4  ;;  %v19644_v4 = vunpack.i.h.bf16 %v20744_v48  ;;  %v3245_v48 = vsel %vm1149_vm2, %v21312_v62, 0 }
 0x708   :  { %v19894_v0 = vpop.eup %19893  ;;  %17700 = vmatprep.mubr.msk.bf16.mxu1 %vm20357_vm1, %v25004_v30 }
 0x709   :  { %v2476_v63 = vmul.f32 %v19894_v0, %v21173_v33  ;;  %v19718_v0 = vunpack.i.l.bf16 %v20831_v57  ;;  %v21314_v50 = vpack.c.bf16 %v19644_v4, %v19639_v47 }
 0x70a   :  { %v2782_v25 = vpop.permute.xlu0 %2781 }
 0x70b   :  { %v2484_v23 = vpack.c.bf16 %v2476_v63, %v2476_v63  ;;  %v25054_v63 = vld [vmem:[#allocation76_spill] sm:$0xff] }
 0x70c   :  { %v19726_v58 = vunpack.i.h.bf16 %v25054_v63 }
 0x70d   :  { %v2787_v2 = vsel %vm1149_vm2, %v2484_v23, 0  ;;  %v19723_v23 = vunpack.i.l.bf16 %v25054_v63 }
 0x70e   :  { %17699 = vmatpush3.bf16.xpose.msra.mxu1 %v2787_v2  ;;  %v19721_v2 = vunpack.i.h.bf16 %v20831_v57 }
 0x70f   :  { %17710 = vmatprep.subr.bf16.mxu1 %v25004_v30  ;;  %v21316_v21 = vpack.c.bf16 %v19723_v23, %v19718_v0 }
 0x710   :  { %v19896_v1 = vpop.eup %19895  ;;  %v21331_v12 = vpack.c.bf16 %v19726_v58, %v19721_v2 }
 0x711   :  { %v2477_v17 = vmul.f32 %v19896_v1, %v21177_v6  ;;  %v19229_v6 = vunpack.i.h.bf16 %v20632_v54  ;;  %v19393_v54 = vunpack.i.h.bf16 %v20643_v11  ;;  %v3061_v11 = vsel %vm1149_vm2, %v20562_v61, 0 }
 0x713   :  { %v2485_v15 = vpack.c.bf16 %v2477_v17, %v2477_v17  ;;  %v21243_v44 = vpack.c.bf16 %v19234_v38, %v19229_v6  ;;  %v21264_v14 = vpack.c.bf16 %v19398_v9, %v19393_v54 }
 0x715   :  { %17701 = vmatmul.mubr.msk.bf16.vlgmr.msra.gmra.mxu1 %vm1149_vm2, %v2782_v25  ;;  %v2836_v33 = vsel %vm1149_vm2, %v2485_v15, 0 }
 0x716   :  { %17705 = vmatpush3.bf16.xpose.msra.mxu0 %v2836_v33  ;;  %17711 = vmatpush3.bf16.xpose.msra.mxu1 %v2923_v36 }
 0x717   :  { %17712 = vmatprep.mubr.msk.bf16.mxu1 %vm20357_vm1, %v25004_v30  ;;  %17716 = vmatprep.subr.bf16.mxu0 %v25004_v30 }
 0x718   :  { %17722 = vmatprep.subr.bf16.mxu1 %v25004_v30 }
 0x71d   :  { %17707 = vmatmul.mubr.msk.bf16.vlgmr.msra.gmra.mxu0 %vm1149_vm2, %v2831_v34  ;;  %17713 = vmatmul.mubr.msk.bf16.vlgmr.msra.gmra.mxu1 %vm1149_vm2, %v21243_v44 }
 0x71e   :  { %17717 = vmatpush3.bf16.xpose.msra.mxu0 %v2969_v10  ;;  %17723 = vmatpush3.bf16.xpose.msra.mxu1 %v3015_v24 }
 0x71f   :  { %17718 = vmatprep.mubr.msk.bf16.mxu0 %vm20357_vm1, %v25004_v30  ;;  %17724 = vmatprep.mubr.msk.bf16.mxu1 %vm20357_vm1, %v25004_v30 }
 0x720   :  { %17728 = vmatprep.subr.bf16.mxu0 %v25004_v30  ;;  %17734 = vmatprep.subr.bf16.mxu1 %v25004_v30 }
 0x725   :  { %17719 = vmatmul.mubr.msk.bf16.vlgmr.msra.gmra.mxu0 %vm1149_vm2, %v21264_v14  ;;  %17725 = vmatmul.mubr.msk.bf16.vlgmr.msra.gmra.mxu1 %vm1149_vm2, %v20552_v39 }
 0x726   :  { %17729 = vmatpush3.bf16.xpose.msra.mxu0 %v3061_v11  ;;  %17735 = vmatpush3.bf16.xpose.msra.mxu1 %v3107_v60 }
 0x727   :  { %17730 = vmatprep.mubr.msk.bf16.mxu0 %vm20357_vm1, %v25004_v30  ;;  %17736 = vmatprep.mubr.msk.bf16.mxu1 %vm20357_vm1, %v25004_v30 }
 0x728   :  { %17740 = vmatprep.subr.bf16.mxu0 %v25004_v30  ;;  %17746 = vmatprep.subr.bf16.mxu1 %v25004_v30 }
 0x72d   :  { %17731 = vmatmul.mubr.msk.bf16.vlgmr.msra.gmra.mxu0 %vm1149_vm2, %v20558_v53  ;;  %17737 = vmatmul.mubr.msk.bf16.vlgmr.msra.gmra.mxu1 %vm1149_vm2, %v21290_v59 }
 0x72e   :  { %17741 = vmatpush3.bf16.xpose.msra.mxu0 %v3153_v56  ;;  %17747 = vmatpush3.bf16.xpose.msra.mxu1 %v3199_v7 }
 0x72f   :  { %17742 = vmatprep.mubr.msk.bf16.mxu0 %vm20357_vm1, %v25004_v30  ;;  %17748 = vmatprep.mubr.msk.bf16.mxu1 %vm20357_vm1, %v25004_v30 }
 0x730   :  { %17752 = vmatprep.subr.bf16.mxu0 %v25004_v30  ;;  %17758 = vmatprep.subr.bf16.mxu1 %v25004_v30 }
 0x735   :  { %17743 = vmatmul.mubr.msk.bf16.vlgmr.msra.gmra.mxu0 %vm1149_vm2, %v21314_v50  ;;  %17749 = vmatmul.mubr.msk.bf16.vlgmr.msra.gmra.mxu1 %vm1149_vm2, %v21316_v21 }
 0x736   :  { %17753 = vmatpush3.bf16.xpose.msra.mxu0 %v3245_v48  ;;  %17754 = vmatprep.mubr.msk.bf16.mxu0 %vm20357_vm1, %v25004_v30 }
 0x737   :  { %17760 = vmatprep.mubr.msk.bf16.mxu1 %vm20357_vm1, %v25004_v30  ;;  %17764 = vmatprep.subr.bf16.mxu0 %v25004_v30 }
 0x73d   :  { %17755 = vmatmul.mubr.msk.bf16.vlgmr.msra.gmra.mxu0 %vm1149_vm2, %v21331_v12 }
 0x73e   :  { %17766 = vmatprep.mubr.msk.bf16.mxu0 %vm20357_vm1, %v25004_v30 }
 0x78a   :  { %v21337_v1 = vpop.f32.mrf.mxu1 }
 0x78b   :  { %25055 = vst [vmem:[#allocation76_spill] sm:$0xff] %v21337_v1 }
 0x78c   :  { %v17666_v17 = vpop.f32.mrf.mxu1 }
 0x78e   :  { %v2532_v15 = vpop.f32.mrf.mxu1 }
 0x790   :  { %v17667_v57 = vpop.f32.mrf.mxu1 }
 0x792   :  { %v21339_v25 = vpop.f32.mrf.mxu1 }
 0x793   :  { %25056 = vst [vmem:[#allocation100_spill] sm:$0xff] %v21339_v25 }
 0x794   :  { %v17678_v33 = vpop.f32.mrf.mxu1 }
 0x796   :  { %v2630_v36 = vpop.f32.mrf.mxu1 }
 0x798   :  { %v21341_v45 = vpop.f32.mrf.mxu0  ;;  %v17679_v35 = vpop.f32.mrf.mxu1 }
 0x799   :  { %25057 = vst [vmem:[#allocation101_spill] sm:$0xff] %v21341_v45 }
 0x79a   :  { %v17672_v38 = vpop.f32.mrf.mxu0 }
 0x79c   :  { %v2581_v6 = vpop.f32.mrf.mxu0 }
 0x79e   :  { %v17673_v34 = vpop.f32.mrf.mxu0 }
 0x7a0   :  { %v21343_v10 = vpop.f32.mrf.mxu0 }
 0x7a1   :  { %25058 = vst [vmem:[#allocation102_spill] sm:$0xff] %v21343_v10 }
 0x7a2   :  { %v17684_v24 = vpop.f32.mrf.mxu0 }
 0x7a4   :  { %v2679_v55 = vpop.f32.mrf.mxu0 }
 0x7a6   :  { %v17685_v54 = vpop.f32.mrf.mxu0 }
 0x7bf   :  { %v21345_v9 = vpop.f32.mrf.mxu0 }
 0x7c1   :  { %v17696_v26 = vpop.f32.mrf.mxu0 }
 0x7c3   :  { %v2777_v11 = vpop.f32.mrf.mxu0 }
 0x7c5   :  { %v17697_v19 = vpop.f32.mrf.mxu0 }
 0x7c7   :  { %v21347_v60 = vpop.f32.mrf.mxu1 }
 0x7c9   :  { %v17690_v40 = vpop.f32.mrf.mxu1 }
 0x7cb   :  { %v2728_v28 = vpop.f32.mrf.mxu1 }
 0x7cd   :  { %v17691_v41 = vpop.f32.mrf.mxu1 }
 0x7d5   :  { %v21349_v13 = vpop.f32.mrf.mxu1 }
 0x7d7   :  { %v17702_v22 = vpop.f32.mrf.mxu1 }
 0x7d9   :  { %v2826_v56 = vpop.f32.mrf.mxu1 }
 0x7db   :  { %v17703_v7 = vpop.f32.mrf.mxu1 }
 0x7dd   :  { %v21351_v37 = vpop.f32.mrf.mxu0  ;;  %v2959_v32 = vpop.f32.mrf.mxu1 }
 0x7de   :  { %v2960_v47 = vadd.f32 %v2959_v32, %v20867_v43 }
 0x7df   :  { %v17708_v4 = vpop.f32.mrf.mxu0  ;;  %v17714_v0 = vpop.f32.mrf.mxu1 }
 0x7e0   :  { %v3287_v63 = vsel %vm1149_vm2, %v2960_v47, -inf }
 0x7e1   :  { %v2875_v23 = vpop.f32.mrf.mxu0  ;;  %3288 = vmax.xlane.f32.xlu0 %v3287_v63  ;;  %v2962_v48 = vpop.f32.mrf.mxu1 }
 0x7e3   :  { %v17709_v2 = vpop.f32.mrf.mxu0  ;;  %v17715_v58 = vpop.f32.mrf.mxu1 }
 0x7e5   :  { %v3005_v17 = vpop.f32.mrf.mxu0  ;;  %v3051_v15 = vpop.f32.mrf.mxu1 }
 0x7e6   :  { %v3006_v57 = vadd.f32 %v3005_v17, %v20867_v43  ;;  %v3052_v33 = vadd.f32 %v3051_v15, %v20867_v43 }
 0x7e7   :  { %v17720_v36 = vpop.f32.mrf.mxu0  ;;  %v17726_v35 = vpop.f32.mrf.mxu1 }
 0x7e8   :  { %v3290_v38 = vsel %vm1149_vm2, %v3006_v57, -inf  ;;  %v3293_v6 = vsel %vm1149_vm2, %v3052_v33, -inf }
 0x7e9   :  { %3291 = vmax.xlane.f32.xlu1 %v3290_v38  ;;  %v3008_v34 = vpop.f32.mrf.mxu0  ;;  %3294 = vmax.xlane.f32.xlu0 %v3293_v6  ;;  %v3054_v24 = vpop.f32.mrf.mxu1 }
 0x7eb   :  { %v17721_v55 = vpop.f32.mrf.mxu0  ;;  %v17727_v54 = vpop.f32.mrf.mxu1 }
 0x7ed   :  { %v3097_v26 = vpop.f32.mrf.mxu0  ;;  %v3143_v11 = vpop.f32.mrf.mxu1 }
 0x7ee   :  { %v3098_v19 = vadd.f32 %v3097_v26, %v20867_v43  ;;  %v3144_v40 = vadd.f32 %v3143_v11, %v20867_v43 }
 0x7ef   :  { %v17732_v28 = vpop.f32.mrf.mxu0  ;;  %v17738_v41 = vpop.f32.mrf.mxu1 }
 0x7f0   :  { %v3296_v22 = vsel %vm1149_vm2, %v3098_v19, -inf  ;;  %v3299_v56 = vsel %vm1149_vm2, %v3144_v40, -inf }
 0x7f1   :  { %v3100_v7 = vpop.f32.mrf.mxu0  ;;  %3297 = vmax.xlane.f32.xlu0 %v3296_v22  ;;  %3300 = vmax.xlane.f32.xlu1 %v3299_v56  ;;  %v3146_v32 = vpop.f32.mrf.mxu1 }
 0x7f3   :  { %v17733_v4 = vpop.f32.mrf.mxu0  ;;  %v17739_v0 = vpop.f32.mrf.mxu1 }
 0x7f5   :  { %v3189_v63 = vpop.f32.mrf.mxu0  ;;  %v3235_v23 = vpop.f32.mrf.mxu1 }
 0x7f6   :  { %v3190_v48 = vadd.f32 %v3189_v63, %v20867_v43  ;;  %v21365_v2 = vadd.f32 %v3235_v23, %v20867_v43 }
 0x7f7   :  { %v17744_v58 = vpop.f32.mrf.mxu0  ;;  %v17750_v17 = vpop.f32.mrf.mxu1 }
 0x7f8   :  { %v3302_v15 = vsel %vm1149_vm2, %v3190_v48, -inf  ;;  %v3305_v36 = vsel %vm1149_vm2, %v21365_v2, -inf }
 0x7f9   :  { %v3192_v35 = vpop.f32.mrf.mxu0  ;;  %3303 = vmax.xlane.f32.xlu0 %v3302_v15  ;;  %3306 = vmax.xlane.f32.xlu1 %v3305_v36  ;;  %v3238_v38 = vpop.f32.mrf.mxu1 }
 0x7fb   :  { %v17745_v6 = vpop.f32.mrf.mxu0  ;;  %v17751_v34 = vpop.f32.mrf.mxu1 }
 0x7fd   :  { %v3281_v24 = vpop.f32.mrf.mxu0 }
 0x7fe   :  { %v3282_v55 = vadd.f32 %v3281_v24, %v20867_v43 }
 0x7ff   :  { %v17756_v54 = vpop.f32.mrf.mxu0 }
 0x800   :  { %v3308_v26 = vsel %vm1149_vm2, %v3282_v55, -inf }
 0x801   :  { %v3284_v11 = vpop.f32.mrf.mxu0  ;;  %3309 = vmax.xlane.f32.xlu0 %v3308_v26 }
 0x803   :  { %v17757_v28 = vpop.f32.mrf.mxu0 }
 0x80a   :  { %3383 = vrot.lane.b32.xlu1 %v20984_v51, %s20360_s12 }
 0x86a   :  { %v3289_v41 = vpop.xlane.xlu0 %3288 }
 0x86b   :  { %v3311_v22 = vsub.f32 %v2960_v47, %v3289_v41 }
 0x86d   :  { %v3319_v56 = vmul.f32 1.442695, %v3311_v22 }
 0x86f   :  { %19897 = vpow2.f32 %v3319_v56 }
 0x872   :  { %v3292_v7 = vpop.xlane.xlu1 %3291  ;;  %v3295_v32 = vpop.xlane.xlu0 %3294 }
 0x873   :  { %v3312_v4 = vsub.f32 %v3006_v57, %v3292_v7  ;;  %v3313_v0 = vsub.f32 %v3052_v33, %v3295_v32 }
 0x875   :  { %v3321_v63 = vmul.f32 1.442695, %v3312_v4  ;;  %v3323_v23 = vmul.f32 1.442695, %v3313_v0 }
 0x877   :  { %19899 = vpow2.f32 %v3321_v63 }
 0x878   :  { %19901 = vpow2.f32 %v3323_v23 }
 0x87a   :  { %v3298_v58 = vpop.xlane.xlu0 %3297  ;;  %v3301_v17 = vpop.xlane.xlu1 %3300 }
 0x87b   :  { %v3314_v15 = vsub.f32 %v3098_v19, %v3298_v58  ;;  %v3315_v36 = vsub.f32 %v3144_v40, %v3301_v17 }
 0x87c   :  { %v19898_v35 = vpop.eup %19897 }
 0x87d   :  { %v3325_v38 = vmul.f32 1.442695, %v3314_v15  ;;  %v3327_v6 = vmul.f32 1.442695, %v3315_v36  ;;  %v3335_v34 = vsel %vm1149_vm2, %v19898_v35, 0.0 }
 0x87e   :  { %3336 = vadd.xlane.f32.xlu1 %v3335_v34 }
 0x87f   :  { %19903 = vpow2.f32 %v3325_v38 }
 0x880   :  { %19905 = vpow2.f32 %v3327_v6 }
 0x882   :  { %v3304_v47 = vpop.xlane.xlu0 %3303  ;;  %v3307_v56 = vpop.xlane.xlu1 %3306 }
 0x883   :  { %v3316_v24 = vsub.f32 %v3190_v48, %v3304_v47  ;;  %v3317_v7 = vsub.f32 %v21365_v2, %v3307_v56 }
 0x884   :  { %v19900_v57 = vpop.eup %19899 }
 0x885   :  { %v19902_v33 = vpop.eup %19901  ;;  %v3329_v54 = vmul.f32 1.442695, %v3316_v24  ;;  %v3338_v26 = vsel %vm1149_vm2, %v19900_v57, 0.0  ;;  %v3331_v0 = vmul.f32 1.442695, %v3317_v7 }
 0x886   :  { %3339 = vadd.xlane.f32.xlu0 %v3338_v26  ;;  %v3341_v11 = vsel %vm1149_vm2, %v19902_v33, 0.0  ;;  %v3384_v2 = vpop.permute.xlu1 %3383 }
 0x887   :  { %19907 = vpow2.f32 %v3329_v54  ;;  %3342 = vadd.xlane.f32.xlu1 %v3341_v11 }
 0x888   :  { %19909 = vpow2.f32 %v3331_v0 }
 0x88a   :  { %v3310_v32 = vpop.xlane.xlu0 %3309 }
 0x88b   :  { %v3318_v4 = vsub.f32 %v3282_v55, %v3310_v32 }
 0x88c   :  { %v21377_v19 = vpop.eup %19903 }
 0x88d   :  { %v21379_v40 = vpop.eup %19905  ;;  %v3344_v28 = vsel %vm1149_vm2, %v21377_v19, 0.0  ;;  %v3333_v63 = vmul.f32 1.442695, %v3318_v4 }
 0x88e   :  { %3345 = vadd.xlane.f32.xlu0 %v3344_v28  ;;  %v3347_v48 = vsel %vm1149_vm2, %v21379_v40, 0.0 }
 0x88f   :  { %3348 = vadd.xlane.f32.xlu1 %v3347_v48  ;;  %19911 = vpow2.f32 %v3333_v63 }
 0x894   :  { %v21385_v41 = vpop.eup %19907 }
 0x895   :  { %v3350_v22 = vsel %vm1149_vm2, %v21385_v41, 0.0  ;;  %v21396_v23 = vpop.eup %19909 }
 0x896   :  { %3351 = vadd.xlane.f32.xlu0 %v3350_v22  ;;  %v3353_v17 = vsel %vm1149_vm2, %v21396_v23, 0.0 }
 0x89c   :  { %v21398_v58 = vpop.eup %19911 }
 0x89d   :  { %v3356_v15 = vsel %vm1149_vm2, %v21398_v58, 0.0 }
 0x8a0   :  { %3479 = vrot.lane.b32.xlu1 %v20996_v27, %s20360_s12 }
 0x8a4   :  { %3527 = vrot.lane.b32.xlu1 %v21023_v42, %s20360_s12 }
 0x8ac   :  { %3431 = vrot.lane.b32.xlu0 %v21013_v16, %s20360_s12 }
 0x8c8   :  { %3354 = vadd.xlane.f32.xlu1 %v3353_v17 }
 0x8cb   :  { %3357 = vadd.xlane.f32.xlu0 %v3356_v15 }
 0x8d9   :  { %3623 = vrot.lane.b32.xlu1 %v21053_v3, %s20360_s12 }
 0x8dd   :  { %3719 = vrot.lane.b32.xlu1 %v21070_v18, %s20360_s12 }
 0x8e1   :  { %3575 = vrot.lane.b32.xlu0 %v21031_v5, %s20360_s12 }
 0x8e5   :  { %3671 = vrot.lane.b32.xlu0 %v21041_v20, %s20360_s12 }
 0x907   :  { %v3337_v55 = vpop.xlane.xlu1 %3336 }
 0x908   :  { %19913 = vrcp.f32 %v3337_v55 }
 0x90f   :  { %v3340_v36 = vpop.xlane.xlu0 %3339 }
 0x910   :  { %19915 = vrcp.f32 %v3340_v36  ;;  %v3343_v38 = vpop.xlane.xlu1 %3342 }
 0x911   :  { %19917 = vrcp.f32 %v3343_v38 }
 0x915   :  { %v19914_v6 = vpop.eup %19913 }
 0x916   :  { %v3367_v34 = vmul.f32 %v19914_v6, %v19898_v35 }
 0x917   :  { %v3346_v47 = vpop.xlane.xlu0 %3345 }
 0x918   :  { %19919 = vrcp.f32 %v3346_v47  ;;  %v3349_v24 = vpop.xlane.xlu1 %3348  ;;  %v3375_v54 = vpack.c.bf16 %v3367_v34, %v3367_v34 }
 0x919   :  { %19921 = vrcp.f32 %v3349_v24 }
 0x91a   :  { %v3389_v26 = vsel %vm1149_vm2, %v3375_v54, 0 }
 0x91b   :  { %17759 = vmatpush3.bf16.xpose.msra.mxu1 %v3389_v26 }
 0x91c   :  { %17770 = vmatprep.subr.bf16.mxu1 %v25004_v30  ;;  %v3480_v55 = vpop.permute.xlu1 %3479 }
 0x91d   :  { %v19916_v11 = vpop.eup %19915 }
 0x91e   :  { %v19918_v28 = vpop.eup %19917  ;;  %v3368_v48 = vmul.f32 %v19916_v11, %v19900_v57 }
 0x91f   :  { %v3352_v22 = vpop.xlane.xlu0 %3351  ;;  %v3369_v56 = vmul.f32 %v19918_v28, %v19902_v33 }
 0x920   :  { %19923 = vrcp.f32 %v3352_v22  ;;  %v3376_v7 = vpack.c.bf16 %v3368_v48, %v3368_v48  ;;  %v3528_v34 = vpop.permute.xlu1 %3527 }
 0x921   :  { %v3377_v32 = vpack.c.bf16 %v3369_v56, %v3369_v56 }
 0x922   :  { %17761 = vmatmul.mubr.msk.bf16.vlgmr.msra.gmra.mxu1 %vm1149_vm2, %v3384_v2  ;;  %v3437_v35 = vsel %vm1149_vm2, %v3376_v7, 0 }
 0x923   :  { %17765 = vmatpush3.bf16.xpose.msra.mxu0 %v3437_v35  ;;  %v3485_v4 = vsel %vm1149_vm2, %v3377_v32, 0  ;;  %17772 = vmatprep.mubr.msk.bf16.mxu1 %vm20357_vm1, %v25004_v30  ;;  %v3432_v15 = vpop.permute.xlu0 %3431 }
 0x924   :  { %17771 = vmatpush3.bf16.xpose.msra.mxu1 %v3485_v4  ;;  %17776 = vmatprep.subr.bf16.mxu0 %v25004_v30  ;;  %v3811_v4 = vrot.slane %v21227_v49, 4 }
 0x925   :  { %v19920_v0 = vpop.eup %19919  ;;  %17782 = vmatprep.subr.bf16.mxu1 %v25004_v30 }
 0x926   :  { %v19922_v57 = vpop.eup %19921  ;;  %v3370_v33 = vmul.f32 %v19920_v0, %v21377_v19 }
 0x927   :  { %v3371_v63 = vmul.f32 %v19922_v57, %v21379_v40 }
 0x928   :  { %v3378_v17 = vpack.c.bf16 %v3370_v33, %v3370_v33  ;;  %v3911_v33 = vrot.slane %v20556_v46, 4 }
 0x929   :  { %v3379_v2 = vpack.c.bf16 %v3371_v63, %v3371_v63  ;;  %v3961_v63 = vrot.slane %v20562_v61, 4  ;;  %v3909_v61 = vrot.slane %v20552_v39, 4  ;;  %v4111_v39 = vrot.slane %v21288_v52, 4 }
 0x92a   :  { %17767 = vmatmul.mubr.msk.bf16.vlgmr.msra.gmra.mxu0 %vm1149_vm2, %v3432_v15  ;;  %v3533_v36 = vsel %vm1149_vm2, %v3378_v17, 0  ;;  %v3916_v17 = vsel %vm1149_vm2, %v3911_v33, 0  ;;  %v3859_v15 = vrot.slane %v21264_v14, 4  ;;  %v4061_v14 = vrot.slane %v21286_v8, 4 }
 0x92b   :  { %17773 = vmatmul.mubr.msk.bf16.vlgmr.msra.gmra.mxu1 %vm1149_vm2, %v3480_v55  ;;  %17777 = vmatpush3.bf16.xpose.msra.mxu0 %v3533_v36  ;;  %v3581_v38 = vsel %vm1149_vm2, %v3379_v2, 0  ;;  %v3966_v46 = vsel %vm1149_vm2, %v3961_v63, 0  ;;  %v3959_v55 = vrot.slane %v20558_v53, 4  ;;  %v4009_v53 = vrot.slane %v21290_v59, 4 }
 0x92c   :  { %17783 = vmatpush3.bf16.xpose.msra.mxu1 %v3581_v38  ;;  %17778 = vmatprep.mubr.msk.bf16.mxu0 %vm20357_vm1, %v25004_v30  ;;  %v4161_v8 = vrot.slane %v21312_v62, 4  ;;  %v4116_v36 = vsel %vm1149_vm2, %v4111_v39, 0  ;;  %v4059_v38 = vrot.slane %v21314_v50, 4  ;;  %v4109_v59 = vrot.slane %v21316_v21, 4 }
 0x92d   :  { %v19924_v19 = vpop.eup %19923  ;;  %17788 = vmatprep.subr.bf16.mxu0 %v25004_v30  ;;  %17784 = vmatprep.mubr.msk.bf16.mxu1 %vm20357_vm1, %v25004_v30  ;;  %v4159_v62 = vrot.slane %v21331_v12, 4 }
 0x92e   :  { %v3372_v40 = vmul.f32 %v19924_v19, %v21385_v41  ;;  %17794 = vmatprep.subr.bf16.mxu1 %v25004_v30  ;;  %v4166_v52 = vsel %vm1149_vm2, %v4161_v8, 0 }
 0x930   :  { %v3380_v6 = vpack.c.bf16 %v3372_v40, %v3372_v40 }
 0x932   :  { %17779 = vmatmul.mubr.msk.bf16.vlgmr.msra.gmra.mxu0 %vm1149_vm2, %v3528_v34  ;;  %v3629_v47 = vsel %vm1149_vm2, %v3380_v6, 0 }
 0x933   :  { %17789 = vmatpush3.bf16.xpose.msra.mxu0 %v3629_v47  ;;  %17790 = vmatprep.mubr.msk.bf16.mxu0 %vm20357_vm1, %v25004_v30 }
 0x934   :  { %17800 = vmatprep.subr.bf16.mxu0 %v25004_v30 }
 0x951   :  { %v3355_v24 = vpop.xlane.xlu1 %3354 }
 0x952   :  { %19925 = vrcp.f32 %v3355_v24 }
 0x954   :  { %v3358_v54 = vpop.xlane.xlu0 %3357 }
 0x955   :  { %19927 = vrcp.f32 %v3358_v54  ;;  %v3624_v26 = vpop.permute.xlu1 %3623 }
 0x956   :  { %17791 = vmatmul.mubr.msk.bf16.vlgmr.msra.gmra.mxu0 %vm1149_vm2, %v3624_v26 }
 0x957   :  { %17802 = vmatprep.mubr.msk.bf16.mxu0 %vm20357_vm1, %v25004_v30 }
 0x958   :  { %v3576_v41 = vpop.permute.xlu0 %3575 }
 0x959   :  { %17785 = vmatmul.mubr.msk.bf16.vlgmr.msra.gmra.mxu1 %vm1149_vm2, %v3576_v41  ;;  %v3720_v57 = vpop.permute.xlu1 %3719 }
 0x95a   :  { %17796 = vmatprep.mubr.msk.bf16.mxu1 %vm20357_vm1, %v25004_v30 }
 0x95c   :  { %v3672_v0 = vpop.permute.xlu0 %3671 }
 0x95f   :  { %v19926_v11 = vpop.eup %19925 }
 0x960   :  { %v3373_v28 = vmul.f32 %v19926_v11, %v21396_v23  ;;  %v3861_v23 = vrot.slane %v21241_v31, 4  ;;  %v3809_v31 = vrot.slane %v21243_v44, 4  ;;  %v4011_v44 = vrot.slane %v21262_v29, 4 }
 0x961   :  { %v4066_v29 = vsel %vm1149_vm2, %v4061_v14, 0 }
 0x962   :  { %v19928_v48 = vpop.eup %19927  ;;  %v3381_v22 = vpack.c.bf16 %v3373_v28, %v3373_v28  ;;  %v3866_v49 = vsel %vm1149_vm2, %v3861_v23, 0  ;;  %v4016_v2 = vsel %vm1149_vm2, %v4011_v44, 0 }
 0x963   :  { %v3374_v56 = vmul.f32 %v19928_v48, %v21398_v58  ;;  %v3816_v58 = vsel %vm1149_vm2, %v3811_v4, 0 }
 0x964   :  { %v3677_v7 = vsel %vm1149_vm2, %v3381_v22, 0 }
 0x965   :  { %17795 = vmatpush3.bf16.xpose.msra.mxu1 %v3677_v7  ;;  %v3382_v32 = vpack.c.bf16 %v3374_v56, %v3374_v56 }
 0x966   :  { %17806 = vmatprep.subr.bf16.mxu1 %v25004_v30 }
 0x967   :  { %v3725_v35 = vsel %vm1149_vm2, %v3382_v32, 0 }
 0x968   :  { %17801 = vmatpush3.bf16.xpose.msra.mxu0 %v3725_v35 }
 0x969   :  { %17812 = vmatprep.subr.bf16.mxu0 %v25004_v30 }
 0x96c   :  { %17797 = vmatmul.mubr.msk.bf16.vlgmr.msra.gmra.mxu1 %vm1149_vm2, %v3672_v0 }
 0x96d   :  { %17807 = vmatpush3.bf16.xpose.msra.mxu1 %v3816_v58  ;;  %17808 = vmatprep.mubr.msk.bf16.mxu1 %vm20357_vm1, %v25004_v30 }
 0x96e   :  { %17818 = vmatprep.subr.bf16.mxu1 %v25004_v30 }
 0x96f   :  { %17803 = vmatmul.mubr.msk.bf16.vlgmr.msra.gmra.mxu0 %vm1149_vm2, %v3720_v57 }
 0x970   :  { %17813 = vmatpush3.bf16.xpose.msra.mxu0 %v3866_v49  ;;  %17814 = vmatprep.mubr.msk.bf16.mxu0 %vm20357_vm1, %v25004_v30 }
 0x971   :  { %17824 = vmatprep.subr.bf16.mxu0 %v25004_v30 }
 0x974   :  { %17809 = vmatmul.mubr.msk.bf16.vlgmr.msra.gmra.mxu1 %vm1149_vm2, %v3809_v31 }
 0x975   :  { %17819 = vmatpush3.bf16.xpose.msra.mxu1 %v3916_v17  ;;  %17820 = vmatprep.mubr.msk.bf16.mxu1 %vm20357_vm1, %v25004_v30 }
 0x976   :  { %17830 = vmatprep.subr.bf16.mxu1 %v25004_v30 }
 0x977   :  { %17815 = vmatmul.mubr.msk.bf16.vlgmr.msra.gmra.mxu0 %vm1149_vm2, %v3859_v15 }
 0x978   :  { %17825 = vmatpush3.bf16.xpose.msra.mxu0 %v3966_v46  ;;  %17826 = vmatprep.mubr.msk.bf16.mxu0 %vm20357_vm1, %v25004_v30 }
 0x979   :  { %17836 = vmatprep.subr.bf16.mxu0 %v25004_v30 }
 0x97c   :  { %17821 = vmatmul.mubr.msk.bf16.vlgmr.msra.gmra.mxu1 %vm1149_vm2, %v3909_v61 }
 0x97d   :  { %17831 = vmatpush3.bf16.xpose.msra.mxu1 %v4016_v2  ;;  %17832 = vmatprep.mubr.msk.bf16.mxu1 %vm20357_vm1, %v25004_v30 }
 0x97e   :  { %17842 = vmatprep.subr.bf16.mxu1 %v25004_v30 }
 0x97f   :  { %17827 = vmatmul.mubr.msk.bf16.vlgmr.msra.gmra.mxu0 %vm1149_vm2, %v3959_v55 }
 0x980   :  { %17837 = vmatpush3.bf16.xpose.msra.mxu0 %v4066_v29  ;;  %17838 = vmatprep.mubr.msk.bf16.mxu0 %vm20357_vm1, %v25004_v30 }
 0x981   :  { %17848 = vmatprep.subr.bf16.mxu0 %v25004_v30 }
 0x984   :  { %17833 = vmatmul.mubr.msk.bf16.vlgmr.msra.gmra.mxu1 %vm1149_vm2, %v4009_v53 }
 0x985   :  { %17843 = vmatpush3.bf16.xpose.msra.mxu1 %v4116_v36  ;;  %17844 = vmatprep.mubr.msk.bf16.mxu1 %vm20357_vm1, %v25004_v30 }
 0x986   :  { %17854 = vmatprep.subr.bf16.mxu1 %v25004_v30 }
 0x987   :  { %17839 = vmatmul.mubr.msk.bf16.vlgmr.msra.gmra.mxu0 %vm1149_vm2, %v4059_v38 }
 0x988   :  { %17849 = vmatpush3.bf16.xpose.msra.mxu0 %v4166_v52  ;;  %17850 = vmatprep.mubr.msk.bf16.mxu0 %vm20357_vm1, %v25004_v30 }
 0x989   :  { %17860 = vmatprep.subr.bf16.mxu0 %v25004_v30 }
 0x98c   :  { %17845 = vmatmul.mubr.msk.bf16.vlgmr.msra.gmra.mxu1 %vm1149_vm2, %v4109_v59 }
 0x98d   :  { %17856 = vmatprep.mubr.msk.bf16.mxu1 %vm20357_vm1, %v25004_v30 }
 0x98f   :  { %17851 = vmatmul.mubr.msk.bf16.vlgmr.msra.gmra.mxu0 %vm1149_vm2, %v4159_v62 }
 0x990   :  { %17862 = vmatprep.mubr.msk.bf16.mxu0 %vm20357_vm1, %v25004_v30 }
 0x9e2   :  { %v21513_v50 = vpop.f32.mrf.mxu1 }
 0x9e3   :  { %25059 = vst [vmem:[#allocation103_spill] sm:$0xff] %v21513_v50 }
 0x9e4   :  { %v17762_v19 = vpop.f32.mrf.mxu1 }
 0x9e6   :  { %v3428_v40 = vpop.f32.mrf.mxu1 }
 0x9e8   :  { %v17763_v6 = vpop.f32.mrf.mxu1 }
 0x9ea   :  { %v21515_v34 = vpop.f32.mrf.mxu0 }
 0x9eb   :  { %25060 = vst [vmem:[#allocation104_spill] sm:$0xff] %v21515_v34  ;;  %v21517_v21 = vpop.f32.mrf.mxu1 }
 0x9ec   :  { %25061 = vst [vmem:[#allocation105_spill] sm:$0xff] %v21517_v21  ;;  %v17768_v47 = vpop.f32.mrf.mxu0 }
 0x9ed   :  { %v17774_v24 = vpop.f32.mrf.mxu1 }
 0x9ee   :  { %v3476_v12 = vpop.f32.mrf.mxu0 }
 0x9ef   :  { %v3524_v54 = vpop.f32.mrf.mxu1 }
 0x9f0   :  { %v17769_v26 = vpop.f32.mrf.mxu0 }
 0x9f1   :  { %v17775_v41 = vpop.f32.mrf.mxu1 }
 0x9f2   :  { %v21519_v11 = vpop.f32.mrf.mxu0 }
 0x9f3   :  { %25062 = vst [vmem:[#allocation106_spill] sm:$0xff] %v21519_v11 }
 0x9f4   :  { %v17780_v28 = vpop.f32.mrf.mxu0 }
 0x9f6   :  { %v3572_v48 = vpop.f32.mrf.mxu0 }
 0x9f8   :  { %v17781_v22 = vpop.f32.mrf.mxu0 }
 0xa16   :  { %v21521_v56 = vpop.f32.mrf.mxu0 }
 0xa18   :  { %v17792_v7 = vpop.f32.mrf.mxu0 }
 0xa19   :  { %v21523_v32 = vpop.f32.mrf.mxu1 }
 0xa1a   :  { %v3668_v35 = vpop.f32.mrf.mxu0 }
 0xa1b   :  { %v17786_v4 = vpop.f32.mrf.mxu1 }
 0xa1c   :  { %v17793_v0 = vpop.f32.mrf.mxu0 }
 0xa1d   :  { %v3620_v23 = vpop.f32.mrf.mxu1 }
 0xa1f   :  { %v17787_v58 = vpop.f32.mrf.mxu1 }
 0xa2c   :  { %v21525_v57 = vpop.f32.mrf.mxu1 }
 0xa2e   :  { %v17798_v49 = vpop.f32.mrf.mxu1 }
 0xa2f   :  { %v21527_v33 = vpop.f32.mrf.mxu0 }
 0xa30   :  { %v3716_v31 = vpop.f32.mrf.mxu1 }
 0xa31   :  { %v17804_v63 = vpop.f32.mrf.mxu0 }
 0xa32   :  { %v17799_v17 = vpop.f32.mrf.mxu1 }
 0xa33   :  { %v3764_v15 = vpop.f32.mrf.mxu0 }
 0xa34   :  { %v3852_v46 = vpop.f32.mrf.mxu1 }
 0xa35   :  { %v3853_v44 = vadd.f32 %v3852_v46, %v20867_v43  ;;  %v17805_v61 = vpop.f32.mrf.mxu0 }
 0xa36   :  { %v17810_v14 = vpop.f32.mrf.mxu1 }
 0xa37   :  { %v3902_v2 = vpop.f32.mrf.mxu0  ;;  %v4208_v55 = vsel %vm1149_vm2, %v3853_v44, -inf }
 0xa38   :  { %v3903_v29 = vadd.f32 %v3902_v2, %v20867_v43  ;;  %4209 = vmax.xlane.f32.xlu0 %v4208_v55  ;;  %v3855_v39 = vpop.f32.mrf.mxu1 }
 0xa39   :  { %v17816_v53 = vpop.f32.mrf.mxu0 }
 0xa3a   :  { %v17811_v8 = vpop.f32.mrf.mxu1  ;;  %v4211_v36 = vsel %vm1149_vm2, %v3903_v29, -inf }
 0xa3b   :  { %4212 = vmax.xlane.f32.xlu1 %v4211_v36  ;;  %v3905_v38 = vpop.f32.mrf.mxu0 }
 0xa3c   :  { %v3952_v52 = vpop.f32.mrf.mxu1 }
 0xa3d   :  { %v3953_v59 = vadd.f32 %v3952_v52, %v20867_v43  ;;  %v17817_v62 = vpop.f32.mrf.mxu0 }
 0xa3e   :  { %v17822_v19 = vpop.f32.mrf.mxu1 }
 0xa3f   :  { %v4002_v40 = vpop.f32.mrf.mxu0  ;;  %v4214_v6 = vsel %vm1149_vm2, %v3953_v59, -inf }
 0xa40   :  { %v4003_v47 = vadd.f32 %v4002_v40, %v20867_v43  ;;  %4215 = vmax.xlane.f32.xlu0 %v4214_v6  ;;  %v3955_v24 = vpop.f32.mrf.mxu1 }
 0xa41   :  { %v17828_v12 = vpop.f32.mrf.mxu0 }
 0xa42   :  { %v17823_v54 = vpop.f32.mrf.mxu1  ;;  %v4217_v26 = vsel %vm1149_vm2, %v4003_v47, -inf }
 0xa43   :  { %v4005_v41 = vpop.f32.mrf.mxu0 }
 0xa44   :  { %4218 = vmax.xlane.f32.xlu0 %v4217_v26  ;;  %v4052_v28 = vpop.f32.mrf.mxu1 }
 0xa45   :  { %v4053_v48 = vadd.f32 %v4052_v28, %v20867_v43  ;;  %v17829_v22 = vpop.f32.mrf.mxu0 }
 0xa46   :  { %v17834_v7 = vpop.f32.mrf.mxu1 }
 0xa47   :  { %v4102_v35 = vpop.f32.mrf.mxu0  ;;  %v4220_v4 = vsel %vm1149_vm2, %v4053_v48, -inf }
 0xa48   :  { %v4103_v0 = vadd.f32 %v4102_v35, %v20867_v43  ;;  %4221 = vmax.xlane.f32.xlu1 %v4220_v4  ;;  %v4055_v23 = vpop.f32.mrf.mxu1 }
 0xa49   :  { %v17840_v58 = vpop.f32.mrf.mxu0 }
 0xa4a   :  { %v17835_v49 = vpop.f32.mrf.mxu1  ;;  %v4223_v31 = vsel %vm1149_vm2, %v4103_v0, -inf }
 0xa4b   :  { %v4105_v63 = vpop.f32.mrf.mxu0  ;;  %4224 = vmax.xlane.f32.xlu0 %v4223_v31 }
 0xa4c   :  { %v4152_v17 = vpop.f32.mrf.mxu1 }
 0xa4d   :  { %v21542_v15 = vadd.f32 %v4152_v17, %v20867_v43  ;;  %v17841_v46 = vpop.f32.mrf.mxu0 }
 0xa4e   :  { %v17846_v61 = vpop.f32.mrf.mxu1 }
 0xa4f   :  { %v4202_v14 = vpop.f32.mrf.mxu0  ;;  %v4226_v2 = vsel %vm1149_vm2, %v21542_v15, -inf }
 0xa50   :  { %v4203_v55 = vadd.f32 %v4202_v14, %v20867_v43  ;;  %4227 = vmax.xlane.f32.xlu1 %v4226_v2  ;;  %v4155_v39 = vpop.f32.mrf.mxu1 }
 0xa51   :  { %v17852_v53 = vpop.f32.mrf.mxu0 }
 0xa52   :  { %v17847_v8 = vpop.f32.mrf.mxu1  ;;  %v4229_v36 = vsel %vm1149_vm2, %v4203_v55, -inf }
 0xa53   :  { %v4205_v38 = vpop.f32.mrf.mxu0  ;;  %4230 = vmax.xlane.f32.xlu0 %v4229_v36 }
 0xa55   :  { %v17853_v52 = vpop.f32.mrf.mxu0 }
 0xa61   :  { %4304 = vrot.lane.b32.xlu1 %v20984_v51, %s20361_s13 }
 0xac1   :  { %v4210_v62 = vpop.xlane.xlu0 %4209 }
 0xac2   :  { %v4232_v19 = vsub.f32 %v3853_v44, %v4210_v62 }
 0xac4   :  { %v4240_v40 = vmul.f32 1.442695, %v4232_v19  ;;  %v4213_v6 = vpop.xlane.xlu1 %4212 }
 0xac5   :  { %v4233_v24 = vsub.f32 %v3903_v29, %v4213_v6 }
 0xac6   :  { %19929 = vpow2.f32 %v4240_v40 }
 0xac7   :  { %v4242_v12 = vmul.f32 1.442695, %v4233_v24 }
 0xac9   :  { %19931 = vpow2.f32 %v4242_v12  ;;  %v4216_v54 = vpop.xlane.xlu0 %4215 }
 0xaca   :  { %v4234_v26 = vsub.f32 %v3953_v59, %v4216_v54 }
 0xacc   :  { %v4244_v41 = vmul.f32 1.442695, %v4234_v26 }
 0xacd   :  { %v4219_v28 = vpop.xlane.xlu0 %4218 }
 0xace   :  { %19933 = vpow2.f32 %v4244_v41  ;;  %v4235_v22 = vsub.f32 %v4003_v47, %v4219_v28 }
 0xad0   :  { %v4246_v7 = vmul.f32 1.442695, %v4235_v22 }
 0xad1   :  { %v4222_v35 = vpop.xlane.xlu1 %4221 }
 0xad2   :  { %19935 = vpow2.f32 %v4246_v7  ;;  %v4236_v4 = vsub.f32 %v4053_v48, %v4222_v35 }
 0xad3   :  { %v19930_v23 = vpop.eup %19929 }
 0xad4   :  { %v4248_v58 = vmul.f32 1.442695, %v4236_v4  ;;  %v4225_v49 = vpop.xlane.xlu0 %4224  ;;  %v4256_v44 = vsel %vm1149_vm2, %v19930_v23, 0.0 }
 0xad5   :  { %v4237_v31 = vsub.f32 %v4103_v0, %v4225_v49  ;;  %4257 = vadd.xlane.f32.xlu1 %v4256_v44 }
 0xad6   :  { %v19932_v29 = vpop.eup %19931  ;;  %19937 = vpow2.f32 %v4248_v58 }
 0xad7   :  { %v4250_v63 = vmul.f32 1.442695, %v4237_v31  ;;  %v4259_v59 = vsel %vm1149_vm2, %v19932_v29, 0.0 }
 0xad8   :  { %4260 = vadd.xlane.f32.xlu0 %v4259_v59 }
 0xad9   :  { %19939 = vpow2.f32 %v4250_v63  ;;  %v4228_v53 = vpop.xlane.xlu1 %4227 }
 0xada   :  { %v4238_v36 = vsub.f32 %v21542_v15, %v4228_v53 }
 0xadb   :  { %v19934_v17 = vpop.eup %19933 }
 0xadc   :  { %v4262_v47 = vsel %vm1149_vm2, %v19934_v17, 0.0  ;;  %v4231_v39 = vpop.xlane.xlu0 %4230  ;;  %v4252_v52 = vmul.f32 1.442695, %v4238_v36 }
 0xadd   :  { %4263 = vadd.xlane.f32.xlu1 %v4262_v47  ;;  %v4239_v8 = vsub.f32 %v4203_v55, %v4231_v39  ;;  %v4305_v15 = vpop.permute.xlu1 %4304 }
 0xadf   :  { %v19936_v46 = vpop.eup %19935  ;;  %v4254_v38 = vmul.f32 1.442695, %v4239_v8 }
 0xae0   :  { %v4265_v48 = vsel %vm1149_vm2, %v19936_v46, 0.0 }
 0xae1   :  { %4266 = vadd.xlane.f32.xlu0 %v4265_v48  ;;  %19941 = vpow2.f32 %v4254_v38 }
 0xae2   :  { %19943 = vpow2.f32 %v4252_v52 }
 0xae3   :  { %v21554_v61 = vpop.eup %19937 }
 0xae4   :  { %v4268_v0 = vsel %vm1149_vm2, %v21554_v61, 0.0 }
 0xae5   :  { %4269 = vadd.xlane.f32.xlu1 %v4268_v0 }
 0xae6   :  { %v21558_v14 = vpop.eup %19939 }
 0xae7   :  { %v4271_v2 = vsel %vm1149_vm2, %v21558_v14, 0.0 }
 0xae8   :  { %4272 = vadd.xlane.f32.xlu0 %v4271_v2 }
 0xaee   :  { %v21569_v62 = vpop.eup %19941 }
 0xaef   :  { %v21571_v19 = vpop.eup %19943  ;;  %v4277_v40 = vsel %vm1149_vm2, %v21569_v62, 0.0 }
 0xaf0   :  { %v4274_v6 = vsel %vm1149_vm2, %v21571_v19, 0.0 }
 0xaf6   :  { %4400 = vrot.lane.b32.xlu1 %v20996_v27, %s20361_s13 }
 0xafa   :  { %4448 = vrot.lane.b32.xlu1 %v21023_v42, %s20361_s13 }
 0xafe   :  { %4352 = vrot.lane.b32.xlu0 %v21013_v16, %s20361_s13 }
 0xb1d   :  { %4278 = vadd.xlane.f32.xlu0 %v4277_v40 }
 0xb1e   :  { %4275 = vadd.xlane.f32.xlu1 %v4274_v6 }
 0xb2f   :  { %4544 = vrot.lane.b32.xlu1 %v21053_v3, %s20361_s13 }
 0xb33   :  { %4640 = vrot.lane.b32.xlu1 %v21070_v18, %s20361_s13  ;;  %4496 = vrot.lane.b32.xlu0 %v21031_v5, %s20361_s13 }
 0xb37   :  { %4592 = vrot.lane.b32.xlu0 %v21041_v20, %s20361_s13 }
 0xb5e   :  { %v4258_v55 = vpop.xlane.xlu1 %4257 }
 0xb5f   :  { %19945 = vrcp.f32 %v4258_v55 }
 0xb61   :  { %v4261_v24 = vpop.xlane.xlu0 %4260 }
 0xb62   :  { %19947 = vrcp.f32 %v4261_v24 }
 0xb66   :  { %v4264_v12 = vpop.xlane.xlu1 %4263 }
 0xb67   :  { %19949 = vrcp.f32 %v4264_v12 }
 0xb6a   :  { %v4267_v54 = vpop.xlane.xlu0 %4266 }
 0xb6b   :  { %19951 = vrcp.f32 %v4267_v54 }
 0xb6c   :  { %v19946_v26 = vpop.eup %19945 }
 0xb6d   :  { %v4288_v41 = vmul.f32 %v19946_v26, %v19930_v23 }
 0xb6e   :  { %v4270_v28 = vpop.xlane.xlu1 %4269 }
 0xb6f   :  { %v19948_v22 = vpop.eup %19947  ;;  %19953 = vrcp.f32 %v4270_v28  ;;  %v4296_v7 = vpack.c.bf16 %v4288_v41, %v4288_v41 }
 0xb70   :  { %v4289_v35 = vmul.f32 %v19948_v22, %v19932_v29 }
 0xb71   :  { %v4273_v4 = vpop.xlane.xlu0 %4272  ;;  %v4310_v58 = vsel %vm1149_vm2, %v4296_v7, 0  ;;  %v25063_v7 = vld [vmem:[#allocation31_spill] sm:$0xff] }
 0xb72   :  { %19955 = vrcp.f32 %v4273_v4  ;;  %17855 = vmatpush3.bf16.xpose.msra.mxu1 %v4310_v58  ;;  %v4297_v49 = vpack.c.bf16 %v4289_v35, %v4289_v35  ;;  %v4401_v53 = vpop.permute.xlu1 %4400  ;;  %v19405_v35 = vunpack.i.l.bf16 %v25063_v7  ;;  %v25064_v4 = vld [vmem:[#allocation29_spill] sm:$0xff] }
 0xb73   :  { %17866 = vmatprep.subr.bf16.mxu1 %v25004_v30  ;;  %v19400_v58 = vunpack.i.l.bf16 %v25064_v4 }
 0xb74   :  { %v19950_v44 = vpop.eup %19949  ;;  %v4358_v31 = vsel %vm1149_vm2, %v4297_v49, 0 }
 0xb75   :  { %17861 = vmatpush3.bf16.xpose.msra.mxu0 %v4358_v31  ;;  %v4290_v63 = vmul.f32 %v19950_v44, %v19934_v17  ;;  %v4353_v48 = vpop.permute.xlu0 %4352  ;;  %v25065_v44 = vld [vmem:[#allocation28_spill] sm:$0xff] }
 0xb76   :  { %17872 = vmatprep.subr.bf16.mxu0 %v25004_v30  ;;  %v19241_v31 = vunpack.i.l.bf16 %v25065_v44 }
 0xb77   :  { %v4298_v23 = vpack.c.bf16 %v4290_v63, %v4290_v63  ;;  %v21627_v63 = vpack.c.bf16 %v19405_v35, %v19400_v58  ;;  %v25075_v35 = vld [vmem:[#allocation75_spill] sm:$0xff] }
 0xb78   :  { %v19952_v59 = vpop.eup %19951  ;;  %v25076_v58 = vld [vmem:[#allocation3_spill] sm:$0xff] }
 0xb79   :  { %17857 = vmatmul.mubr.msk.bf16.vlgmr.msra.gmra.mxu1 %vm1149_vm2, %v4305_v15  ;;  %v4406_v29 = vsel %vm1149_vm2, %v4298_v23, 0  ;;  %v4291_v47 = vmul.f32 %v19952_v59, %v19936_v46 }
 0xb7a   :  { %17867 = vmatpush3.bf16.xpose.msra.mxu1 %v4406_v29  ;;  %17868 = vmatprep.mubr.msk.bf16.mxu1 %vm20357_vm1, %v25004_v30 }
 0xb7b   :  { %v4299_v0 = vpack.c.bf16 %v4291_v47, %v4291_v47  ;;  %17878 = vmatprep.subr.bf16.mxu1 %v25004_v30  ;;  %v4779_v47 = vsel %vm1149_vm2, %v21627_v63, 0 }
 0xb7c   :  { %v19954_v2 = vpop.eup %19953  ;;  %17863 = vmatmul.mubr.msk.bf16.vlgmr.msra.gmra.mxu0 %vm1149_vm2, %v4353_v48 }
 0xb7d   :  { %v4454_v17 = vsel %vm1149_vm2, %v4299_v0, 0  ;;  %v4292_v39 = vmul.f32 %v19954_v2, %v21554_v61  ;;  %17874 = vmatprep.mubr.msk.bf16.mxu0 %vm20357_vm1, %v25004_v30  ;;  %v4449_v61 = vpop.permute.xlu1 %4448  ;;  %v19403_v0 = vunpack.i.h.bf16 %v25064_v4  ;;  %v19408_v2 = vunpack.i.h.bf16 %v25063_v7 }
 0xb7e   :  { %17873 = vmatpush3.bf16.xpose.msra.mxu0 %v4454_v17  ;;  %v19244_v17 = vunpack.i.h.bf16 %v25065_v44  ;;  %v19567_v4 = vunpack.i.h.bf16 %v25075_v35 }
 0xb7f   :  { %v19956_v46 = vpop.eup %19955  ;;  %v4300_v8 = vpack.c.bf16 %v4292_v39, %v4292_v39  ;;  %17884 = vmatprep.subr.bf16.mxu0 %v25004_v30 }
 0xb80   :  { %v4293_v36 = vmul.f32 %v19956_v46, %v21558_v14 }
 0xb81   :  { %17869 = vmatmul.mubr.msk.bf16.vlgmr.msra.gmra.mxu1 %vm1149_vm2, %v4401_v53  ;;  %v4502_v38 = vsel %vm1149_vm2, %v4300_v8, 0  ;;  %v21647_v53 = vpack.c.bf16 %v19408_v2, %v19403_v0  ;;  %v25067_v8 = vld [vmem:[#allocation7_spill] sm:$0xff] }
 0xb82   :  { %17879 = vmatpush3.bf16.xpose.msra.mxu1 %v4502_v38  ;;  %v4301_v52 = vpack.c.bf16 %v4293_v36, %v4293_v36  ;;  %17880 = vmatprep.mubr.msk.bf16.mxu1 %vm20357_vm1, %v25004_v30  ;;  %v4871_v36 = vsel %vm1149_vm2, %v25067_v8, 0  ;;  %v25068_v38 = vld [vmem:[#allocation55_spill] sm:$0xff] }
 0xb83   :  { %17890 = vmatprep.subr.bf16.mxu1 %v25004_v30 }
 0xb84   :  { %v4550_v40 = vsel %vm1149_vm2, %v4301_v52, 0  ;;  %v19651_v52 = vunpack.i.l.bf16 %v25068_v38 }
 0xb85   :  { %17875 = vmatmul.mubr.msk.bf16.vlgmr.msra.gmra.mxu0 %vm1149_vm2, %v4449_v61  ;;  %v25069_v61 = vld [vmem:[#allocation53_spill] sm:$0xff] }
 0xb86   :  { %17885 = vmatpush3.bf16.xpose.msra.mxu0 %v4550_v40  ;;  %17886 = vmatprep.mubr.msk.bf16.mxu0 %vm20357_vm1, %v25004_v30  ;;  %v19646_v40 = vunpack.i.l.bf16 %v25069_v61 }
 0xb87   :  { %17896 = vmatprep.subr.bf16.mxu0 %v25004_v30 }
 0xba6   :  { %v4279_v14 = vpop.xlane.xlu0 %4278 }
 0xba7   :  { %19957 = vrcp.f32 %v4279_v14  ;;  %v4276_v6 = vpop.xlane.xlu1 %4275  ;;  %v25070_v14 = vld [vmem:[#allocation4_spill] sm:$0xff] }
 0xba8   :  { %19959 = vrcp.f32 %v4276_v6  ;;  %v4825_v6 = vsel %vm1149_vm2, %v25070_v14, 0 }
 0xbaa   :  { %v4497_v15 = vpop.permute.xlu0 %4496 }
 0xbab   :  { %v4545_v55 = vpop.permute.xlu1 %4544  ;;  %17881 = vmatmul.mubr.msk.bf16.vlgmr.msra.gmra.mxu1 %vm1149_vm2, %v4497_v15  ;;  %v25071_v15 = vld [vmem:[#allocation52_spill] sm:$0xff] }
 0xbac   :  { %17887 = vmatmul.mubr.msk.bf16.vlgmr.msra.gmra.mxu0 %vm1149_vm2, %v4545_v55  ;;  %17892 = vmatprep.mubr.msk.bf16.mxu1 %vm20357_vm1, %v25004_v30  ;;  %v19487_v55 = vunpack.i.l.bf16 %v25071_v15 }
 0xbad   :  { %17898 = vmatprep.mubr.msk.bf16.mxu0 %vm20357_vm1, %v25004_v30 }
 0xbae   :  { %v4593_v29 = vpop.permute.xlu0 %4592 }
 0xbaf   :  { %v4641_v59 = vpop.permute.xlu1 %4640 }
 0xbb4   :  { %v19958_v24 = vpop.eup %19957 }
 0xbb5   :  { %v19960_v12 = vpop.eup %19959  ;;  %v4295_v54 = vmul.f32 %v19958_v24, %v21569_v62  ;;  %v25066_v62 = vld [vmem:[#allocation27_spill] sm:$0xff] }
 0xbb6   :  { %v4294_v26 = vmul.f32 %v19960_v12, %v21571_v19  ;;  %v19236_v19 = vunpack.i.l.bf16 %v25066_v62  ;;  %v19239_v39 = vunpack.i.h.bf16 %v25066_v62  ;;  %v25072_v24 = vld [vmem:[#allocation51_spill] sm:$0xff]  ;;  %v19649_v62 = vunpack.i.h.bf16 %v25069_v61 }
 0xbb7   :  { %v4303_v41 = vpack.c.bf16 %v4295_v54, %v4295_v54  ;;  %v19482_v12 = vunpack.i.l.bf16 %v25072_v24  ;;  %v21669_v54 = vpack.c.bf16 %v19651_v52, %v19646_v40  ;;  %v25078_v52 = vld [vmem:[#allocation80_spill] sm:$0xff] }
 0xbb8   :  { %v4302_v28 = vpack.c.bf16 %v4294_v26, %v4294_v26  ;;  %v21629_v23 = vpack.c.bf16 %v19241_v31, %v19236_v19  ;;  %v21649_v46 = vpack.c.bf16 %v19244_v17, %v19239_v39  ;;  %v19564_v31 = vunpack.i.l.bf16 %v25075_v35 }
 0xbb9   :  { %v4646_v22 = vsel %vm1149_vm2, %v4303_v41, 0  ;;  %v21671_v26 = vpack.c.bf16 %v19487_v55, %v19482_v12  ;;  %v25073_v41 = vld [vmem:[#allocation5_spill] sm:$0xff]  ;;  %v19654_v19 = vunpack.i.h.bf16 %v25068_v38  ;;  %v19736_v61 = vunpack.i.h.bf16 %v25078_v52 }
 0xbba   :  { %v4598_v49 = vsel %vm1149_vm2, %v4302_v28, 0  ;;  %17897 = vmatpush3.bf16.xpose.msra.mxu0 %v4646_v22  ;;  %v4733_v48 = vsel %vm1149_vm2, %v21629_v23, 0  ;;  %v4963_v28 = vsel %vm1149_vm2, %v21669_v54, 0  ;;  %v25074_v22 = vld [vmem:[#allocation77_spill] sm:$0xff] }
 0xbbb   :  { %17891 = vmatpush3.bf16.xpose.msra.mxu1 %v4598_v49  ;;  %17908 = vmatprep.subr.bf16.mxu0 %v25004_v30  ;;  %v19572_v7 = vunpack.i.h.bf16 %v25074_v22  ;;  %v4917_v49 = vsel %vm1149_vm2, %v21671_v26, 0  ;;  %v19569_v44 = vunpack.i.l.bf16 %v25074_v22  ;;  %v21699_v0 = vpack.c.bf16 %v19654_v19, %v19649_v62 }
 0xbbc   :  { %17902 = vmatprep.subr.bf16.mxu1 %v25004_v30 }
 0xbc1   :  { %17899 = vmatmul.mubr.msk.bf16.vlgmr.msra.gmra.mxu0 %vm1149_vm2, %v4641_v59  ;;  %v19490_v59 = vunpack.i.h.bf16 %v25071_v15 }
 0xbc2   :  { %17893 = vmatmul.mubr.msk.bf16.vlgmr.msra.gmra.mxu1 %vm1149_vm2, %v4593_v29  ;;  %17909 = vmatpush3.bf16.xpose.msra.mxu0 %v4779_v47  ;;  %v21694_v29 = vpack.c.bf16 %v19572_v7, %v19567_v4  ;;  %v19485_v47 = vunpack.i.h.bf16 %v25072_v24 }
 0xbc3   :  { %17903 = vmatpush3.bf16.xpose.msra.mxu1 %v4733_v48  ;;  %17904 = vmatprep.mubr.msk.bf16.mxu1 %vm20357_vm1, %v25004_v30  ;;  %v21697_v48 = vpack.c.bf16 %v19569_v44, %v19564_v31 }
 0xbc4   :  { %17910 = vmatprep.mubr.msk.bf16.mxu0 %vm20357_vm1, %v25004_v30  ;;  %17914 = vmatprep.subr.bf16.mxu1 %v25004_v30  ;;  %v21701_v2 = vpack.c.bf16 %v19490_v59, %v19485_v47  ;;  %v5055_v17 = vsel %vm1149_vm2, %v21694_v29, 0 }
 0xbc5   :  { %17920 = vmatprep.subr.bf16.mxu0 %v25004_v30  ;;  %v5009_v39 = vsel %vm1149_vm2, %v21697_v48, 0 }
 0xbc9   :  { %17911 = vmatmul.mubr.msk.bf16.vlgmr.msra.gmra.mxu0 %vm1149_vm2, %v21647_v53 }
 0xbca   :  { %17905 = vmatmul.mubr.msk.bf16.vlgmr.msra.gmra.mxu1 %vm1149_vm2, %v21649_v46  ;;  %17921 = vmatpush3.bf16.xpose.msra.mxu0 %v4871_v36  ;;  %v25077_v36 = vld [vmem:[#allocation78_spill] sm:$0xff] }
 0xbcb   :  { %17915 = vmatpush3.bf16.xpose.msra.mxu1 %v4825_v6  ;;  %17916 = vmatprep.mubr.msk.bf16.mxu1 %vm20357_vm1, %v25004_v30  ;;  %v19731_v38 = vunpack.i.h.bf16 %v25077_v36  ;;  %v19728_v40 = vunpack.i.l.bf16 %v25077_v36  ;;  %v19733_v6 = vunpack.i.l.bf16 %v25078_v52 }
 0xbcc   :  { %17922 = vmatprep.mubr.msk.bf16.mxu0 %vm20357_vm1, %v25004_v30  ;;  %17926 = vmatprep.subr.bf16.mxu1 %v25004_v30 }
 0xbcd   :  { %17932 = vmatprep.subr.bf16.mxu0 %v25004_v30  ;;  %v21721_v15 = vpack.c.bf16 %v19736_v61, %v19731_v38  ;;  %v21723_v55 = vpack.c.bf16 %v19733_v6, %v19728_v40 }
 0xbd1   :  { %17923 = vmatmul.mubr.msk.bf16.vlgmr.msra.gmra.mxu0 %vm1149_vm2, %v25073_v41 }
 0xbd2   :  { %17917 = vmatmul.mubr.msk.bf16.vlgmr.msra.gmra.mxu1 %vm1149_vm2, %v25076_v58  ;;  %17933 = vmatpush3.bf16.xpose.msra.mxu0 %v4963_v28 }
 0xbd3   :  { %17927 = vmatpush3.bf16.xpose.msra.mxu1 %v4917_v49  ;;  %17928 = vmatprep.mubr.msk.bf16.mxu1 %vm20357_vm1, %v25004_v30 }
 0xbd4   :  { %17934 = vmatprep.mubr.msk.bf16.mxu0 %vm20357_vm1, %v25004_v30  ;;  %17938 = vmatprep.subr.bf16.mxu1 %v25004_v30 }
 0xbd5   :  { %17944 = vmatprep.subr.bf16.mxu0 %v25004_v30 }
 0xbd9   :  { %17935 = vmatmul.mubr.msk.bf16.vlgmr.msra.gmra.mxu0 %vm1149_vm2, %v21699_v0 }
 0xbda   :  { %17929 = vmatmul.mubr.msk.bf16.vlgmr.msra.gmra.mxu1 %vm1149_vm2, %v21701_v2  ;;  %17945 = vmatpush3.bf16.xpose.msra.mxu0 %v5055_v17 }
 0xbdb   :  { %17939 = vmatpush3.bf16.xpose.msra.mxu1 %v5009_v39  ;;  %17940 = vmatprep.mubr.msk.bf16.mxu1 %vm20357_vm1, %v25004_v30 }
 0xbdc   :  { %17946 = vmatprep.mubr.msk.bf16.mxu0 %vm20357_vm1, %v25004_v30  ;;  %17950 = vmatprep.subr.bf16.mxu1 %v25004_v30 }
 0xbdd   :  { %17956 = vmatprep.subr.bf16.mxu0 %v25004_v30 }
 0xbe1   :  { %17947 = vmatmul.mubr.msk.bf16.vlgmr.msra.gmra.mxu0 %vm1149_vm2, %v21721_v15 }
 0xbe2   :  { %17941 = vmatmul.mubr.msk.bf16.vlgmr.msra.gmra.mxu1 %vm1149_vm2, %v21723_v55  ;;  %17958 = vmatprep.mubr.msk.bf16.mxu0 %vm20357_vm1, %v25004_v30 }
 0xbe3   :  { %17952 = vmatprep.mubr.msk.bf16.mxu1 %vm20357_vm1, %v25004_v30 }
 0xc39   :  { %v21733_v24 = vpop.f32.mrf.mxu1 }
 0xc3a   :  { %25079 = vst [vmem:[#allocation31_spill] sm:$0xff] %v21733_v24 }
 0xc3b   :  { %v17858_v12 = vpop.f32.mrf.mxu1 }
 0xc3c   :  { %v21735_v28 = vpop.f32.mrf.mxu0 }
 0xc3d   :  { %25080 = vst [vmem:[#allocation29_spill] sm:$0xff] %v21735_v28  ;;  %v4349_v22 = vpop.f32.mrf.mxu1 }
 0xc3e   :  { %v17864_v7 = vpop.f32.mrf.mxu0 }
 0xc3f   :  { %v17859_v35 = vpop.f32.mrf.mxu1 }
 0xc40   :  { %v4397_v4 = vpop.f32.mrf.mxu0 }
 0xc41   :  { %v21737_v49 = vpop.f32.mrf.mxu1 }
 0xc42   :  { %25081 = vst [vmem:[#allocation28_spill] sm:$0xff] %v21737_v49  ;;  %v17865_v44 = vpop.f32.mrf.mxu0 }
 0xc43   :  { %v17870_v31 = vpop.f32.mrf.mxu1 }
 0xc45   :  { %v4445_v62 = vpop.f32.mrf.mxu1  ;;  %v21739_v19 = vpop.f32.mrf.mxu0 }
 0xc46   :  { %25082 = vst [vmem:[#allocation27_spill] sm:$0xff] %v21739_v19 }
 0xc47   :  { %v17871_v59 = vpop.f32.mrf.mxu1  ;;  %v17876_v47 = vpop.f32.mrf.mxu0 }
 0xc49   :  { %v4493_v17 = vpop.f32.mrf.mxu0 }
 0xc4b   :  { %v17877_v39 = vpop.f32.mrf.mxu0 }
 0xc6b   :  { %v21741_v36 = vpop.f32.mrf.mxu1 }
 0xc6c   :  { %25083 = vst [vmem:[#allocation7_spill] sm:$0xff] %v21741_v36  ;;  %v21743_v38 = vpop.f32.mrf.mxu0 }
 0xc6d   :  { %25084 = vst [vmem:[#allocation55_spill] sm:$0xff] %v21743_v38  ;;  %v17882_v52 = vpop.f32.mrf.mxu1 }
 0xc6e   :  { %v17888_v61 = vpop.f32.mrf.mxu0 }
 0xc6f   :  { %v4541_v40 = vpop.f32.mrf.mxu1 }
 0xc70   :  { %v4589_v6 = vpop.f32.mrf.mxu0 }
 0xc71   :  { %v17883_v12 = vpop.f32.mrf.mxu1 }
 0xc72   :  { %v17889_v22 = vpop.f32.mrf.mxu0 }
 0xc81   :  { %v21745_v7 = vpop.f32.mrf.mxu0 }
 0xc82   :  { %v21747_v35 = vpop.f32.mrf.mxu1 }
 0xc83   :  { %v17900_v4 = vpop.f32.mrf.mxu0 }
 0xc84   :  { %v17894_v44 = vpop.f32.mrf.mxu1 }
 0xc85   :  { %v4685_v31 = vpop.f32.mrf.mxu0 }
 0xc86   :  { %v4637_v62 = vpop.f32.mrf.mxu1 }
 0xc87   :  { %v17901_v59 = vpop.f32.mrf.mxu0 }
 0xc88   :  { %v17895_v47 = vpop.f32.mrf.mxu1 }
 0xc89   :  { %v4815_v17 = vpop.f32.mrf.mxu0 }
 0xc8a   :  { %v4769_v39 = vpop.f32.mrf.mxu1  ;;  %v4816_v24 = vadd.f32 %v4815_v17, %v20867_v43 }
 0xc8b   :  { %v4770_v52 = vadd.f32 %v4769_v39, %v20867_v43  ;;  %v17912_v61 = vpop.f32.mrf.mxu0 }
 0xc8c   :  { %v17906_v40 = vpop.f32.mrf.mxu1  ;;  %v5100_v6 = vsel %vm1149_vm2, %v4816_v24, -inf }
 0xc8d   :  { %5101 = vmax.xlane.f32.xlu1 %v5100_v6  ;;  %v4818_v12 = vpop.f32.mrf.mxu0  ;;  %v5097_v22 = vsel %vm1149_vm2, %v4770_v52, -inf }
 0xc8e   :  { %5098 = vmax.xlane.f32.xlu0 %v5097_v22  ;;  %v4772_v4 = vpop.f32.mrf.mxu1 }
 0xc8f   :  { %v17913_v44 = vpop.f32.mrf.mxu0 }
 0xc90   :  { %v17907_v31 = vpop.f32.mrf.mxu1 }
 0xc91   :  { %v4907_v62 = vpop.f32.mrf.mxu0 }
 0xc92   :  { %v4861_v59 = vpop.f32.mrf.mxu1  ;;  %v4908_v39 = vadd.f32 %v4907_v62, %v20867_v43 }
 0xc93   :  { %v4862_v47 = vadd.f32 %v4861_v59, %v20867_v43  ;;  %v17924_v28 = vpop.f32.mrf.mxu0 }
 0xc94   :  { %v17918_v17 = vpop.f32.mrf.mxu1  ;;  %v5106_v22 = vsel %vm1149_vm2, %v4908_v39, -inf }
 0xc95   :  { %v4910_v61 = vpop.f32.mrf.mxu0  ;;  %v5103_v40 = vsel %vm1149_vm2, %v4862_v47, -inf }
 0xc96   :  { %5104 = vmax.xlane.f32.xlu0 %v5103_v40  ;;  %v4864_v6 = vpop.f32.mrf.mxu1 }
 0xc97   :  { %v17925_v12 = vpop.f32.mrf.mxu0 }
 0xc98   :  { %v17919_v50 = vpop.f32.mrf.mxu1 }
 0xc99   :  { %v4999_v34 = vpop.f32.mrf.mxu0 }
 0xc9a   :  { %v5000_v4 = vadd.f32 %v4999_v34, %v20867_v43  ;;  %5107 = vmax.xlane.f32.xlu0 %v5106_v22  ;;  %v4953_v44 = vpop.f32.mrf.mxu1 }
 0xc9b   :  { %v4954_v31 = vadd.f32 %v4953_v44, %v20867_v43  ;;  %v17936_v28 = vpop.f32.mrf.mxu0 }
 0xc9c   :  { %v17930_v59 = vpop.f32.mrf.mxu1  ;;  %v5112_v62 = vsel %vm1149_vm2, %v5000_v4, -inf }
 0xc9d   :  { %v5002_v17 = vpop.f32.mrf.mxu0  ;;  %v5109_v61 = vsel %vm1149_vm2, %v4954_v31, -inf }
 0xc9e   :  { %5113 = vmax.xlane.f32.xlu0 %v5112_v62  ;;  %5110 = vmax.xlane.f32.xlu1 %v5109_v61  ;;  %v4956_v40 = vpop.f32.mrf.mxu1 }
 0xc9f   :  { %v17937_v50 = vpop.f32.mrf.mxu0 }
 0xca0   :  { %v17931_v6 = vpop.f32.mrf.mxu1 }
 0xca1   :  { %v5091_v12 = vpop.f32.mrf.mxu0 }
 0xca2   :  { %v5045_v1 = vpop.f32.mrf.mxu1  ;;  %v5092_v34 = vadd.f32 %v5091_v12, %v20867_v43 }
 0xca3   :  { %v21763_v22 = vadd.f32 %v5045_v1, %v20867_v43  ;;  %v17948_v44 = vpop.f32.mrf.mxu0 }
 0xca4   :  { %v17942_v28 = vpop.f32.mrf.mxu1  ;;  %v5118_v59 = vsel %vm1149_vm2, %v5092_v34, -inf }
 0xca5   :  { %v5094_v45 = vpop.f32.mrf.mxu0  ;;  %5119 = vmax.xlane.f32.xlu0 %v5118_v59  ;;  %v5115_v62 = vsel %vm1149_vm2, %v21763_v22, -inf }
 0xca6   :  { %5116 = vmax.xlane.f32.xlu1 %v5115_v62  ;;  %v5048_v17 = vpop.f32.mrf.mxu1 }
 0xca7   :  { %v17949_v61 = vpop.f32.mrf.mxu0 }
 0xca8   :  { %v17943_v40 = vpop.f32.mrf.mxu1 }
 0xcb7   :  { %5193 = vrot.lane.b32.xlu1 %v20984_v51, %s20362_s14 }
 0xd16   :  { %v5102_v50 = vpop.xlane.xlu1 %5101 }
 0xd17   :  { %v5122_v1 = vsub.f32 %v4816_v24, %v5102_v50  ;;  %v5099_v6 = vpop.xlane.xlu0 %5098 }
 0xd18   :  { %v5121_v12 = vsub.f32 %v4770_v52, %v5099_v6 }
 0xd19   :  { %v5131_v44 = vmul.f32 1.442695, %v5122_v1 }
 0xd1a   :  { %v5129_v28 = vmul.f32 1.442695, %v5121_v12 }
 0xd1b   :  { %19961 = vpow2.f32 %v5131_v44 }
 0xd1c   :  { %19963 = vpow2.f32 %v5129_v28 }
 0xd1f   :  { %v5105_v45 = vpop.xlane.xlu0 %5104 }
 0xd20   :  { %v5123_v59 = vsub.f32 %v4862_v47, %v5105_v45 }
 0xd22   :  { %v5133_v49 = vmul.f32 1.442695, %v5123_v59 }
 0xd23   :  { %v5108_v19 = vpop.xlane.xlu0 %5107 }
 0xd24   :  { %19965 = vpow2.f32 %v5133_v49  ;;  %v5124_v62 = vsub.f32 %v4908_v39, %v5108_v19 }
 0xd26   :  { %v5135_v17 = vmul.f32 1.442695, %v5124_v62 }
 0xd27   :  { %v5114_v61 = vpop.xlane.xlu0 %5113  ;;  %v5111_v40 = vpop.xlane.xlu1 %5110 }
 0xd28   :  { %v19962_v21 = vpop.eup %19961  ;;  %19967 = vpow2.f32 %v5135_v17  ;;  %v5126_v11 = vsub.f32 %v5000_v4, %v5114_v61  ;;  %v5125_v25 = vsub.f32 %v4954_v31, %v5111_v40 }
 0xd29   :  { %v19964_v24 = vpop.eup %19963  ;;  %v5148_v52 = vsel %vm1149_vm2, %v19962_v21, 0.0 }
 0xd2a   :  { %v5139_v50 = vmul.f32 1.442695, %v5126_v11  ;;  %v5137_v1 = vmul.f32 1.442695, %v5125_v25  ;;  %5149 = vadd.xlane.f32.xlu0 %v5148_v52  ;;  %v5145_v6 = vsel %vm1149_vm2, %v19964_v24, 0.0 }
 0xd2b   :  { %5146 = vadd.xlane.f32.xlu1 %v5145_v6 }
 0xd2c   :  { %19969 = vpow2.f32 %v5139_v50 }
 0xd2d   :  { %19971 = vpow2.f32 %v5137_v1 }
 0xd2e   :  { %v5120_v12 = vpop.xlane.xlu0 %5119 }
 0xd2f   :  { %v5128_v44 = vsub.f32 %v5092_v34, %v5120_v12  ;;  %v5117_v28 = vpop.xlane.xlu1 %5116 }
 0xd30   :  { %v5127_v59 = vsub.f32 %v21763_v22, %v5117_v28 }
 0xd31   :  { %v19966_v49 = vpop.eup %19965  ;;  %v5143_v45 = vmul.f32 1.442695, %v5128_v44 }
 0xd32   :  { %v5151_v19 = vsel %vm1149_vm2, %v19966_v49, 0.0  ;;  %v5141_v62 = vmul.f32 1.442695, %v5127_v59 }
 0xd33   :  { %5152 = vadd.xlane.f32.xlu1 %v5151_v19  ;;  %19973 = vpow2.f32 %v5143_v45  ;;  %v5194_v34 = vpop.permute.xlu1 %5193 }
 0xd34   :  { %19975 = vpow2.f32 %v5141_v62 }
 0xd35   :  { %v21773_v47 = vpop.eup %19967 }
 0xd36   :  { %v5154_v39 = vsel %vm1149_vm2, %v21773_v47, 0.0 }
 0xd37   :  { %5155 = vadd.xlane.f32.xlu0 %v5154_v39 }
 0xd39   :  { %v21777_v4 = vpop.eup %19969 }
 0xd3a   :  { %v21779_v11 = vpop.eup %19971  ;;  %v5160_v25 = vsel %vm1149_vm2, %v21777_v4, 0.0 }
 0xd3b   :  { %5161 = vadd.xlane.f32.xlu0 %v5160_v25  ;;  %v5157_v31 = vsel %vm1149_vm2, %v21779_v11, 0.0 }
 0xd3c   :  { %5158 = vadd.xlane.f32.xlu1 %v5157_v31 }
 0xd40   :  { %v21792_v17 = vpop.eup %19973 }
 0xd41   :  { %v5166_v61 = vsel %vm1149_vm2, %v21792_v17, 0.0  ;;  %v21796_v40 = vpop.eup %19975 }
 0xd42   :  { %v5163_v52 = vsel %vm1149_vm2, %v21796_v40, 0.0 }
 0xd4d   :  { %5289 = vrot.lane.b32.xlu1 %v20996_v27, %s20362_s14 }
 0xd51   :  { %5337 = vrot.lane.b32.xlu1 %v21023_v42, %s20362_s14  ;;  %5241 = vrot.lane.b32.xlu0 %v21013_v16, %s20362_s14 }
 0xd70   :  { %5167 = vadd.xlane.f32.xlu0 %v5166_v61 }
 0xd75   :  { %5164 = vadd.xlane.f32.xlu1 %v5163_v52 }
 0xd86   :  { %5433 = vrot.lane.b32.xlu1 %v21053_v3, %s20362_s14  ;;  %5385 = vrot.lane.b32.xlu0 %v21031_v5, %s20362_s14 }
 0xd8a   :  { %5529 = vrot.lane.b32.xlu1 %v21070_v18, %s20362_s14  ;;  %5481 = vrot.lane.b32.xlu0 %v21041_v20, %s20362_s14 }
 0xdb3   :  { %v5150_v22 = vpop.xlane.xlu0 %5149 }
 0xdb4   :  { %19977 = vrcp.f32 %v5150_v22  ;;  %v5147_v50 = vpop.xlane.xlu1 %5146 }
 0xdb5   :  { %19979 = vrcp.f32 %v5147_v50 }
 0xdbc   :  { %v5153_v1 = vpop.xlane.xlu1 %5152 }
 0xdbd   :  { %19981 = vrcp.f32 %v5153_v1 }
 0xdc0   :  { %v5156_v6 = vpop.xlane.xlu0 %5155 }
 0xdc1   :  { %v19978_v19 = vpop.eup %19977  ;;  %19983 = vrcp.f32 %v5156_v6 }
 0xdc2   :  { %v19980_v39 = vpop.eup %19979  ;;  %v5178_v25 = vmul.f32 %v19978_v19, %v19962_v21 }
 0xdc3   :  { %v5177_v31 = vmul.f32 %v19980_v39, %v19964_v24 }
 0xdc4   :  { %v5162_v12 = vpop.xlane.xlu0 %5161  ;;  %v5186_v44 = vpack.c.bf16 %v5178_v25, %v5178_v25 }
 0xdc5   :  { %19985 = vrcp.f32 %v5162_v12  ;;  %v5159_v28 = vpop.xlane.xlu1 %5158  ;;  %v5185_v45 = vpack.c.bf16 %v5177_v31, %v5177_v31 }
 0xdc6   :  { %19987 = vrcp.f32 %v5159_v28  ;;  %v5247_v59 = vsel %vm1149_vm2, %v5186_v44, 0 }
 0xdc7   :  { %17957 = vmatpush3.bf16.xpose.msra.mxu0 %v5247_v59  ;;  %v5199_v62 = vsel %vm1149_vm2, %v5185_v45, 0 }
 0xdc8   :  { %17951 = vmatpush3.bf16.xpose.msra.mxu1 %v5199_v62  ;;  %17968 = vmatprep.subr.bf16.mxu0 %v25004_v30  ;;  %v5242_v21 = vpop.permute.xlu0 %5241 }
 0xdc9   :  { %17962 = vmatprep.subr.bf16.mxu1 %v25004_v30  ;;  %v5290_v25 = vpop.permute.xlu1 %5289 }
 0xdca   :  { %v19982_v61 = vpop.eup %19981 }
 0xdcb   :  { %v5179_v52 = vmul.f32 %v19982_v61, %v19966_v49 }
 0xdcd   :  { %v5187_v24 = vpack.c.bf16 %v5179_v52, %v5179_v52  ;;  %v5338_v28 = vpop.permute.xlu1 %5337 }
 0xdce   :  { %v19984_v22 = vpop.eup %19983  ;;  %17959 = vmatmul.mubr.msk.bf16.vlgmr.msra.gmra.mxu0 %vm1149_vm2, %v5242_v21 }
 0xdcf   :  { %17953 = vmatmul.mubr.msk.bf16.vlgmr.msra.gmra.mxu1 %vm1149_vm2, %v5194_v34  ;;  %v5295_v50 = vsel %vm1149_vm2, %v5187_v24, 0  ;;  %v5180_v1 = vmul.f32 %v19984_v22, %v21773_v47  ;;  %17970 = vmatprep.mubr.msk.bf16.mxu0 %vm20357_vm1, %v25004_v30 }
 0xdd0   :  { %17963 = vmatpush3.bf16.xpose.msra.mxu1 %v5295_v50  ;;  %17964 = vmatprep.mubr.msk.bf16.mxu1 %vm20357_vm1, %v25004_v30 }
 0xdd1   :  { %v5188_v6 = vpack.c.bf16 %v5180_v1, %v5180_v1  ;;  %17974 = vmatprep.subr.bf16.mxu1 %v25004_v30 }
 0xdd2   :  { %v19986_v49 = vpop.eup %19985 }
 0xdd3   :  { %v19988_v19 = vpop.eup %19987  ;;  %v5343_v39 = vsel %vm1149_vm2, %v5188_v6, 0  ;;  %v5182_v34 = vmul.f32 %v19986_v49, %v21777_v4  ;;  %v5671_v6 = vrot.slane %v21627_v63, 4  ;;  %v5771_v63 = vrot.slane %v25067_v8, 4 }
 0xdd4   :  { %17969 = vmatpush3.bf16.xpose.msra.mxu0 %v5343_v39  ;;  %v5181_v47 = vmul.f32 %v19988_v19, %v21779_v11  ;;  %v5621_v39 = vrot.slane %v21629_v23, 4  ;;  %v5871_v8 = vrot.slane %v21669_v54, 4  ;;  %v5719_v54 = vrot.slane %v25076_v58, 4 }
 0xdd5   :  { %17980 = vmatprep.subr.bf16.mxu0 %v25004_v30  ;;  %v5190_v12 = vpack.c.bf16 %v5182_v34, %v5182_v34  ;;  %v5776_v23 = vsel %vm1149_vm2, %v5771_v63, 0  ;;  %v5921_v58 = vrot.slane %v21697_v48, 4  ;;  %v5919_v48 = vrot.slane %v21723_v55, 4 }
 0xdd6   :  { %v5189_v31 = vpack.c.bf16 %v5181_v47, %v5181_v47  ;;  %v5626_v34 = vsel %vm1149_vm2, %v5621_v39, 0  ;;  %v5721_v47 = vrot.slane %v25070_v14, 4  ;;  %v5876_v14 = vsel %vm1149_vm2, %v5871_v8, 0 }
 0xdd7   :  { %17965 = vmatmul.mubr.msk.bf16.vlgmr.msra.gmra.mxu1 %vm1149_vm2, %v5290_v25  ;;  %v5439_v4 = vsel %vm1149_vm2, %v5190_v12, 0  ;;  %v5669_v25 = vrot.slane %v21647_v53, 4  ;;  %v5619_v53 = vrot.slane %v21649_v46, 4  ;;  %v5769_v12 = vrot.slane %v25073_v41, 4 }
 0xdd8   :  { %v5391_v44 = vsel %vm1149_vm2, %v5189_v31, 0  ;;  %17976 = vmatprep.mubr.msk.bf16.mxu1 %vm20357_vm1, %v25004_v30  ;;  %v5726_v31 = vsel %vm1149_vm2, %v5721_v47, 0  ;;  %v5821_v46 = vrot.slane %v21671_v26, 4  ;;  %v5971_v41 = vrot.slane %v21694_v29, 4 }
 0xdd9   :  { %17975 = vmatpush3.bf16.xpose.msra.mxu1 %v5391_v44  ;;  %v5819_v29 = vrot.slane %v21701_v2, 4 }
 0xdda   :  { %17986 = vmatprep.subr.bf16.mxu1 %v25004_v30  ;;  %v5826_v44 = vsel %vm1149_vm2, %v5821_v46, 0  ;;  %v5976_v26 = vsel %vm1149_vm2, %v5971_v41, 0 }
 0xddb   :  { %17971 = vmatmul.mubr.msk.bf16.vlgmr.msra.gmra.mxu0 %vm1149_vm2, %v5338_v28  ;;  %v5869_v28 = vrot.slane %v21699_v0, 4  ;;  %v5926_v0 = vsel %vm1149_vm2, %v5921_v58, 0 }
 0xddc   :  { %17981 = vmatpush3.bf16.xpose.msra.mxu0 %v5439_v4  ;;  %17982 = vmatprep.mubr.msk.bf16.mxu0 %vm20357_vm1, %v25004_v30  ;;  %v5969_v4 = vrot.slane %v21721_v15, 4 }
 0xddd   :  { %17992 = vmatprep.subr.bf16.mxu0 %v25004_v30 }
 0xdf9   :  { %v5168_v11 = vpop.xlane.xlu0 %5167 }
 0xdfa   :  { %19989 = vrcp.f32 %v5168_v11 }
 0xdfd   :  { %v5386_v45 = vpop.permute.xlu0 %5385 }
 0xdfe   :  { %v5165_v59 = vpop.xlane.xlu1 %5164  ;;  %17977 = vmatmul.mubr.msk.bf16.vlgmr.msra.gmra.mxu1 %vm1149_vm2, %v5386_v45 }
 0xdff   :  { %19991 = vrcp.f32 %v5165_v59  ;;  %17988 = vmatprep.mubr.msk.bf16.mxu1 %vm20357_vm1, %v25004_v30 }
 0xe02   :  { %v5434_v62 = vpop.permute.xlu1 %5433 }
 0xe03   :  { %17983 = vmatmul.mubr.msk.bf16.vlgmr.msra.gmra.mxu0 %vm1149_vm2, %v5434_v62 }
 0xe04   :  { %17994 = vmatprep.mubr.msk.bf16.mxu0 %vm20357_vm1, %v25004_v30 }
 0xe06   :  { %v5530_v19 = vpop.permute.xlu1 %5529 }
 0xe07   :  { %v19990_v61 = vpop.eup %19989 }
 0xe08   :  { %v5184_v52 = vmul.f32 %v19990_v61, %v21792_v17  ;;  %v5676_v17 = vsel %vm1149_vm2, %v5671_v6, 0 }
 0xe0a   :  { %v5192_v21 = vpack.c.bf16 %v5184_v52, %v5184_v52 }
 0xe0c   :  { %v19992_v24 = vpop.eup %19991  ;;  %v5535_v22 = vsel %vm1149_vm2, %v5192_v21, 0 }
 0xe0d   :  { %17993 = vmatpush3.bf16.xpose.msra.mxu0 %v5535_v22  ;;  %v5183_v50 = vmul.f32 %v19992_v24, %v21796_v40  ;;  %v5482_v40 = vpop.permute.xlu0 %5481 }
 0xe0e   :  { %18004 = vmatprep.subr.bf16.mxu0 %v25004_v30 }
 0xe0f   :  { %v5191_v1 = vpack.c.bf16 %v5183_v50, %v5183_v50 }
 0xe11   :  { %v5487_v49 = vsel %vm1149_vm2, %v5191_v1, 0 }
 0xe12   :  { %17987 = vmatpush3.bf16.xpose.msra.mxu1 %v5487_v49 }
 0xe13   :  { %17998 = vmatprep.subr.bf16.mxu1 %v25004_v30 }
 0xe14   :  { %17995 = vmatmul.mubr.msk.bf16.vlgmr.msra.gmra.mxu0 %vm1149_vm2, %v5530_v19 }
 0xe15   :  { %18005 = vmatpush3.bf16.xpose.msra.mxu0 %v5676_v17  ;;  %18006 = vmatprep.mubr.msk.bf16.mxu0 %vm20357_vm1, %v25004_v30 }
 0xe16   :  { %18016 = vmatprep.subr.bf16.mxu0 %v25004_v30 }
 0xe19   :  { %17989 = vmatmul.mubr.msk.bf16.vlgmr.msra.gmra.mxu1 %vm1149_vm2, %v5482_v40 }
 0xe1a   :  { %17999 = vmatpush3.bf16.xpose.msra.mxu1 %v5626_v34  ;;  %18000 = vmatprep.mubr.msk.bf16.mxu1 %vm20357_vm1, %v25004_v30 }
 0xe1b   :  { %18010 = vmatprep.subr.bf16.mxu1 %v25004_v30 }
 0xe1c   :  { %18007 = vmatmul.mubr.msk.bf16.vlgmr.msra.gmra.mxu0 %vm1149_vm2, %v5669_v25 }
 0xe1d   :  { %18017 = vmatpush3.bf16.xpose.msra.mxu0 %v5776_v23  ;;  %18018 = vmatprep.mubr.msk.bf16.mxu0 %vm20357_vm1, %v25004_v30 }
 0xe1e   :  { %18028 = vmatprep.subr.bf16.mxu0 %v25004_v30 }
 0xe21   :  { %18001 = vmatmul.mubr.msk.bf16.vlgmr.msra.gmra.mxu1 %vm1149_vm2, %v5619_v53 }
 0xe22   :  { %18011 = vmatpush3.bf16.xpose.msra.mxu1 %v5726_v31  ;;  %18012 = vmatprep.mubr.msk.bf16.mxu1 %vm20357_vm1, %v25004_v30 }
 0xe23   :  { %18022 = vmatprep.subr.bf16.mxu1 %v25004_v30 }
 0xe24   :  { %18019 = vmatmul.mubr.msk.bf16.vlgmr.msra.gmra.mxu0 %vm1149_vm2, %v5769_v12 }
 0xe25   :  { %18029 = vmatpush3.bf16.xpose.msra.mxu0 %v5876_v14  ;;  %18030 = vmatprep.mubr.msk.bf16.mxu0 %vm20357_vm1, %v25004_v30 }
 0xe26   :  { %18040 = vmatprep.subr.bf16.mxu0 %v25004_v30 }
 0xe29   :  { %18013 = vmatmul.mubr.msk.bf16.vlgmr.msra.gmra.mxu1 %vm1149_vm2, %v5719_v54 }
 0xe2a   :  { %18023 = vmatpush3.bf16.xpose.msra.mxu1 %v5826_v44  ;;  %18024 = vmatprep.mubr.msk.bf16.mxu1 %vm20357_vm1, %v25004_v30 }
 0xe2b   :  { %18034 = vmatprep.subr.bf16.mxu1 %v25004_v30 }
 0xe2c   :  { %18031 = vmatmul.mubr.msk.bf16.vlgmr.msra.gmra.mxu0 %vm1149_vm2, %v5869_v28 }
 0xe2d   :  { %18041 = vmatpush3.bf16.xpose.msra.mxu0 %v5976_v26  ;;  %18042 = vmatprep.mubr.msk.bf16.mxu0 %vm20357_vm1, %v25004_v30 }
 0xe2e   :  { %18052 = vmatprep.subr.bf16.mxu0 %v25004_v30 }
 0xe31   :  { %18025 = vmatmul.mubr.msk.bf16.vlgmr.msra.gmra.mxu1 %vm1149_vm2, %v5819_v29 }
 0xe32   :  { %18035 = vmatpush3.bf16.xpose.msra.mxu1 %v5926_v0  ;;  %18036 = vmatprep.mubr.msk.bf16.mxu1 %vm20357_vm1, %v25004_v30 }
 0xe33   :  { %18046 = vmatprep.subr.bf16.mxu1 %v25004_v30 }
 0xe34   :  { %18043 = vmatmul.mubr.msk.bf16.vlgmr.msra.gmra.mxu0 %vm1149_vm2, %v5969_v4 }
 0xe35   :  { %18054 = vmatprep.mubr.msk.bf16.mxu0 %vm20357_vm1, %v25004_v30 }
 0xe39   :  { %18037 = vmatmul.mubr.msk.bf16.vlgmr.msra.gmra.mxu1 %vm1149_vm2, %v5919_v48 }
 0xe3a   :  { %18048 = vmatprep.mubr.msk.bf16.mxu1 %vm20357_vm1, %v25004_v30 }
 0xe8e   :  { %v21909_v2 = vpop.f32.mrf.mxu0 }
 0xe8f   :  { %25085 = vst [vmem:[#allocation53_spill] sm:$0xff] %v21909_v2  ;;  %v21911_v15 = vpop.f32.mrf.mxu1 }
 0xe90   :  { %25086 = vst [vmem:[#allocation4_spill] sm:$0xff] %v21911_v15  ;;  %v17960_v11 = vpop.f32.mrf.mxu0 }
 0xe91   :  { %v17954_v45 = vpop.f32.mrf.mxu1 }
 0xe92   :  { %v5286_v59 = vpop.f32.mrf.mxu0 }
 0xe93   :  { %v5238_v62 = vpop.f32.mrf.mxu1 }
 0xe94   :  { %v17961_v61 = vpop.f32.mrf.mxu0 }
 0xe95   :  { %v17955_v52 = vpop.f32.mrf.mxu1 }
 0xe97   :  { %v21913_v21 = vpop.f32.mrf.mxu1 }
 0xe98   :  { %25087 = vst [vmem:[#allocation52_spill] sm:$0xff] %v21913_v21 }
 0xe99   :  { %v17966_v24 = vpop.f32.mrf.mxu1 }
 0xe9b   :  { %v5334_v22 = vpop.f32.mrf.mxu1  ;;  %v21915_v55 = vpop.f32.mrf.mxu0 }
 0xe9c   :  { %25088 = vst [vmem:[#allocation51_spill] sm:$0xff] %v21915_v55 }
 0xe9d   :  { %v17967_v50 = vpop.f32.mrf.mxu1  ;;  %v17972_v1 = vpop.f32.mrf.mxu0 }
 0xe9f   :  { %v5382_v6 = vpop.f32.mrf.mxu0 }
 0xea1   :  { %v17973_v49 = vpop.f32.mrf.mxu0 }
 0xebe   :  { %v21917_v19 = vpop.f32.mrf.mxu1 }
 0xebf   :  { %25089 = vst [vmem:[#allocation5_spill] sm:$0xff] %v21917_v19 }
 0xec0   :  { %v17978_v17 = vpop.f32.mrf.mxu1 }
 0xec2   :  { %v5430_v39 = vpop.f32.mrf.mxu1 }
 0xec3   :  { %v21919_v40 = vpop.f32.mrf.mxu0 }
 0xec4   :  { %25090 = vst [vmem:[#allocation77_spill] sm:$0xff] %v21919_v40  ;;  %v17979_v63 = vpop.f32.mrf.mxu1 }
 0xec5   :  { %v17984_v34 = vpop.f32.mrf.mxu0 }
 0xec7   :  { %v5478_v25 = vpop.f32.mrf.mxu0 }
 0xec9   :  { %v17985_v23 = vpop.f32.mrf.mxu0 }
 0xed4   :  { %v21921_v47 = vpop.f32.mrf.mxu0 }
 0xed6   :  { %v17996_v53 = vpop.f32.mrf.mxu0 }
 0xed8   :  { %v5574_v8 = vpop.f32.mrf.mxu0 }
 0xed9   :  { %v21923_v31 = vpop.f32.mrf.mxu1 }
 0xeda   :  { %v17997_v12 = vpop.f32.mrf.mxu0 }
 0xedb   :  { %v17990_v14 = vpop.f32.mrf.mxu1 }
 0xedc   :  { %v5712_v46 = vpop.f32.mrf.mxu0 }
 0xedd   :  { %v5526_v54 = vpop.f32.mrf.mxu1  ;;  %v5713_v41 = vadd.f32 %v5712_v46, %v20867_v43 }
 0xede   :  { %v18008_v44 = vpop.f32.mrf.mxu0 }
 0xedf   :  { %v17991_v28 = vpop.f32.mrf.mxu1  ;;  %v6021_v26 = vsel %vm1149_vm2, %v5713_v41, -inf }
 0xee0   :  { %6022 = vmax.xlane.f32.xlu1 %v6021_v26  ;;  %v5715_v58 = vpop.f32.mrf.mxu0 }
 0xee1   :  { %v5662_v29 = vpop.f32.mrf.mxu1 }
 0xee2   :  { %v5663_v0 = vadd.f32 %v5662_v29, %v20867_v43  ;;  %v18009_v4 = vpop.f32.mrf.mxu0 }
 0xee3   :  { %v18002_v48 = vpop.f32.mrf.mxu1 }
 0xee4   :  { %v5812_v11 = vpop.f32.mrf.mxu0  ;;  %v6018_v45 = vsel %vm1149_vm2, %v5663_v0, -inf }
 0xee5   :  { %6019 = vmax.xlane.f32.xlu0 %v6018_v45  ;;  %v5665_v59 = vpop.f32.mrf.mxu1  ;;  %v5813_v6 = vadd.f32 %v5812_v11, %v20867_v43 }
 0xee6   :  { %v18020_v62 = vpop.f32.mrf.mxu0 }
 0xee7   :  { %v18003_v61 = vpop.f32.mrf.mxu1  ;;  %v6027_v53 = vsel %vm1149_vm2, %v5813_v6, -inf }
 0xee8   :  { %v5815_v52 = vpop.f32.mrf.mxu0 }
 0xee9   :  { %v5762_v24 = vpop.f32.mrf.mxu1 }
 0xeea   :  { %v5763_v22 = vadd.f32 %v5762_v24, %v20867_v43  ;;  %v18021_v50 = vpop.f32.mrf.mxu0 }
 0xeeb   :  { %v18014_v1 = vpop.f32.mrf.mxu1 }
 0xeec   :  { %v5912_v49 = vpop.f32.mrf.mxu0  ;;  %v6024_v17 = vsel %vm1149_vm2, %v5763_v22, -inf }
 0xeed   :  { %6025 = vmax.xlane.f32.xlu0 %v6024_v17  ;;  %v5765_v39 = vpop.f32.mrf.mxu1  ;;  %v5913_v25 = vadd.f32 %v5912_v49, %v20867_v43 }
 0xeee   :  { %v18032_v63 = vpop.f32.mrf.mxu0 }
 0xeef   :  { %v18015_v34 = vpop.f32.mrf.mxu1  ;;  %v6033_v44 = vsel %vm1149_vm2, %v5913_v25, -inf }
 0xef0   :  { %v5915_v23 = vpop.f32.mrf.mxu0 }
 0xef1   :  { %6028 = vmax.xlane.f32.xlu0 %v6027_v53  ;;  %v5862_v8 = vpop.f32.mrf.mxu1 }
 0xef2   :  { %v5863_v12 = vadd.f32 %v5862_v8, %v20867_v43  ;;  %v18033_v14 = vpop.f32.mrf.mxu0 }
 0xef3   :  { %v18026_v46 = vpop.f32.mrf.mxu1 }
 0xef4   :  { %v6012_v54 = vpop.f32.mrf.mxu0  ;;  %v6030_v28 = vsel %vm1149_vm2, %v5863_v12, -inf }
 0xef5   :  { %v21938_v26 = vadd.f32 %v6012_v54, %v20867_v43  ;;  %6034 = vmax.xlane.f32.xlu0 %v6033_v44  ;;  %6031 = vmax.xlane.f32.xlu1 %v6030_v28  ;;  %v5865_v58 = vpop.f32.mrf.mxu1 }
 0xef6   :  { %v18044_v29 = vpop.f32.mrf.mxu0 }
 0xef7   :  { %v18027_v4 = vpop.f32.mrf.mxu1  ;;  %v6039_v48 = vsel %vm1149_vm2, %v21938_v26, -inf }
 0xef8   :  { %v6015_v11 = vpop.f32.mrf.mxu0 }
 0xef9   :  { %6040 = vmax.xlane.f32.xlu0 %v6039_v48  ;;  %v5962_v45 = vpop.f32.mrf.mxu1 }
 0xefa   :  { %v5963_v59 = vadd.f32 %v5962_v45, %v20867_v43  ;;  %v18045_v62 = vpop.f32.mrf.mxu0 }
 0xefb   :  { %v18038_v61 = vpop.f32.mrf.mxu1 }
 0xefc   :  { %v6036_v52 = vsel %vm1149_vm2, %v5963_v59, -inf }
 0xefd   :  { %6037 = vmax.xlane.f32.xlu1 %v6036_v52  ;;  %v5965_v24 = vpop.f32.mrf.mxu1 }
 0xeff   :  { %v18039_v50 = vpop.f32.mrf.mxu1 }
 0xf0e   :  { %6114 = vrot.lane.b32.xlu1 %v20984_v51, %s20363_s15 }
 0xf69   :  { %v6023_v1 = vpop.xlane.xlu1 %6022 }
 0xf6a   :  { %v6043_v49 = vsub.f32 %v5713_v41, %v6023_v1 }
 0xf6c   :  { %v6052_v17 = vmul.f32 1.442695, %v6043_v49 }
 0xf6e   :  { %19993 = vpow2.f32 %v6052_v17  ;;  %v6020_v39 = vpop.xlane.xlu0 %6019 }
 0xf6f   :  { %v6042_v63 = vsub.f32 %v5663_v0, %v6020_v39 }
 0xf71   :  { %v6050_v34 = vmul.f32 1.442695, %v6042_v63 }
 0xf73   :  { %19995 = vpow2.f32 %v6050_v34 }
 0xf76   :  { %v6026_v23 = vpop.xlane.xlu0 %6025 }
 0xf77   :  { %v6044_v53 = vsub.f32 %v5763_v22, %v6026_v23 }
 0xf79   :  { %v6054_v8 = vmul.f32 1.442695, %v6044_v53 }
 0xf7a   :  { %v6029_v14 = vpop.xlane.xlu0 %6028 }
 0xf7b   :  { %v19994_v46 = vpop.eup %19993  ;;  %19997 = vpow2.f32 %v6054_v8  ;;  %v6045_v54 = vsub.f32 %v5813_v6, %v6029_v14 }
 0xf7c   :  { %v6069_v44 = vsel %vm1149_vm2, %v19994_v46, 0.0 }
 0xf7d   :  { %v6056_v28 = vmul.f32 1.442695, %v6045_v54  ;;  %6070 = vadd.xlane.f32.xlu0 %v6069_v44 }
 0xf7e   :  { %v6035_v58 = vpop.xlane.xlu0 %6034  ;;  %v6032_v29 = vpop.xlane.xlu1 %6031 }
 0xf7f   :  { %19999 = vpow2.f32 %v6056_v28  ;;  %v6047_v41 = vsub.f32 %v5913_v25, %v6035_v58  ;;  %v6046_v4 = vsub.f32 %v5863_v12, %v6032_v29 }
 0xf80   :  { %v19996_v48 = vpop.eup %19995 }
 0xf81   :  { %v6060_v0 = vmul.f32 1.442695, %v6047_v41  ;;  %v6058_v11 = vmul.f32 1.442695, %v6046_v4  ;;  %v6066_v45 = vsel %vm1149_vm2, %v19996_v48, 0.0 }
 0xf82   :  { %6067 = vadd.xlane.f32.xlu1 %v6066_v45  ;;  %v6041_v50 = vpop.xlane.xlu0 %6040 }
 0xf83   :  { %20001 = vpow2.f32 %v6060_v0  ;;  %v6049_v1 = vsub.f32 %v21938_v26, %v6041_v50 }
 0xf84   :  { %20003 = vpow2.f32 %v6058_v11 }
 0xf85   :  { %v6064_v17 = vmul.f32 1.442695, %v6049_v1 }
 0xf86   :  { %v6038_v49 = vpop.xlane.xlu1 %6037 }
 0xf87   :  { %v6048_v39 = vsub.f32 %v5963_v59, %v6038_v49  ;;  %20005 = vpow2.f32 %v6064_v17 }
 0xf88   :  { %v19998_v22 = vpop.eup %19997 }
 0xf89   :  { %v6072_v6 = vsel %vm1149_vm2, %v19998_v22, 0.0  ;;  %v6062_v63 = vmul.f32 1.442695, %v6048_v39 }
 0xf8a   :  { %6073 = vadd.xlane.f32.xlu1 %v6072_v6  ;;  %v6115_v59 = vpop.permute.xlu1 %6114 }
 0xf8b   :  { %20007 = vpow2.f32 %v6062_v63 }
 0xf8c   :  { %v21949_v62 = vpop.eup %19999 }
 0xf8d   :  { %v6075_v61 = vsel %vm1149_vm2, %v21949_v62, 0.0 }
 0xf8e   :  { %6076 = vadd.xlane.f32.xlu0 %v6075_v61 }
 0xf90   :  { %v21953_v25 = vpop.eup %20001 }
 0xf91   :  { %v21955_v12 = vpop.eup %20003  ;;  %v6081_v52 = vsel %vm1149_vm2, %v21953_v25, 0.0 }
 0xf92   :  { %6082 = vadd.xlane.f32.xlu0 %v6081_v52  ;;  %v6078_v24 = vsel %vm1149_vm2, %v21955_v12, 0.0 }
 0xf93   :  { %6079 = vadd.xlane.f32.xlu1 %v6078_v24 }
 0xf94   :  { %v21968_v34 = vpop.eup %20005 }
 0xf95   :  { %v6087_v23 = vsel %vm1149_vm2, %v21968_v34, 0.0 }
 0xf98   :  { %v21972_v53 = vpop.eup %20007 }
 0xf99   :  { %v6084_v8 = vsel %vm1149_vm2, %v21972_v53, 0.0 }
 0xfa4   :  { %6210 = vrot.lane.b32.xlu1 %v20996_v27, %s20363_s15 }
 0xfa8   :  { %6258 = vrot.lane.b32.xlu1 %v21023_v42, %s20363_s15  ;;  %6162 = vrot.lane.b32.xlu0 %v21013_v16, %s20363_s15 }
 0xfc7   :  { %6088 = vadd.xlane.f32.xlu0 %v6087_v23 }
 0xfcc   :  { %6085 = vadd.xlane.f32.xlu1 %v6084_v8 }
 0xfdd   :  { %6354 = vrot.lane.b32.xlu1 %v21053_v3, %s20363_s15  ;;  %6306 = vrot.lane.b32.xlu0 %v21031_v5, %s20363_s15 }
 0xfe1   :  { %6450 = vrot.lane.b32.xlu1 %v21070_v18, %s20363_s15  ;;  %6402 = vrot.lane.b32.xlu0 %v21041_v20, %s20363_s15 }
0x1006   :  { %v6071_v26 = vpop.xlane.xlu0 %6070 }
0x1007   :  { %20009 = vrcp.f32 %v6071_v26 }
0x100b   :  { %v6068_v14 = vpop.xlane.xlu1 %6067 }
0x100c   :  { %20011 = vrcp.f32 %v6068_v14 }
0x1013   :  { %v6074_v54 = vpop.xlane.xlu1 %6073 }
0x1014   :  { %v20010_v44 = vpop.eup %20009  ;;  %20013 = vrcp.f32 %v6074_v54 }
0x1015   :  { %v6099_v28 = vmul.f32 %v20010_v44, %v19994_v46 }
0x1017   :  { %v6077_v58 = vpop.xlane.xlu0 %6076  ;;  %v6107_v29 = vpack.c.bf16 %v6099_v28, %v6099_v28 }
0x1018   :  { %20015 = vrcp.f32 %v6077_v58 }
0x1019   :  { %v20012_v41 = vpop.eup %20011  ;;  %v6168_v4 = vsel %vm1149_vm2, %v6107_v29, 0 }
0x101a   :  { %18053 = vmatpush3.bf16.xpose.msra.mxu0 %v6168_v4  ;;  %v6098_v0 = vmul.f32 %v20012_v41, %v19996_v48 }
0x101b   :  { %v6083_v11 = vpop.xlane.xlu0 %6082  ;;  %18064 = vmatprep.subr.bf16.mxu0 %v25004_v30 }
0x101c   :  { %20017 = vrcp.f32 %v6083_v11  ;;  %v6080_v45 = vpop.xlane.xlu1 %6079  ;;  %v6106_v6 = vpack.c.bf16 %v6098_v0, %v6098_v0 }
0x101d   :  { %20019 = vrcp.f32 %v6080_v45  ;;  %v25091_v45 = vld [vmem:[#allocation35_spill] sm:$0xff] }
0x101e   :  { %v6120_v61 = vsel %vm1149_vm2, %v6106_v6, 0  ;;  %v19415_v6 = vunpack.i.l.bf16 %v25091_v45 }
0x101f   :  { %18047 = vmatpush3.bf16.xpose.msra.mxu1 %v6120_v61  ;;  %v6163_v52 = vpop.permute.xlu0 %6162  ;;  %v25092_v61 = vld [vmem:[#allocation33_spill] sm:$0xff] }
0x1020   :  { %18058 = vmatprep.subr.bf16.mxu1 %v25004_v30  ;;  %v6211_v8 = vpop.permute.xlu1 %6210 }
0x1021   :  { %v20014_v46 = vpop.eup %20013  ;;  %18055 = vmatmul.mubr.msk.bf16.vlgmr.msra.gmra.mxu0 %vm1149_vm2, %v6163_v52  ;;  %v19410_v52 = vunpack.i.l.bf16 %v25092_v61 }
0x1022   :  { %v6100_v24 = vmul.f32 %v20014_v46, %v19998_v22  ;;  %18066 = vmatprep.mubr.msk.bf16.mxu0 %vm20357_vm1, %v25004_v30 }
0x1024   :  { %v6108_v48 = vpack.c.bf16 %v6100_v24, %v6100_v24  ;;  %v6259_v54 = vpop.permute.xlu1 %6258 }
0x1025   :  { %v20016_v50 = vpop.eup %20015 }
0x1026   :  { %18049 = vmatmul.mubr.msk.bf16.vlgmr.msra.gmra.mxu1 %vm1149_vm2, %v6115_v59  ;;  %v6216_v1 = vsel %vm1149_vm2, %v6108_v48, 0  ;;  %v6101_v49 = vmul.f32 %v20016_v50, %v21949_v62  ;;  %v22023_v48 = vpack.c.bf16 %v19415_v6, %v19410_v52  ;;  %v25100_v6 = vld [vmem:[#allocation54_spill] sm:$0xff]  ;;  %v25101_v52 = vld [vmem:[#allocation9_spill] sm:$0xff] }
0x1027   :  { %18059 = vmatpush3.bf16.xpose.msra.mxu1 %v6216_v1  ;;  %18060 = vmatprep.mubr.msk.bf16.mxu1 %vm20357_vm1, %v25004_v30  ;;  %v25093_v1 = vld [vmem:[#allocation32_spill] sm:$0xff] }
0x1028   :  { %v6109_v17 = vpack.c.bf16 %v6101_v49, %v6101_v49  ;;  %18070 = vmatprep.subr.bf16.mxu1 %v25004_v30 }
0x1029   :  { %v20018_v39 = vpop.eup %20017 }
0x102a   :  { %v20020_v22 = vpop.eup %20019  ;;  %v6264_v63 = vsel %vm1149_vm2, %v6109_v17, 0  ;;  %v6103_v23 = vmul.f32 %v20018_v39, %v21953_v25  ;;  %v25094_v17 = vld [vmem:[#allocation30_spill] sm:$0xff] }
0x102b   :  { %18065 = vmatpush3.bf16.xpose.msra.mxu0 %v6264_v63  ;;  %v6102_v26 = vmul.f32 %v20020_v22, %v21955_v12  ;;  %v19246_v39 = vunpack.i.l.bf16 %v25094_v17  ;;  %v19413_v63 = vunpack.i.h.bf16 %v25092_v61  ;;  %v19492_v61 = vunpack.i.l.bf16 %v25100_v6 }
0x102c   :  { %18076 = vmatprep.subr.bf16.mxu0 %v25004_v30  ;;  %v6111_v59 = vpack.c.bf16 %v6103_v23, %v6103_v23  ;;  %v19418_v23 = vunpack.i.h.bf16 %v25091_v45 }
0x102d   :  { %v6110_v62 = vpack.c.bf16 %v6102_v26, %v6102_v26 }
0x102e   :  { %18061 = vmatmul.mubr.msk.bf16.vlgmr.msra.gmra.mxu1 %vm1149_vm2, %v6211_v8  ;;  %v6360_v25 = vsel %vm1149_vm2, %v6111_v59, 0  ;;  %v19254_v59 = vunpack.i.h.bf16 %v25093_v1 }
0x102f   :  { %v6312_v14 = vsel %vm1149_vm2, %v6110_v62, 0  ;;  %18072 = vmatprep.mubr.msk.bf16.mxu1 %vm20357_vm1, %v25004_v30  ;;  %v22042_v62 = vpack.c.bf16 %v19418_v23, %v19413_v63  ;;  %v25104_v63 = vld [vmem:[#allocation6_spill] sm:$0xff] }
0x1030   :  { %18071 = vmatpush3.bf16.xpose.msra.mxu1 %v6312_v14  ;;  %v25095_v14 = vld [vmem:[#allocation11_spill] sm:$0xff] }
0x1031   :  { %18082 = vmatprep.subr.bf16.mxu1 %v25004_v30 }
0x1032   :  { %18067 = vmatmul.mubr.msk.bf16.vlgmr.msra.gmra.mxu0 %vm1149_vm2, %v6259_v54  ;;  %v6681_v54 = vsel %vm1149_vm2, %v25095_v14, 0 }
0x1033   :  { %18077 = vmatpush3.bf16.xpose.msra.mxu0 %v6360_v25  ;;  %18078 = vmatprep.mubr.msk.bf16.mxu0 %vm20357_vm1, %v25004_v30  ;;  %v25096_v25 = vld [vmem:[#allocation59_spill] sm:$0xff] }
0x1034   :  { %18088 = vmatprep.subr.bf16.mxu0 %v25004_v30 }
0x1050   :  { %v6089_v12 = vpop.xlane.xlu0 %6088 }
0x1051   :  { %20021 = vrcp.f32 %v6089_v12  ;;  %v19661_v12 = vunpack.i.l.bf16 %v25096_v25 }
0x1054   :  { %v6307_v44 = vpop.permute.xlu0 %6306 }
0x1055   :  { %v6086_v28 = vpop.xlane.xlu1 %6085  ;;  %18073 = vmatmul.mubr.msk.bf16.vlgmr.msra.gmra.mxu1 %vm1149_vm2, %v6307_v44  ;;  %v25097_v44 = vld [vmem:[#allocation57_spill] sm:$0xff] }
0x1056   :  { %20023 = vrcp.f32 %v6086_v28  ;;  %18084 = vmatprep.mubr.msk.bf16.mxu1 %vm20357_vm1, %v25004_v30  ;;  %v19656_v28 = vunpack.i.l.bf16 %v25097_v44 }
0x1058   :  { %v6403_v8 = vpop.permute.xlu0 %6402 }
0x1059   :  { %v6355_v58 = vpop.permute.xlu1 %6354 }
0x105a   :  { %18079 = vmatmul.mubr.msk.bf16.vlgmr.msra.gmra.mxu0 %vm1149_vm2, %v6355_v58  ;;  %v19249_v58 = vunpack.i.h.bf16 %v25094_v17  ;;  %v19659_v17 = vunpack.i.h.bf16 %v25097_v44 }
0x105b   :  { %18090 = vmatprep.mubr.msk.bf16.mxu0 %vm20357_vm1, %v25004_v30 }
0x105d   :  { %v6451_v49 = vpop.permute.xlu1 %6450 }
0x105e   :  { %v20022_v29 = vpop.eup %20021 }
0x105f   :  { %v6105_v41 = vmul.f32 %v20022_v29, %v21968_v34  ;;  %v19251_v34 = vunpack.i.l.bf16 %v25093_v1  ;;  %v22058_v29 = vpack.c.bf16 %v19254_v59, %v19249_v58  ;;  %v25103_v1 = vld [vmem:[#allocation79_spill] sm:$0xff] }
0x1061   :  { %v6113_v4 = vpack.c.bf16 %v6105_v41, %v6105_v41  ;;  %v22032_v22 = vpack.c.bf16 %v19251_v34, %v19246_v39  ;;  %v22060_v41 = vpack.c.bf16 %v19661_v12, %v19656_v28  ;;  %v19577_v34 = vunpack.i.h.bf16 %v25103_v1  ;;  %v25105_v28 = vld [vmem:[#allocation82_spill] sm:$0xff] }
0x1062   :  { %v19664_v39 = vunpack.i.h.bf16 %v25096_v25  ;;  %v19495_v12 = vunpack.i.h.bf16 %v25100_v6  ;;  %v19741_v58 = vunpack.i.h.bf16 %v25105_v28 }
0x1063   :  { %v20024_v0 = vpop.eup %20023  ;;  %v6456_v11 = vsel %vm1149_vm2, %v6113_v4, 0  ;;  %v6543_v26 = vsel %vm1149_vm2, %v22032_v22, 0  ;;  %v25098_v4 = vld [vmem:[#allocation8_spill] sm:$0xff] }
0x1064   :  { %18089 = vmatpush3.bf16.xpose.msra.mxu0 %v6456_v11  ;;  %v6104_v46 = vmul.f32 %v20024_v0, %v21972_v53  ;;  %v6589_v53 = vsel %vm1149_vm2, %v22023_v48, 0  ;;  %v6635_v0 = vsel %vm1149_vm2, %v25098_v4, 0  ;;  %v25099_v11 = vld [vmem:[#allocation56_spill] sm:$0xff]  ;;  %v22092_v59 = vpack.c.bf16 %v19664_v39, %v19659_v17 }
0x1065   :  { %18100 = vmatprep.subr.bf16.mxu0 %v25004_v30  ;;  %v19497_v45 = vunpack.i.l.bf16 %v25099_v11 }
0x1066   :  { %v6112_v24 = vpack.c.bf16 %v6104_v46, %v6104_v46  ;;  %v6773_v46 = vsel %vm1149_vm2, %v22060_v41, 0 }
0x1068   :  { %v6408_v50 = vsel %vm1149_vm2, %v6112_v24, 0  ;;  %v25102_v24 = vld [vmem:[#allocation81_spill] sm:$0xff] }
0x1069   :  { %18083 = vmatpush3.bf16.xpose.msra.mxu1 %v6408_v50  ;;  %v19582_v50 = vunpack.i.h.bf16 %v25102_v24 }
0x106a   :  { %18094 = vmatprep.subr.bf16.mxu1 %v25004_v30 }
0x106b   :  { %18091 = vmatmul.mubr.msk.bf16.vlgmr.msra.gmra.mxu0 %vm1149_vm2, %v6451_v49  ;;  %v22077_v49 = vpack.c.bf16 %v19497_v45, %v19492_v61 }
0x106c   :  { %18101 = vmatpush3.bf16.xpose.msra.mxu0 %v6589_v53  ;;  %18102 = vmatprep.mubr.msk.bf16.mxu0 %vm20357_vm1, %v25004_v30  ;;  %v22084_v53 = vpack.c.bf16 %v19582_v50, %v19577_v34 }
0x106d   :  { %18112 = vmatprep.subr.bf16.mxu0 %v25004_v30  ;;  %v6727_v23 = vsel %vm1149_vm2, %v22077_v49, 0 }
0x106e   :  { %v6865_v25 = vsel %vm1149_vm2, %v22084_v53, 0 }
0x1070   :  { %18085 = vmatmul.mubr.msk.bf16.vlgmr.msra.gmra.mxu1 %vm1149_vm2, %v6403_v8  ;;  %v19579_v8 = vunpack.i.l.bf16 %v25102_v24 }
0x1071   :  { %18095 = vmatpush3.bf16.xpose.msra.mxu1 %v6543_v26  ;;  %18096 = vmatprep.mubr.msk.bf16.mxu1 %vm20357_vm1, %v25004_v30  ;;  %v19574_v26 = vunpack.i.l.bf16 %v25103_v1 }
0x1072   :  { %18106 = vmatprep.subr.bf16.mxu1 %v25004_v30 }
0x1073   :  { %18103 = vmatmul.mubr.msk.bf16.vlgmr.msra.gmra.mxu0 %vm1149_vm2, %v22042_v62  ;;  %v22103_v44 = vpack.c.bf16 %v19579_v8, %v19574_v26 }
0x1074   :  { %18113 = vmatpush3.bf16.xpose.msra.mxu0 %v6681_v54  ;;  %18114 = vmatprep.mubr.msk.bf16.mxu0 %vm20357_vm1, %v25004_v30  ;;  %v19500_v54 = vunpack.i.h.bf16 %v25099_v11 }
0x1075   :  { %18124 = vmatprep.subr.bf16.mxu0 %v25004_v30  ;;  %v6819_v6 = vsel %vm1149_vm2, %v22103_v44, 0 }
0x1076   :  { %v22110_v45 = vpack.c.bf16 %v19500_v54, %v19495_v12 }
0x1078   :  { %18097 = vmatmul.mubr.msk.bf16.vlgmr.msra.gmra.mxu1 %vm1149_vm2, %v22058_v29 }
0x1079   :  { %18107 = vmatpush3.bf16.xpose.msra.mxu1 %v6635_v0  ;;  %18108 = vmatprep.mubr.msk.bf16.mxu1 %vm20357_vm1, %v25004_v30  ;;  %v25106_v0 = vld [vmem:[#allocation84_spill] sm:$0xff] }
0x107a   :  { %18118 = vmatprep.subr.bf16.mxu1 %v25004_v30  ;;  %v19746_v11 = vunpack.i.h.bf16 %v25106_v0  ;;  %v19743_v24 = vunpack.i.l.bf16 %v25106_v0 }
0x107b   :  { %18115 = vmatmul.mubr.msk.bf16.vlgmr.msra.gmra.mxu0 %vm1149_vm2, %v25101_v52 }
0x107c   :  { %18125 = vmatpush3.bf16.xpose.msra.mxu0 %v6773_v46  ;;  %18126 = vmatprep.mubr.msk.bf16.mxu0 %vm20357_vm1, %v25004_v30  ;;  %v22116_v61 = vpack.c.bf16 %v19746_v11, %v19741_v58  ;;  %v19738_v46 = vunpack.i.l.bf16 %v25105_v28 }
0x107d   :  { %18136 = vmatprep.subr.bf16.mxu0 %v25004_v30 }
0x107e   :  { %v22127_v50 = vpack.c.bf16 %v19743_v24, %v19738_v46 }
0x1080   :  { %18109 = vmatmul.mubr.msk.bf16.vlgmr.msra.gmra.mxu1 %vm1149_vm2, %v25104_v63 }
0x1081   :  { %18119 = vmatpush3.bf16.xpose.msra.mxu1 %v6727_v23  ;;  %18120 = vmatprep.mubr.msk.bf16.mxu1 %vm20357_vm1, %v25004_v30 }
0x1082   :  { %18130 = vmatprep.subr.bf16.mxu1 %v25004_v30 }
0x1083   :  { %18127 = vmatmul.mubr.msk.bf16.vlgmr.msra.gmra.mxu0 %vm1149_vm2, %v22092_v59 }
0x1084   :  { %18137 = vmatpush3.bf16.xpose.msra.mxu0 %v6865_v25  ;;  %18138 = vmatprep.mubr.msk.bf16.mxu0 %vm20357_vm1, %v25004_v30 }
0x1085   :  { %18148 = vmatprep.subr.bf16.mxu0 %v25004_v30 }
0x1088   :  { %18121 = vmatmul.mubr.msk.bf16.vlgmr.msra.gmra.mxu1 %vm1149_vm2, %v22110_v45 }
0x1089   :  { %18131 = vmatpush3.bf16.xpose.msra.mxu1 %v6819_v6  ;;  %18132 = vmatprep.mubr.msk.bf16.mxu1 %vm20357_vm1, %v25004_v30 }
0x108a   :  { %18142 = vmatprep.subr.bf16.mxu1 %v25004_v30 }
0x108b   :  { %18139 = vmatmul.mubr.msk.bf16.vlgmr.msra.gmra.mxu0 %vm1149_vm2, %v22116_v61 }
0x108c   :  { %18150 = vmatprep.mubr.msk.bf16.mxu0 %vm20357_vm1, %v25004_v30 }
0x1090   :  { %18133 = vmatmul.mubr.msk.bf16.vlgmr.msra.gmra.mxu1 %vm1149_vm2, %v22127_v50 }
0x1091   :  { %18144 = vmatprep.mubr.msk.bf16.mxu1 %vm20357_vm1, %v25004_v30 }
0x10e1   :  { %v22133_v1 = vpop.f32.mrf.mxu0 }
0x10e2   :  { %25107 = vst [vmem:[#allocation75_spill] sm:$0xff] %v22133_v1 }
0x10e3   :  { %v18056_v34 = vpop.f32.mrf.mxu0 }
0x10e5   :  { %v6207_v17 = vpop.f32.mrf.mxu0 }
0x10e6   :  { %v22135_v39 = vpop.f32.mrf.mxu1 }
0x10e7   :  { %25108 = vst [vmem:[#allocation3_spill] sm:$0xff] %v22135_v39  ;;  %v18057_v23 = vpop.f32.mrf.mxu0 }
0x10e8   :  { %v18050_v8 = vpop.f32.mrf.mxu1 }
0x10ea   :  { %v6159_v26 = vpop.f32.mrf.mxu1 }
0x10ec   :  { %v18051_v54 = vpop.f32.mrf.mxu1 }
0x10ee   :  { %v22137_v25 = vpop.f32.mrf.mxu1 }
0x10ef   :  { %25109 = vst [vmem:[#allocation78_spill] sm:$0xff] %v22137_v25 }
0x10f0   :  { %v18062_v12 = vpop.f32.mrf.mxu1 }
0x10f2   :  { %v6255_v28 = vpop.f32.mrf.mxu1  ;;  %v22139_v58 = vpop.f32.mrf.mxu0 }
0x10f3   :  { %25110 = vst [vmem:[#allocation80_spill] sm:$0xff] %v22139_v58 }
0x10f4   :  { %v18063_v0 = vpop.f32.mrf.mxu1  ;;  %v18068_v11 = vpop.f32.mrf.mxu0 }
0x10f6   :  { %v6303_v6 = vpop.f32.mrf.mxu0 }
0x10f8   :  { %v18069_v46 = vpop.f32.mrf.mxu0 }
0x1115   :  { %v22141_v24 = vpop.f32.mrf.mxu1 }
0x1116   :  { %25111 = vst [vmem:[#allocation35_spill] sm:$0xff] %v22141_v24 }
0x1117   :  { %v18074_v34 = vpop.f32.mrf.mxu1 }
0x1119   :  { %v6351_v17 = vpop.f32.mrf.mxu1 }
0x111a   :  { %v22143_v1 = vpop.f32.mrf.mxu0 }
0x111b   :  { %25112 = vst [vmem:[#allocation33_spill] sm:$0xff] %v22143_v1  ;;  %v18075_v23 = vpop.f32.mrf.mxu1 }
0x111c   :  { %v18080_v8 = vpop.f32.mrf.mxu0 }
0x111e   :  { %v6399_v26 = vpop.f32.mrf.mxu0 }
0x1120   :  { %v18081_v54 = vpop.f32.mrf.mxu0 }
0x112b   :  { %v22145_v39 = vpop.f32.mrf.mxu0 }
0x112d   :  { %v18092_v12 = vpop.f32.mrf.mxu0 }
0x112f   :  { %v6495_v28 = vpop.f32.mrf.mxu0 }
0x1130   :  { %v22147_v15 = vpop.f32.mrf.mxu1 }
0x1131   :  { %v18093_v0 = vpop.f32.mrf.mxu0 }
0x1132   :  { %v18086_v11 = vpop.f32.mrf.mxu1 }
0x1133   :  { %v6625_v6 = vpop.f32.mrf.mxu0 }
0x1134   :  { %v6447_v46 = vpop.f32.mrf.mxu1  ;;  %v6626_v2 = vadd.f32 %v6625_v6, %v20867_v43 }
0x1135   :  { %v18104_v34 = vpop.f32.mrf.mxu0 }
0x1136   :  { %v18087_v17 = vpop.f32.mrf.mxu1  ;;  %v6910_v25 = vsel %vm1149_vm2, %v6626_v2, -inf }
0x1137   :  { %6911 = vmax.xlane.f32.xlu1 %v6910_v25  ;;  %v6628_v23 = vpop.f32.mrf.mxu0 }
0x1138   :  { %v6579_v8 = vpop.f32.mrf.mxu1 }
0x1139   :  { %v6580_v26 = vadd.f32 %v6579_v8, %v20867_v43  ;;  %v18105_v54 = vpop.f32.mrf.mxu0 }
0x113a   :  { %v18098_v12 = vpop.f32.mrf.mxu1 }
0x113b   :  { %v6717_v28 = vpop.f32.mrf.mxu0  ;;  %v6907_v58 = vsel %vm1149_vm2, %v6580_v26, -inf }
0x113c   :  { %6908 = vmax.xlane.f32.xlu0 %v6907_v58  ;;  %v6582_v0 = vpop.f32.mrf.mxu1  ;;  %v6718_v25 = vadd.f32 %v6717_v28, %v20867_v43 }
0x113d   :  { %v18116_v11 = vpop.f32.mrf.mxu0 }
0x113e   :  { %v18099_v46 = vpop.f32.mrf.mxu1  ;;  %v6916_v11 = vsel %vm1149_vm2, %v6718_v25, -inf }
0x113f   :  { %v6720_v21 = vpop.f32.mrf.mxu0 }
0x1140   :  { %v6671_v6 = vpop.f32.mrf.mxu1 }
0x1141   :  { %v6672_v34 = vadd.f32 %v6671_v6, %v20867_v43  ;;  %v18117_v17 = vpop.f32.mrf.mxu0 }
0x1142   :  { %v18110_v55 = vpop.f32.mrf.mxu1 }
0x1143   :  { %v6809_v23 = vpop.f32.mrf.mxu0  ;;  %v6913_v8 = vsel %vm1149_vm2, %v6672_v34, -inf }
0x1144   :  { %6914 = vmax.xlane.f32.xlu0 %v6913_v8  ;;  %v6674_v54 = vpop.f32.mrf.mxu1  ;;  %v6810_v58 = vadd.f32 %v6809_v23, %v20867_v43 }
0x1145   :  { %v18128_v12 = vpop.f32.mrf.mxu0 }
0x1146   :  { %v18111_v24 = vpop.f32.mrf.mxu1  ;;  %v6922_v28 = vsel %vm1149_vm2, %v6810_v58, -inf }
0x1147   :  { %v6812_v0 = vpop.f32.mrf.mxu0 }
0x1148   :  { %6917 = vmax.xlane.f32.xlu0 %v6916_v11  ;;  %v6763_v21 = vpop.f32.mrf.mxu1 }
0x1149   :  { %v6764_v46 = vadd.f32 %v6763_v21, %v20867_v43  ;;  %v18129_v6 = vpop.f32.mrf.mxu0 }
0x114a   :  { %v18122_v55 = vpop.f32.mrf.mxu1 }
0x114b   :  { %v6901_v17 = vpop.f32.mrf.mxu0  ;;  %v6919_v1 = vsel %vm1149_vm2, %v6764_v46, -inf }
0x114c   :  { %v22162_v8 = vadd.f32 %v6901_v17, %v20867_v43  ;;  %6923 = vmax.xlane.f32.xlu0 %v6922_v28  ;;  %6920 = vmax.xlane.f32.xlu1 %v6919_v1  ;;  %v6766_v24 = vpop.f32.mrf.mxu1 }
0x114d   :  { %v18140_v23 = vpop.f32.mrf.mxu0 }
0x114e   :  { %v18123_v54 = vpop.f32.mrf.mxu1  ;;  %v6928_v12 = vsel %vm1149_vm2, %v22162_v8, -inf }
0x114f   :  { %v6904_v0 = vpop.f32.mrf.mxu0 }
0x1150   :  { %6929 = vmax.xlane.f32.xlu0 %v6928_v12  ;;  %v6855_v11 = vpop.f32.mrf.mxu1 }
0x1151   :  { %v6856_v21 = vadd.f32 %v6855_v11, %v20867_v43  ;;  %v18141_v6 = vpop.f32.mrf.mxu0 }
0x1152   :  { %v18134_v55 = vpop.f32.mrf.mxu1 }
0x1153   :  { %v6925_v10 = vsel %vm1149_vm2, %v6856_v21, -inf }
0x1154   :  { %6926 = vmax.xlane.f32.xlu1 %v6925_v10  ;;  %v6858_v17 = vpop.f32.mrf.mxu1 }
0x1156   :  { %v18135_v19 = vpop.f32.mrf.mxu1 }
0x1165   :  { %7003 = vrot.lane.b32.xlu1 %v20984_v51, %s20364_s16 }
0x11c0   :  { %v6912_v1 = vpop.xlane.xlu1 %6911 }
0x11c1   :  { %v6932_v28 = vsub.f32 %v6626_v2, %v6912_v1 }
0x11c3   :  { %v6941_v24 = vmul.f32 1.442695, %v6932_v28 }
0x11c5   :  { %20025 = vpow2.f32 %v6941_v24  ;;  %v6909_v23 = vpop.xlane.xlu0 %6908 }
0x11c6   :  { %v6931_v54 = vsub.f32 %v6580_v26, %v6909_v23 }
0x11c8   :  { %v6939_v12 = vmul.f32 1.442695, %v6931_v54 }
0x11ca   :  { %20027 = vpow2.f32 %v6939_v12 }
0x11cd   :  { %v6915_v0 = vpop.xlane.xlu0 %6914 }
0x11ce   :  { %v6933_v11 = vsub.f32 %v6672_v34, %v6915_v0 }
0x11d0   :  { %v6943_v6 = vmul.f32 1.442695, %v6933_v11 }
0x11d1   :  { %v6918_v55 = vpop.xlane.xlu0 %6917 }
0x11d2   :  { %v20026_v40 = vpop.eup %20025  ;;  %20029 = vpow2.f32 %v6943_v6  ;;  %v6934_v10 = vsub.f32 %v6718_v25, %v6918_v55 }
0x11d3   :  { %v6958_v19 = vsel %vm1149_vm2, %v20026_v40, 0.0 }
0x11d4   :  { %v6945_v17 = vmul.f32 1.442695, %v6934_v10  ;;  %6959 = vadd.xlane.f32.xlu0 %v6958_v19 }
0x11d5   :  { %v6924_v36 = vpop.xlane.xlu0 %6923  ;;  %v6921_v38 = vpop.xlane.xlu1 %6920 }
0x11d6   :  { %20031 = vpow2.f32 %v6945_v17  ;;  %v6936_v2 = vsub.f32 %v6810_v58, %v6924_v36  ;;  %v6935_v1 = vsub.f32 %v6764_v46, %v6921_v38 }
0x11d7   :  { %v20028_v28 = vpop.eup %20027 }
0x11d8   :  { %v6949_v26 = vmul.f32 1.442695, %v6936_v2  ;;  %v6947_v24 = vmul.f32 1.442695, %v6935_v1  ;;  %v6955_v23 = vsel %vm1149_vm2, %v20028_v28, 0.0 }
0x11d9   :  { %6956 = vadd.xlane.f32.xlu1 %v6955_v23  ;;  %v6930_v0 = vpop.xlane.xlu0 %6929 }
0x11da   :  { %20033 = vpow2.f32 %v6949_v26  ;;  %v6938_v11 = vsub.f32 %v22162_v8, %v6930_v0 }
0x11db   :  { %20035 = vpow2.f32 %v6947_v24 }
0x11dc   :  { %v6953_v55 = vmul.f32 1.442695, %v6938_v11 }
0x11dd   :  { %v6927_v6 = vpop.xlane.xlu1 %6926 }
0x11de   :  { %v6937_v10 = vsub.f32 %v6856_v21, %v6927_v6  ;;  %20037 = vpow2.f32 %v6953_v55 }
0x11df   :  { %v20030_v34 = vpop.eup %20029 }
0x11e0   :  { %v6961_v25 = vsel %vm1149_vm2, %v20030_v34, 0.0  ;;  %v6951_v19 = vmul.f32 1.442695, %v6937_v10 }
0x11e1   :  { %6962 = vadd.xlane.f32.xlu1 %v6961_v25  ;;  %v7004_v21 = vpop.permute.xlu1 %7003 }
0x11e2   :  { %20039 = vpow2.f32 %v6951_v19 }
0x11e3   :  { %v22173_v54 = vpop.eup %20031 }
0x11e4   :  { %v6964_v12 = vsel %vm1149_vm2, %v22173_v54, 0.0 }
0x11e5   :  { %6965 = vadd.xlane.f32.xlu0 %v6964_v12 }
0x11e7   :  { %v22177_v36 = vpop.eup %20033 }
0x11e8   :  { %v22179_v38 = vpop.eup %20035  ;;  %v6970_v58 = vsel %vm1149_vm2, %v22177_v36, 0.0 }
0x11e9   :  { %6971 = vadd.xlane.f32.xlu0 %v6970_v58  ;;  %v6967_v46 = vsel %vm1149_vm2, %v22179_v38, 0.0 }
0x11ea   :  { %6968 = vadd.xlane.f32.xlu1 %v6967_v46 }
0x11eb   :  { %v22192_v17 = vpop.eup %20037 }
0x11ec   :  { %v6976_v2 = vsel %vm1149_vm2, %v22192_v17, 0.0 }
0x11ef   :  { %v22196_v1 = vpop.eup %20039 }
0x11f0   :  { %v6973_v26 = vsel %vm1149_vm2, %v22196_v1, 0.0 }
0x11fb   :  { %7099 = vrot.lane.b32.xlu1 %v20996_v27, %s20364_s16 }
0x11ff   :  { %7147 = vrot.lane.b32.xlu1 %v21023_v42, %s20364_s16  ;;  %7051 = vrot.lane.b32.xlu0 %v21013_v16, %s20364_s16 }
0x121e   :  { %6977 = vadd.xlane.f32.xlu0 %v6976_v2 }
0x1223   :  { %6974 = vadd.xlane.f32.xlu1 %v6973_v26 }
0x1234   :  { %7243 = vrot.lane.b32.xlu1 %v21053_v3, %s20364_s16  ;;  %7195 = vrot.lane.b32.xlu0 %v21031_v5, %s20364_s16 }
0x1238   :  { %7339 = vrot.lane.b32.xlu1 %v21070_v18, %s20364_s16  ;;  %7291 = vrot.lane.b32.xlu0 %v21041_v20, %s20364_s16 }
0x125d   :  { %v6960_v8 = vpop.xlane.xlu0 %6959 }
0x125e   :  { %20041 = vrcp.f32 %v6960_v8 }
0x1262   :  { %v6957_v24 = vpop.xlane.xlu1 %6956 }
0x1263   :  { %20043 = vrcp.f32 %v6957_v24 }
0x126a   :  { %v6963_v23 = vpop.xlane.xlu1 %6962 }
0x126b   :  { %v20042_v25 = vpop.eup %20041  ;;  %20045 = vrcp.f32 %v6963_v23 }
0x126c   :  { %v6988_v12 = vmul.f32 %v20042_v25, %v20026_v40 }
0x126e   :  { %v6966_v58 = vpop.xlane.xlu0 %6965  ;;  %v6996_v46 = vpack.c.bf16 %v6988_v12, %v6988_v12 }
0x126f   :  { %20047 = vrcp.f32 %v6966_v58 }
0x1270   :  { %v20044_v0 = vpop.eup %20043  ;;  %v7057_v11 = vsel %vm1149_vm2, %v6996_v46, 0 }
0x1271   :  { %18149 = vmatpush3.bf16.xpose.msra.mxu0 %v7057_v11  ;;  %v6987_v6 = vmul.f32 %v20044_v0, %v20028_v28 }
0x1272   :  { %v6972_v55 = vpop.xlane.xlu0 %6971  ;;  %18160 = vmatprep.subr.bf16.mxu0 %v25004_v30 }
0x1273   :  { %20049 = vrcp.f32 %v6972_v55  ;;  %v6969_v10 = vpop.xlane.xlu1 %6968  ;;  %v6995_v19 = vpack.c.bf16 %v6987_v6, %v6987_v6 }
0x1274   :  { %20051 = vrcp.f32 %v6969_v10 }
0x1275   :  { %v7009_v2 = vsel %vm1149_vm2, %v6995_v19, 0 }
0x1276   :  { %18143 = vmatpush3.bf16.xpose.msra.mxu1 %v7009_v2  ;;  %v7052_v26 = vpop.permute.xlu0 %7051 }
0x1277   :  { %18154 = vmatprep.subr.bf16.mxu1 %v25004_v30  ;;  %v7100_v11 = vpop.permute.xlu1 %7099 }
0x1278   :  { %v20046_v40 = vpop.eup %20045  ;;  %18151 = vmatmul.mubr.msk.bf16.vlgmr.msra.gmra.mxu0 %vm1149_vm2, %v7052_v26 }
0x1279   :  { %v6989_v8 = vmul.f32 %v20046_v40, %v20030_v34  ;;  %18162 = vmatprep.mubr.msk.bf16.mxu0 %vm20357_vm1, %v25004_v30 }
0x127b   :  { %v6997_v28 = vpack.c.bf16 %v6989_v8, %v6989_v8  ;;  %v7148_v10 = vpop.permute.xlu1 %7147 }
0x127c   :  { %v20048_v24 = vpop.eup %20047 }
0x127d   :  { %18145 = vmatmul.mubr.msk.bf16.vlgmr.msra.gmra.mxu1 %vm1149_vm2, %v7004_v21  ;;  %v7105_v23 = vsel %vm1149_vm2, %v6997_v28, 0  ;;  %v6990_v25 = vmul.f32 %v20048_v24, %v22173_v54 }
0x127e   :  { %18155 = vmatpush3.bf16.xpose.msra.mxu1 %v7105_v23  ;;  %18156 = vmatprep.mubr.msk.bf16.mxu1 %vm20357_vm1, %v25004_v30 }
0x127f   :  { %v6998_v12 = vpack.c.bf16 %v6990_v25, %v6990_v25  ;;  %18166 = vmatprep.subr.bf16.mxu1 %v25004_v30 }
0x1280   :  { %v20050_v58 = vpop.eup %20049 }
0x1281   :  { %v20052_v34 = vpop.eup %20051  ;;  %v7153_v46 = vsel %vm1149_vm2, %v6998_v12, 0  ;;  %v6992_v0 = vmul.f32 %v20050_v58, %v22177_v36  ;;  %v7481_v58 = vrot.slane %v22023_v48, 4  ;;  %v7581_v48 = vrot.slane %v25095_v14, 4 }
0x1282   :  { %18161 = vmatpush3.bf16.xpose.msra.mxu0 %v7153_v46  ;;  %v6991_v21 = vmul.f32 %v20052_v34, %v22179_v38  ;;  %v7681_v14 = vrot.slane %v22060_v41, 4  ;;  %v7529_v41 = vrot.slane %v25104_v63, 4  ;;  %v7731_v63 = vrot.slane %v22103_v44, 4 }
0x1283   :  { %18172 = vmatprep.subr.bf16.mxu0 %v25004_v30  ;;  %v7000_v6 = vpack.c.bf16 %v6992_v0, %v6992_v0  ;;  %v7431_v0 = vrot.slane %v22032_v22, 4  ;;  %v7586_v22 = vsel %vm1149_vm2, %v7581_v48, 0  ;;  %v7729_v44 = vrot.slane %v22127_v50, 4 }
0x1284   :  { %v6999_v54 = vpack.c.bf16 %v6991_v21, %v6991_v21  ;;  %v7479_v21 = vrot.slane %v22042_v62, 4  ;;  %v7429_v62 = vrot.slane %v22058_v29, 4  ;;  %v7631_v29 = vrot.slane %v22077_v49, 4 }
0x1285   :  { %18157 = vmatmul.mubr.msk.bf16.vlgmr.msra.gmra.mxu1 %vm1149_vm2, %v7100_v11  ;;  %v7249_v36 = vsel %vm1149_vm2, %v7000_v6, 0  ;;  %v7436_v11 = vsel %vm1149_vm2, %v7431_v0, 0 }
0x1286   :  { %v7201_v55 = vsel %vm1149_vm2, %v6999_v54, 0  ;;  %18168 = vmatprep.mubr.msk.bf16.mxu1 %vm20357_vm1, %v25004_v30  ;;  %v7531_v54 = vrot.slane %v25098_v4, 4  ;;  %v7686_v4 = vsel %vm1149_vm2, %v7681_v14, 0 }
0x1287   :  { %18167 = vmatpush3.bf16.xpose.msra.mxu1 %v7201_v55  ;;  %v7579_v55 = vrot.slane %v25101_v52, 4  ;;  %v7781_v52 = vrot.slane %v22084_v53, 4  ;;  %v7629_v53 = vrot.slane %v22110_v45, 4 }
0x1288   :  { %18178 = vmatprep.subr.bf16.mxu1 %v25004_v30  ;;  %v7536_v6 = vsel %vm1149_vm2, %v7531_v54, 0 }
0x1289   :  { %18163 = vmatmul.mubr.msk.bf16.vlgmr.msra.gmra.mxu0 %vm1149_vm2, %v7148_v10  ;;  %v7636_v10 = vsel %vm1149_vm2, %v7631_v29, 0  ;;  %v7786_v49 = vsel %vm1149_vm2, %v7781_v52, 0 }
0x128a   :  { %18173 = vmatpush3.bf16.xpose.msra.mxu0 %v7249_v36  ;;  %18174 = vmatprep.mubr.msk.bf16.mxu0 %vm20357_vm1, %v25004_v30  ;;  %v7679_v36 = vrot.slane %v22092_v59, 4  ;;  %v7736_v59 = vsel %vm1149_vm2, %v7731_v63, 0 }
0x128b   :  { %18184 = vmatprep.subr.bf16.mxu0 %v25004_v30 }
0x12a7   :  { %v6978_v38 = vpop.xlane.xlu0 %6977 }
0x12a8   :  { %20053 = vrcp.f32 %v6978_v38  ;;  %v7779_v38 = vrot.slane %v22116_v61, 4 }
0x12ab   :  { %v7196_v19 = vpop.permute.xlu0 %7195 }
0x12ac   :  { %v6975_v2 = vpop.xlane.xlu1 %6974  ;;  %18169 = vmatmul.mubr.msk.bf16.vlgmr.msra.gmra.mxu1 %vm1149_vm2, %v7196_v19 }
0x12ad   :  { %20055 = vrcp.f32 %v6975_v2  ;;  %18180 = vmatprep.mubr.msk.bf16.mxu1 %vm20357_vm1, %v25004_v30 }
0x12b0   :  { %v7244_v26 = vpop.permute.xlu1 %7243 }
0x12b1   :  { %18175 = vmatmul.mubr.msk.bf16.vlgmr.msra.gmra.mxu0 %vm1149_vm2, %v7244_v26 }
0x12b2   :  { %18186 = vmatprep.mubr.msk.bf16.mxu0 %vm20357_vm1, %v25004_v30 }
0x12b4   :  { %v7340_v46 = vpop.permute.xlu1 %7339 }
0x12b5   :  { %v20054_v40 = vpop.eup %20053 }
0x12b6   :  { %v6994_v8 = vmul.f32 %v20054_v40, %v22192_v17  ;;  %v7486_v17 = vsel %vm1149_vm2, %v7481_v58, 0 }
0x12b8   :  { %v7002_v28 = vpack.c.bf16 %v6994_v8, %v6994_v8 }
0x12ba   :  { %v20056_v24 = vpop.eup %20055  ;;  %v7345_v23 = vsel %vm1149_vm2, %v7002_v28, 0 }
0x12bb   :  { %18185 = vmatpush3.bf16.xpose.msra.mxu0 %v7345_v23  ;;  %v6993_v25 = vmul.f32 %v20056_v24, %v22196_v1  ;;  %v7292_v1 = vpop.permute.xlu0 %7291 }
0x12bc   :  { %18196 = vmatprep.subr.bf16.mxu0 %v25004_v30 }
0x12bd   :  { %v7001_v12 = vpack.c.bf16 %v6993_v25, %v6993_v25 }
0x12bf   :  { %v7297_v34 = vsel %vm1149_vm2, %v7001_v12, 0 }
0x12c0   :  { %18179 = vmatpush3.bf16.xpose.msra.mxu1 %v7297_v34 }
0x12c1   :  { %18190 = vmatprep.subr.bf16.mxu1 %v25004_v30 }
0x12c2   :  { %18187 = vmatmul.mubr.msk.bf16.vlgmr.msra.gmra.mxu0 %vm1149_vm2, %v7340_v46 }
0x12c3   :  { %18197 = vmatpush3.bf16.xpose.msra.mxu0 %v7486_v17  ;;  %18198 = vmatprep.mubr.msk.bf16.mxu0 %vm20357_vm1, %v25004_v30 }
0x12c4   :  { %18208 = vmatprep.subr.bf16.mxu0 %v25004_v30 }
0x12c7   :  { %18181 = vmatmul.mubr.msk.bf16.vlgmr.msra.gmra.mxu1 %vm1149_vm2, %v7292_v1 }
0x12c8   :  { %18191 = vmatpush3.bf16.xpose.msra.mxu1 %v7436_v11  ;;  %18192 = vmatprep.mubr.msk.bf16.mxu1 %vm20357_vm1, %v25004_v30 }
0x12c9   :  { %18202 = vmatprep.subr.bf16.mxu1 %v25004_v30 }
0x12ca   :  { %18199 = vmatmul.mubr.msk.bf16.vlgmr.msra.gmra.mxu0 %vm1149_vm2, %v7479_v21 }
0x12cb   :  { %18209 = vmatpush3.bf16.xpose.msra.mxu0 %v7586_v22  ;;  %18210 = vmatprep.mubr.msk.bf16.mxu0 %vm20357_vm1, %v25004_v30 }
0x12cc   :  { %18220 = vmatprep.subr.bf16.mxu0 %v25004_v30 }
0x12cf   :  { %18193 = vmatmul.mubr.msk.bf16.vlgmr.msra.gmra.mxu1 %vm1149_vm2, %v7429_v62 }
0x12d0   :  { %18203 = vmatpush3.bf16.xpose.msra.mxu1 %v7536_v6  ;;  %18204 = vmatprep.mubr.msk.bf16.mxu1 %vm20357_vm1, %v25004_v30 }
0x12d1   :  { %18214 = vmatprep.subr.bf16.mxu1 %v25004_v30 }
0x12d2   :  { %18211 = vmatmul.mubr.msk.bf16.vlgmr.msra.gmra.mxu0 %vm1149_vm2, %v7579_v55 }
0x12d3   :  { %18221 = vmatpush3.bf16.xpose.msra.mxu0 %v7686_v4  ;;  %18222 = vmatprep.mubr.msk.bf16.mxu0 %vm20357_vm1, %v25004_v30 }
0x12d4   :  { %18232 = vmatprep.subr.bf16.mxu0 %v25004_v30 }
0x12d7   :  { %18205 = vmatmul.mubr.msk.bf16.vlgmr.msra.gmra.mxu1 %vm1149_vm2, %v7529_v41 }
0x12d8   :  { %18215 = vmatpush3.bf16.xpose.msra.mxu1 %v7636_v10  ;;  %18216 = vmatprep.mubr.msk.bf16.mxu1 %vm20357_vm1, %v25004_v30 }
0x12d9   :  { %18226 = vmatprep.subr.bf16.mxu1 %v25004_v30 }
0x12da   :  { %18223 = vmatmul.mubr.msk.bf16.vlgmr.msra.gmra.mxu0 %vm1149_vm2, %v7679_v36 }
0x12db   :  { %18233 = vmatpush3.bf16.xpose.msra.mxu0 %v7786_v49  ;;  %18234 = vmatprep.mubr.msk.bf16.mxu0 %vm20357_vm1, %v25004_v30 }
0x12dc   :  { %18244 = vmatprep.subr.bf16.mxu0 %v25004_v30 }
0x12df   :  { %18217 = vmatmul.mubr.msk.bf16.vlgmr.msra.gmra.mxu1 %vm1149_vm2, %v7629_v53 }
0x12e0   :  { %18227 = vmatpush3.bf16.xpose.msra.mxu1 %v7736_v59  ;;  %18228 = vmatprep.mubr.msk.bf16.mxu1 %vm20357_vm1, %v25004_v30 }
0x12e1   :  { %18238 = vmatprep.subr.bf16.mxu1 %v25004_v30 }
0x12e2   :  { %18235 = vmatmul.mubr.msk.bf16.vlgmr.msra.gmra.mxu0 %vm1149_vm2, %v7779_v38 }
0x12e3   :  { %18246 = vmatprep.mubr.msk.bf16.mxu0 %vm20357_vm1, %v25004_v30 }
0x12e7   :  { %18229 = vmatmul.mubr.msk.bf16.vlgmr.msra.gmra.mxu1 %vm1149_vm2, %v7729_v44 }
0x12e8   :  { %18240 = vmatprep.mubr.msk.bf16.mxu1 %vm20357_vm1, %v25004_v30 }
0x1338   :  { %v22309_v45 = vpop.f32.mrf.mxu0 }
0x1339   :  { %25113 = vst [vmem:[#allocation32_spill] sm:$0xff] %v22309_v45 }
0x133a   :  { %v18152_v61 = vpop.f32.mrf.mxu0 }
0x133c   :  { %v7096_v19 = vpop.f32.mrf.mxu0 }
0x133d   :  { %v22311_v2 = vpop.f32.mrf.mxu1 }
0x133e   :  { %25114 = vst [vmem:[#allocation30_spill] sm:$0xff] %v22311_v2  ;;  %v18153_v26 = vpop.f32.mrf.mxu0 }
0x133f   :  { %v18146_v40 = vpop.f32.mrf.mxu1 }
0x1341   :  { %v7048_v8 = vpop.f32.mrf.mxu1 }
0x1343   :  { %v18147_v28 = vpop.f32.mrf.mxu1 }
0x1345   :  { %v22313_v24 = vpop.f32.mrf.mxu1 }
0x1346   :  { %25115 = vst [vmem:[#allocation11_spill] sm:$0xff] %v22313_v24 }
0x1347   :  { %v18158_v23 = vpop.f32.mrf.mxu1 }
0x1349   :  { %v7144_v25 = vpop.f32.mrf.mxu1  ;;  %v22315_v50 = vpop.f32.mrf.mxu0 }
0x134a   :  { %25116 = vst [vmem:[#allocation59_spill] sm:$0xff] %v22315_v50 }
0x134b   :  { %v18159_v12 = vpop.f32.mrf.mxu1  ;;  %v18164_v58 = vpop.f32.mrf.mxu0 }
0x134d   :  { %v7192_v34 = vpop.f32.mrf.mxu0 }
0x134f   :  { %v18165_v46 = vpop.f32.mrf.mxu0 }
0x136c   :  { %v22317_v17 = vpop.f32.mrf.mxu1 }
0x136d   :  { %25117 = vst [vmem:[#allocation57_spill] sm:$0xff] %v22317_v17 }
0x136e   :  { %v18170_v0 = vpop.f32.mrf.mxu1 }
0x1370   :  { %v7240_v1 = vpop.f32.mrf.mxu1 }
0x1371   :  { %v22319_v48 = vpop.f32.mrf.mxu0 }
0x1372   :  { %25118 = vst [vmem:[#allocation8_spill] sm:$0xff] %v22319_v48  ;;  %v18171_v11 = vpop.f32.mrf.mxu1 }
0x1373   :  { %v18176_v21 = vpop.f32.mrf.mxu0 }
0x1375   :  { %v7288_v22 = vpop.f32.mrf.mxu0 }
0x1377   :  { %v18177_v54 = vpop.f32.mrf.mxu0 }
0x1382   :  { %v22321_v62 = vpop.f32.mrf.mxu0 }
0x1383   :  { %25119 = vst [vmem:[#allocation56_spill] sm:$0xff] %v22321_v62 }
0x1384   :  { %v18188_v14 = vpop.f32.mrf.mxu0 }
0x1386   :  { %v7384_v6 = vpop.f32.mrf.mxu0 }
0x1387   :  { %v22323_v55 = vpop.f32.mrf.mxu1 }
0x1388   :  { %25120 = vst [vmem:[#allocation54_spill] sm:$0xff] %v22323_v55  ;;  %v18189_v4 = vpop.f32.mrf.mxu0 }
0x1389   :  { %v18182_v29 = vpop.f32.mrf.mxu1 }
0x138a   :  { %v7522_v41 = vpop.f32.mrf.mxu0 }
0x138b   :  { %v7336_v52 = vpop.f32.mrf.mxu1  ;;  %v7523_v10 = vadd.f32 %v7522_v41, %v20867_v43 }
0x138c   :  { %v18200_v36 = vpop.f32.mrf.mxu0 }
0x138d   :  { %v18183_v49 = vpop.f32.mrf.mxu1  ;;  %v7831_v63 = vsel %vm1149_vm2, %v7523_v10, -inf }
0x138e   :  { %7832 = vmax.xlane.f32.xlu1 %v7831_v63  ;;  %v7525_v53 = vpop.f32.mrf.mxu0 }
0x138f   :  { %v7472_v59 = vpop.f32.mrf.mxu1 }
0x1390   :  { %v7473_v38 = vadd.f32 %v7472_v59, %v20867_v43  ;;  %v18201_v44 = vpop.f32.mrf.mxu0 }
0x1391   :  { %v18194_v61 = vpop.f32.mrf.mxu1 }
0x1392   :  { %v7622_v19 = vpop.f32.mrf.mxu0  ;;  %v7828_v26 = vsel %vm1149_vm2, %v7473_v38, -inf }
0x1393   :  { %7829 = vmax.xlane.f32.xlu0 %v7828_v26  ;;  %v7475_v40 = vpop.f32.mrf.mxu1  ;;  %v7623_v46 = vadd.f32 %v7622_v19, %v20867_v43 }
0x1394   :  { %v18212_v8 = vpop.f32.mrf.mxu0 }
0x1395   :  { %v18195_v28 = vpop.f32.mrf.mxu1  ;;  %v7837_v6 = vsel %vm1149_vm2, %v7623_v46, -inf }
0x1396   :  { %v7625_v23 = vpop.f32.mrf.mxu0 }
0x1397   :  { %v7572_v25 = vpop.f32.mrf.mxu1 }
0x1398   :  { %v7573_v12 = vadd.f32 %v7572_v25, %v20867_v43  ;;  %v18213_v58 = vpop.f32.mrf.mxu0 }
0x1399   :  { %v18206_v34 = vpop.f32.mrf.mxu1 }
0x139a   :  { %v7722_v0 = vpop.f32.mrf.mxu0  ;;  %v7834_v1 = vsel %vm1149_vm2, %v7573_v12, -inf }
0x139b   :  { %7835 = vmax.xlane.f32.xlu0 %v7834_v1  ;;  %v7575_v11 = vpop.f32.mrf.mxu1  ;;  %v7723_v54 = vadd.f32 %v7722_v0, %v20867_v43 }
0x139c   :  { %v18224_v21 = vpop.f32.mrf.mxu0 }
0x139d   :  { %v18207_v22 = vpop.f32.mrf.mxu1  ;;  %v7843_v49 = vsel %vm1149_vm2, %v7723_v54, -inf }
0x139e   :  { %v7725_v14 = vpop.f32.mrf.mxu0 }
0x139f   :  { %7838 = vmax.xlane.f32.xlu0 %v7837_v6  ;;  %v7672_v4 = vpop.f32.mrf.mxu1 }
0x13a0   :  { %v7673_v29 = vadd.f32 %v7672_v4, %v20867_v43  ;;  %v18225_v41 = vpop.f32.mrf.mxu0 }
0x13a1   :  { %v18218_v52 = vpop.f32.mrf.mxu1 }
0x13a2   :  { %v7822_v36 = vpop.f32.mrf.mxu0  ;;  %v7840_v63 = vsel %vm1149_vm2, %v7673_v29, -inf }
0x13a3   :  { %v22338_v53 = vadd.f32 %v7822_v36, %v20867_v43  ;;  %7844 = vmax.xlane.f32.xlu0 %v7843_v49  ;;  %7841 = vmax.xlane.f32.xlu1 %v7840_v63  ;;  %v7675_v59 = vpop.f32.mrf.mxu1 }
0x13a4   :  { %v18236_v44 = vpop.f32.mrf.mxu0 }
0x13a5   :  { %v18219_v61 = vpop.f32.mrf.mxu1  ;;  %v7849_v19 = vsel %vm1149_vm2, %v22338_v53, -inf }
0x13a6   :  { %v7825_v26 = vpop.f32.mrf.mxu0 }
0x13a7   :  { %7850 = vmax.xlane.f32.xlu0 %v7849_v19  ;;  %v7772_v40 = vpop.f32.mrf.mxu1 }
0x13a8   :  { %v7773_v8 = vadd.f32 %v7772_v40, %v20867_v43  ;;  %v18237_v28 = vpop.f32.mrf.mxu0 }
0x13a9   :  { %v18230_v23 = vpop.f32.mrf.mxu1 }
0x13aa   :  { %v7846_v25 = vsel %vm1149_vm2, %v7773_v8, -inf }
0x13ab   :  { %7847 = vmax.xlane.f32.xlu1 %v7846_v25  ;;  %v7775_v58 = vpop.f32.mrf.mxu1 }
0x13ad   :  { %v18231_v34 = vpop.f32.mrf.mxu1 }
0x13bc   :  { %7924 = vrot.lane.b32.xlu1 %v20984_v51, %s20365_s17 }
0x1417   :  { %v7833_v0 = vpop.xlane.xlu1 %7832 }
0x1418   :  { %v7853_v1 = vsub.f32 %v7523_v10, %v7833_v0 }
0x141a   :  { %v7862_v11 = vmul.f32 1.442695, %v7853_v1 }
0x141c   :  { %20057 = vpow2.f32 %v7862_v11  ;;  %v7830_v21 = vpop.xlane.xlu0 %7829 }
0x141d   :  { %v7852_v22 = vsub.f32 %v7473_v38, %v7830_v21 }
0x141f   :  { %v7860_v14 = vmul.f32 1.442695, %v7852_v22 }
0x1421   :  { %20059 = vpow2.f32 %v7860_v14 }
0x1424   :  { %v7836_v6 = vpop.xlane.xlu0 %7835 }
0x1425   :  { %v7854_v4 = vsub.f32 %v7573_v12, %v7836_v6 }
0x1427   :  { %v7864_v41 = vmul.f32 1.442695, %v7854_v4 }
0x1428   :  { %v7839_v52 = vpop.xlane.xlu0 %7838 }
0x1429   :  { %v20058_v36 = vpop.eup %20057  ;;  %20061 = vpow2.f32 %v7864_v41  ;;  %v7855_v49 = vsub.f32 %v7623_v46, %v7839_v52 }
0x142a   :  { %v7879_v63 = vsel %vm1149_vm2, %v20058_v36, 0.0 }
0x142b   :  { %v7866_v59 = vmul.f32 1.442695, %v7855_v49  ;;  %7880 = vadd.xlane.f32.xlu0 %v7879_v63 }
0x142c   :  { %v7845_v44 = vpop.xlane.xlu0 %7844  ;;  %v7842_v61 = vpop.xlane.xlu1 %7841 }
0x142d   :  { %20063 = vpow2.f32 %v7866_v59  ;;  %v7857_v10 = vsub.f32 %v7723_v54, %v7845_v44  ;;  %v7856_v19 = vsub.f32 %v7673_v29, %v7842_v61 }
0x142e   :  { %v20060_v26 = vpop.eup %20059 }
0x142f   :  { %v7870_v38 = vmul.f32 1.442695, %v7857_v10  ;;  %v7868_v40 = vmul.f32 1.442695, %v7856_v19  ;;  %v7876_v28 = vsel %vm1149_vm2, %v20060_v26, 0.0 }
0x1430   :  { %7877 = vadd.xlane.f32.xlu1 %v7876_v28  ;;  %v7851_v0 = vpop.xlane.xlu0 %7850 }
0x1431   :  { %20065 = vpow2.f32 %v7870_v38  ;;  %v7859_v1 = vsub.f32 %v22338_v53, %v7851_v0 }
0x1432   :  { %20067 = vpow2.f32 %v7868_v40 }
0x1433   :  { %v7874_v21 = vmul.f32 1.442695, %v7859_v1 }
0x1434   :  { %v7848_v11 = vpop.xlane.xlu1 %7847 }
0x1435   :  { %v7858_v22 = vsub.f32 %v7773_v8, %v7848_v11  ;;  %20069 = vpow2.f32 %v7874_v21 }
0x1436   :  { %v20062_v12 = vpop.eup %20061 }
0x1437   :  { %v7882_v46 = vsel %vm1149_vm2, %v20062_v12, 0.0  ;;  %v7872_v14 = vmul.f32 1.442695, %v7858_v22 }
0x1438   :  { %7883 = vadd.xlane.f32.xlu1 %v7882_v46  ;;  %v7925_v8 = vpop.permute.xlu1 %7924 }
0x1439   :  { %20071 = vpow2.f32 %v7872_v14 }
0x143a   :  { %v22349_v23 = vpop.eup %20063 }
0x143b   :  { %v7885_v25 = vsel %vm1149_vm2, %v22349_v23, 0.0 }
0x143c   :  { %7886 = vadd.xlane.f32.xlu0 %v7885_v25 }
0x143e   :  { %v22353_v54 = vpop.eup %20065 }
0x143f   :  { %v22355_v29 = vpop.eup %20067  ;;  %v7891_v58 = vsel %vm1149_vm2, %v22353_v54, 0.0 }
0x1440   :  { %7892 = vadd.xlane.f32.xlu0 %v7891_v58  ;;  %v7888_v34 = vsel %vm1149_vm2, %v22355_v29, 0.0 }
0x1441   :  { %7889 = vadd.xlane.f32.xlu1 %v7888_v34 }
0x1442   :  { %v22368_v6 = vpop.eup %20069 }
0x1443   :  { %v7897_v4 = vsel %vm1149_vm2, %v22368_v6, 0.0 }
0x1446   :  { %v22372_v41 = vpop.eup %20071 }
0x1447   :  { %v7894_v52 = vsel %vm1149_vm2, %v22372_v41, 0.0 }
0x1452   :  { %8020 = vrot.lane.b32.xlu1 %v20996_v27, %s20365_s17 }
0x1456   :  { %8068 = vrot.lane.b32.xlu1 %v21023_v42, %s20365_s17  ;;  %7972 = vrot.lane.b32.xlu0 %v21013_v16, %s20365_s17 }
0x1475   :  { %7898 = vadd.xlane.f32.xlu0 %v7897_v4 }
0x147a   :  { %7895 = vadd.xlane.f32.xlu1 %v7894_v52 }
0x148b   :  { %8164 = vrot.lane.b32.xlu1 %v21053_v3, %s20365_s17  ;;  %8116 = vrot.lane.b32.xlu0 %v21031_v5, %s20365_s17 }
0x148f   :  { %8260 = vrot.lane.b32.xlu1 %v21070_v18, %s20365_s17  ;;  %8212 = vrot.lane.b32.xlu0 %v21041_v20, %s20365_s17 }
0x14b4   :  { %v7881_v53 = vpop.xlane.xlu0 %7880 }
0x14b5   :  { %20073 = vrcp.f32 %v7881_v53 }
0x14b9   :  { %v7878_v49 = vpop.xlane.xlu1 %7877 }
0x14ba   :  { %20075 = vrcp.f32 %v7878_v49 }
0x14c1   :  { %v7884_v63 = vpop.xlane.xlu1 %7883 }
0x14c2   :  { %v20074_v59 = vpop.eup %20073  ;;  %20077 = vrcp.f32 %v7884_v63 }
0x14c3   :  { %v7909_v44 = vmul.f32 %v20074_v59, %v20058_v36 }
0x14c5   :  { %v7887_v61 = vpop.xlane.xlu0 %7886  ;;  %v7917_v10 = vpack.c.bf16 %v7909_v44, %v7909_v44 }
0x14c6   :  { %20079 = vrcp.f32 %v7887_v61 }
0x14c7   :  { %v20076_v19 = vpop.eup %20075  ;;  %v7978_v38 = vsel %vm1149_vm2, %v7917_v10, 0 }
0x14c8   :  { %18245 = vmatpush3.bf16.xpose.msra.mxu0 %v7978_v38  ;;  %v7908_v40 = vmul.f32 %v20076_v19, %v20060_v26 }
0x14c9   :  { %v7893_v28 = vpop.xlane.xlu0 %7892  ;;  %18256 = vmatprep.subr.bf16.mxu0 %v25004_v30 }
0x14ca   :  { %20081 = vrcp.f32 %v7893_v28  ;;  %v7890_v46 = vpop.xlane.xlu1 %7889  ;;  %v7916_v25 = vpack.c.bf16 %v7908_v40, %v7908_v40 }
0x14cb   :  { %20083 = vrcp.f32 %v7890_v46 }
0x14cc   :  { %v7930_v58 = vsel %vm1149_vm2, %v7916_v25, 0  ;;  %v25121_v25 = vld [vmem:[#allocation39_spill] sm:$0xff] }
0x14cd   :  { %18239 = vmatpush3.bf16.xpose.msra.mxu1 %v7930_v58  ;;  %v7973_v34 = vpop.permute.xlu0 %7972  ;;  %v19425_v58 = vunpack.i.l.bf16 %v25121_v25 }
0x14ce   :  { %18250 = vmatprep.subr.bf16.mxu1 %v25004_v30  ;;  %v8021_v53 = vpop.permute.xlu1 %8020 }
0x14cf   :  { %v20078_v36 = vpop.eup %20077  ;;  %18247 = vmatmul.mubr.msk.bf16.vlgmr.msra.gmra.mxu0 %vm1149_vm2, %v7973_v34  ;;  %v25122_v34 = vld [vmem:[#allocation37_spill] sm:$0xff] }
0x14d0   :  { %v7910_v0 = vmul.f32 %v20078_v36, %v20062_v12  ;;  %18258 = vmatprep.mubr.msk.bf16.mxu0 %vm20357_vm1, %v25004_v30  ;;  %v19420_v36 = vunpack.i.l.bf16 %v25122_v34 }
0x14d2   :  { %v7918_v26 = vpack.c.bf16 %v7910_v0, %v7910_v0  ;;  %v8069_v59 = vpop.permute.xlu1 %8068 }
0x14d3   :  { %v20080_v1 = vpop.eup %20079 }
0x14d4   :  { %18241 = vmatmul.mubr.msk.bf16.vlgmr.msra.gmra.mxu1 %vm1149_vm2, %v7925_v8  ;;  %v8026_v11 = vsel %vm1149_vm2, %v7918_v26, 0  ;;  %v7911_v21 = vmul.f32 %v20080_v1, %v22349_v23  ;;  %v22423_v1 = vpack.c.bf16 %v19425_v58, %v19420_v36 }
0x14d5   :  { %18251 = vmatpush3.bf16.xpose.msra.mxu1 %v8026_v11  ;;  %18252 = vmatprep.mubr.msk.bf16.mxu1 %vm20357_vm1, %v25004_v30 }
0x14d6   :  { %v7919_v22 = vpack.c.bf16 %v7911_v21, %v7911_v21  ;;  %18262 = vmatprep.subr.bf16.mxu1 %v25004_v30  ;;  %v25123_v21 = vld [vmem:[#allocation36_spill] sm:$0xff] }
0x14d7   :  { %v20082_v14 = vpop.eup %20081 }
0x14d8   :  { %v20084_v12 = vpop.eup %20083  ;;  %v8074_v4 = vsel %vm1149_vm2, %v7919_v22, 0  ;;  %v7913_v52 = vmul.f32 %v20082_v14, %v22353_v54  ;;  %v25124_v14 = vld [vmem:[#allocation34_spill] sm:$0xff] }
0x14d9   :  { %18257 = vmatpush3.bf16.xpose.msra.mxu0 %v8074_v4  ;;  %v7912_v8 = vmul.f32 %v20084_v12, %v22355_v29  ;;  %v19256_v12 = vunpack.i.l.bf16 %v25124_v14 }
0x14da   :  { %18268 = vmatprep.subr.bf16.mxu0 %v25004_v30  ;;  %v7921_v49 = vpack.c.bf16 %v7913_v52, %v7913_v52  ;;  %v19423_v52 = vunpack.i.h.bf16 %v25122_v34  ;;  %v25130_v34 = vld [vmem:[#allocation58_spill] sm:$0xff] }
0x14db   :  { %v7920_v23 = vpack.c.bf16 %v7912_v8, %v7912_v8  ;;  %v19502_v36 = vunpack.i.l.bf16 %v25130_v34 }
0x14dc   :  { %18253 = vmatmul.mubr.msk.bf16.vlgmr.msra.gmra.mxu1 %vm1149_vm2, %v8021_v53  ;;  %v8170_v54 = vsel %vm1149_vm2, %v7921_v49, 0  ;;  %v19428_v53 = vunpack.i.h.bf16 %v25121_v25  ;;  %v25129_v25 = vld [vmem:[#allocation60_spill] sm:$0xff] }
0x14dd   :  { %v8122_v63 = vsel %vm1149_vm2, %v7920_v23, 0  ;;  %18264 = vmatprep.mubr.msk.bf16.mxu1 %vm20357_vm1, %v25004_v30  ;;  %v19507_v58 = vunpack.i.l.bf16 %v25129_v25 }
0x14de   :  { %18263 = vmatpush3.bf16.xpose.msra.mxu1 %v8122_v63  ;;  %v22442_v49 = vpack.c.bf16 %v19428_v53, %v19423_v52  ;;  %v19264_v63 = vunpack.i.h.bf16 %v25123_v21  ;;  %v25134_v53 = vld [vmem:[#allocation10_spill] sm:$0xff] }
0x14df   :  { %18274 = vmatprep.subr.bf16.mxu1 %v25004_v30 }
0x14e0   :  { %18259 = vmatmul.mubr.msk.bf16.vlgmr.msra.gmra.mxu0 %vm1149_vm2, %v8069_v59  ;;  %v25125_v59 = vld [vmem:[#allocation15_spill] sm:$0xff] }
0x14e1   :  { %18269 = vmatpush3.bf16.xpose.msra.mxu0 %v8170_v54  ;;  %18270 = vmatprep.mubr.msk.bf16.mxu0 %vm20357_vm1, %v25004_v30  ;;  %v8491_v54 = vsel %vm1149_vm2, %v25125_v59, 0 }
0x14e2   :  { %18280 = vmatprep.subr.bf16.mxu0 %v25004_v30 }
0x14fe   :  { %v7899_v29 = vpop.xlane.xlu0 %7898 }
0x14ff   :  { %20085 = vrcp.f32 %v7899_v29  ;;  %v25126_v29 = vld [vmem:[#allocation63_spill] sm:$0xff] }
0x1502   :  { %v8117_v44 = vpop.permute.xlu0 %8116 }
0x1503   :  { %v7896_v61 = vpop.xlane.xlu1 %7895  ;;  %18265 = vmatmul.mubr.msk.bf16.vlgmr.msra.gmra.mxu1 %vm1149_vm2, %v8117_v44  ;;  %v19671_v44 = vunpack.i.l.bf16 %v25126_v29 }
0x1504   :  { %20087 = vrcp.f32 %v7896_v61  ;;  %18276 = vmatprep.mubr.msk.bf16.mxu1 %vm20357_vm1, %v25004_v30  ;;  %v25127_v61 = vld [vmem:[#allocation61_spill] sm:$0xff] }
0x1506   :  { %v8213_v8 = vpop.permute.xlu0 %8212 }
0x1507   :  { %v8165_v10 = vpop.permute.xlu1 %8164 }
0x1508   :  { %18271 = vmatmul.mubr.msk.bf16.vlgmr.msra.gmra.mxu0 %vm1149_vm2, %v8165_v10  ;;  %v19666_v10 = vunpack.i.l.bf16 %v25127_v61 }
0x1509   :  { %18282 = vmatprep.mubr.msk.bf16.mxu0 %vm20357_vm1, %v25004_v30 }
0x150b   :  { %v8261_v22 = vpop.permute.xlu1 %8260 }
0x150c   :  { %v20086_v19 = vpop.eup %20085 }
0x150d   :  { %v7915_v38 = vmul.f32 %v20086_v19, %v22368_v6  ;;  %v19261_v6 = vunpack.i.l.bf16 %v25123_v21  ;;  %v19259_v19 = vunpack.i.h.bf16 %v25124_v14  ;;  %v22477_v14 = vpack.c.bf16 %v19507_v58, %v19502_v36  ;;  %v25136_v58 = vld [vmem:[#allocation88_spill] sm:$0xff] }
0x150f   :  { %v7923_v40 = vpack.c.bf16 %v7915_v38, %v7915_v38  ;;  %v22432_v4 = vpack.c.bf16 %v19261_v6, %v19256_v12  ;;  %v22458_v38 = vpack.c.bf16 %v19264_v63, %v19259_v19  ;;  %v25133_v6 = vld [vmem:[#allocation83_spill] sm:$0xff]  ;;  %v19669_v12 = vunpack.i.h.bf16 %v25127_v61  ;;  %v25135_v19 = vld [vmem:[#allocation86_spill] sm:$0xff] }
0x1510   :  { %v19584_v63 = vunpack.i.l.bf16 %v25133_v6  ;;  %v19505_v61 = vunpack.i.h.bf16 %v25130_v34 }
0x1511   :  { %v20088_v28 = vpop.eup %20087  ;;  %v8266_v46 = vsel %vm1149_vm2, %v7923_v40, 0  ;;  %v8353_v23 = vsel %vm1149_vm2, %v22432_v4, 0  ;;  %v22460_v40 = vpack.c.bf16 %v19671_v44, %v19666_v10 }
0x1512   :  { %18281 = vmatpush3.bf16.xpose.msra.mxu0 %v8266_v46  ;;  %v7914_v0 = vmul.f32 %v20088_v28, %v22372_v41  ;;  %v8399_v41 = vsel %vm1149_vm2, %v22423_v1, 0  ;;  %v25128_v28 = vld [vmem:[#allocation12_spill] sm:$0xff] }
0x1513   :  { %18292 = vmatprep.subr.bf16.mxu0 %v25004_v30  ;;  %v8445_v46 = vsel %vm1149_vm2, %v25128_v28, 0 }
0x1514   :  { %v7922_v26 = vpack.c.bf16 %v7914_v0, %v7914_v0  ;;  %v25131_v0 = vld [vmem:[#allocation13_spill] sm:$0xff] }
0x1516   :  { %v8218_v11 = vsel %vm1149_vm2, %v7922_v26, 0  ;;  %v8583_v26 = vsel %vm1149_vm2, %v22460_v40, 0 }
0x1517   :  { %18275 = vmatpush3.bf16.xpose.msra.mxu1 %v8218_v11  ;;  %v25132_v11 = vld [vmem:[#allocation85_spill] sm:$0xff] }
0x1518   :  { %18286 = vmatprep.subr.bf16.mxu1 %v25004_v30  ;;  %v19592_v21 = vunpack.i.h.bf16 %v25132_v11 }
0x1519   :  { %18283 = vmatmul.mubr.msk.bf16.vlgmr.msra.gmra.mxu0 %vm1149_vm2, %v8261_v22  ;;  %v19587_v22 = vunpack.i.h.bf16 %v25133_v6 }
0x151a   :  { %18293 = vmatpush3.bf16.xpose.msra.mxu0 %v8399_v41  ;;  %18294 = vmatprep.mubr.msk.bf16.mxu0 %vm20357_vm1, %v25004_v30  ;;  %v19674_v41 = vunpack.i.h.bf16 %v25126_v29  ;;  %v19510_v29 = vunpack.i.h.bf16 %v25129_v25  ;;  %v19756_v25 = vunpack.i.h.bf16 %v25136_v58 }
0x151b   :  { %18304 = vmatprep.subr.bf16.mxu0 %v25004_v30  ;;  %v22484_v52 = vpack.c.bf16 %v19592_v21, %v19587_v22  ;;  %v19753_v21 = vunpack.i.l.bf16 %v25136_v58 }
0x151c   :  { %v22510_v36 = vpack.c.bf16 %v19510_v29, %v19505_v61 }
0x151d   :  { %v8675_v44 = vsel %vm1149_vm2, %v22484_v52, 0 }
0x151e   :  { %18277 = vmatmul.mubr.msk.bf16.vlgmr.msra.gmra.mxu1 %vm1149_vm2, %v8213_v8  ;;  %v8537_v8 = vsel %vm1149_vm2, %v22477_v14, 0 }
0x151f   :  { %18287 = vmatpush3.bf16.xpose.msra.mxu1 %v8353_v23  ;;  %18288 = vmatprep.mubr.msk.bf16.mxu1 %vm20357_vm1, %v25004_v30  ;;  %v19589_v23 = vunpack.i.l.bf16 %v25132_v11  ;;  %v19748_v11 = vunpack.i.l.bf16 %v25135_v19 }
0x1520   :  { %18298 = vmatprep.subr.bf16.mxu1 %v25004_v30 }
0x1521   :  { %18295 = vmatmul.mubr.msk.bf16.vlgmr.msra.gmra.mxu0 %vm1149_vm2, %v22442_v49  ;;  %v22503_v10 = vpack.c.bf16 %v19589_v23, %v19584_v63  ;;  %v22527_v6 = vpack.c.bf16 %v19753_v21, %v19748_v11 }
0x1522   :  { %18305 = vmatpush3.bf16.xpose.msra.mxu0 %v8491_v54  ;;  %18306 = vmatprep.mubr.msk.bf16.mxu0 %vm20357_vm1, %v25004_v30  ;;  %v22492_v54 = vpack.c.bf16 %v19674_v41, %v19669_v12 }
0x1523   :  { %18316 = vmatprep.subr.bf16.mxu0 %v25004_v30  ;;  %v8629_v34 = vsel %vm1149_vm2, %v22503_v10, 0 }
0x1526   :  { %18289 = vmatmul.mubr.msk.bf16.vlgmr.msra.gmra.mxu1 %vm1149_vm2, %v22458_v38 }
0x1527   :  { %18299 = vmatpush3.bf16.xpose.msra.mxu1 %v8445_v46  ;;  %18300 = vmatprep.mubr.msk.bf16.mxu1 %vm20357_vm1, %v25004_v30  ;;  %v19751_v46 = vunpack.i.h.bf16 %v25135_v19 }
0x1528   :  { %18310 = vmatprep.subr.bf16.mxu1 %v25004_v30 }
0x1529   :  { %18307 = vmatmul.mubr.msk.bf16.vlgmr.msra.gmra.mxu0 %vm1149_vm2, %v25131_v0 }
0x152a   :  { %18317 = vmatpush3.bf16.xpose.msra.mxu0 %v8583_v26  ;;  %18318 = vmatprep.mubr.msk.bf16.mxu0 %vm20357_vm1, %v25004_v30  ;;  %v22516_v26 = vpack.c.bf16 %v19756_v25, %v19751_v46 }
0x152b   :  { %18328 = vmatprep.subr.bf16.mxu0 %v25004_v30 }
0x152e   :  { %18301 = vmatmul.mubr.msk.bf16.vlgmr.msra.gmra.mxu1 %vm1149_vm2, %v25134_v53 }
0x152f   :  { %18311 = vmatpush3.bf16.xpose.msra.mxu1 %v8537_v8  ;;  %18312 = vmatprep.mubr.msk.bf16.mxu1 %vm20357_vm1, %v25004_v30 }
0x1530   :  { %18322 = vmatprep.subr.bf16.mxu1 %v25004_v30 }
0x1531   :  { %18319 = vmatmul.mubr.msk.bf16.vlgmr.msra.gmra.mxu0 %vm1149_vm2, %v22492_v54 }
0x1532   :  { %18329 = vmatpush3.bf16.xpose.msra.mxu0 %v8675_v44  ;;  %18330 = vmatprep.mubr.msk.bf16.mxu0 %vm20357_vm1, %v25004_v30 }
0x1533   :  { %18340 = vmatprep.subr.bf16.mxu0 %v25004_v30 }
0x1536   :  { %18313 = vmatmul.mubr.msk.bf16.vlgmr.msra.gmra.mxu1 %vm1149_vm2, %v22510_v36 }
0x1537   :  { %18323 = vmatpush3.bf16.xpose.msra.mxu1 %v8629_v34  ;;  %18324 = vmatprep.mubr.msk.bf16.mxu1 %vm20357_vm1, %v25004_v30 }
0x1538   :  { %18334 = vmatprep.subr.bf16.mxu1 %v25004_v30 }
0x1539   :  { %18331 = vmatmul.mubr.msk.bf16.vlgmr.msra.gmra.mxu0 %vm1149_vm2, %v22516_v26 }
0x153a   :  { %18342 = vmatprep.mubr.msk.bf16.mxu0 %vm20357_vm1, %v25004_v30 }
0x153e   :  { %18325 = vmatmul.mubr.msk.bf16.vlgmr.msra.gmra.mxu1 %vm1149_vm2, %v22527_v6 }
0x153f   :  { %18336 = vmatprep.mubr.msk.bf16.mxu1 %vm20357_vm1, %v25004_v30 }
0x158f   :  { %v22533_v22 = vpop.f32.mrf.mxu0 }
0x1590   :  { %25137 = vst [vmem:[#allocation9_spill] sm:$0xff] %v22533_v22 }
0x1591   :  { %v18248_v12 = vpop.f32.mrf.mxu0 }
0x1593   :  { %v8017_v41 = vpop.f32.mrf.mxu0 }
0x1594   :  { %v22535_v8 = vpop.f32.mrf.mxu1 }
0x1595   :  { %25138 = vst [vmem:[#allocation81_spill] sm:$0xff] %v22535_v8  ;;  %v18249_v23 = vpop.f32.mrf.mxu0 }
0x1596   :  { %v18242_v63 = vpop.f32.mrf.mxu1 }
0x1598   :  { %v7969_v29 = vpop.f32.mrf.mxu1 }
0x159a   :  { %v18243_v44 = vpop.f32.mrf.mxu1 }
0x159c   :  { %v22537_v61 = vpop.f32.mrf.mxu1 }
0x159d   :  { %25139 = vst [vmem:[#allocation79_spill] sm:$0xff] %v22537_v61 }
0x159e   :  { %v18254_v19 = vpop.f32.mrf.mxu1 }
0x15a0   :  { %v8065_v46 = vpop.f32.mrf.mxu1  ;;  %v22539_v58 = vpop.f32.mrf.mxu0 }
0x15a1   :  { %25140 = vst [vmem:[#allocation6_spill] sm:$0xff] %v22539_v58 }
0x15a2   :  { %v18255_v25 = vpop.f32.mrf.mxu1  ;;  %v18260_v34 = vpop.f32.mrf.mxu0 }
0x15a4   :  { %v8113_v11 = vpop.f32.mrf.mxu0 }
0x15a6   :  { %v18261_v21 = vpop.f32.mrf.mxu0 }
0x15c3   :  { %v22541_v2 = vpop.f32.mrf.mxu1 }
0x15c4   :  { %25141 = vst [vmem:[#allocation82_spill] sm:$0xff] %v22541_v2 }
0x15c5   :  { %v18266_v12 = vpop.f32.mrf.mxu1 }
0x15c7   :  { %v8161_v41 = vpop.f32.mrf.mxu1 }
0x15c8   :  { %v22543_v22 = vpop.f32.mrf.mxu0 }
0x15c9   :  { %25142 = vst [vmem:[#allocation84_spill] sm:$0xff] %v22543_v22  ;;  %v18267_v23 = vpop.f32.mrf.mxu1 }
0x15ca   :  { %v18272_v63 = vpop.f32.mrf.mxu0 }
0x15cc   :  { %v8209_v29 = vpop.f32.mrf.mxu0 }
0x15ce   :  { %v18273_v44 = vpop.f32.mrf.mxu0 }
0x15d9   :  { %v22545_v8 = vpop.f32.mrf.mxu0 }
0x15da   :  { %25143 = vst [vmem:[#allocation39_spill] sm:$0xff] %v22545_v8 }
0x15db   :  { %v18284_v19 = vpop.f32.mrf.mxu0 }
0x15dd   :  { %v8305_v46 = vpop.f32.mrf.mxu0 }
0x15de   :  { %v22547_v45 = vpop.f32.mrf.mxu1 }
0x15df   :  { %25144 = vst [vmem:[#allocation37_spill] sm:$0xff] %v22547_v45  ;;  %v18285_v25 = vpop.f32.mrf.mxu0 }
0x15e0   :  { %v18278_v34 = vpop.f32.mrf.mxu1 }
0x15e1   :  { %v8435_v11 = vpop.f32.mrf.mxu0 }
0x15e2   :  { %v8257_v21 = vpop.f32.mrf.mxu1  ;;  %v8436_v61 = vadd.f32 %v8435_v11, %v20867_v43 }
0x15e3   :  { %v18296_v12 = vpop.f32.mrf.mxu0 }
0x15e4   :  { %v18279_v41 = vpop.f32.mrf.mxu1  ;;  %v8720_v58 = vsel %vm1149_vm2, %v8436_v61, -inf }
0x15e5   :  { %8721 = vmax.xlane.f32.xlu1 %v8720_v58  ;;  %v8438_v23 = vpop.f32.mrf.mxu0 }
0x15e6   :  { %v8389_v63 = vpop.f32.mrf.mxu1 }
0x15e7   :  { %v8390_v29 = vadd.f32 %v8389_v63, %v20867_v43  ;;  %v18297_v44 = vpop.f32.mrf.mxu0 }
0x15e8   :  { %v18290_v19 = vpop.f32.mrf.mxu1 }
0x15e9   :  { %v8527_v46 = vpop.f32.mrf.mxu0  ;;  %v8717_v24 = vsel %vm1149_vm2, %v8390_v29, -inf }
0x15ea   :  { %8718 = vmax.xlane.f32.xlu0 %v8717_v24  ;;  %v8392_v25 = vpop.f32.mrf.mxu1  ;;  %v8528_v58 = vadd.f32 %v8527_v46, %v20867_v43 }
0x15eb   :  { %v18308_v34 = vpop.f32.mrf.mxu0 }
0x15ec   :  { %v18291_v21 = vpop.f32.mrf.mxu1  ;;  %v8726_v34 = vsel %vm1149_vm2, %v8528_v58, -inf }
0x15ed   :  { %v8530_v50 = vpop.f32.mrf.mxu0 }
0x15ee   :  { %v8481_v11 = vpop.f32.mrf.mxu1 }
0x15ef   :  { %v8482_v12 = vadd.f32 %v8481_v11, %v20867_v43  ;;  %v18309_v41 = vpop.f32.mrf.mxu0 }
0x15f0   :  { %v18302_v2 = vpop.f32.mrf.mxu1 }
0x15f1   :  { %v8619_v23 = vpop.f32.mrf.mxu0  ;;  %v8723_v63 = vsel %vm1149_vm2, %v8482_v12, -inf }
0x15f2   :  { %8724 = vmax.xlane.f32.xlu0 %v8723_v63  ;;  %v8484_v44 = vpop.f32.mrf.mxu1  ;;  %v8620_v24 = vadd.f32 %v8619_v23, %v20867_v43 }
0x15f3   :  { %v18320_v19 = vpop.f32.mrf.mxu0 }
0x15f4   :  { %v18303_v22 = vpop.f32.mrf.mxu1  ;;  %v8732_v46 = vsel %vm1149_vm2, %v8620_v24, -inf }
0x15f5   :  { %v8622_v25 = vpop.f32.mrf.mxu0 }
0x15f6   :  { %8727 = vmax.xlane.f32.xlu0 %v8726_v34  ;;  %v8573_v50 = vpop.f32.mrf.mxu1 }
0x15f7   :  { %v8574_v21 = vadd.f32 %v8573_v50, %v20867_v43  ;;  %v18321_v11 = vpop.f32.mrf.mxu0 }
0x15f8   :  { %v18314_v2 = vpop.f32.mrf.mxu1 }
0x15f9   :  { %v8711_v41 = vpop.f32.mrf.mxu0  ;;  %v8729_v17 = vsel %vm1149_vm2, %v8574_v21, -inf }
0x15fa   :  { %v22562_v63 = vadd.f32 %v8711_v41, %v20867_v43  ;;  %8733 = vmax.xlane.f32.xlu0 %v8732_v46  ;;  %8730 = vmax.xlane.f32.xlu1 %v8729_v17  ;;  %v8576_v22 = vpop.f32.mrf.mxu1 }
0x15fb   :  { %v18332_v23 = vpop.f32.mrf.mxu0 }
0x15fc   :  { %v18315_v44 = vpop.f32.mrf.mxu1  ;;  %v8738_v19 = vsel %vm1149_vm2, %v22562_v63, -inf }
0x15fd   :  { %v8714_v25 = vpop.f32.mrf.mxu0 }
0x15fe   :  { %8739 = vmax.xlane.f32.xlu0 %v8738_v19  ;;  %v8665_v34 = vpop.f32.mrf.mxu1 }
0x15ff   :  { %v8666_v50 = vadd.f32 %v8665_v34, %v20867_v43  ;;  %v18333_v11 = vpop.f32.mrf.mxu0 }
0x1600   :  { %v18326_v2 = vpop.f32.mrf.mxu1 }
0x1601   :  { %v8735_v48 = vsel %vm1149_vm2, %v8666_v50, -inf }
0x1602   :  { %8736 = vmax.xlane.f32.xlu1 %v8735_v48  ;;  %v8668_v41 = vpop.f32.mrf.mxu1 }
0x1604   :  { %v18327_v45 = vpop.f32.mrf.mxu1 }
0x1613   :  { %8813 = vrot.lane.b32.xlu1 %v20984_v51, %s20366_s1 }
0x166e   :  { %v8722_v17 = vpop.xlane.xlu1 %8721 }
0x166f   :  { %v8742_v46 = vsub.f32 %v8436_v61, %v8722_v17 }
0x1671   :  { %v8751_v22 = vmul.f32 1.442695, %v8742_v46 }
0x1673   :  { %20089 = vpow2.f32 %v8751_v22  ;;  %v8719_v23 = vpop.xlane.xlu0 %8718 }
0x1674   :  { %v8741_v44 = vsub.f32 %v8390_v29, %v8719_v23 }
0x1676   :  { %v8749_v19 = vmul.f32 1.442695, %v8741_v44 }
0x1678   :  { %20091 = vpow2.f32 %v8749_v19 }
0x167b   :  { %v8725_v25 = vpop.xlane.xlu0 %8724 }
0x167c   :  { %v8743_v34 = vsub.f32 %v8482_v12, %v8725_v25 }
0x167e   :  { %v8753_v11 = vmul.f32 1.442695, %v8743_v34 }
0x167f   :  { %v8728_v2 = vpop.xlane.xlu0 %8727 }
0x1680   :  { %v20090_v8 = vpop.eup %20089  ;;  %20093 = vpow2.f32 %v8753_v11  ;;  %v8744_v48 = vsub.f32 %v8528_v58, %v8728_v2 }
0x1681   :  { %v8768_v45 = vsel %vm1149_vm2, %v20090_v8, 0.0 }
0x1682   :  { %v8755_v41 = vmul.f32 1.442695, %v8744_v48  ;;  %8769 = vadd.xlane.f32.xlu0 %v8768_v45 }
0x1683   :  { %v8734_v55 = vpop.xlane.xlu0 %8733  ;;  %v8731_v62 = vpop.xlane.xlu1 %8730 }
0x1684   :  { %20095 = vpow2.f32 %v8755_v41  ;;  %v8746_v61 = vsub.f32 %v8620_v24, %v8734_v55  ;;  %v8745_v17 = vsub.f32 %v8574_v21, %v8731_v62 }
0x1685   :  { %v20092_v46 = vpop.eup %20091 }
0x1686   :  { %v8759_v29 = vmul.f32 1.442695, %v8746_v61  ;;  %v8757_v22 = vmul.f32 1.442695, %v8745_v17  ;;  %v8765_v23 = vsel %vm1149_vm2, %v20092_v46, 0.0 }
0x1687   :  { %8766 = vadd.xlane.f32.xlu1 %v8765_v23  ;;  %v8740_v25 = vpop.xlane.xlu0 %8739 }
0x1688   :  { %20097 = vpow2.f32 %v8759_v29  ;;  %v8748_v34 = vsub.f32 %v22562_v63, %v8740_v25 }
0x1689   :  { %20099 = vpow2.f32 %v8757_v22 }
0x168a   :  { %v8763_v2 = vmul.f32 1.442695, %v8748_v34 }
0x168b   :  { %v8737_v11 = vpop.xlane.xlu1 %8736 }
0x168c   :  { %v8747_v48 = vsub.f32 %v8666_v50, %v8737_v11  ;;  %20101 = vpow2.f32 %v8763_v2 }
0x168d   :  { %v20094_v12 = vpop.eup %20093 }
0x168e   :  { %v8771_v58 = vsel %vm1149_vm2, %v20094_v12, 0.0  ;;  %v8761_v45 = vmul.f32 1.442695, %v8747_v48 }
0x168f   :  { %8772 = vadd.xlane.f32.xlu1 %v8771_v58  ;;  %v8814_v50 = vpop.permute.xlu1 %8813 }
0x1690   :  { %20103 = vpow2.f32 %v8761_v45 }
0x1691   :  { %v22573_v44 = vpop.eup %20095 }
0x1692   :  { %v8774_v19 = vsel %vm1149_vm2, %v22573_v44, 0.0 }
0x1693   :  { %8775 = vadd.xlane.f32.xlu0 %v8774_v19 }
0x1695   :  { %v22577_v55 = vpop.eup %20097 }
0x1696   :  { %v22579_v62 = vpop.eup %20099  ;;  %v8780_v24 = vsel %vm1149_vm2, %v22577_v55, 0.0 }
0x1697   :  { %8781 = vadd.xlane.f32.xlu0 %v8780_v24  ;;  %v8777_v21 = vsel %vm1149_vm2, %v22579_v62, 0.0 }
0x1698   :  { %8778 = vadd.xlane.f32.xlu1 %v8777_v21 }
0x1699   :  { %v22592_v41 = vpop.eup %20101 }
0x169a   :  { %v8786_v61 = vsel %vm1149_vm2, %v22592_v41, 0.0 }
0x169d   :  { %v22596_v17 = vpop.eup %20103 }
0x169e   :  { %v8783_v29 = vsel %vm1149_vm2, %v22596_v17, 0.0 }
0x16a9   :  { %8909 = vrot.lane.b32.xlu1 %v20996_v27, %s20366_s1 }
0x16ad   :  { %8957 = vrot.lane.b32.xlu1 %v21023_v42, %s20366_s1  ;;  %8861 = vrot.lane.b32.xlu0 %v21013_v16, %s20366_s1 }
0x16cc   :  { %8787 = vadd.xlane.f32.xlu0 %v8786_v61 }
0x16d1   :  { %8784 = vadd.xlane.f32.xlu1 %v8783_v29 }
0x16e2   :  { %9053 = vrot.lane.b32.xlu1 %v21053_v3, %s20366_s1  ;;  %9005 = vrot.lane.b32.xlu0 %v21031_v5, %s20366_s1 }
0x16e6   :  { %9149 = vrot.lane.b32.xlu1 %v21070_v18, %s20366_s1  ;;  %9101 = vrot.lane.b32.xlu0 %v21041_v20, %s20366_s1 }
0x170b   :  { %v8770_v63 = vpop.xlane.xlu0 %8769 }
0x170c   :  { %20105 = vrcp.f32 %v8770_v63 }
0x1710   :  { %v8767_v22 = vpop.xlane.xlu1 %8766 }
0x1711   :  { %20107 = vrcp.f32 %v8767_v22 }
0x1718   :  { %v8773_v23 = vpop.xlane.xlu1 %8772 }
0x1719   :  { %v20106_v58 = vpop.eup %20105  ;;  %20109 = vrcp.f32 %v8773_v23 }
0x171a   :  { %v8798_v19 = vmul.f32 %v20106_v58, %v20090_v8 }
0x171c   :  { %v8776_v24 = vpop.xlane.xlu0 %8775  ;;  %v8806_v21 = vpack.c.bf16 %v8798_v19, %v8798_v19 }
0x171d   :  { %20111 = vrcp.f32 %v8776_v24 }
0x171e   :  { %v20108_v25 = vpop.eup %20107  ;;  %v8867_v34 = vsel %vm1149_vm2, %v8806_v21, 0 }
0x171f   :  { %18341 = vmatpush3.bf16.xpose.msra.mxu0 %v8867_v34  ;;  %v8797_v11 = vmul.f32 %v20108_v25, %v20092_v46 }
0x1720   :  { %v8782_v2 = vpop.xlane.xlu0 %8781  ;;  %18352 = vmatprep.subr.bf16.mxu0 %v25004_v30 }
0x1721   :  { %20113 = vrcp.f32 %v8782_v2  ;;  %v8779_v48 = vpop.xlane.xlu1 %8778  ;;  %v8805_v45 = vpack.c.bf16 %v8797_v11, %v8797_v11 }
0x1722   :  { %20115 = vrcp.f32 %v8779_v48 }
0x1723   :  { %v8819_v61 = vsel %vm1149_vm2, %v8805_v45, 0 }
0x1724   :  { %18335 = vmatpush3.bf16.xpose.msra.mxu1 %v8819_v61  ;;  %v8862_v29 = vpop.permute.xlu0 %8861 }
0x1725   :  { %18346 = vmatprep.subr.bf16.mxu1 %v25004_v30  ;;  %v8910_v34 = vpop.permute.xlu1 %8909 }
0x1726   :  { %v20110_v8 = vpop.eup %20109  ;;  %18343 = vmatmul.mubr.msk.bf16.vlgmr.msra.gmra.mxu0 %vm1149_vm2, %v8862_v29 }
0x1727   :  { %v8799_v63 = vmul.f32 %v20110_v8, %v20094_v12  ;;  %18354 = vmatprep.mubr.msk.bf16.mxu0 %vm20357_vm1, %v25004_v30 }
0x1729   :  { %v8807_v46 = vpack.c.bf16 %v8799_v63, %v8799_v63  ;;  %v8958_v48 = vpop.permute.xlu1 %8957 }
0x172a   :  { %v20112_v22 = vpop.eup %20111 }
0x172b   :  { %18337 = vmatmul.mubr.msk.bf16.vlgmr.msra.gmra.mxu1 %vm1149_vm2, %v8814_v50  ;;  %v8915_v23 = vsel %vm1149_vm2, %v8807_v46, 0  ;;  %v8800_v58 = vmul.f32 %v20112_v22, %v22573_v44 }
0x172c   :  { %18347 = vmatpush3.bf16.xpose.msra.mxu1 %v8915_v23  ;;  %18348 = vmatprep.mubr.msk.bf16.mxu1 %vm20357_vm1, %v25004_v30 }
0x172d   :  { %v8808_v19 = vpack.c.bf16 %v8800_v58, %v8800_v58  ;;  %18358 = vmatprep.subr.bf16.mxu1 %v25004_v30 }
0x172e   :  { %v20114_v24 = vpop.eup %20113 }
0x172f   :  { %v20116_v12 = vpop.eup %20115  ;;  %v8963_v21 = vsel %vm1149_vm2, %v8808_v19, 0  ;;  %v8802_v25 = vmul.f32 %v20114_v24, %v22577_v55  ;;  %v9291_v24 = vrot.slane %v22423_v1, 4  ;;  %v9391_v1 = vrot.slane %v25125_v59, 4 }
0x1730   :  { %18353 = vmatpush3.bf16.xpose.msra.mxu0 %v8963_v21  ;;  %v8801_v50 = vmul.f32 %v20116_v12, %v22579_v62  ;;  %v9491_v59 = vrot.slane %v22460_v40, 4  ;;  %v9339_v40 = vrot.slane %v25134_v53, 4  ;;  %v9541_v53 = vrot.slane %v22503_v10, 4 }
0x1731   :  { %18364 = vmatprep.subr.bf16.mxu0 %v25004_v30  ;;  %v8810_v11 = vpack.c.bf16 %v8802_v25, %v8802_v25  ;;  %v9241_v25 = vrot.slane %v22432_v4, 4  ;;  %v9396_v4 = vsel %vm1149_vm2, %v9391_v1, 0  ;;  %v9539_v10 = vrot.slane %v22527_v6, 4 }
0x1732   :  { %v8809_v44 = vpack.c.bf16 %v8801_v50, %v8801_v50  ;;  %v9289_v50 = vrot.slane %v22442_v49, 4  ;;  %v9239_v49 = vrot.slane %v22458_v38, 4  ;;  %v9441_v38 = vrot.slane %v22477_v14, 4 }
0x1733   :  { %18349 = vmatmul.mubr.msk.bf16.vlgmr.msra.gmra.mxu1 %vm1149_vm2, %v8910_v34  ;;  %v9059_v55 = vsel %vm1149_vm2, %v8810_v11, 0  ;;  %v9246_v34 = vsel %vm1149_vm2, %v9241_v25, 0 }
0x1734   :  { %v9011_v2 = vsel %vm1149_vm2, %v8809_v44, 0  ;;  %18360 = vmatprep.mubr.msk.bf16.mxu1 %vm20357_vm1, %v25004_v30  ;;  %v9341_v44 = vrot.slane %v25128_v28, 4  ;;  %v9496_v28 = vsel %vm1149_vm2, %v9491_v59, 0 }
0x1735   :  { %18359 = vmatpush3.bf16.xpose.msra.mxu1 %v9011_v2  ;;  %v9389_v2 = vrot.slane %v25131_v0, 4  ;;  %v9591_v0 = vrot.slane %v22484_v52, 4  ;;  %v9439_v52 = vrot.slane %v22510_v36, 4 }
0x1736   :  { %18370 = vmatprep.subr.bf16.mxu1 %v25004_v30  ;;  %v9346_v11 = vsel %vm1149_vm2, %v9341_v44, 0 }
0x1737   :  { %18355 = vmatmul.mubr.msk.bf16.vlgmr.msra.gmra.mxu0 %vm1149_vm2, %v8958_v48  ;;  %v9446_v48 = vsel %vm1149_vm2, %v9441_v38, 0  ;;  %v9596_v14 = vsel %vm1149_vm2, %v9591_v0, 0 }
0x1738   :  { %18365 = vmatpush3.bf16.xpose.msra.mxu0 %v9059_v55  ;;  %18366 = vmatprep.mubr.msk.bf16.mxu0 %vm20357_vm1, %v25004_v30  ;;  %v9489_v55 = vrot.slane %v22492_v54, 4  ;;  %v9546_v54 = vsel %vm1149_vm2, %v9541_v53, 0 }
0x1739   :  { %18376 = vmatprep.subr.bf16.mxu0 %v25004_v30 }
0x1755   :  { %v8788_v62 = vpop.xlane.xlu0 %8787 }
0x1756   :  { %20117 = vrcp.f32 %v8788_v62  ;;  %v9589_v62 = vrot.slane %v22516_v26, 4 }
0x1759   :  { %v9006_v45 = vpop.permute.xlu0 %9005 }
0x175a   :  { %v8785_v61 = vpop.xlane.xlu1 %8784  ;;  %18361 = vmatmul.mubr.msk.bf16.vlgmr.msra.gmra.mxu1 %vm1149_vm2, %v9006_v45 }
0x175b   :  { %20119 = vrcp.f32 %v8785_v61  ;;  %18372 = vmatprep.mubr.msk.bf16.mxu1 %vm20357_vm1, %v25004_v30 }
0x175e   :  { %v9054_v29 = vpop.permute.xlu1 %9053 }
0x175f   :  { %18367 = vmatmul.mubr.msk.bf16.vlgmr.msra.gmra.mxu0 %vm1149_vm2, %v9054_v29 }
0x1760   :  { %18378 = vmatprep.mubr.msk.bf16.mxu0 %vm20357_vm1, %v25004_v30 }
0x1762   :  { %v9150_v21 = vpop.permute.xlu1 %9149 }
0x1763   :  { %v20118_v8 = vpop.eup %20117 }
0x1764   :  { %v8804_v63 = vmul.f32 %v20118_v8, %v22592_v41  ;;  %v9296_v41 = vsel %vm1149_vm2, %v9291_v24, 0 }
0x1766   :  { %v8812_v46 = vpack.c.bf16 %v8804_v63, %v8804_v63 }
0x1768   :  { %v20120_v22 = vpop.eup %20119  ;;  %v9155_v23 = vsel %vm1149_vm2, %v8812_v46, 0 }
0x1769   :  { %18377 = vmatpush3.bf16.xpose.msra.mxu0 %v9155_v23  ;;  %v8803_v58 = vmul.f32 %v20120_v22, %v22596_v17  ;;  %v9102_v17 = vpop.permute.xlu0 %9101 }
0x176a   :  { %18388 = vmatprep.subr.bf16.mxu0 %v25004_v30 }
0x176b   :  { %v8811_v19 = vpack.c.bf16 %v8803_v58, %v8803_v58 }
0x176d   :  { %v9107_v12 = vsel %vm1149_vm2, %v8811_v19, 0 }
0x176e   :  { %18371 = vmatpush3.bf16.xpose.msra.mxu1 %v9107_v12 }
0x176f   :  { %18382 = vmatprep.subr.bf16.mxu1 %v25004_v30 }
0x1770   :  { %18379 = vmatmul.mubr.msk.bf16.vlgmr.msra.gmra.mxu0 %vm1149_vm2, %v9150_v21 }
0x1771   :  { %18389 = vmatpush3.bf16.xpose.msra.mxu0 %v9296_v41  ;;  %18390 = vmatprep.mubr.msk.bf16.mxu0 %vm20357_vm1, %v25004_v30 }
0x1772   :  { %18400 = vmatprep.subr.bf16.mxu0 %v25004_v30 }
0x1775   :  { %18373 = vmatmul.mubr.msk.bf16.vlgmr.msra.gmra.mxu1 %vm1149_vm2, %v9102_v17 }
0x1776   :  { %18383 = vmatpush3.bf16.xpose.msra.mxu1 %v9246_v34  ;;  %18384 = vmatprep.mubr.msk.bf16.mxu1 %vm20357_vm1, %v25004_v30 }
0x1777   :  { %18394 = vmatprep.subr.bf16.mxu1 %v25004_v30 }
0x1778   :  { %18391 = vmatmul.mubr.msk.bf16.vlgmr.msra.gmra.mxu0 %vm1149_vm2, %v9289_v50 }
0x1779   :  { %18401 = vmatpush3.bf16.xpose.msra.mxu0 %v9396_v4  ;;  %18402 = vmatprep.mubr.msk.bf16.mxu0 %vm20357_vm1, %v25004_v30 }
0x177a   :  { %18412 = vmatprep.subr.bf16.mxu0 %v25004_v30 }
0x177d   :  { %18385 = vmatmul.mubr.msk.bf16.vlgmr.msra.gmra.mxu1 %vm1149_vm2, %v9239_v49 }
0x177e   :  { %18395 = vmatpush3.bf16.xpose.msra.mxu1 %v9346_v11  ;;  %18396 = vmatprep.mubr.msk.bf16.mxu1 %vm20357_vm1, %v25004_v30 }
0x177f   :  { %18406 = vmatprep.subr.bf16.mxu1 %v25004_v30 }
0x1780   :  { %18403 = vmatmul.mubr.msk.bf16.vlgmr.msra.gmra.mxu0 %vm1149_vm2, %v9389_v2 }
0x1781   :  { %18413 = vmatpush3.bf16.xpose.msra.mxu0 %v9496_v28  ;;  %18414 = vmatprep.mubr.msk.bf16.mxu0 %vm20357_vm1, %v25004_v30 }
0x1782   :  { %18424 = vmatprep.subr.bf16.mxu0 %v25004_v30 }
0x1785   :  { %18397 = vmatmul.mubr.msk.bf16.vlgmr.msra.gmra.mxu1 %vm1149_vm2, %v9339_v40 }
0x1786   :  { %18407 = vmatpush3.bf16.xpose.msra.mxu1 %v9446_v48  ;;  %18408 = vmatprep.mubr.msk.bf16.mxu1 %vm20357_vm1, %v25004_v30 }
0x1787   :  { %18418 = vmatprep.subr.bf16.mxu1 %v25004_v30 }
0x1788   :  { %18415 = vmatmul.mubr.msk.bf16.vlgmr.msra.gmra.mxu0 %vm1149_vm2, %v9489_v55 }
0x1789   :  { %18425 = vmatpush3.bf16.xpose.msra.mxu0 %v9596_v14  ;;  %18426 = vmatprep.mubr.msk.bf16.mxu0 %vm20357_vm1, %v25004_v30 }
0x178a   :  { %18436 = vmatprep.subr.bf16.mxu0 %v25004_v30 }
0x178d   :  { %18409 = vmatmul.mubr.msk.bf16.vlgmr.msra.gmra.mxu1 %vm1149_vm2, %v9439_v52 }
0x178e   :  { %18419 = vmatpush3.bf16.xpose.msra.mxu1 %v9546_v54  ;;  %18420 = vmatprep.mubr.msk.bf16.mxu1 %vm20357_vm1, %v25004_v30 }
0x178f   :  { %18430 = vmatprep.subr.bf16.mxu1 %v25004_v30 }
0x1790   :  { %18427 = vmatmul.mubr.msk.bf16.vlgmr.msra.gmra.mxu0 %vm1149_vm2, %v9589_v62 }
0x1791   :  { %18438 = vmatprep.mubr.msk.bf16.mxu0 %vm20357_vm1, %v25004_v30 }
0x1795   :  { %18421 = vmatmul.mubr.msk.bf16.vlgmr.msra.gmra.mxu1 %vm1149_vm2, %v9539_v10 }
0x1796   :  { %18432 = vmatprep.mubr.msk.bf16.mxu1 %vm20357_vm1, %v25004_v30 }
0x17e6   :  { %v22709_v36 = vpop.f32.mrf.mxu0 }
0x17e7   :  { %25145 = vst [vmem:[#allocation36_spill] sm:$0xff] %v22709_v36 }
0x17e8   :  { %v18344_v26 = vpop.f32.mrf.mxu0 }
0x17ea   :  { %v8906_v45 = vpop.f32.mrf.mxu0 }
0x17eb   :  { %v22711_v61 = vpop.f32.mrf.mxu1 }
0x17ec   :  { %25146 = vst [vmem:[#allocation34_spill] sm:$0xff] %v22711_v61  ;;  %v18345_v29 = vpop.f32.mrf.mxu0 }
0x17ed   :  { %v18338_v8 = vpop.f32.mrf.mxu1 }
0x17ef   :  { %v8858_v63 = vpop.f32.mrf.mxu1 }
0x17f1   :  { %v18339_v46 = vpop.f32.mrf.mxu1 }
0x17f3   :  { %v22713_v22 = vpop.f32.mrf.mxu1 }
0x17f4   :  { %25147 = vst [vmem:[#allocation15_spill] sm:$0xff] %v22713_v22 }
0x17f5   :  { %v18350_v23 = vpop.f32.mrf.mxu1 }
0x17f7   :  { %v8954_v58 = vpop.f32.mrf.mxu1  ;;  %v22715_v6 = vpop.f32.mrf.mxu0 }
0x17f8   :  { %25148 = vst [vmem:[#allocation63_spill] sm:$0xff] %v22715_v6 }
0x17f9   :  { %v18351_v19 = vpop.f32.mrf.mxu1  ;;  %v18356_v24 = vpop.f32.mrf.mxu0 }
0x17fb   :  { %v9002_v12 = vpop.f32.mrf.mxu0 }
0x17fd   :  { %v18357_v21 = vpop.f32.mrf.mxu0 }
0x181a   :  { %v22717_v41 = vpop.f32.mrf.mxu1 }
0x181b   :  { %25149 = vst [vmem:[#allocation61_spill] sm:$0xff] %v22717_v41 }
0x181c   :  { %v18362_v25 = vpop.f32.mrf.mxu1 }
0x181e   :  { %v9050_v17 = vpop.f32.mrf.mxu1 }
0x181f   :  { %v22719_v1 = vpop.f32.mrf.mxu0 }
0x1820   :  { %25150 = vst [vmem:[#allocation12_spill] sm:$0xff] %v22719_v1  ;;  %v18363_v34 = vpop.f32.mrf.mxu1 }
0x1821   :  { %v18368_v50 = vpop.f32.mrf.mxu0 }
0x1823   :  { %v9098_v4 = vpop.f32.mrf.mxu0 }
0x1825   :  { %v18369_v44 = vpop.f32.mrf.mxu0 }
0x1830   :  { %v22721_v49 = vpop.f32.mrf.mxu0 }
0x1831   :  { %25151 = vst [vmem:[#allocation60_spill] sm:$0xff] %v22721_v49 }
0x1832   :  { %v18380_v59 = vpop.f32.mrf.mxu0 }
0x1834   :  { %v9194_v11 = vpop.f32.mrf.mxu0 }
0x1835   :  { %v22723_v2 = vpop.f32.mrf.mxu1 }
0x1836   :  { %25152 = vst [vmem:[#allocation58_spill] sm:$0xff] %v22723_v2  ;;  %v18381_v28 = vpop.f32.mrf.mxu0 }
0x1837   :  { %v18374_v38 = vpop.f32.mrf.mxu1 }
0x1838   :  { %v9332_v40 = vpop.f32.mrf.mxu0 }
0x1839   :  { %v9146_v0 = vpop.f32.mrf.mxu1  ;;  %v9333_v48 = vadd.f32 %v9332_v40, %v20867_v43 }
0x183a   :  { %v18392_v55 = vpop.f32.mrf.mxu0 }
0x183b   :  { %v18375_v14 = vpop.f32.mrf.mxu1  ;;  %v9641_v53 = vsel %vm1149_vm2, %v9333_v48, -inf }
0x183c   :  { %9642 = vmax.xlane.f32.xlu1 %v9641_v53  ;;  %v9335_v52 = vpop.f32.mrf.mxu0 }
0x183d   :  { %v9282_v54 = vpop.f32.mrf.mxu1 }
0x183e   :  { %v9283_v62 = vadd.f32 %v9282_v54, %v20867_v43  ;;  %v18393_v10 = vpop.f32.mrf.mxu0 }
0x183f   :  { %v18386_v26 = vpop.f32.mrf.mxu1 }
0x1840   :  { %v9432_v45 = vpop.f32.mrf.mxu0  ;;  %v9638_v29 = vsel %vm1149_vm2, %v9283_v62, -inf }
0x1841   :  { %9639 = vmax.xlane.f32.xlu0 %v9638_v29  ;;  %v9285_v8 = vpop.f32.mrf.mxu1  ;;  %v9433_v21 = vadd.f32 %v9432_v45, %v20867_v43 }
0x1842   :  { %v18404_v63 = vpop.f32.mrf.mxu0 }
0x1843   :  { %v18387_v46 = vpop.f32.mrf.mxu1  ;;  %v9647_v11 = vsel %vm1149_vm2, %v9433_v21, -inf }
0x1844   :  { %v9435_v23 = vpop.f32.mrf.mxu0 }
0x1845   :  { %v9382_v58 = vpop.f32.mrf.mxu1 }
0x1846   :  { %v9383_v19 = vadd.f32 %v9382_v58, %v20867_v43  ;;  %v18405_v24 = vpop.f32.mrf.mxu0 }
0x1847   :  { %v18398_v12 = vpop.f32.mrf.mxu1 }
0x1848   :  { %v9532_v25 = vpop.f32.mrf.mxu0  ;;  %v9644_v17 = vsel %vm1149_vm2, %v9383_v19, -inf }
0x1849   :  { %9645 = vmax.xlane.f32.xlu0 %v9644_v17  ;;  %v9385_v34 = vpop.f32.mrf.mxu1  ;;  %v9533_v44 = vadd.f32 %v9532_v25, %v20867_v43 }
0x184a   :  { %v18416_v50 = vpop.f32.mrf.mxu0 }
0x184b   :  { %v18399_v4 = vpop.f32.mrf.mxu1  ;;  %v9653_v14 = vsel %vm1149_vm2, %v9533_v44, -inf }
0x184c   :  { %v9535_v59 = vpop.f32.mrf.mxu0 }
0x184d   :  { %9648 = vmax.xlane.f32.xlu0 %v9647_v11  ;;  %v9482_v28 = vpop.f32.mrf.mxu1 }
0x184e   :  { %v9483_v38 = vadd.f32 %v9482_v28, %v20867_v43  ;;  %v18417_v40 = vpop.f32.mrf.mxu0 }
0x184f   :  { %v18410_v0 = vpop.f32.mrf.mxu1 }
0x1850   :  { %v9632_v55 = vpop.f32.mrf.mxu0  ;;  %v9650_v53 = vsel %vm1149_vm2, %v9483_v38, -inf }
0x1851   :  { %v22738_v52 = vadd.f32 %v9632_v55, %v20867_v43  ;;  %9654 = vmax.xlane.f32.xlu0 %v9653_v14  ;;  %9651 = vmax.xlane.f32.xlu1 %v9650_v53  ;;  %v9485_v54 = vpop.f32.mrf.mxu1 }
0x1852   :  { %v18428_v10 = vpop.f32.mrf.mxu0 }
0x1853   :  { %v18411_v26 = vpop.f32.mrf.mxu1  ;;  %v9659_v45 = vsel %vm1149_vm2, %v22738_v52, -inf }
0x1854   :  { %v9635_v29 = vpop.f32.mrf.mxu0 }
0x1855   :  { %9660 = vmax.xlane.f32.xlu0 %v9659_v45  ;;  %v9582_v8 = vpop.f32.mrf.mxu1 }
0x1856   :  { %v9583_v63 = vadd.f32 %v9582_v8, %v20867_v43  ;;  %v18429_v46 = vpop.f32.mrf.mxu0 }
0x1857   :  { %v18422_v23 = vpop.f32.mrf.mxu1 }
0x1858   :  { %v9656_v58 = vsel %vm1149_vm2, %v9583_v63, -inf }
0x1859   :  { %9657 = vmax.xlane.f32.xlu1 %v9656_v58  ;;  %v9585_v24 = vpop.f32.mrf.mxu1 }
0x185b   :  { %v18423_v12 = vpop.f32.mrf.mxu1 }
0x186a   :  { %9734 = vrot.lane.b32.xlu1 %v20984_v51, %s20367_s18 }
0x18c5   :  { %v9643_v25 = vpop.xlane.xlu1 %9642 }
0x18c6   :  { %v9663_v17 = vsub.f32 %v9333_v48, %v9643_v25 }
0x18c8   :  { %v9672_v34 = vmul.f32 1.442695, %v9663_v17 }
0x18ca   :  { %20121 = vpow2.f32 %v9672_v34  ;;  %v9640_v50 = vpop.xlane.xlu0 %9639 }
0x18cb   :  { %v9662_v4 = vsub.f32 %v9283_v62, %v9640_v50 }
0x18cd   :  { %v9670_v59 = vmul.f32 1.442695, %v9662_v4 }
0x18cf   :  { %20123 = vpow2.f32 %v9670_v59 }
0x18d2   :  { %v9646_v11 = vpop.xlane.xlu0 %9645 }
0x18d3   :  { %v9664_v28 = vsub.f32 %v9383_v19, %v9646_v11 }
0x18d5   :  { %v9674_v40 = vmul.f32 1.442695, %v9664_v28 }
0x18d6   :  { %v9649_v0 = vpop.xlane.xlu0 %9648 }
0x18d7   :  { %v20122_v55 = vpop.eup %20121  ;;  %20125 = vpow2.f32 %v9674_v40  ;;  %v9665_v14 = vsub.f32 %v9433_v21, %v9649_v0 }
0x18d8   :  { %v9689_v53 = vsel %vm1149_vm2, %v20122_v55, 0.0 }
0x18d9   :  { %v9676_v54 = vmul.f32 1.442695, %v9665_v14  ;;  %9690 = vadd.xlane.f32.xlu0 %v9689_v53 }
0x18da   :  { %v9655_v10 = vpop.xlane.xlu0 %9654  ;;  %v9652_v26 = vpop.xlane.xlu1 %9651 }
0x18db   :  { %20127 = vpow2.f32 %v9676_v54  ;;  %v9667_v48 = vsub.f32 %v9533_v44, %v9655_v10  ;;  %v9666_v45 = vsub.f32 %v9483_v38, %v9652_v26 }
0x18dc   :  { %v20124_v29 = vpop.eup %20123 }
0x18dd   :  { %v9680_v62 = vmul.f32 1.442695, %v9667_v48  ;;  %v9678_v8 = vmul.f32 1.442695, %v9666_v45  ;;  %v9686_v46 = vsel %vm1149_vm2, %v20124_v29, 0.0 }
0x18de   :  { %9687 = vadd.xlane.f32.xlu1 %v9686_v46  ;;  %v9661_v25 = vpop.xlane.xlu0 %9660 }
0x18df   :  { %20129 = vpow2.f32 %v9680_v62  ;;  %v9669_v17 = vsub.f32 %v22738_v52, %v9661_v25 }
0x18e0   :  { %20131 = vpow2.f32 %v9678_v8 }
0x18e1   :  { %v9684_v50 = vmul.f32 1.442695, %v9669_v17 }
0x18e2   :  { %v9658_v34 = vpop.xlane.xlu1 %9657 }
0x18e3   :  { %v9668_v4 = vsub.f32 %v9583_v63, %v9658_v34  ;;  %20133 = vpow2.f32 %v9684_v50 }
0x18e4   :  { %v20126_v19 = vpop.eup %20125 }
0x18e5   :  { %v9692_v21 = vsel %vm1149_vm2, %v20126_v19, 0.0  ;;  %v9682_v59 = vmul.f32 1.442695, %v9668_v4 }
0x18e6   :  { %9693 = vadd.xlane.f32.xlu1 %v9692_v21  ;;  %v9735_v63 = vpop.permute.xlu1 %9734 }
0x18e7   :  { %20135 = vpow2.f32 %v9682_v59 }
0x18e8   :  { %v22749_v23 = vpop.eup %20127 }
0x18e9   :  { %v9695_v58 = vsel %vm1149_vm2, %v22749_v23, 0.0 }
0x18ea   :  { %9696 = vadd.xlane.f32.xlu0 %v9695_v58 }
0x18ec   :  { %v22753_v44 = vpop.eup %20129 }
0x18ed   :  { %v22755_v38 = vpop.eup %20131  ;;  %v9701_v24 = vsel %vm1149_vm2, %v22753_v44, 0.0 }
0x18ee   :  { %9702 = vadd.xlane.f32.xlu0 %v9701_v24  ;;  %v9698_v12 = vsel %vm1149_vm2, %v22755_v38, 0.0 }
0x18ef   :  { %9699 = vadd.xlane.f32.xlu1 %v9698_v12 }
0x18f0   :  { %v22768_v11 = vpop.eup %20133 }
0x18f1   :  { %v9707_v28 = vsel %vm1149_vm2, %v22768_v11, 0.0 }
0x18f4   :  { %v22772_v40 = vpop.eup %20135 }
0x18f5   :  { %v9704_v0 = vsel %vm1149_vm2, %v22772_v40, 0.0 }
0x1900   :  { %9830 = vrot.lane.b32.xlu1 %v20996_v27, %s20367_s18 }
0x1904   :  { %9878 = vrot.lane.b32.xlu1 %v21023_v42, %s20367_s18  ;;  %9782 = vrot.lane.b32.xlu0 %v21013_v16, %s20367_s18 }
0x1923   :  { %9708 = vadd.xlane.f32.xlu0 %v9707_v28 }
0x1928   :  { %9705 = vadd.xlane.f32.xlu1 %v9704_v0 }
0x1939   :  { %9974 = vrot.lane.b32.xlu1 %v21053_v3, %s20367_s18  ;;  %9926 = vrot.lane.b32.xlu0 %v21031_v5, %s20367_s18 }
0x193d   :  { %10070 = vrot.lane.b32.xlu1 %v21070_v18, %s20367_s18  ;;  %10022 = vrot.lane.b32.xlu0 %v21041_v20, %s20367_s18 }
0x1962   :  { %v9691_v52 = vpop.xlane.xlu0 %9690 }
0x1963   :  { %20137 = vrcp.f32 %v9691_v52 }
0x1967   :  { %v9688_v14 = vpop.xlane.xlu1 %9687 }
0x1968   :  { %20139 = vrcp.f32 %v9688_v14 }
0x196f   :  { %v9694_v53 = vpop.xlane.xlu1 %9693 }
0x1970   :  { %v20138_v54 = vpop.eup %20137  ;;  %20141 = vrcp.f32 %v9694_v53 }
0x1971   :  { %v9719_v10 = vmul.f32 %v20138_v54, %v20122_v55 }
0x1973   :  { %v9697_v26 = vpop.xlane.xlu0 %9696  ;;  %v9727_v48 = vpack.c.bf16 %v9719_v10, %v9719_v10 }
0x1974   :  { %20143 = vrcp.f32 %v9697_v26 }
0x1975   :  { %v20140_v45 = vpop.eup %20139  ;;  %v9788_v62 = vsel %vm1149_vm2, %v9727_v48, 0 }
0x1976   :  { %18437 = vmatpush3.bf16.xpose.msra.mxu0 %v9788_v62  ;;  %v9718_v8 = vmul.f32 %v20140_v45, %v20124_v29 }
0x1977   :  { %v9703_v46 = vpop.xlane.xlu0 %9702  ;;  %18448 = vmatprep.subr.bf16.mxu0 %v25004_v30 }
0x1978   :  { %20145 = vrcp.f32 %v9703_v46  ;;  %v9700_v21 = vpop.xlane.xlu1 %9699  ;;  %v9726_v58 = vpack.c.bf16 %v9718_v8, %v9718_v8 }
0x1979   :  { %20147 = vrcp.f32 %v9700_v21 }
0x197a   :  { %v9740_v24 = vsel %vm1149_vm2, %v9726_v58, 0  ;;  %v25153_v58 = vld [vmem:[#allocation43_spill] sm:$0xff] }
0x197b   :  { %18431 = vmatpush3.bf16.xpose.msra.mxu1 %v9740_v24  ;;  %v9783_v12 = vpop.permute.xlu0 %9782  ;;  %v19435_v24 = vunpack.i.l.bf16 %v25153_v58 }
0x197c   :  { %18442 = vmatprep.subr.bf16.mxu1 %v25004_v30  ;;  %v9831_v52 = vpop.permute.xlu1 %9830 }
0x197d   :  { %v20142_v55 = vpop.eup %20141  ;;  %18439 = vmatmul.mubr.msk.bf16.vlgmr.msra.gmra.mxu0 %vm1149_vm2, %v9783_v12  ;;  %v25154_v12 = vld [vmem:[#allocation41_spill] sm:$0xff] }
0x197e   :  { %v9720_v25 = vmul.f32 %v20142_v55, %v20126_v19  ;;  %18450 = vmatprep.mubr.msk.bf16.mxu0 %vm20357_vm1, %v25004_v30  ;;  %v19430_v55 = vunpack.i.l.bf16 %v25154_v12 }
0x1980   :  { %v9728_v29 = vpack.c.bf16 %v9720_v25, %v9720_v25  ;;  %v9879_v54 = vpop.permute.xlu1 %9878 }
0x1981   :  { %v20144_v17 = vpop.eup %20143 }
0x1982   :  { %18433 = vmatmul.mubr.msk.bf16.vlgmr.msra.gmra.mxu1 %vm1149_vm2, %v9735_v63  ;;  %v9836_v34 = vsel %vm1149_vm2, %v9728_v29, 0  ;;  %v9721_v50 = vmul.f32 %v20144_v17, %v22749_v23  ;;  %v22823_v17 = vpack.c.bf16 %v19435_v24, %v19430_v55 }
0x1983   :  { %18443 = vmatpush3.bf16.xpose.msra.mxu1 %v9836_v34  ;;  %18444 = vmatprep.mubr.msk.bf16.mxu1 %vm20357_vm1, %v25004_v30 }
0x1984   :  { %v9729_v4 = vpack.c.bf16 %v9721_v50, %v9721_v50  ;;  %18454 = vmatprep.subr.bf16.mxu1 %v25004_v30  ;;  %v25155_v50 = vld [vmem:[#allocation40_spill] sm:$0xff] }
0x1985   :  { %v20146_v59 = vpop.eup %20145 }
0x1986   :  { %v20148_v19 = vpop.eup %20147  ;;  %v9884_v28 = vsel %vm1149_vm2, %v9729_v4, 0  ;;  %v9723_v0 = vmul.f32 %v20146_v59, %v22753_v44  ;;  %v25156_v59 = vld [vmem:[#allocation38_spill] sm:$0xff] }
0x1987   :  { %18449 = vmatpush3.bf16.xpose.msra.mxu0 %v9884_v28  ;;  %v9722_v63 = vmul.f32 %v20148_v19, %v22755_v38  ;;  %v19266_v19 = vunpack.i.l.bf16 %v25156_v59 }
0x1988   :  { %18460 = vmatprep.subr.bf16.mxu0 %v25004_v30  ;;  %v9731_v14 = vpack.c.bf16 %v9723_v0, %v9723_v0  ;;  %v19433_v0 = vunpack.i.h.bf16 %v25154_v12  ;;  %v25162_v12 = vld [vmem:[#allocation62_spill] sm:$0xff] }
0x1989   :  { %v9730_v23 = vpack.c.bf16 %v9722_v63, %v9722_v63  ;;  %v19512_v55 = vunpack.i.l.bf16 %v25162_v12 }
0x198a   :  { %18445 = vmatmul.mubr.msk.bf16.vlgmr.msra.gmra.mxu1 %vm1149_vm2, %v9831_v52  ;;  %v9980_v44 = vsel %vm1149_vm2, %v9731_v14, 0  ;;  %v19438_v52 = vunpack.i.h.bf16 %v25153_v58  ;;  %v25161_v58 = vld [vmem:[#allocation64_spill] sm:$0xff] }
0x198b   :  { %v9932_v53 = vsel %vm1149_vm2, %v9730_v23, 0  ;;  %18456 = vmatprep.mubr.msk.bf16.mxu1 %vm20357_vm1, %v25004_v30  ;;  %v19517_v24 = vunpack.i.l.bf16 %v25161_v58 }
0x198c   :  { %18455 = vmatpush3.bf16.xpose.msra.mxu1 %v9932_v53  ;;  %v22842_v14 = vpack.c.bf16 %v19438_v52, %v19433_v0  ;;  %v19274_v53 = vunpack.i.h.bf16 %v25155_v50  ;;  %v25166_v52 = vld [vmem:[#allocation14_spill] sm:$0xff] }
0x198d   :  { %18466 = vmatprep.subr.bf16.mxu1 %v25004_v30 }
0x198e   :  { %18451 = vmatmul.mubr.msk.bf16.vlgmr.msra.gmra.mxu0 %vm1149_vm2, %v9879_v54  ;;  %v25157_v54 = vld [vmem:[#allocation19_spill] sm:$0xff] }
0x198f   :  { %18461 = vmatpush3.bf16.xpose.msra.mxu0 %v9980_v44  ;;  %18462 = vmatprep.mubr.msk.bf16.mxu0 %vm20357_vm1, %v25004_v30  ;;  %v10301_v44 = vsel %vm1149_vm2, %v25157_v54, 0 }
0x1990   :  { %18472 = vmatprep.subr.bf16.mxu0 %v25004_v30 }
0x19ac   :  { %v9709_v38 = vpop.xlane.xlu0 %9708 }
0x19ad   :  { %20149 = vrcp.f32 %v9709_v38  ;;  %v25158_v38 = vld [vmem:[#allocation67_spill] sm:$0xff] }
0x19b0   :  { %v9927_v10 = vpop.permute.xlu0 %9926 }
0x19b1   :  { %v9706_v26 = vpop.xlane.xlu1 %9705  ;;  %18457 = vmatmul.mubr.msk.bf16.vlgmr.msra.gmra.mxu1 %vm1149_vm2, %v9927_v10  ;;  %v19681_v10 = vunpack.i.l.bf16 %v25158_v38 }
0x19b2   :  { %20151 = vrcp.f32 %v9706_v26  ;;  %18468 = vmatprep.mubr.msk.bf16.mxu1 %vm20357_vm1, %v25004_v30  ;;  %v25159_v26 = vld [vmem:[#allocation65_spill] sm:$0xff] }
0x19b4   :  { %v10023_v63 = vpop.permute.xlu0 %10022 }
0x19b5   :  { %v9975_v48 = vpop.permute.xlu1 %9974 }
0x19b6   :  { %18463 = vmatmul.mubr.msk.bf16.vlgmr.msra.gmra.mxu0 %vm1149_vm2, %v9975_v48  ;;  %v19676_v48 = vunpack.i.l.bf16 %v25159_v26 }
0x19b7   :  { %18474 = vmatprep.mubr.msk.bf16.mxu0 %vm20357_vm1, %v25004_v30 }
0x19b9   :  { %v10071_v4 = vpop.permute.xlu1 %10070 }
0x19ba   :  { %v20150_v45 = vpop.eup %20149 }
0x19bb   :  { %v9725_v62 = vmul.f32 %v20150_v45, %v22768_v11  ;;  %v19271_v11 = vunpack.i.l.bf16 %v25155_v50  ;;  %v19269_v45 = vunpack.i.h.bf16 %v25156_v59  ;;  %v22877_v59 = vpack.c.bf16 %v19517_v24, %v19512_v55  ;;  %v25168_v24 = vld [vmem:[#allocation92_spill] sm:$0xff] }
0x19bd   :  { %v9733_v8 = vpack.c.bf16 %v9725_v62, %v9725_v62  ;;  %v22832_v28 = vpack.c.bf16 %v19271_v11, %v19266_v19  ;;  %v22858_v62 = vpack.c.bf16 %v19274_v53, %v19269_v45  ;;  %v25165_v11 = vld [vmem:[#allocation87_spill] sm:$0xff]  ;;  %v19679_v19 = vunpack.i.h.bf16 %v25159_v26  ;;  %v25167_v45 = vld [vmem:[#allocation90_spill] sm:$0xff] }
0x19be   :  { %v19594_v53 = vunpack.i.l.bf16 %v25165_v11  ;;  %v19515_v26 = vunpack.i.h.bf16 %v25162_v12 }
0x19bf   :  { %v20152_v46 = vpop.eup %20151  ;;  %v10076_v21 = vsel %vm1149_vm2, %v9733_v8, 0  ;;  %v10163_v23 = vsel %vm1149_vm2, %v22832_v28, 0  ;;  %v22860_v8 = vpack.c.bf16 %v19681_v10, %v19676_v48 }
0x19c0   :  { %18473 = vmatpush3.bf16.xpose.msra.mxu0 %v10076_v21  ;;  %v9724_v25 = vmul.f32 %v20152_v46, %v22772_v40  ;;  %v10209_v40 = vsel %vm1149_vm2, %v22823_v17, 0  ;;  %v25160_v46 = vld [vmem:[#allocation16_spill] sm:$0xff] }
0x19c1   :  { %18484 = vmatprep.subr.bf16.mxu0 %v25004_v30  ;;  %v10255_v21 = vsel %vm1149_vm2, %v25160_v46, 0 }
0x19c2   :  { %v9732_v29 = vpack.c.bf16 %v9724_v25, %v9724_v25  ;;  %v25163_v25 = vld [vmem:[#allocation17_spill] sm:$0xff] }
0x19c4   :  { %v10028_v34 = vsel %vm1149_vm2, %v9732_v29, 0  ;;  %v10393_v29 = vsel %vm1149_vm2, %v22860_v8, 0 }
0x19c5   :  { %18467 = vmatpush3.bf16.xpose.msra.mxu1 %v10028_v34  ;;  %v25164_v34 = vld [vmem:[#allocation89_spill] sm:$0xff] }
0x19c6   :  { %18478 = vmatprep.subr.bf16.mxu1 %v25004_v30  ;;  %v19602_v50 = vunpack.i.h.bf16 %v25164_v34 }
0x19c7   :  { %18475 = vmatmul.mubr.msk.bf16.vlgmr.msra.gmra.mxu0 %vm1149_vm2, %v10071_v4  ;;  %v19597_v4 = vunpack.i.h.bf16 %v25165_v11 }
0x19c8   :  { %18485 = vmatpush3.bf16.xpose.msra.mxu0 %v10209_v40  ;;  %18486 = vmatprep.mubr.msk.bf16.mxu0 %vm20357_vm1, %v25004_v30  ;;  %v19684_v40 = vunpack.i.h.bf16 %v25158_v38  ;;  %v19520_v38 = vunpack.i.h.bf16 %v25161_v58  ;;  %v19766_v58 = vunpack.i.h.bf16 %v25168_v24 }
0x19c9   :  { %18496 = vmatprep.subr.bf16.mxu0 %v25004_v30  ;;  %v22884_v0 = vpack.c.bf16 %v19602_v50, %v19597_v4  ;;  %v19763_v50 = vunpack.i.l.bf16 %v25168_v24 }
0x19ca   :  { %v22910_v55 = vpack.c.bf16 %v19520_v38, %v19515_v26 }
0x19cb   :  { %v10485_v10 = vsel %vm1149_vm2, %v22884_v0, 0 }
0x19cc   :  { %18469 = vmatmul.mubr.msk.bf16.vlgmr.msra.gmra.mxu1 %vm1149_vm2, %v10023_v63  ;;  %v10347_v63 = vsel %vm1149_vm2, %v22877_v59, 0 }
0x19cd   :  { %18479 = vmatpush3.bf16.xpose.msra.mxu1 %v10163_v23  ;;  %18480 = vmatprep.mubr.msk.bf16.mxu1 %vm20357_vm1, %v25004_v30  ;;  %v19599_v23 = vunpack.i.l.bf16 %v25164_v34  ;;  %v19758_v34 = vunpack.i.l.bf16 %v25167_v45 }
0x19ce   :  { %18490 = vmatprep.subr.bf16.mxu1 %v25004_v30 }
0x19cf   :  { %18487 = vmatmul.mubr.msk.bf16.vlgmr.msra.gmra.mxu0 %vm1149_vm2, %v22842_v14  ;;  %v22903_v48 = vpack.c.bf16 %v19599_v23, %v19594_v53  ;;  %v22927_v11 = vpack.c.bf16 %v19763_v50, %v19758_v34 }
0x19d0   :  { %18497 = vmatpush3.bf16.xpose.msra.mxu0 %v10301_v44  ;;  %18498 = vmatprep.mubr.msk.bf16.mxu0 %vm20357_vm1, %v25004_v30  ;;  %v22892_v44 = vpack.c.bf16 %v19684_v40, %v19679_v19 }
0x19d1   :  { %18508 = vmatprep.subr.bf16.mxu0 %v25004_v30  ;;  %v10439_v12 = vsel %vm1149_vm2, %v22903_v48, 0 }
0x19d4   :  { %18481 = vmatmul.mubr.msk.bf16.vlgmr.msra.gmra.mxu1 %vm1149_vm2, %v22858_v62 }
0x19d5   :  { %18491 = vmatpush3.bf16.xpose.msra.mxu1 %v10255_v21  ;;  %18492 = vmatprep.mubr.msk.bf16.mxu1 %vm20357_vm1, %v25004_v30  ;;  %v19761_v21 = vunpack.i.h.bf16 %v25167_v45 }
0x19d6   :  { %18502 = vmatprep.subr.bf16.mxu1 %v25004_v30 }
0x19d7   :  { %18499 = vmatmul.mubr.msk.bf16.vlgmr.msra.gmra.mxu0 %vm1149_vm2, %v25163_v25 }
0x19d8   :  { %18509 = vmatpush3.bf16.xpose.msra.mxu0 %v10393_v29  ;;  %18510 = vmatprep.mubr.msk.bf16.mxu0 %vm20357_vm1, %v25004_v30  ;;  %v22916_v29 = vpack.c.bf16 %v19766_v58, %v19761_v21 }
0x19d9   :  { %18520 = vmatprep.subr.bf16.mxu0 %v25004_v30 }
0x19dc   :  { %18493 = vmatmul.mubr.msk.bf16.vlgmr.msra.gmra.mxu1 %vm1149_vm2, %v25166_v52 }
0x19dd   :  { %18503 = vmatpush3.bf16.xpose.msra.mxu1 %v10347_v63  ;;  %18504 = vmatprep.mubr.msk.bf16.mxu1 %vm20357_vm1, %v25004_v30 }
0x19de   :  { %18514 = vmatprep.subr.bf16.mxu1 %v25004_v30 }
0x19df   :  { %18511 = vmatmul.mubr.msk.bf16.vlgmr.msra.gmra.mxu0 %vm1149_vm2, %v22892_v44 }
0x19e0   :  { %18521 = vmatpush3.bf16.xpose.msra.mxu0 %v10485_v10  ;;  %18522 = vmatprep.mubr.msk.bf16.mxu0 %vm20357_vm1, %v25004_v30 }
0x19e1   :  { %18532 = vmatprep.subr.bf16.mxu0 %v25004_v30 }
0x19e4   :  { %18505 = vmatmul.mubr.msk.bf16.vlgmr.msra.gmra.mxu1 %vm1149_vm2, %v22910_v55 }
0x19e5   :  { %18515 = vmatpush3.bf16.xpose.msra.mxu1 %v10439_v12  ;;  %18516 = vmatprep.mubr.msk.bf16.mxu1 %vm20357_vm1, %v25004_v30 }
0x19e6   :  { %18526 = vmatprep.subr.bf16.mxu1 %v25004_v30 }
0x19e7   :  { %18523 = vmatmul.mubr.msk.bf16.vlgmr.msra.gmra.mxu0 %vm1149_vm2, %v22916_v29 }
0x19e8   :  { %18534 = vmatprep.mubr.msk.bf16.mxu0 %vm20357_vm1, %v25004_v30 }
0x19ec   :  { %18517 = vmatmul.mubr.msk.bf16.vlgmr.msra.gmra.mxu1 %vm1149_vm2, %v22927_v11 }
0x19ed   :  { %18528 = vmatprep.mubr.msk.bf16.mxu1 %vm20357_vm1, %v25004_v30 }
0x1a3d   :  { %v22933_v4 = vpop.f32.mrf.mxu0 }
0x1a3e   :  { %25169 = vst [vmem:[#allocation13_spill] sm:$0xff] %v22933_v4 }
0x1a3f   :  { %v18440_v19 = vpop.f32.mrf.mxu0 }
0x1a41   :  { %v9827_v40 = vpop.f32.mrf.mxu0 }
0x1a42   :  { %v22935_v63 = vpop.f32.mrf.mxu1 }
0x1a43   :  { %25170 = vst [vmem:[#allocation85_spill] sm:$0xff] %v22935_v63  ;;  %v18441_v23 = vpop.f32.mrf.mxu0 }
0x1a44   :  { %v18434_v53 = vpop.f32.mrf.mxu1 }
0x1a46   :  { %v9779_v38 = vpop.f32.mrf.mxu1 }
0x1a48   :  { %v18435_v10 = vpop.f32.mrf.mxu1 }
0x1a4a   :  { %v22937_v26 = vpop.f32.mrf.mxu1 }
0x1a4b   :  { %25171 = vst [vmem:[#allocation83_spill] sm:$0xff] %v22937_v26 }
0x1a4c   :  { %v18446_v45 = vpop.f32.mrf.mxu1 }
0x1a4e   :  { %v9875_v21 = vpop.f32.mrf.mxu1  ;;  %v22939_v24 = vpop.f32.mrf.mxu0 }
0x1a4f   :  { %25172 = vst [vmem:[#allocation10_spill] sm:$0xff] %v22939_v24 }
0x1a50   :  { %v18447_v58 = vpop.f32.mrf.mxu1  ;;  %v18452_v12 = vpop.f32.mrf.mxu0 }
0x1a52   :  { %v9923_v34 = vpop.f32.mrf.mxu0 }
0x1a54   :  { %v18453_v50 = vpop.f32.mrf.mxu0 }
0x1a71   :  { %v22941_v61 = vpop.f32.mrf.mxu1 }
0x1a72   :  { %25173 = vst [vmem:[#allocation86_spill] sm:$0xff] %v22941_v61 }
0x1a73   :  { %v18458_v19 = vpop.f32.mrf.mxu1 }
0x1a75   :  { %v9971_v40 = vpop.f32.mrf.mxu1 }
0x1a76   :  { %v22943_v4 = vpop.f32.mrf.mxu0 }
0x1a77   :  { %25174 = vst [vmem:[#allocation88_spill] sm:$0xff] %v22943_v4  ;;  %v18459_v23 = vpop.f32.mrf.mxu1 }
0x1a78   :  { %v18464_v53 = vpop.f32.mrf.mxu0 }
0x1a7a   :  { %v10019_v38 = vpop.f32.mrf.mxu0 }
0x1a7c   :  { %v18465_v10 = vpop.f32.mrf.mxu0 }
0x1a87   :  { %v22945_v63 = vpop.f32.mrf.mxu0 }
0x1a88   :  { %25175 = vst [vmem:[#allocation43_spill] sm:$0xff] %v22945_v63 }
0x1a89   :  { %v18476_v45 = vpop.f32.mrf.mxu0 }
0x1a8b   :  { %v10115_v21 = vpop.f32.mrf.mxu0 }
0x1a8c   :  { %v22947_v36 = vpop.f32.mrf.mxu1 }
0x1a8d   :  { %25176 = vst [vmem:[#allocation41_spill] sm:$0xff] %v22947_v36  ;;  %v18477_v58 = vpop.f32.mrf.mxu0 }
0x1a8e   :  { %v18470_v12 = vpop.f32.mrf.mxu1 }
0x1a8f   :  { %v10245_v34 = vpop.f32.mrf.mxu0 }
0x1a90   :  { %v10067_v50 = vpop.f32.mrf.mxu1  ;;  %v10246_v26 = vadd.f32 %v10245_v34, %v20867_v43 }
0x1a91   :  { %v18488_v19 = vpop.f32.mrf.mxu0 }
0x1a92   :  { %v18471_v40 = vpop.f32.mrf.mxu1  ;;  %v10530_v24 = vsel %vm1149_vm2, %v10246_v26, -inf }
0x1a93   :  { %10531 = vmax.xlane.f32.xlu1 %v10530_v24  ;;  %v10248_v23 = vpop.f32.mrf.mxu0 }
0x1a94   :  { %v10199_v53 = vpop.f32.mrf.mxu1 }
0x1a95   :  { %v10200_v38 = vadd.f32 %v10199_v53, %v20867_v43  ;;  %v18489_v10 = vpop.f32.mrf.mxu0 }
0x1a96   :  { %v18482_v45 = vpop.f32.mrf.mxu1 }
0x1a97   :  { %v10337_v21 = vpop.f32.mrf.mxu0  ;;  %v10527_v22 = vsel %vm1149_vm2, %v10200_v38, -inf }
0x1a98   :  { %10528 = vmax.xlane.f32.xlu0 %v10527_v22  ;;  %v10202_v58 = vpop.f32.mrf.mxu1  ;;  %v10338_v24 = vadd.f32 %v10337_v21, %v20867_v43 }
0x1a99   :  { %v18500_v12 = vpop.f32.mrf.mxu0 }
0x1a9a   :  { %v18483_v50 = vpop.f32.mrf.mxu1  ;;  %v10536_v12 = vsel %vm1149_vm2, %v10338_v24, -inf }
0x1a9b   :  { %v10340_v6 = vpop.f32.mrf.mxu0 }
0x1a9c   :  { %v10291_v34 = vpop.f32.mrf.mxu1 }
0x1a9d   :  { %v10292_v19 = vadd.f32 %v10291_v34, %v20867_v43  ;;  %v18501_v40 = vpop.f32.mrf.mxu0 }
0x1a9e   :  { %v18494_v61 = vpop.f32.mrf.mxu1 }
0x1a9f   :  { %v10429_v23 = vpop.f32.mrf.mxu0  ;;  %v10533_v53 = vsel %vm1149_vm2, %v10292_v19, -inf }
0x1aa0   :  { %10534 = vmax.xlane.f32.xlu0 %v10533_v53  ;;  %v10294_v10 = vpop.f32.mrf.mxu1  ;;  %v10430_v22 = vadd.f32 %v10429_v23, %v20867_v43 }
0x1aa1   :  { %v18512_v45 = vpop.f32.mrf.mxu0 }
0x1aa2   :  { %v18495_v4 = vpop.f32.mrf.mxu1  ;;  %v10542_v21 = vsel %vm1149_vm2, %v10430_v22, -inf }
0x1aa3   :  { %v10432_v58 = vpop.f32.mrf.mxu0 }
0x1aa4   :  { %10537 = vmax.xlane.f32.xlu0 %v10536_v12  ;;  %v10383_v6 = vpop.f32.mrf.mxu1 }
0x1aa5   :  { %v10384_v50 = vadd.f32 %v10383_v6, %v20867_v43  ;;  %v18513_v34 = vpop.f32.mrf.mxu0 }
0x1aa6   :  { %v18506_v61 = vpop.f32.mrf.mxu1 }
0x1aa7   :  { %v10521_v40 = vpop.f32.mrf.mxu0  ;;  %v10539_v41 = vsel %vm1149_vm2, %v10384_v50, -inf }
0x1aa8   :  { %v22962_v53 = vadd.f32 %v10521_v40, %v20867_v43  ;;  %10543 = vmax.xlane.f32.xlu0 %v10542_v21  ;;  %10540 = vmax.xlane.f32.xlu1 %v10539_v41  ;;  %v10386_v4 = vpop.f32.mrf.mxu1 }
0x1aa9   :  { %v18524_v23 = vpop.f32.mrf.mxu0 }
0x1aaa   :  { %v18507_v10 = vpop.f32.mrf.mxu1  ;;  %v10548_v45 = vsel %vm1149_vm2, %v22962_v53, -inf }
0x1aab   :  { %v10524_v58 = vpop.f32.mrf.mxu0 }
0x1aac   :  { %10549 = vmax.xlane.f32.xlu0 %v10548_v45  ;;  %v10475_v12 = vpop.f32.mrf.mxu1 }
0x1aad   :  { %v10476_v6 = vadd.f32 %v10475_v12, %v20867_v43  ;;  %v18525_v34 = vpop.f32.mrf.mxu0 }
0x1aae   :  { %v18518_v61 = vpop.f32.mrf.mxu1 }
0x1aaf   :  { %v10545_v1 = vsel %vm1149_vm2, %v10476_v6, -inf }
0x1ab0   :  { %10546 = vmax.xlane.f32.xlu1 %v10545_v1  ;;  %v10478_v40 = vpop.f32.mrf.mxu1 }
0x1ab2   :  { %v18519_v36 = vpop.f32.mrf.mxu1 }
0x1ac1   :  { %10623 = vrot.lane.b32.xlu1 %v20984_v51, %s20368_s19 }
0x1b1c   :  { %v10532_v41 = vpop.xlane.xlu1 %10531 }
0x1b1d   :  { %v10552_v21 = vsub.f32 %v10246_v26, %v10532_v41 }
0x1b1f   :  { %v10561_v4 = vmul.f32 1.442695, %v10552_v21 }
0x1b21   :  { %20153 = vpow2.f32 %v10561_v4  ;;  %v10529_v23 = vpop.xlane.xlu0 %10528 }
0x1b22   :  { %v10551_v10 = vsub.f32 %v10200_v38, %v10529_v23 }
0x1b24   :  { %v10559_v45 = vmul.f32 1.442695, %v10551_v10 }
0x1b26   :  { %20155 = vpow2.f32 %v10559_v45 }
0x1b29   :  { %v10535_v58 = vpop.xlane.xlu0 %10534 }
0x1b2a   :  { %v10553_v12 = vsub.f32 %v10292_v19, %v10535_v58 }
0x1b2c   :  { %v10563_v34 = vmul.f32 1.442695, %v10553_v12 }
0x1b2d   :  { %v10538_v61 = vpop.xlane.xlu0 %10537 }
0x1b2e   :  { %v20154_v63 = vpop.eup %20153  ;;  %20157 = vpow2.f32 %v10563_v34  ;;  %v10554_v1 = vsub.f32 %v10338_v24, %v10538_v61 }
0x1b2f   :  { %v10578_v36 = vsel %vm1149_vm2, %v20154_v63, 0.0 }
0x1b30   :  { %v10565_v40 = vmul.f32 1.442695, %v10554_v1  ;;  %10579 = vadd.xlane.f32.xlu0 %v10578_v36 }
0x1b31   :  { %v10544_v2 = vpop.xlane.xlu0 %10543  ;;  %v10541_v49 = vpop.xlane.xlu1 %10540 }
0x1b32   :  { %20159 = vpow2.f32 %v10565_v40  ;;  %v10556_v26 = vsub.f32 %v10430_v22, %v10544_v2  ;;  %v10555_v41 = vsub.f32 %v10384_v50, %v10541_v49 }
0x1b33   :  { %v20156_v21 = vpop.eup %20155 }
0x1b34   :  { %v10569_v38 = vmul.f32 1.442695, %v10556_v26  ;;  %v10567_v4 = vmul.f32 1.442695, %v10555_v41  ;;  %v10575_v23 = vsel %vm1149_vm2, %v20156_v21, 0.0 }
0x1b35   :  { %10576 = vadd.xlane.f32.xlu1 %v10575_v23  ;;  %v10550_v58 = vpop.xlane.xlu0 %10549 }
0x1b36   :  { %20161 = vpow2.f32 %v10569_v38  ;;  %v10558_v12 = vsub.f32 %v22962_v53, %v10550_v58 }
0x1b37   :  { %20163 = vpow2.f32 %v10567_v4 }
0x1b38   :  { %v10573_v61 = vmul.f32 1.442695, %v10558_v12 }
0x1b39   :  { %v10547_v34 = vpop.xlane.xlu1 %10546 }
0x1b3a   :  { %v10557_v1 = vsub.f32 %v10476_v6, %v10547_v34  ;;  %20165 = vpow2.f32 %v10573_v61 }
0x1b3b   :  { %v20158_v19 = vpop.eup %20157 }
0x1b3c   :  { %v10581_v24 = vsel %vm1149_vm2, %v20158_v19, 0.0  ;;  %v10571_v36 = vmul.f32 1.442695, %v10557_v1 }
0x1b3d   :  { %10582 = vadd.xlane.f32.xlu1 %v10581_v24  ;;  %v10624_v6 = vpop.permute.xlu1 %10623 }
0x1b3e   :  { %20167 = vpow2.f32 %v10571_v36 }
0x1b3f   :  { %v22973_v10 = vpop.eup %20159 }
0x1b40   :  { %v10584_v45 = vsel %vm1149_vm2, %v22973_v10, 0.0 }
0x1b41   :  { %10585 = vadd.xlane.f32.xlu0 %v10584_v45 }
0x1b43   :  { %v22977_v2 = vpop.eup %20161 }
0x1b44   :  { %v22979_v49 = vpop.eup %20163  ;;  %v10590_v22 = vsel %vm1149_vm2, %v22977_v2, 0.0 }
0x1b45   :  { %10591 = vadd.xlane.f32.xlu0 %v10590_v22  ;;  %v10587_v50 = vsel %vm1149_vm2, %v22979_v49, 0.0 }
0x1b46   :  { %10588 = vadd.xlane.f32.xlu1 %v10587_v50 }
0x1b47   :  { %v22992_v40 = vpop.eup %20165 }
0x1b48   :  { %v10596_v26 = vsel %vm1149_vm2, %v22992_v40, 0.0 }
0x1b4b   :  { %v22996_v41 = vpop.eup %20167 }
0x1b4c   :  { %v10593_v38 = vsel %vm1149_vm2, %v22996_v41, 0.0 }
0x1b57   :  { %10719 = vrot.lane.b32.xlu1 %v20996_v27, %s20368_s19 }
0x1b5b   :  { %10767 = vrot.lane.b32.xlu1 %v21023_v42, %s20368_s19  ;;  %10671 = vrot.lane.b32.xlu0 %v21013_v16, %s20368_s19 }
0x1b7a   :  { %10597 = vadd.xlane.f32.xlu0 %v10596_v26 }
0x1b7f   :  { %10594 = vadd.xlane.f32.xlu1 %v10593_v38 }
0x1b90   :  { %10863 = vrot.lane.b32.xlu1 %v21053_v3, %s20368_s19  ;;  %10815 = vrot.lane.b32.xlu0 %v21031_v5, %s20368_s19 }
0x1b94   :  { %10959 = vrot.lane.b32.xlu1 %v21070_v18, %s20368_s19  ;;  %10911 = vrot.lane.b32.xlu0 %v21041_v20, %s20368_s19 }
0x1bb9   :  { %v10580_v53 = vpop.xlane.xlu0 %10579 }
0x1bba   :  { %20169 = vrcp.f32 %v10580_v53 }
0x1bbe   :  { %v10577_v4 = vpop.xlane.xlu1 %10576 }
0x1bbf   :  { %20171 = vrcp.f32 %v10577_v4 }
0x1bc6   :  { %v10583_v23 = vpop.xlane.xlu1 %10582 }
0x1bc7   :  { %v20170_v24 = vpop.eup %20169  ;;  %20173 = vrcp.f32 %v10583_v23 }
0x1bc8   :  { %v10608_v45 = vmul.f32 %v20170_v24, %v20154_v63 }
0x1bca   :  { %v10586_v22 = vpop.xlane.xlu0 %10585  ;;  %v10616_v50 = vpack.c.bf16 %v10608_v45, %v10608_v45 }
0x1bcb   :  { %20175 = vrcp.f32 %v10586_v22 }
0x1bcc   :  { %v20172_v58 = vpop.eup %20171  ;;  %v10677_v12 = vsel %vm1149_vm2, %v10616_v50, 0 }
0x1bcd   :  { %18533 = vmatpush3.bf16.xpose.msra.mxu0 %v10677_v12  ;;  %v10607_v34 = vmul.f32 %v20172_v58, %v20156_v21 }
0x1bce   :  { %v10592_v61 = vpop.xlane.xlu0 %10591  ;;  %18544 = vmatprep.subr.bf16.mxu0 %v25004_v30 }
0x1bcf   :  { %20177 = vrcp.f32 %v10592_v61  ;;  %v10589_v1 = vpop.xlane.xlu1 %10588  ;;  %v10615_v36 = vpack.c.bf16 %v10607_v34, %v10607_v34 }
0x1bd0   :  { %20179 = vrcp.f32 %v10589_v1 }
0x1bd1   :  { %v10629_v26 = vsel %vm1149_vm2, %v10615_v36, 0 }
0x1bd2   :  { %18527 = vmatpush3.bf16.xpose.msra.mxu1 %v10629_v26  ;;  %v10672_v38 = vpop.permute.xlu0 %10671 }
0x1bd3   :  { %18538 = vmatprep.subr.bf16.mxu1 %v25004_v30  ;;  %v10720_v12 = vpop.permute.xlu1 %10719 }
0x1bd4   :  { %v20174_v63 = vpop.eup %20173  ;;  %18535 = vmatmul.mubr.msk.bf16.vlgmr.msra.gmra.mxu0 %vm1149_vm2, %v10672_v38 }
0x1bd5   :  { %v10609_v53 = vmul.f32 %v20174_v63, %v20158_v19  ;;  %18546 = vmatprep.mubr.msk.bf16.mxu0 %vm20357_vm1, %v25004_v30 }
0x1bd7   :  { %v10617_v21 = vpack.c.bf16 %v10609_v53, %v10609_v53  ;;  %v10768_v1 = vpop.permute.xlu1 %10767 }
0x1bd8   :  { %v20176_v4 = vpop.eup %20175 }
0x1bd9   :  { %18529 = vmatmul.mubr.msk.bf16.vlgmr.msra.gmra.mxu1 %vm1149_vm2, %v10624_v6  ;;  %v10725_v23 = vsel %vm1149_vm2, %v10617_v21, 0  ;;  %v10610_v24 = vmul.f32 %v20176_v4, %v22973_v10 }
0x1bda   :  { %18539 = vmatpush3.bf16.xpose.msra.mxu1 %v10725_v23  ;;  %18540 = vmatprep.mubr.msk.bf16.mxu1 %vm20357_vm1, %v25004_v30 }
0x1bdb   :  { %v10618_v45 = vpack.c.bf16 %v10610_v24, %v10610_v24  ;;  %18550 = vmatprep.subr.bf16.mxu1 %v25004_v30 }
0x1bdc   :  { %v20178_v22 = vpop.eup %20177 }
0x1bdd   :  { %v20180_v19 = vpop.eup %20179  ;;  %v10773_v50 = vsel %vm1149_vm2, %v10618_v45, 0  ;;  %v10612_v58 = vmul.f32 %v20178_v22, %v22977_v2  ;;  %v11101_v22 = vrot.slane %v22823_v17, 4  ;;  %v11201_v17 = vrot.slane %v25157_v54, 4 }
0x1bde   :  { %18545 = vmatpush3.bf16.xpose.msra.mxu0 %v10773_v50  ;;  %v10611_v6 = vmul.f32 %v20180_v19, %v22979_v49  ;;  %v11301_v54 = vrot.slane %v22860_v8, 4  ;;  %v11149_v8 = vrot.slane %v25166_v52, 4  ;;  %v11351_v52 = vrot.slane %v22903_v48, 4 }
0x1bdf   :  { %18556 = vmatprep.subr.bf16.mxu0 %v25004_v30  ;;  %v10620_v34 = vpack.c.bf16 %v10612_v58, %v10612_v58  ;;  %v11051_v58 = vrot.slane %v22832_v28, 4  ;;  %v11206_v28 = vsel %vm1149_vm2, %v11201_v17, 0  ;;  %v11349_v48 = vrot.slane %v22927_v11, 4 }
0x1be0   :  { %v10619_v10 = vpack.c.bf16 %v10611_v6, %v10611_v6  ;;  %v11099_v6 = vrot.slane %v22842_v14, 4  ;;  %v11049_v14 = vrot.slane %v22858_v62, 4  ;;  %v11251_v62 = vrot.slane %v22877_v59, 4 }
0x1be1   :  { %18541 = vmatmul.mubr.msk.bf16.vlgmr.msra.gmra.mxu1 %vm1149_vm2, %v10720_v12  ;;  %v10869_v2 = vsel %vm1149_vm2, %v10620_v34, 0  ;;  %v11056_v12 = vsel %vm1149_vm2, %v11051_v58, 0 }
0x1be2   :  { %v10821_v61 = vsel %vm1149_vm2, %v10619_v10, 0  ;;  %18552 = vmatprep.mubr.msk.bf16.mxu1 %vm20357_vm1, %v25004_v30  ;;  %v11151_v10 = vrot.slane %v25160_v46, 4  ;;  %v11306_v46 = vsel %vm1149_vm2, %v11301_v54, 0 }
0x1be3   :  { %18551 = vmatpush3.bf16.xpose.msra.mxu1 %v10821_v61  ;;  %v11199_v61 = vrot.slane %v25163_v25, 4  ;;  %v11401_v25 = vrot.slane %v22884_v0, 4  ;;  %v11249_v0 = vrot.slane %v22910_v55, 4 }
0x1be4   :  { %18562 = vmatprep.subr.bf16.mxu1 %v25004_v30  ;;  %v11156_v34 = vsel %vm1149_vm2, %v11151_v10, 0 }
0x1be5   :  { %18547 = vmatmul.mubr.msk.bf16.vlgmr.msra.gmra.mxu0 %vm1149_vm2, %v10768_v1  ;;  %v11256_v1 = vsel %vm1149_vm2, %v11251_v62, 0  ;;  %v11406_v59 = vsel %vm1149_vm2, %v11401_v25, 0 }
0x1be6   :  { %18557 = vmatpush3.bf16.xpose.msra.mxu0 %v10869_v2  ;;  %18558 = vmatprep.mubr.msk.bf16.mxu0 %vm20357_vm1, %v25004_v30  ;;  %v11299_v2 = vrot.slane %v22892_v44, 4  ;;  %v11356_v44 = vsel %vm1149_vm2, %v11351_v52, 0 }
0x1be7   :  { %18568 = vmatprep.subr.bf16.mxu0 %v25004_v30 }
0x1c03   :  { %v10598_v49 = vpop.xlane.xlu0 %10597 }
0x1c04   :  { %20181 = vrcp.f32 %v10598_v49  ;;  %v11399_v49 = vrot.slane %v22916_v29, 4 }
0x1c07   :  { %v10816_v36 = vpop.permute.xlu0 %10815 }
0x1c08   :  { %v10595_v26 = vpop.xlane.xlu1 %10594  ;;  %18553 = vmatmul.mubr.msk.bf16.vlgmr.msra.gmra.mxu1 %vm1149_vm2, %v10816_v36 }
0x1c09   :  { %20183 = vrcp.f32 %v10595_v26  ;;  %18564 = vmatprep.mubr.msk.bf16.mxu1 %vm20357_vm1, %v25004_v30 }
0x1c0c   :  { %v10864_v38 = vpop.permute.xlu1 %10863 }
0x1c0d   :  { %18559 = vmatmul.mubr.msk.bf16.vlgmr.msra.gmra.mxu0 %vm1149_vm2, %v10864_v38 }
0x1c0e   :  { %18570 = vmatprep.mubr.msk.bf16.mxu0 %vm20357_vm1, %v25004_v30 }
0x1c10   :  { %v10960_v50 = vpop.permute.xlu1 %10959 }
0x1c11   :  { %v20182_v63 = vpop.eup %20181 }
0x1c12   :  { %v10614_v53 = vmul.f32 %v20182_v63, %v22992_v40  ;;  %v11106_v40 = vsel %vm1149_vm2, %v11101_v22, 0 }
0x1c14   :  { %v10622_v21 = vpack.c.bf16 %v10614_v53, %v10614_v53 }
0x1c16   :  { %v20184_v4 = vpop.eup %20183  ;;  %v10965_v23 = vsel %vm1149_vm2, %v10622_v21, 0 }
0x1c17   :  { %18569 = vmatpush3.bf16.xpose.msra.mxu0 %v10965_v23  ;;  %v10613_v24 = vmul.f32 %v20184_v4, %v22996_v41  ;;  %v10912_v41 = vpop.permute.xlu0 %10911 }
0x1c18   :  { %18580 = vmatprep.subr.bf16.mxu0 %v25004_v30 }
0x1c19   :  { %v10621_v45 = vpack.c.bf16 %v10613_v24, %v10613_v24 }
0x1c1b   :  { %v10917_v19 = vsel %vm1149_vm2, %v10621_v45, 0 }
0x1c1c   :  { %18563 = vmatpush3.bf16.xpose.msra.mxu1 %v10917_v19 }
0x1c1d   :  { %18574 = vmatprep.subr.bf16.mxu1 %v25004_v30 }
0x1c1e   :  { %18571 = vmatmul.mubr.msk.bf16.vlgmr.msra.gmra.mxu0 %vm1149_vm2, %v10960_v50 }
0x1c1f   :  { %18581 = vmatpush3.bf16.xpose.msra.mxu0 %v11106_v40  ;;  %18582 = vmatprep.mubr.msk.bf16.mxu0 %vm20357_vm1, %v25004_v30 }
0x1c20   :  { %18592 = vmatprep.subr.bf16.mxu0 %v25004_v30 }
0x1c23   :  { %18565 = vmatmul.mubr.msk.bf16.vlgmr.msra.gmra.mxu1 %vm1149_vm2, %v10912_v41 }
0x1c24   :  { %18575 = vmatpush3.bf16.xpose.msra.mxu1 %v11056_v12  ;;  %18576 = vmatprep.mubr.msk.bf16.mxu1 %vm20357_vm1, %v25004_v30 }
0x1c25   :  { %18586 = vmatprep.subr.bf16.mxu1 %v25004_v30 }
0x1c26   :  { %18583 = vmatmul.mubr.msk.bf16.vlgmr.msra.gmra.mxu0 %vm1149_vm2, %v11099_v6 }
0x1c27   :  { %18593 = vmatpush3.bf16.xpose.msra.mxu0 %v11206_v28  ;;  %18594 = vmatprep.mubr.msk.bf16.mxu0 %vm20357_vm1, %v25004_v30 }
0x1c28   :  { %18604 = vmatprep.subr.bf16.mxu0 %v25004_v30 }
0x1c2b   :  { %18577 = vmatmul.mubr.msk.bf16.vlgmr.msra.gmra.mxu1 %vm1149_vm2, %v11049_v14 }
0x1c2c   :  { %18587 = vmatpush3.bf16.xpose.msra.mxu1 %v11156_v34  ;;  %18588 = vmatprep.mubr.msk.bf16.mxu1 %vm20357_vm1, %v25004_v30 }
0x1c2d   :  { %18598 = vmatprep.subr.bf16.mxu1 %v25004_v30 }
0x1c2e   :  { %18595 = vmatmul.mubr.msk.bf16.vlgmr.msra.gmra.mxu0 %vm1149_vm2, %v11199_v61 }
0x1c2f   :  { %18605 = vmatpush3.bf16.xpose.msra.mxu0 %v11306_v46  ;;  %18606 = vmatprep.mubr.msk.bf16.mxu0 %vm20357_vm1, %v25004_v30 }
0x1c30   :  { %18616 = vmatprep.subr.bf16.mxu0 %v25004_v30 }
0x1c33   :  { %18589 = vmatmul.mubr.msk.bf16.vlgmr.msra.gmra.mxu1 %vm1149_vm2, %v11149_v8 }
0x1c34   :  { %18599 = vmatpush3.bf16.xpose.msra.mxu1 %v11256_v1  ;;  %18600 = vmatprep.mubr.msk.bf16.mxu1 %vm20357_vm1, %v25004_v30 }
0x1c35   :  { %18610 = vmatprep.subr.bf16.mxu1 %v25004_v30 }
0x1c36   :  { %18607 = vmatmul.mubr.msk.bf16.vlgmr.msra.gmra.mxu0 %vm1149_vm2, %v11299_v2 }
0x1c37   :  { %18617 = vmatpush3.bf16.xpose.msra.mxu0 %v11406_v59  ;;  %18618 = vmatprep.mubr.msk.bf16.mxu0 %vm20357_vm1, %v25004_v30 }
0x1c38   :  { %18628 = vmatprep.subr.bf16.mxu0 %v25004_v30 }
0x1c3b   :  { %18601 = vmatmul.mubr.msk.bf16.vlgmr.msra.gmra.mxu1 %vm1149_vm2, %v11249_v0 }
0x1c3c   :  { %18611 = vmatpush3.bf16.xpose.msra.mxu1 %v11356_v44  ;;  %18612 = vmatprep.mubr.msk.bf16.mxu1 %vm20357_vm1, %v25004_v30 }
0x1c3d   :  { %18622 = vmatprep.subr.bf16.mxu1 %v25004_v30 }
0x1c3e   :  { %18619 = vmatmul.mubr.msk.bf16.vlgmr.msra.gmra.mxu0 %vm1149_vm2, %v11399_v49 }
0x1c3f   :  { %18630 = vmatprep.mubr.msk.bf16.mxu0 %vm20357_vm1, %v25004_v30 }
0x1c43   :  { %18613 = vmatmul.mubr.msk.bf16.vlgmr.msra.gmra.mxu1 %vm1149_vm2, %v11349_v48 }
0x1c44   :  { %18624 = vmatprep.mubr.msk.bf16.mxu1 %vm20357_vm1, %v25004_v30 }
0x1c94   :  { %v23109_v55 = vpop.f32.mrf.mxu0 }
0x1c95   :  { %25177 = vst [vmem:[#allocation40_spill] sm:$0xff] %v23109_v55 }
0x1c96   :  { %v18536_v29 = vpop.f32.mrf.mxu0 }
0x1c98   :  { %v10716_v36 = vpop.f32.mrf.mxu0 }
0x1c99   :  { %v23111_v26 = vpop.f32.mrf.mxu1 }
0x1c9a   :  { %25178 = vst [vmem:[#allocation38_spill] sm:$0xff] %v23111_v26  ;;  %v18537_v38 = vpop.f32.mrf.mxu0 }
0x1c9b   :  { %v18530_v63 = vpop.f32.mrf.mxu1 }
0x1c9d   :  { %v10668_v53 = vpop.f32.mrf.mxu1 }
0x1c9f   :  { %v18531_v21 = vpop.f32.mrf.mxu1 }
0x1ca1   :  { %v23113_v4 = vpop.f32.mrf.mxu1 }
0x1ca2   :  { %25179 = vst [vmem:[#allocation19_spill] sm:$0xff] %v23113_v4 }
0x1ca3   :  { %v18542_v23 = vpop.f32.mrf.mxu1 }
0x1ca5   :  { %v10764_v24 = vpop.f32.mrf.mxu1  ;;  %v23115_v11 = vpop.f32.mrf.mxu0 }
0x1ca6   :  { %25180 = vst [vmem:[#allocation67_spill] sm:$0xff] %v23115_v11 }
0x1ca7   :  { %v18543_v45 = vpop.f32.mrf.mxu1  ;;  %v18548_v22 = vpop.f32.mrf.mxu0 }
0x1ca9   :  { %v10812_v19 = vpop.f32.mrf.mxu0 }
0x1cab   :  { %v18549_v50 = vpop.f32.mrf.mxu0 }
0x1cc8   :  { %v23117_v40 = vpop.f32.mrf.mxu1 }
0x1cc9   :  { %25181 = vst [vmem:[#allocation65_spill] sm:$0xff] %v23117_v40 }
0x1cca   :  { %v18554_v58 = vpop.f32.mrf.mxu1 }
0x1ccc   :  { %v10860_v41 = vpop.f32.mrf.mxu1 }
0x1ccd   :  { %v23119_v17 = vpop.f32.mrf.mxu0 }
0x1cce   :  { %25182 = vst [vmem:[#allocation16_spill] sm:$0xff] %v23119_v17  ;;  %v18555_v12 = vpop.f32.mrf.mxu1 }
0x1ccf   :  { %v18560_v6 = vpop.f32.mrf.mxu0 }
0x1cd1   :  { %v10908_v28 = vpop.f32.mrf.mxu0 }
0x1cd3   :  { %v18561_v10 = vpop.f32.mrf.mxu0 }
0x1cde   :  { %v23121_v14 = vpop.f32.mrf.mxu0 }
0x1cdf   :  { %25183 = vst [vmem:[#allocation64_spill] sm:$0xff] %v23121_v14 }
0x1ce0   :  { %v18572_v54 = vpop.f32.mrf.mxu0 }
0x1ce2   :  { %v11004_v34 = vpop.f32.mrf.mxu0 }
0x1ce3   :  { %v23123_v61 = vpop.f32.mrf.mxu1 }
0x1ce4   :  { %25184 = vst [vmem:[#allocation62_spill] sm:$0xff] %v23123_v61  ;;  %v18573_v46 = vpop.f32.mrf.mxu0 }
0x1ce5   :  { %v18566_v62 = vpop.f32.mrf.mxu1 }
0x1ce6   :  { %v11142_v8 = vpop.f32.mrf.mxu0 }
0x1ce7   :  { %v10956_v25 = vpop.f32.mrf.mxu1  ;;  %v11143_v1 = vadd.f32 %v11142_v8, %v20867_v43 }
0x1ce8   :  { %v18584_v2 = vpop.f32.mrf.mxu0 }
0x1ce9   :  { %v18567_v59 = vpop.f32.mrf.mxu1  ;;  %v11451_v52 = vsel %vm1149_vm2, %v11143_v1, -inf }
0x1cea   :  { %11452 = vmax.xlane.f32.xlu1 %v11451_v52  ;;  %v11145_v0 = vpop.f32.mrf.mxu0 }
0x1ceb   :  { %v11092_v44 = vpop.f32.mrf.mxu1 }
0x1cec   :  { %v11093_v49 = vadd.f32 %v11092_v44, %v20867_v43  ;;  %v18585_v48 = vpop.f32.mrf.mxu0 }
0x1ced   :  { %v18578_v29 = vpop.f32.mrf.mxu1 }
0x1cee   :  { %v11242_v36 = vpop.f32.mrf.mxu0  ;;  %v11448_v38 = vsel %vm1149_vm2, %v11093_v49, -inf }
0x1cef   :  { %11449 = vmax.xlane.f32.xlu0 %v11448_v38  ;;  %v11095_v63 = vpop.f32.mrf.mxu1  ;;  %v11243_v50 = vadd.f32 %v11242_v36, %v20867_v43 }
0x1cf0   :  { %v18596_v53 = vpop.f32.mrf.mxu0 }
0x1cf1   :  { %v18579_v21 = vpop.f32.mrf.mxu1  ;;  %v11457_v34 = vsel %vm1149_vm2, %v11243_v50, -inf }
0x1cf2   :  { %v11245_v23 = vpop.f32.mrf.mxu0 }
0x1cf3   :  { %v11192_v24 = vpop.f32.mrf.mxu1 }
0x1cf4   :  { %v11193_v45 = vadd.f32 %v11192_v24, %v20867_v43  ;;  %v18597_v22 = vpop.f32.mrf.mxu0 }
0x1cf5   :  { %v18590_v19 = vpop.f32.mrf.mxu1 }
0x1cf6   :  { %v11342_v58 = vpop.f32.mrf.mxu0  ;;  %v11454_v41 = vsel %vm1149_vm2, %v11193_v45, -inf }
0x1cf7   :  { %11455 = vmax.xlane.f32.xlu0 %v11454_v41  ;;  %v11195_v12 = vpop.f32.mrf.mxu1  ;;  %v11343_v10 = vadd.f32 %v11342_v58, %v20867_v43 }
0x1cf8   :  { %v18608_v6 = vpop.f32.mrf.mxu0 }
0x1cf9   :  { %v18591_v28 = vpop.f32.mrf.mxu1  ;;  %v11463_v59 = vsel %vm1149_vm2, %v11343_v10, -inf }
0x1cfa   :  { %v11345_v54 = vpop.f32.mrf.mxu0 }
0x1cfb   :  { %11458 = vmax.xlane.f32.xlu0 %v11457_v34  ;;  %v11292_v46 = vpop.f32.mrf.mxu1 }
0x1cfc   :  { %v11293_v62 = vadd.f32 %v11292_v46, %v20867_v43  ;;  %v18609_v8 = vpop.f32.mrf.mxu0 }
0x1cfd   :  { %v18602_v25 = vpop.f32.mrf.mxu1 }
0x1cfe   :  { %v11442_v2 = vpop.f32.mrf.mxu0  ;;  %v11460_v52 = vsel %vm1149_vm2, %v11293_v62, -inf }
0x1cff   :  { %v23138_v0 = vadd.f32 %v11442_v2, %v20867_v43  ;;  %11464 = vmax.xlane.f32.xlu0 %v11463_v59  ;;  %11461 = vmax.xlane.f32.xlu1 %v11460_v52  ;;  %v11295_v44 = vpop.f32.mrf.mxu1 }
0x1d00   :  { %v18620_v48 = vpop.f32.mrf.mxu0 }
0x1d01   :  { %v18603_v29 = vpop.f32.mrf.mxu1  ;;  %v11469_v36 = vsel %vm1149_vm2, %v23138_v0, -inf }
0x1d02   :  { %v11445_v38 = vpop.f32.mrf.mxu0 }
0x1d03   :  { %11470 = vmax.xlane.f32.xlu0 %v11469_v36  ;;  %v11392_v63 = vpop.f32.mrf.mxu1 }
0x1d04   :  { %v11393_v53 = vadd.f32 %v11392_v63, %v20867_v43  ;;  %v18621_v21 = vpop.f32.mrf.mxu0 }
0x1d05   :  { %v18614_v23 = vpop.f32.mrf.mxu1 }
0x1d06   :  { %v11466_v24 = vsel %vm1149_vm2, %v11393_v53, -inf }
0x1d07   :  { %11467 = vmax.xlane.f32.xlu1 %v11466_v24  ;;  %v11395_v22 = vpop.f32.mrf.mxu1 }
0x1d09   :  { %v18615_v19 = vpop.f32.mrf.mxu1 }
0x1d18   :  { %11544 = vrot.lane.b32.xlu1 %v20984_v51, %s20369_s20 }
0x1d73   :  { %v11453_v58 = vpop.xlane.xlu1 %11452 }
0x1d74   :  { %v11473_v41 = vsub.f32 %v11143_v1, %v11453_v58 }
0x1d76   :  { %v11482_v12 = vmul.f32 1.442695, %v11473_v41 }
0x1d78   :  { %20185 = vpow2.f32 %v11482_v12  ;;  %v11450_v6 = vpop.xlane.xlu0 %11449 }
0x1d79   :  { %v11472_v28 = vsub.f32 %v11093_v49, %v11450_v6 }
0x1d7b   :  { %v11480_v54 = vmul.f32 1.442695, %v11472_v28 }
0x1d7d   :  { %20187 = vpow2.f32 %v11480_v54 }
0x1d80   :  { %v11456_v34 = vpop.xlane.xlu0 %11455 }
0x1d81   :  { %v11474_v46 = vsub.f32 %v11193_v45, %v11456_v34 }
0x1d83   :  { %v11484_v8 = vmul.f32 1.442695, %v11474_v46 }
0x1d84   :  { %v11459_v25 = vpop.xlane.xlu0 %11458 }
0x1d85   :  { %v20186_v2 = vpop.eup %20185  ;;  %20189 = vpow2.f32 %v11484_v8  ;;  %v11475_v59 = vsub.f32 %v11243_v50, %v11459_v25 }
0x1d86   :  { %v11499_v52 = vsel %vm1149_vm2, %v20186_v2, 0.0 }
0x1d87   :  { %v11486_v44 = vmul.f32 1.442695, %v11475_v59  ;;  %11500 = vadd.xlane.f32.xlu0 %v11499_v52 }
0x1d88   :  { %v11465_v48 = vpop.xlane.xlu0 %11464  ;;  %v11462_v29 = vpop.xlane.xlu1 %11461 }
0x1d89   :  { %20191 = vpow2.f32 %v11486_v44  ;;  %v11477_v1 = vsub.f32 %v11343_v10, %v11465_v48  ;;  %v11476_v36 = vsub.f32 %v11293_v62, %v11462_v29 }
0x1d8a   :  { %v20188_v38 = vpop.eup %20187 }
0x1d8b   :  { %v11490_v49 = vmul.f32 1.442695, %v11477_v1  ;;  %v11488_v63 = vmul.f32 1.442695, %v11476_v36  ;;  %v11496_v21 = vsel %vm1149_vm2, %v20188_v38, 0.0 }
0x1d8c   :  { %11497 = vadd.xlane.f32.xlu1 %v11496_v21  ;;  %v11471_v58 = vpop.xlane.xlu0 %11470 }
0x1d8d   :  { %20193 = vpow2.f32 %v11490_v49  ;;  %v11479_v41 = vsub.f32 %v23138_v0, %v11471_v58 }
0x1d8e   :  { %20195 = vpow2.f32 %v11488_v63 }
0x1d8f   :  { %v11494_v6 = vmul.f32 1.442695, %v11479_v41 }
0x1d90   :  { %v11468_v12 = vpop.xlane.xlu1 %11467 }
0x1d91   :  { %v11478_v28 = vsub.f32 %v11393_v53, %v11468_v12  ;;  %20197 = vpow2.f32 %v11494_v6 }
0x1d92   :  { %v20190_v45 = vpop.eup %20189 }
0x1d93   :  { %v11502_v50 = vsel %vm1149_vm2, %v20190_v45, 0.0  ;;  %v11492_v54 = vmul.f32 1.442695, %v11478_v28 }
0x1d94   :  { %11503 = vadd.xlane.f32.xlu1 %v11502_v50  ;;  %v11545_v53 = vpop.permute.xlu1 %11544 }
0x1d95   :  { %20199 = vpow2.f32 %v11492_v54 }
0x1d96   :  { %v23149_v23 = vpop.eup %20191 }
0x1d97   :  { %v11505_v24 = vsel %vm1149_vm2, %v23149_v23, 0.0 }
0x1d98   :  { %11506 = vadd.xlane.f32.xlu0 %v11505_v24 }
0x1d9a   :  { %v23153_v10 = vpop.eup %20193 }
0x1d9b   :  { %v23155_v62 = vpop.eup %20195  ;;  %v11511_v22 = vsel %vm1149_vm2, %v23153_v10, 0.0 }
0x1d9c   :  { %11512 = vadd.xlane.f32.xlu0 %v11511_v22  ;;  %v11508_v19 = vsel %vm1149_vm2, %v23155_v62, 0.0 }
0x1d9d   :  { %11509 = vadd.xlane.f32.xlu1 %v11508_v19 }
0x1d9e   :  { %v23168_v34 = vpop.eup %20197 }
0x1d9f   :  { %v11517_v46 = vsel %vm1149_vm2, %v23168_v34, 0.0 }
0x1da2   :  { %v23172_v8 = vpop.eup %20199 }
0x1da3   :  { %v11514_v25 = vsel %vm1149_vm2, %v23172_v8, 0.0 }
0x1dae   :  { %11640 = vrot.lane.b32.xlu1 %v20996_v27, %s20369_s20 }
0x1db2   :  { %11688 = vrot.lane.b32.xlu1 %v21023_v42, %s20369_s20  ;;  %11592 = vrot.lane.b32.xlu0 %v21013_v16, %s20369_s20 }
0x1dd1   :  { %11518 = vadd.xlane.f32.xlu0 %v11517_v46 }
0x1dd6   :  { %11515 = vadd.xlane.f32.xlu1 %v11514_v25 }
0x1de7   :  { %11784 = vrot.lane.b32.xlu1 %v21053_v3, %s20369_s20  ;;  %11736 = vrot.lane.b32.xlu0 %v21031_v5, %s20369_s20 }
0x1deb   :  { %11880 = vrot.lane.b32.xlu1 %v21070_v18, %s20369_s20  ;;  %11832 = vrot.lane.b32.xlu0 %v21041_v20, %s20369_s20 }
0x1e10   :  { %v11501_v0 = vpop.xlane.xlu0 %11500 }
0x1e11   :  { %20201 = vrcp.f32 %v11501_v0 }
0x1e15   :  { %v11498_v59 = vpop.xlane.xlu1 %11497 }
0x1e16   :  { %20203 = vrcp.f32 %v11498_v59 }
0x1e1d   :  { %v11504_v52 = vpop.xlane.xlu1 %11503 }
0x1e1e   :  { %v20202_v44 = vpop.eup %20201  ;;  %20205 = vrcp.f32 %v11504_v52 }
0x1e1f   :  { %v11529_v48 = vmul.f32 %v20202_v44, %v20186_v2 }
0x1e21   :  { %v11507_v29 = vpop.xlane.xlu0 %11506  ;;  %v11537_v1 = vpack.c.bf16 %v11529_v48, %v11529_v48 }
0x1e22   :  { %20207 = vrcp.f32 %v11507_v29 }
0x1e23   :  { %v20204_v36 = vpop.eup %20203  ;;  %v11598_v49 = vsel %vm1149_vm2, %v11537_v1, 0 }
0x1e24   :  { %18629 = vmatpush3.bf16.xpose.msra.mxu0 %v11598_v49  ;;  %v11528_v63 = vmul.f32 %v20204_v36, %v20188_v38 }
0x1e25   :  { %v11513_v21 = vpop.xlane.xlu0 %11512  ;;  %18640 = vmatprep.subr.bf16.mxu0 %v25004_v30 }
0x1e26   :  { %20209 = vrcp.f32 %v11513_v21  ;;  %v11510_v50 = vpop.xlane.xlu1 %11509  ;;  %v11536_v24 = vpack.c.bf16 %v11528_v63, %v11528_v63 }
0x1e27   :  { %20211 = vrcp.f32 %v11510_v50 }
0x1e28   :  { %v11550_v22 = vsel %vm1149_vm2, %v11536_v24, 0  ;;  %v25185_v24 = vld [vmem:[#allocation47_spill] sm:$0xff] }
0x1e29   :  { %18623 = vmatpush3.bf16.xpose.msra.mxu1 %v11550_v22  ;;  %v11593_v19 = vpop.permute.xlu0 %11592  ;;  %v19445_v22 = vunpack.i.l.bf16 %v25185_v24 }
0x1e2a   :  { %18634 = vmatprep.subr.bf16.mxu1 %v25004_v30  ;;  %v11641_v0 = vpop.permute.xlu1 %11640 }
0x1e2b   :  { %v20206_v2 = vpop.eup %20205  ;;  %18631 = vmatmul.mubr.msk.bf16.vlgmr.msra.gmra.mxu0 %vm1149_vm2, %v11593_v19  ;;  %v25186_v19 = vld [vmem:[#allocation45_spill] sm:$0xff] }
0x1e2c   :  { %v11530_v58 = vmul.f32 %v20206_v2, %v20190_v45  ;;  %18642 = vmatprep.mubr.msk.bf16.mxu0 %vm20357_vm1, %v25004_v30  ;;  %v19440_v2 = vunpack.i.l.bf16 %v25186_v19 }
0x1e2e   :  { %v11538_v38 = vpack.c.bf16 %v11530_v58, %v11530_v58  ;;  %v11689_v44 = vpop.permute.xlu1 %11688 }
0x1e2f   :  { %v20208_v41 = vpop.eup %20207 }
0x1e30   :  { %18625 = vmatmul.mubr.msk.bf16.vlgmr.msra.gmra.mxu1 %vm1149_vm2, %v11545_v53  ;;  %v11646_v12 = vsel %vm1149_vm2, %v11538_v38, 0  ;;  %v11531_v6 = vmul.f32 %v20208_v41, %v23149_v23  ;;  %v23223_v41 = vpack.c.bf16 %v19445_v22, %v19440_v2 }
0x1e31   :  { %18635 = vmatpush3.bf16.xpose.msra.mxu1 %v11646_v12  ;;  %18636 = vmatprep.mubr.msk.bf16.mxu1 %vm20357_vm1, %v25004_v30 }
0x1e32   :  { %v11539_v28 = vpack.c.bf16 %v11531_v6, %v11531_v6  ;;  %18646 = vmatprep.subr.bf16.mxu1 %v25004_v30  ;;  %v25187_v6 = vld [vmem:[#allocation44_spill] sm:$0xff] }
0x1e33   :  { %v20210_v54 = vpop.eup %20209 }
0x1e34   :  { %v20212_v45 = vpop.eup %20211  ;;  %v11694_v46 = vsel %vm1149_vm2, %v11539_v28, 0  ;;  %v11533_v25 = vmul.f32 %v20210_v54, %v23153_v10  ;;  %v25188_v54 = vld [vmem:[#allocation42_spill] sm:$0xff] }
0x1e35   :  { %18641 = vmatpush3.bf16.xpose.msra.mxu0 %v11694_v46  ;;  %v11532_v53 = vmul.f32 %v20212_v45, %v23155_v62  ;;  %v19276_v45 = vunpack.i.l.bf16 %v25188_v54 }
0x1e36   :  { %18652 = vmatprep.subr.bf16.mxu0 %v25004_v30  ;;  %v11541_v59 = vpack.c.bf16 %v11533_v25, %v11533_v25  ;;  %v19443_v25 = vunpack.i.h.bf16 %v25186_v19  ;;  %v25194_v19 = vld [vmem:[#allocation66_spill] sm:$0xff] }
0x1e37   :  { %v11540_v23 = vpack.c.bf16 %v11532_v53, %v11532_v53  ;;  %v19522_v2 = vunpack.i.l.bf16 %v25194_v19 }
0x1e38   :  { %18637 = vmatmul.mubr.msk.bf16.vlgmr.msra.gmra.mxu1 %vm1149_vm2, %v11641_v0  ;;  %v11790_v10 = vsel %vm1149_vm2, %v11541_v59, 0  ;;  %v19448_v0 = vunpack.i.h.bf16 %v25185_v24  ;;  %v25193_v24 = vld [vmem:[#allocation68_spill] sm:$0xff] }
0x1e39   :  { %v11742_v52 = vsel %vm1149_vm2, %v11540_v23, 0  ;;  %18648 = vmatprep.mubr.msk.bf16.mxu1 %vm20357_vm1, %v25004_v30  ;;  %v19527_v22 = vunpack.i.l.bf16 %v25193_v24 }
0x1e3a   :  { %18647 = vmatpush3.bf16.xpose.msra.mxu1 %v11742_v52  ;;  %v23242_v59 = vpack.c.bf16 %v19448_v0, %v19443_v25  ;;  %v19284_v52 = vunpack.i.h.bf16 %v25187_v6  ;;  %v25198_v0 = vld [vmem:[#allocation18_spill] sm:$0xff] }
0x1e3b   :  { %18658 = vmatprep.subr.bf16.mxu1 %v25004_v30 }
0x1e3c   :  { %18643 = vmatmul.mubr.msk.bf16.vlgmr.msra.gmra.mxu0 %vm1149_vm2, %v11689_v44  ;;  %v25189_v44 = vld [vmem:[#allocation25_spill] sm:$0xff] }
0x1e3d   :  { %18653 = vmatpush3.bf16.xpose.msra.mxu0 %v11790_v10  ;;  %18654 = vmatprep.mubr.msk.bf16.mxu0 %vm20357_vm1, %v25004_v30  ;;  %v12111_v10 = vsel %vm1149_vm2, %v25189_v44, 0 }
0x1e3e   :  { %18664 = vmatprep.subr.bf16.mxu0 %v25004_v30 }
0x1e5a   :  { %v11519_v62 = vpop.xlane.xlu0 %11518 }
0x1e5b   :  { %20213 = vrcp.f32 %v11519_v62  ;;  %v25190_v62 = vld [vmem:[#allocation71_spill] sm:$0xff] }
0x1e5e   :  { %v11737_v48 = vpop.permute.xlu0 %11736 }
0x1e5f   :  { %v11516_v29 = vpop.xlane.xlu1 %11515  ;;  %18649 = vmatmul.mubr.msk.bf16.vlgmr.msra.gmra.mxu1 %vm1149_vm2, %v11737_v48  ;;  %v19691_v48 = vunpack.i.l.bf16 %v25190_v62 }
0x1e60   :  { %20215 = vrcp.f32 %v11516_v29  ;;  %18660 = vmatprep.mubr.msk.bf16.mxu1 %vm20357_vm1, %v25004_v30  ;;  %v25191_v29 = vld [vmem:[#allocation69_spill] sm:$0xff] }
0x1e62   :  { %v11833_v53 = vpop.permute.xlu0 %11832 }
0x1e63   :  { %v11785_v1 = vpop.permute.xlu1 %11784 }
0x1e64   :  { %18655 = vmatmul.mubr.msk.bf16.vlgmr.msra.gmra.mxu0 %vm1149_vm2, %v11785_v1  ;;  %v19686_v1 = vunpack.i.l.bf16 %v25191_v29 }
0x1e65   :  { %18666 = vmatprep.mubr.msk.bf16.mxu0 %vm20357_vm1, %v25004_v30 }
0x1e67   :  { %v11881_v28 = vpop.permute.xlu1 %11880 }
0x1e68   :  { %v20214_v36 = vpop.eup %20213 }
0x1e69   :  { %v11535_v49 = vmul.f32 %v20214_v36, %v23168_v34  ;;  %v19281_v34 = vunpack.i.l.bf16 %v25187_v6  ;;  %v19279_v36 = vunpack.i.h.bf16 %v25188_v54  ;;  %v23277_v54 = vpack.c.bf16 %v19527_v22, %v19522_v2  ;;  %v25200_v22 = vld [vmem:[#allocation96_spill] sm:$0xff] }
0x1e6b   :  { %v11543_v63 = vpack.c.bf16 %v11535_v49, %v11535_v49  ;;  %v23232_v46 = vpack.c.bf16 %v19281_v34, %v19276_v45  ;;  %v23258_v49 = vpack.c.bf16 %v19284_v52, %v19279_v36  ;;  %v25197_v34 = vld [vmem:[#allocation91_spill] sm:$0xff]  ;;  %v19689_v45 = vunpack.i.h.bf16 %v25191_v29  ;;  %v25199_v36 = vld [vmem:[#allocation94_spill] sm:$0xff] }
0x1e6c   :  { %v19604_v52 = vunpack.i.l.bf16 %v25197_v34  ;;  %v19525_v29 = vunpack.i.h.bf16 %v25194_v19 }
0x1e6d   :  { %v20216_v21 = vpop.eup %20215  ;;  %v11886_v50 = vsel %vm1149_vm2, %v11543_v63, 0  ;;  %v11973_v23 = vsel %vm1149_vm2, %v23232_v46, 0  ;;  %v23260_v63 = vpack.c.bf16 %v19691_v48, %v19686_v1 }
0x1e6e   :  { %18665 = vmatpush3.bf16.xpose.msra.mxu0 %v11886_v50  ;;  %v11534_v58 = vmul.f32 %v20216_v21, %v23172_v8  ;;  %v12019_v8 = vsel %vm1149_vm2, %v23223_v41, 0  ;;  %v25192_v21 = vld [vmem:[#allocation21_spill] sm:$0xff] }
0x1e6f   :  { %18676 = vmatprep.subr.bf16.mxu0 %v25004_v30  ;;  %v12065_v50 = vsel %vm1149_vm2, %v25192_v21, 0 }
0x1e70   :  { %v11542_v38 = vpack.c.bf16 %v11534_v58, %v11534_v58  ;;  %v25195_v58 = vld [vmem:[#allocation22_spill] sm:$0xff] }
0x1e72   :  { %v11838_v12 = vsel %vm1149_vm2, %v11542_v38, 0  ;;  %v12203_v38 = vsel %vm1149_vm2, %v23260_v63, 0 }
0x1e73   :  { %18659 = vmatpush3.bf16.xpose.msra.mxu1 %v11838_v12  ;;  %v25196_v12 = vld [vmem:[#allocation93_spill] sm:$0xff] }
0x1e74   :  { %18670 = vmatprep.subr.bf16.mxu1 %v25004_v30  ;;  %v19612_v6 = vunpack.i.h.bf16 %v25196_v12 }
0x1e75   :  { %18667 = vmatmul.mubr.msk.bf16.vlgmr.msra.gmra.mxu0 %vm1149_vm2, %v11881_v28  ;;  %v19607_v28 = vunpack.i.h.bf16 %v25197_v34 }
0x1e76   :  { %18677 = vmatpush3.bf16.xpose.msra.mxu0 %v12019_v8  ;;  %18678 = vmatprep.mubr.msk.bf16.mxu0 %vm20357_vm1, %v25004_v30  ;;  %v19694_v8 = vunpack.i.h.bf16 %v25190_v62  ;;  %v19530_v62 = vunpack.i.h.bf16 %v25193_v24  ;;  %v19776_v24 = vunpack.i.h.bf16 %v25200_v22 }
0x1e77   :  { %18688 = vmatprep.subr.bf16.mxu0 %v25004_v30  ;;  %v23284_v25 = vpack.c.bf16 %v19612_v6, %v19607_v28  ;;  %v19773_v6 = vunpack.i.l.bf16 %v25200_v22 }
0x1e78   :  { %v23310_v2 = vpack.c.bf16 %v19530_v62, %v19525_v29 }
0x1e79   :  { %v12295_v48 = vsel %vm1149_vm2, %v23284_v25, 0 }
0x1e7a   :  { %18661 = vmatmul.mubr.msk.bf16.vlgmr.msra.gmra.mxu1 %vm1149_vm2, %v11833_v53  ;;  %v12157_v53 = vsel %vm1149_vm2, %v23277_v54, 0 }
0x1e7b   :  { %18671 = vmatpush3.bf16.xpose.msra.mxu1 %v11973_v23  ;;  %18672 = vmatprep.mubr.msk.bf16.mxu1 %vm20357_vm1, %v25004_v30  ;;  %v19609_v23 = vunpack.i.l.bf16 %v25196_v12  ;;  %v19768_v12 = vunpack.i.l.bf16 %v25199_v36 }
0x1e7c   :  { %18682 = vmatprep.subr.bf16.mxu1 %v25004_v30 }
0x1e7d   :  { %18679 = vmatmul.mubr.msk.bf16.vlgmr.msra.gmra.mxu0 %vm1149_vm2, %v23242_v59  ;;  %v23303_v1 = vpack.c.bf16 %v19609_v23, %v19604_v52  ;;  %v23327_v34 = vpack.c.bf16 %v19773_v6, %v19768_v12 }
0x1e7e   :  { %18689 = vmatpush3.bf16.xpose.msra.mxu0 %v12111_v10  ;;  %18690 = vmatprep.mubr.msk.bf16.mxu0 %vm20357_vm1, %v25004_v30  ;;  %v23292_v10 = vpack.c.bf16 %v19694_v8, %v19689_v45 }
0x1e7f   :  { %18700 = vmatprep.subr.bf16.mxu0 %v25004_v30  ;;  %v12249_v19 = vsel %vm1149_vm2, %v23303_v1, 0 }
0x1e82   :  { %18673 = vmatmul.mubr.msk.bf16.vlgmr.msra.gmra.mxu1 %vm1149_vm2, %v23258_v49 }
0x1e83   :  { %18683 = vmatpush3.bf16.xpose.msra.mxu1 %v12065_v50  ;;  %18684 = vmatprep.mubr.msk.bf16.mxu1 %vm20357_vm1, %v25004_v30  ;;  %v19771_v50 = vunpack.i.h.bf16 %v25199_v36 }
0x1e84   :  { %18694 = vmatprep.subr.bf16.mxu1 %v25004_v30 }
0x1e85   :  { %18691 = vmatmul.mubr.msk.bf16.vlgmr.msra.gmra.mxu0 %vm1149_vm2, %v25195_v58 }
0x1e86   :  { %18701 = vmatpush3.bf16.xpose.msra.mxu0 %v12203_v38  ;;  %18702 = vmatprep.mubr.msk.bf16.mxu0 %vm20357_vm1, %v25004_v30  ;;  %v23316_v38 = vpack.c.bf16 %v19776_v24, %v19771_v50 }
0x1e87   :  { %18712 = vmatprep.subr.bf16.mxu0 %v25004_v30 }
0x1e8a   :  { %18685 = vmatmul.mubr.msk.bf16.vlgmr.msra.gmra.mxu1 %vm1149_vm2, %v25198_v0 }
0x1e8b   :  { %18695 = vmatpush3.bf16.xpose.msra.mxu1 %v12157_v53  ;;  %18696 = vmatprep.mubr.msk.bf16.mxu1 %vm20357_vm1, %v25004_v30 }
0x1e8c   :  { %18706 = vmatprep.subr.bf16.mxu1 %v25004_v30 }
0x1e8d   :  { %18703 = vmatmul.mubr.msk.bf16.vlgmr.msra.gmra.mxu0 %vm1149_vm2, %v23292_v10 }
0x1e8e   :  { %18713 = vmatpush3.bf16.xpose.msra.mxu0 %v12295_v48  ;;  %18714 = vmatprep.mubr.msk.bf16.mxu0 %vm20357_vm1, %v25004_v30 }
0x1e8f   :  { %18724 = vmatprep.subr.bf16.mxu0 %v25004_v30 }
0x1e92   :  { %18697 = vmatmul.mubr.msk.bf16.vlgmr.msra.gmra.mxu1 %vm1149_vm2, %v23310_v2 }
0x1e93   :  { %18707 = vmatpush3.bf16.xpose.msra.mxu1 %v12249_v19  ;;  %18708 = vmatprep.mubr.msk.bf16.mxu1 %vm20357_vm1, %v25004_v30 }
0x1e94   :  { %18718 = vmatprep.subr.bf16.mxu1 %v25004_v30 }
0x1e95   :  { %18715 = vmatmul.mubr.msk.bf16.vlgmr.msra.gmra.mxu0 %vm1149_vm2, %v23316_v38 }
0x1e96   :  { %18726 = vmatprep.mubr.msk.bf16.mxu0 %vm20357_vm1, %v25004_v30 }
0x1e9a   :  { %18709 = vmatmul.mubr.msk.bf16.vlgmr.msra.gmra.mxu1 %vm1149_vm2, %v23327_v34 }
0x1e9b   :  { %18720 = vmatprep.mubr.msk.bf16.mxu1 %vm20357_vm1, %v25004_v30 }
0x1eeb   :  { %v23333_v28 = vpop.f32.mrf.mxu0 }
0x1eec   :  { %25201 = vst [vmem:[#allocation17_spill] sm:$0xff] %v23333_v28 }
0x1eed   :  { %v18632_v45 = vpop.f32.mrf.mxu0 }
0x1eef   :  { %v11637_v8 = vpop.f32.mrf.mxu0 }
0x1ef0   :  { %v23335_v53 = vpop.f32.mrf.mxu1 }
0x1ef1   :  { %25202 = vst [vmem:[#allocation89_spill] sm:$0xff] %v23335_v53  ;;  %v18633_v23 = vpop.f32.mrf.mxu0 }
0x1ef2   :  { %v18626_v52 = vpop.f32.mrf.mxu1 }
0x1ef4   :  { %v11589_v62 = vpop.f32.mrf.mxu1 }
0x1ef6   :  { %v18627_v48 = vpop.f32.mrf.mxu1 }
0x1ef8   :  { %v23337_v29 = vpop.f32.mrf.mxu1 }
0x1ef9   :  { %25203 = vst [vmem:[#allocation87_spill] sm:$0xff] %v23337_v29 }
0x1efa   :  { %v18638_v36 = vpop.f32.mrf.mxu1 }
0x1efc   :  { %v11685_v50 = vpop.f32.mrf.mxu1  ;;  %v23339_v22 = vpop.f32.mrf.mxu0 }
0x1efd   :  { %25204 = vst [vmem:[#allocation14_spill] sm:$0xff] %v23339_v22 }
0x1efe   :  { %v18639_v24 = vpop.f32.mrf.mxu1  ;;  %v18644_v19 = vpop.f32.mrf.mxu0 }
0x1f00   :  { %v11733_v12 = vpop.f32.mrf.mxu0 }
0x1f02   :  { %v18645_v6 = vpop.f32.mrf.mxu0 }
0x1f1f   :  { %v23341_v26 = vpop.f32.mrf.mxu1 }
0x1f20   :  { %25205 = vst [vmem:[#allocation90_spill] sm:$0xff] %v23341_v26 }
0x1f21   :  { %v18650_v45 = vpop.f32.mrf.mxu1 }
0x1f23   :  { %v11781_v8 = vpop.f32.mrf.mxu1 }
0x1f24   :  { %v23343_v28 = vpop.f32.mrf.mxu0 }
0x1f25   :  { %25206 = vst [vmem:[#allocation92_spill] sm:$0xff] %v23343_v28  ;;  %v18651_v23 = vpop.f32.mrf.mxu1 }
0x1f26   :  { %v18656_v52 = vpop.f32.mrf.mxu0 }
0x1f28   :  { %v11829_v62 = vpop.f32.mrf.mxu0 }
0x1f2a   :  { %v18657_v48 = vpop.f32.mrf.mxu0 }
0x1f35   :  { %v23345_v53 = vpop.f32.mrf.mxu0 }
0x1f36   :  { %25207 = vst [vmem:[#allocation47_spill] sm:$0xff] %v23345_v53 }
0x1f37   :  { %v18668_v36 = vpop.f32.mrf.mxu0 }
0x1f39   :  { %v11925_v50 = vpop.f32.mrf.mxu0 }
0x1f3a   :  { %v23347_v55 = vpop.f32.mrf.mxu1 }
0x1f3b   :  { %25208 = vst [vmem:[#allocation45_spill] sm:$0xff] %v23347_v55  ;;  %v18669_v24 = vpop.f32.mrf.mxu0 }
0x1f3c   :  { %v18662_v19 = vpop.f32.mrf.mxu1 }
0x1f3d   :  { %v12055_v12 = vpop.f32.mrf.mxu0 }
0x1f3e   :  { %v11877_v6 = vpop.f32.mrf.mxu1  ;;  %v12056_v29 = vadd.f32 %v12055_v12, %v20867_v43 }
0x1f3f   :  { %v18680_v45 = vpop.f32.mrf.mxu0 }
0x1f40   :  { %v18663_v8 = vpop.f32.mrf.mxu1  ;;  %v12340_v22 = vsel %vm1149_vm2, %v12056_v29, -inf }
0x1f41   :  { %12341 = vmax.xlane.f32.xlu1 %v12340_v22  ;;  %v12058_v23 = vpop.f32.mrf.mxu0 }
0x1f42   :  { %v12009_v52 = vpop.f32.mrf.mxu1 }
0x1f43   :  { %v12010_v62 = vadd.f32 %v12009_v52, %v20867_v43  ;;  %v18681_v48 = vpop.f32.mrf.mxu0 }
0x1f44   :  { %v18674_v36 = vpop.f32.mrf.mxu1 }
0x1f45   :  { %v12147_v50 = vpop.f32.mrf.mxu0  ;;  %v12337_v4 = vsel %vm1149_vm2, %v12010_v62, -inf }
0x1f46   :  { %12338 = vmax.xlane.f32.xlu0 %v12337_v4  ;;  %v12012_v24 = vpop.f32.mrf.mxu1  ;;  %v12148_v22 = vadd.f32 %v12147_v50, %v20867_v43 }
0x1f47   :  { %v18692_v19 = vpop.f32.mrf.mxu0 }
0x1f48   :  { %v18675_v6 = vpop.f32.mrf.mxu1  ;;  %v12346_v19 = vsel %vm1149_vm2, %v12148_v22, -inf }
0x1f49   :  { %v12150_v11 = vpop.f32.mrf.mxu0 }
0x1f4a   :  { %v12101_v12 = vpop.f32.mrf.mxu1 }
0x1f4b   :  { %v12102_v45 = vadd.f32 %v12101_v12, %v20867_v43  ;;  %v18693_v8 = vpop.f32.mrf.mxu0 }
0x1f4c   :  { %v18686_v26 = vpop.f32.mrf.mxu1 }
0x1f4d   :  { %v12239_v23 = vpop.f32.mrf.mxu0  ;;  %v12343_v52 = vsel %vm1149_vm2, %v12102_v45, -inf }
0x1f4e   :  { %12344 = vmax.xlane.f32.xlu0 %v12343_v52  ;;  %v12104_v48 = vpop.f32.mrf.mxu1  ;;  %v12240_v4 = vadd.f32 %v12239_v23, %v20867_v43 }
0x1f4f   :  { %v18704_v36 = vpop.f32.mrf.mxu0 }
0x1f50   :  { %v18687_v28 = vpop.f32.mrf.mxu1  ;;  %v12352_v50 = vsel %vm1149_vm2, %v12240_v4, -inf }
0x1f51   :  { %v12242_v24 = vpop.f32.mrf.mxu0 }
0x1f52   :  { %12347 = vmax.xlane.f32.xlu0 %v12346_v19  ;;  %v12193_v11 = vpop.f32.mrf.mxu1 }
0x1f53   :  { %v12194_v6 = vadd.f32 %v12193_v11, %v20867_v43  ;;  %v18705_v12 = vpop.f32.mrf.mxu0 }
0x1f54   :  { %v18698_v26 = vpop.f32.mrf.mxu1 }
0x1f55   :  { %v12331_v8 = vpop.f32.mrf.mxu0  ;;  %v12349_v40 = vsel %vm1149_vm2, %v12194_v6, -inf }
0x1f56   :  { %v23362_v52 = vadd.f32 %v12331_v8, %v20867_v43  ;;  %12353 = vmax.xlane.f32.xlu0 %v12352_v50  ;;  %12350 = vmax.xlane.f32.xlu1 %v12349_v40  ;;  %v12196_v28 = vpop.f32.mrf.mxu1 }
0x1f57   :  { %v18716_v23 = vpop.f32.mrf.mxu0 }
0x1f58   :  { %v18699_v48 = vpop.f32.mrf.mxu1  ;;  %v12358_v36 = vsel %vm1149_vm2, %v23362_v52, -inf }
0x1f59   :  { %v12334_v24 = vpop.f32.mrf.mxu0 }
0x1f5a   :  { %12359 = vmax.xlane.f32.xlu0 %v12358_v36  ;;  %v12285_v19 = vpop.f32.mrf.mxu1 }
0x1f5b   :  { %v12286_v11 = vadd.f32 %v12285_v19, %v20867_v43  ;;  %v18717_v12 = vpop.f32.mrf.mxu0 }
0x1f5c   :  { %v18710_v26 = vpop.f32.mrf.mxu1 }
0x1f5d   :  { %v12355_v17 = vsel %vm1149_vm2, %v12286_v11, -inf }
0x1f5e   :  { %12356 = vmax.xlane.f32.xlu1 %v12355_v17  ;;  %v12288_v8 = vpop.f32.mrf.mxu1 }
0x1f60   :  { %v18711_v55 = vpop.f32.mrf.mxu1 }
0x1f6f   :  { %12433 = vrot.lane.b32.xlu1 %v20984_v51, %s20370_s21 }
0x1fca   :  { %v12342_v40 = vpop.xlane.xlu1 %12341 }
0x1fcb   :  { %v12362_v50 = vsub.f32 %v12056_v29, %v12342_v40 }
0x1fcd   :  { %v12371_v28 = vmul.f32 1.442695, %v12362_v50 }
0x1fcf   :  { %20217 = vpow2.f32 %v12371_v28  ;;  %v12339_v23 = vpop.xlane.xlu0 %12338 }
0x1fd0   :  { %v12361_v48 = vsub.f32 %v12010_v62, %v12339_v23 }
0x1fd2   :  { %v12369_v36 = vmul.f32 1.442695, %v12361_v48 }
0x1fd4   :  { %20219 = vpow2.f32 %v12369_v36 }
0x1fd7   :  { %v12345_v24 = vpop.xlane.xlu0 %12344 }
0x1fd8   :  { %v12363_v19 = vsub.f32 %v12102_v45, %v12345_v24 }
0x1fda   :  { %v12373_v12 = vmul.f32 1.442695, %v12363_v19 }
0x1fdb   :  { %v12348_v26 = vpop.xlane.xlu0 %12347 }
0x1fdc   :  { %v20218_v53 = vpop.eup %20217  ;;  %20221 = vpow2.f32 %v12373_v12  ;;  %v12364_v17 = vsub.f32 %v12148_v22, %v12348_v26 }
0x1fdd   :  { %v12388_v55 = vsel %vm1149_vm2, %v20218_v53, 0.0 }
0x1fde   :  { %v12375_v8 = vmul.f32 1.442695, %v12364_v17  ;;  %12389 = vadd.xlane.f32.xlu0 %v12388_v55 }
0x1fdf   :  { %v12354_v61 = vpop.xlane.xlu0 %12353  ;;  %v12351_v14 = vpop.xlane.xlu1 %12350 }
0x1fe0   :  { %20223 = vpow2.f32 %v12375_v8  ;;  %v12366_v29 = vsub.f32 %v12240_v4, %v12354_v61  ;;  %v12365_v40 = vsub.f32 %v12194_v6, %v12351_v14 }
0x1fe1   :  { %v20220_v50 = vpop.eup %20219 }
0x1fe2   :  { %v12379_v62 = vmul.f32 1.442695, %v12366_v29  ;;  %v12377_v28 = vmul.f32 1.442695, %v12365_v40  ;;  %v12385_v23 = vsel %vm1149_vm2, %v20220_v50, 0.0 }
0x1fe3   :  { %12386 = vadd.xlane.f32.xlu1 %v12385_v23  ;;  %v12360_v24 = vpop.xlane.xlu0 %12359 }
0x1fe4   :  { %20225 = vpow2.f32 %v12379_v62  ;;  %v12368_v19 = vsub.f32 %v23362_v52, %v12360_v24 }
0x1fe5   :  { %20227 = vpow2.f32 %v12377_v28 }
0x1fe6   :  { %v12383_v26 = vmul.f32 1.442695, %v12368_v19 }
0x1fe7   :  { %v12357_v12 = vpop.xlane.xlu1 %12356 }
0x1fe8   :  { %v12367_v17 = vsub.f32 %v12286_v11, %v12357_v12  ;;  %20229 = vpow2.f32 %v12383_v26 }
0x1fe9   :  { %v20222_v45 = vpop.eup %20221 }
0x1fea   :  { %v12391_v22 = vsel %vm1149_vm2, %v20222_v45, 0.0  ;;  %v12381_v55 = vmul.f32 1.442695, %v12367_v17 }
0x1feb   :  { %12392 = vadd.xlane.f32.xlu1 %v12391_v22  ;;  %v12434_v11 = vpop.permute.xlu1 %12433 }
0x1fec   :  { %20231 = vpow2.f32 %v12381_v55 }
0x1fed   :  { %v23373_v48 = vpop.eup %20223 }
0x1fee   :  { %v12394_v36 = vsel %vm1149_vm2, %v23373_v48, 0.0 }
0x1fef   :  { %12395 = vadd.xlane.f32.xlu0 %v12394_v36 }
0x1ff1   :  { %v23377_v61 = vpop.eup %20225 }
0x1ff2   :  { %v23379_v14 = vpop.eup %20227  ;;  %v12400_v4 = vsel %vm1149_vm2, %v23377_v61, 0.0 }
0x1ff3   :  { %12401 = vadd.xlane.f32.xlu0 %v12400_v4  ;;  %v12397_v6 = vsel %vm1149_vm2, %v23379_v14, 0.0 }
0x1ff4   :  { %12398 = vadd.xlane.f32.xlu1 %v12397_v6 }
0x1ff5   :  { %v23392_v8 = vpop.eup %20229 }
0x1ff6   :  { %v12406_v29 = vsel %vm1149_vm2, %v23392_v8, 0.0 }
0x1ff9   :  { %v23396_v40 = vpop.eup %20231 }
0x1ffa   :  { %v12403_v62 = vsel %vm1149_vm2, %v23396_v40, 0.0 }
0x2005   :  { %12529 = vrot.lane.b32.xlu1 %v20996_v27, %s20370_s21 }
0x2009   :  { %12577 = vrot.lane.b32.xlu1 %v21023_v42, %s20370_s21  ;;  %12481 = vrot.lane.b32.xlu0 %v21013_v16, %s20370_s21 }
0x2028   :  { %12407 = vadd.xlane.f32.xlu0 %v12406_v29 }
0x202d   :  { %12404 = vadd.xlane.f32.xlu1 %v12403_v62 }
0x203e   :  { %12673 = vrot.lane.b32.xlu1 %v21053_v3, %s20370_s21  ;;  %12625 = vrot.lane.b32.xlu0 %v21031_v5, %s20370_s21 }
0x2042   :  { %12769 = vrot.lane.b32.xlu1 %v21070_v18, %s20370_s21  ;;  %12721 = vrot.lane.b32.xlu0 %v21041_v20, %s20370_s21 }
0x2067   :  { %v12390_v52 = vpop.xlane.xlu0 %12389 }
0x2068   :  { %20233 = vrcp.f32 %v12390_v52 }
0x206c   :  { %v12387_v28 = vpop.xlane.xlu1 %12386 }
0x206d   :  { %20235 = vrcp.f32 %v12387_v28 }
0x2074   :  { %v12393_v23 = vpop.xlane.xlu1 %12392 }
0x2075   :  { %v20234_v22 = vpop.eup %20233  ;;  %20237 = vrcp.f32 %v12393_v23 }
0x2076   :  { %v12418_v36 = vmul.f32 %v20234_v22, %v20218_v53 }
0x2078   :  { %v12396_v4 = vpop.xlane.xlu0 %12395  ;;  %v12426_v6 = vpack.c.bf16 %v12418_v36, %v12418_v36 }
0x2079   :  { %20239 = vrcp.f32 %v12396_v4 }
0x207a   :  { %v20236_v24 = vpop.eup %20235  ;;  %v12487_v19 = vsel %vm1149_vm2, %v12426_v6, 0 }
0x207b   :  { %18725 = vmatpush3.bf16.xpose.msra.mxu0 %v12487_v19  ;;  %v12417_v12 = vmul.f32 %v20236_v24, %v20220_v50 }
0x207c   :  { %v12402_v26 = vpop.xlane.xlu0 %12401  ;;  %18736 = vmatprep.subr.bf16.mxu0 %v25004_v30 }
0x207d   :  { %20241 = vrcp.f32 %v12402_v26  ;;  %v12399_v17 = vpop.xlane.xlu1 %12398  ;;  %v12425_v55 = vpack.c.bf16 %v12417_v12, %v12417_v12 }
0x207e   :  { %20243 = vrcp.f32 %v12399_v17 }
0x207f   :  { %v12439_v29 = vsel %vm1149_vm2, %v12425_v55, 0 }
0x2080   :  { %18719 = vmatpush3.bf16.xpose.msra.mxu1 %v12439_v29  ;;  %v12482_v62 = vpop.permute.xlu0 %12481 }
0x2081   :  { %18730 = vmatprep.subr.bf16.mxu1 %v25004_v30  ;;  %v12530_v19 = vpop.permute.xlu1 %12529 }
0x2082   :  { %v20238_v53 = vpop.eup %20237  ;;  %18727 = vmatmul.mubr.msk.bf16.vlgmr.msra.gmra.mxu0 %vm1149_vm2, %v12482_v62 }
0x2083   :  { %v12419_v52 = vmul.f32 %v20238_v53, %v20222_v45  ;;  %18738 = vmatprep.mubr.msk.bf16.mxu0 %vm20357_vm1, %v25004_v30 }
0x2085   :  { %v12427_v50 = vpack.c.bf16 %v12419_v52, %v12419_v52  ;;  %v12578_v17 = vpop.permute.xlu1 %12577 }
0x2086   :  { %v20240_v28 = vpop.eup %20239 }
0x2087   :  { %18721 = vmatmul.mubr.msk.bf16.vlgmr.msra.gmra.mxu1 %vm1149_vm2, %v12434_v11  ;;  %v12535_v23 = vsel %vm1149_vm2, %v12427_v50, 0  ;;  %v12420_v22 = vmul.f32 %v20240_v28, %v23373_v48 }
0x2088   :  { %18731 = vmatpush3.bf16.xpose.msra.mxu1 %v12535_v23  ;;  %18732 = vmatprep.mubr.msk.bf16.mxu1 %vm20357_vm1, %v25004_v30 }
0x2089   :  { %v12428_v36 = vpack.c.bf16 %v12420_v22, %v12420_v22  ;;  %18742 = vmatprep.subr.bf16.mxu1 %v25004_v30 }
0x208a   :  { %v20242_v4 = vpop.eup %20241 }
0x208b   :  { %v20244_v45 = vpop.eup %20243  ;;  %v12583_v6 = vsel %vm1149_vm2, %v12428_v36, 0  ;;  %v12422_v24 = vmul.f32 %v20242_v4, %v23377_v61  ;;  %v12911_v4 = vrot.slane %v23223_v41, 4  ;;  %v13011_v41 = vrot.slane %v25189_v44, 4 }
0x208c   :  { %18737 = vmatpush3.bf16.xpose.msra.mxu0 %v12583_v6  ;;  %v12421_v11 = vmul.f32 %v20244_v45, %v23379_v14  ;;  %v13111_v44 = vrot.slane %v23260_v63, 4  ;;  %v12959_v63 = vrot.slane %v25198_v0, 4  ;;  %v13161_v0 = vrot.slane %v23303_v1, 4 }
0x208d   :  { %18748 = vmatprep.subr.bf16.mxu0 %v25004_v30  ;;  %v12430_v12 = vpack.c.bf16 %v12422_v24, %v12422_v24  ;;  %v12861_v24 = vrot.slane %v23232_v46, 4  ;;  %v13016_v46 = vsel %vm1149_vm2, %v13011_v41, 0  ;;  %v13159_v1 = vrot.slane %v23327_v34, 4 }
0x208e   :  { %v12429_v48 = vpack.c.bf16 %v12421_v11, %v12421_v11  ;;  %v12909_v11 = vrot.slane %v23242_v59, 4  ;;  %v12859_v59 = vrot.slane %v23258_v49, 4  ;;  %v13061_v49 = vrot.slane %v23277_v54, 4 }
0x208f   :  { %18733 = vmatmul.mubr.msk.bf16.vlgmr.msra.gmra.mxu1 %vm1149_vm2, %v12530_v19  ;;  %v12679_v61 = vsel %vm1149_vm2, %v12430_v12, 0  ;;  %v12866_v19 = vsel %vm1149_vm2, %v12861_v24, 0 }
0x2090   :  { %v12631_v26 = vsel %vm1149_vm2, %v12429_v48, 0  ;;  %18744 = vmatprep.mubr.msk.bf16.mxu1 %vm20357_vm1, %v25004_v30  ;;  %v12961_v48 = vrot.slane %v25192_v21, 4  ;;  %v13116_v21 = vsel %vm1149_vm2, %v13111_v44, 0 }
0x2091   :  { %18743 = vmatpush3.bf16.xpose.msra.mxu1 %v12631_v26  ;;  %v13009_v26 = vrot.slane %v25195_v58, 4  ;;  %v13211_v58 = vrot.slane %v23284_v25, 4  ;;  %v13059_v25 = vrot.slane %v23310_v2, 4 }
0x2092   :  { %18754 = vmatprep.subr.bf16.mxu1 %v25004_v30  ;;  %v12966_v12 = vsel %vm1149_vm2, %v12961_v48, 0 }
0x2093   :  { %18739 = vmatmul.mubr.msk.bf16.vlgmr.msra.gmra.mxu0 %vm1149_vm2, %v12578_v17  ;;  %v13066_v17 = vsel %vm1149_vm2, %v13061_v49, 0  ;;  %v13216_v54 = vsel %vm1149_vm2, %v13211_v58, 0 }
0x2094   :  { %18749 = vmatpush3.bf16.xpose.msra.mxu0 %v12679_v61  ;;  %18750 = vmatprep.mubr.msk.bf16.mxu0 %vm20357_vm1, %v25004_v30  ;;  %v13109_v61 = vrot.slane %v23292_v10, 4  ;;  %v13166_v10 = vsel %vm1149_vm2, %v13161_v0, 0 }
0x2095   :  { %18760 = vmatprep.subr.bf16.mxu0 %v25004_v30 }
0x20b1   :  { %v12408_v14 = vpop.xlane.xlu0 %12407 }
0x20b2   :  { %20245 = vrcp.f32 %v12408_v14  ;;  %v13209_v14 = vrot.slane %v23316_v38, 4 }
0x20b5   :  { %v12626_v55 = vpop.permute.xlu0 %12625 }
0x20b6   :  { %v12405_v29 = vpop.xlane.xlu1 %12404  ;;  %18745 = vmatmul.mubr.msk.bf16.vlgmr.msra.gmra.mxu1 %vm1149_vm2, %v12626_v55 }
0x20b7   :  { %20247 = vrcp.f32 %v12405_v29  ;;  %18756 = vmatprep.mubr.msk.bf16.mxu1 %vm20357_vm1, %v25004_v30 }
0x20ba   :  { %v12674_v62 = vpop.permute.xlu1 %12673 }
0x20bb   :  { %18751 = vmatmul.mubr.msk.bf16.vlgmr.msra.gmra.mxu0 %vm1149_vm2, %v12674_v62 }
0x20bc   :  { %18762 = vmatprep.mubr.msk.bf16.mxu0 %vm20357_vm1, %v25004_v30 }
0x20be   :  { %v12770_v6 = vpop.permute.xlu1 %12769 }
0x20bf   :  { %v20246_v53 = vpop.eup %20245 }
0x20c0   :  { %v12424_v52 = vmul.f32 %v20246_v53, %v23392_v8  ;;  %v12916_v8 = vsel %vm1149_vm2, %v12911_v4, 0 }
0x20c2   :  { %v12432_v50 = vpack.c.bf16 %v12424_v52, %v12424_v52 }
0x20c4   :  { %v20248_v28 = vpop.eup %20247  ;;  %v12775_v23 = vsel %vm1149_vm2, %v12432_v50, 0 }
0x20c5   :  { %18761 = vmatpush3.bf16.xpose.msra.mxu0 %v12775_v23  ;;  %v12423_v22 = vmul.f32 %v20248_v28, %v23396_v40  ;;  %v12722_v40 = vpop.permute.xlu0 %12721 }
0x20c6   :  { %18772 = vmatprep.subr.bf16.mxu0 %v25004_v30 }
0x20c7   :  { %v12431_v36 = vpack.c.bf16 %v12423_v22, %v12423_v22 }
0x20c9   :  { %v12727_v45 = vsel %vm1149_vm2, %v12431_v36, 0 }
0x20ca   :  { %18755 = vmatpush3.bf16.xpose.msra.mxu1 %v12727_v45 }
0x20cb   :  { %18766 = vmatprep.subr.bf16.mxu1 %v25004_v30 }
0x20cc   :  { %18763 = vmatmul.mubr.msk.bf16.vlgmr.msra.gmra.mxu0 %vm1149_vm2, %v12770_v6 }
0x20cd   :  { %18773 = vmatpush3.bf16.xpose.msra.mxu0 %v12916_v8  ;;  %18774 = vmatprep.mubr.msk.bf16.mxu0 %vm20357_vm1, %v25004_v30 }
0x20ce   :  { %18784 = vmatprep.subr.bf16.mxu0 %v25004_v30 }
0x20d1   :  { %18757 = vmatmul.mubr.msk.bf16.vlgmr.msra.gmra.mxu1 %vm1149_vm2, %v12722_v40 }
0x20d2   :  { %18767 = vmatpush3.bf16.xpose.msra.mxu1 %v12866_v19  ;;  %18768 = vmatprep.mubr.msk.bf16.mxu1 %vm20357_vm1, %v25004_v30 }
0x20d3   :  { %18778 = vmatprep.subr.bf16.mxu1 %v25004_v30 }
0x20d4   :  { %18775 = vmatmul.mubr.msk.bf16.vlgmr.msra.gmra.mxu0 %vm1149_vm2, %v12909_v11 }
0x20d5   :  { %18785 = vmatpush3.bf16.xpose.msra.mxu0 %v13016_v46  ;;  %18786 = vmatprep.mubr.msk.bf16.mxu0 %vm20357_vm1, %v25004_v30 }
0x20d6   :  { %18796 = vmatprep.subr.bf16.mxu0 %v25004_v30 }
0x20d9   :  { %18769 = vmatmul.mubr.msk.bf16.vlgmr.msra.gmra.mxu1 %vm1149_vm2, %v12859_v59 }
0x20da   :  { %18779 = vmatpush3.bf16.xpose.msra.mxu1 %v12966_v12  ;;  %18780 = vmatprep.mubr.msk.bf16.mxu1 %vm20357_vm1, %v25004_v30 }
0x20db   :  { %18790 = vmatprep.subr.bf16.mxu1 %v25004_v30 }
0x20dc   :  { %18787 = vmatmul.mubr.msk.bf16.vlgmr.msra.gmra.mxu0 %vm1149_vm2, %v13009_v26 }
0x20dd   :  { %18797 = vmatpush3.bf16.xpose.msra.mxu0 %v13116_v21  ;;  %18798 = vmatprep.mubr.msk.bf16.mxu0 %vm20357_vm1, %v25004_v30 }
0x20de   :  { %18808 = vmatprep.subr.bf16.mxu0 %v25004_v30 }
0x20e1   :  { %18781 = vmatmul.mubr.msk.bf16.vlgmr.msra.gmra.mxu1 %vm1149_vm2, %v12959_v63 }
0x20e2   :  { %18791 = vmatpush3.bf16.xpose.msra.mxu1 %v13066_v17  ;;  %18792 = vmatprep.mubr.msk.bf16.mxu1 %vm20357_vm1, %v25004_v30 }
0x20e3   :  { %18802 = vmatprep.subr.bf16.mxu1 %v25004_v30 }
0x20e4   :  { %18799 = vmatmul.mubr.msk.bf16.vlgmr.msra.gmra.mxu0 %vm1149_vm2, %v13109_v61 }
0x20e5   :  { %18809 = vmatpush3.bf16.xpose.msra.mxu0 %v13216_v54  ;;  %18810 = vmatprep.mubr.msk.bf16.mxu0 %vm20357_vm1, %v25004_v30 }
0x20e6   :  { %18820 = vmatprep.subr.bf16.mxu0 %v25004_v30 }
0x20e9   :  { %18793 = vmatmul.mubr.msk.bf16.vlgmr.msra.gmra.mxu1 %vm1149_vm2, %v13059_v25 }
0x20ea   :  { %18803 = vmatpush3.bf16.xpose.msra.mxu1 %v13166_v10  ;;  %18804 = vmatprep.mubr.msk.bf16.mxu1 %vm20357_vm1, %v25004_v30 }
0x20eb   :  { %18814 = vmatprep.subr.bf16.mxu1 %v25004_v30 }
0x20ec   :  { %18811 = vmatmul.mubr.msk.bf16.vlgmr.msra.gmra.mxu0 %vm1149_vm2, %v13209_v14 }
0x20ed   :  { %18822 = vmatprep.mubr.msk.bf16.mxu0 %vm20357_vm1, %v25004_v30 }
0x20f1   :  { %18805 = vmatmul.mubr.msk.bf16.vlgmr.msra.gmra.mxu1 %vm1149_vm2, %v13159_v1 }
0x20f2   :  { %18816 = vmatprep.mubr.msk.bf16.mxu1 %vm20357_vm1, %v25004_v30 }
0x2142   :  { %v23509_v2 = vpop.f32.mrf.mxu0 }
0x2143   :  { %25209 = vst [vmem:[#allocation44_spill] sm:$0xff] %v23509_v2 }
0x2144   :  { %v18728_v38 = vpop.f32.mrf.mxu0 }
0x2146   :  { %v12526_v55 = vpop.f32.mrf.mxu0 }
0x2147   :  { %v23511_v29 = vpop.f32.mrf.mxu1 }
0x2148   :  { %25210 = vst [vmem:[#allocation42_spill] sm:$0xff] %v23511_v29  ;;  %v18729_v62 = vpop.f32.mrf.mxu0 }
0x2149   :  { %v18722_v53 = vpop.f32.mrf.mxu1 }
0x214b   :  { %v12478_v52 = vpop.f32.mrf.mxu1 }
0x214d   :  { %v18723_v50 = vpop.f32.mrf.mxu1 }
0x214f   :  { %v23513_v28 = vpop.f32.mrf.mxu1 }
0x2150   :  { %25211 = vst [vmem:[#allocation25_spill] sm:$0xff] %v23513_v28 }
0x2151   :  { %v18734_v23 = vpop.f32.mrf.mxu1 }
0x2153   :  { %v12574_v22 = vpop.f32.mrf.mxu1  ;;  %v23515_v34 = vpop.f32.mrf.mxu0 }
0x2154   :  { %25212 = vst [vmem:[#allocation71_spill] sm:$0xff] %v23515_v34 }
0x2155   :  { %v18735_v36 = vpop.f32.mrf.mxu1  ;;  %v18740_v4 = vpop.f32.mrf.mxu0 }
0x2157   :  { %v12622_v45 = vpop.f32.mrf.mxu0 }
0x2159   :  { %v18741_v6 = vpop.f32.mrf.mxu0 }
0x2176   :  { %v23517_v8 = vpop.f32.mrf.mxu1 }
0x2177   :  { %25213 = vst [vmem:[#allocation69_spill] sm:$0xff] %v23517_v8 }
0x2178   :  { %v18746_v24 = vpop.f32.mrf.mxu1 }
0x217a   :  { %v12670_v40 = vpop.f32.mrf.mxu1 }
0x217b   :  { %v23519_v41 = vpop.f32.mrf.mxu0 }
0x217c   :  { %25214 = vst [vmem:[#allocation21_spill] sm:$0xff] %v23519_v41  ;;  %v18747_v19 = vpop.f32.mrf.mxu1 }
0x217d   :  { %v18752_v11 = vpop.f32.mrf.mxu0 }
0x217f   :  { %v12718_v46 = vpop.f32.mrf.mxu0 }
0x2181   :  { %v18753_v48 = vpop.f32.mrf.mxu0 }
0x218c   :  { %v23521_v59 = vpop.f32.mrf.mxu0 }
0x218d   :  { %25215 = vst [vmem:[#allocation68_spill] sm:$0xff] %v23521_v59 }
0x218e   :  { %v18764_v44 = vpop.f32.mrf.mxu0 }
0x2190   :  { %v12814_v12 = vpop.f32.mrf.mxu0 }
0x2191   :  { %v23523_v26 = vpop.f32.mrf.mxu1 }
0x2192   :  { %25216 = vst [vmem:[#allocation66_spill] sm:$0xff] %v23523_v26  ;;  %v18765_v21 = vpop.f32.mrf.mxu0 }
0x2193   :  { %v18758_v49 = vpop.f32.mrf.mxu1 }
0x2194   :  { %v12952_v63 = vpop.f32.mrf.mxu0 }
0x2195   :  { %v12766_v58 = vpop.f32.mrf.mxu1  ;;  %v12953_v17 = vadd.f32 %v12952_v63, %v20867_v43 }
0x2196   :  { %v18776_v61 = vpop.f32.mrf.mxu0 }
0x2197   :  { %v18759_v54 = vpop.f32.mrf.mxu1  ;;  %v13261_v0 = vsel %vm1149_vm2, %v12953_v17, -inf }
0x2198   :  { %13262 = vmax.xlane.f32.xlu1 %v13261_v0  ;;  %v12955_v25 = vpop.f32.mrf.mxu0 }
0x2199   :  { %v12902_v10 = vpop.f32.mrf.mxu1 }
0x219a   :  { %v12903_v14 = vadd.f32 %v12902_v10, %v20867_v43  ;;  %v18777_v1 = vpop.f32.mrf.mxu0 }
0x219b   :  { %v18770_v38 = vpop.f32.mrf.mxu1 }
0x219c   :  { %v13052_v55 = vpop.f32.mrf.mxu0  ;;  %v13258_v62 = vsel %vm1149_vm2, %v12903_v14, -inf }
0x219d   :  { %13259 = vmax.xlane.f32.xlu0 %v13258_v62  ;;  %v12905_v53 = vpop.f32.mrf.mxu1  ;;  %v13053_v6 = vadd.f32 %v13052_v55, %v20867_v43 }
0x219e   :  { %v18788_v52 = vpop.f32.mrf.mxu0 }
0x219f   :  { %v18771_v50 = vpop.f32.mrf.mxu1  ;;  %v13267_v12 = vsel %vm1149_vm2, %v13053_v6, -inf }
0x21a0   :  { %v13055_v23 = vpop.f32.mrf.mxu0 }
0x21a1   :  { %v13002_v22 = vpop.f32.mrf.mxu1 }
0x21a2   :  { %v13003_v36 = vadd.f32 %v13002_v22, %v20867_v43  ;;  %v18789_v4 = vpop.f32.mrf.mxu0 }
0x21a3   :  { %v18782_v45 = vpop.f32.mrf.mxu1 }
0x21a4   :  { %v13152_v24 = vpop.f32.mrf.mxu0  ;;  %v13264_v40 = vsel %vm1149_vm2, %v13003_v36, -inf }
0x21a5   :  { %13265 = vmax.xlane.f32.xlu0 %v13264_v40  ;;  %v13005_v19 = vpop.f32.mrf.mxu1  ;;  %v13153_v48 = vadd.f32 %v13152_v24, %v20867_v43 }
0x21a6   :  { %v18800_v11 = vpop.f32.mrf.mxu0 }
0x21a7   :  { %v18783_v46 = vpop.f32.mrf.mxu1  ;;  %v13273_v54 = vsel %vm1149_vm2, %v13153_v48, -inf }
0x21a8   :  { %v13155_v44 = vpop.f32.mrf.mxu0 }
0x21a9   :  { %13268 = vmax.xlane.f32.xlu0 %v13267_v12  ;;  %v13102_v21 = vpop.f32.mrf.mxu1 }
0x21aa   :  { %v13103_v49 = vadd.f32 %v13102_v21, %v20867_v43  ;;  %v18801_v63 = vpop.f32.mrf.mxu0 }
0x21ab   :  { %v18794_v58 = vpop.f32.mrf.mxu1 }
0x21ac   :  { %v13252_v61 = vpop.f32.mrf.mxu0  ;;  %v13270_v0 = vsel %vm1149_vm2, %v13103_v49, -inf }
0x21ad   :  { %v23538_v25 = vadd.f32 %v13252_v61, %v20867_v43  ;;  %13274 = vmax.xlane.f32.xlu0 %v13273_v54  ;;  %13271 = vmax.xlane.f32.xlu1 %v13270_v0  ;;  %v13105_v10 = vpop.f32.mrf.mxu1 }
0x21ae   :  { %v18812_v1 = vpop.f32.mrf.mxu0 }
0x21af   :  { %v18795_v38 = vpop.f32.mrf.mxu1  ;;  %v13279_v55 = vsel %vm1149_vm2, %v23538_v25, -inf }
0x21b0   :  { %v13255_v62 = vpop.f32.mrf.mxu0 }
0x21b1   :  { %13280 = vmax.xlane.f32.xlu0 %v13279_v55  ;;  %v13202_v53 = vpop.f32.mrf.mxu1 }
0x21b2   :  { %v13203_v52 = vadd.f32 %v13202_v53, %v20867_v43  ;;  %v18813_v50 = vpop.f32.mrf.mxu0 }
0x21b3   :  { %v18806_v23 = vpop.f32.mrf.mxu1 }
0x21b4   :  { %v13276_v22 = vsel %vm1149_vm2, %v13203_v52, -inf }
0x21b5   :  { %13277 = vmax.xlane.f32.xlu1 %v13276_v22  ;;  %v13205_v4 = vpop.f32.mrf.mxu1 }
0x21b7   :  { %v18807_v45 = vpop.f32.mrf.mxu1 }
0x21c6   :  { %13354 = vrot.lane.b32.xlu1 %v20984_v51, %s20371_s22 }
0x2221   :  { %v13263_v24 = vpop.xlane.xlu1 %13262 }
0x2222   :  { %v13283_v40 = vsub.f32 %v12953_v17, %v13263_v24 }
0x2224   :  { %v13292_v19 = vmul.f32 1.442695, %v13283_v40 }
0x2226   :  { %20249 = vpow2.f32 %v13292_v19  ;;  %v13260_v11 = vpop.xlane.xlu0 %13259 }
0x2227   :  { %v13282_v46 = vsub.f32 %v12903_v14, %v13260_v11 }
0x2229   :  { %v13290_v44 = vmul.f32 1.442695, %v13282_v46 }
0x222b   :  { %20251 = vpow2.f32 %v13290_v44 }
0x222e   :  { %v13266_v12 = vpop.xlane.xlu0 %13265 }
0x222f   :  { %v13284_v21 = vsub.f32 %v13003_v36, %v13266_v12 }
0x2231   :  { %v13294_v63 = vmul.f32 1.442695, %v13284_v21 }
0x2232   :  { %v13269_v58 = vpop.xlane.xlu0 %13268 }
0x2233   :  { %v20250_v61 = vpop.eup %20249  ;;  %20253 = vpow2.f32 %v13294_v63  ;;  %v13285_v54 = vsub.f32 %v13053_v6, %v13269_v58 }
0x2234   :  { %v13309_v0 = vsel %vm1149_vm2, %v20250_v61, 0.0 }
0x2235   :  { %v13296_v10 = vmul.f32 1.442695, %v13285_v54  ;;  %13310 = vadd.xlane.f32.xlu0 %v13309_v0 }
0x2236   :  { %v13275_v1 = vpop.xlane.xlu0 %13274  ;;  %v13272_v38 = vpop.xlane.xlu1 %13271 }
0x2237   :  { %20255 = vpow2.f32 %v13296_v10  ;;  %v13287_v17 = vsub.f32 %v13153_v48, %v13275_v1  ;;  %v13286_v55 = vsub.f32 %v13103_v49, %v13272_v38 }
0x2238   :  { %v20252_v62 = vpop.eup %20251 }
0x2239   :  { %v13300_v14 = vmul.f32 1.442695, %v13287_v17  ;;  %v13298_v53 = vmul.f32 1.442695, %v13286_v55  ;;  %v13306_v50 = vsel %vm1149_vm2, %v20252_v62, 0.0 }
0x223a   :  { %13307 = vadd.xlane.f32.xlu1 %v13306_v50  ;;  %v13281_v24 = vpop.xlane.xlu0 %13280 }
0x223b   :  { %20257 = vpow2.f32 %v13300_v14  ;;  %v13289_v40 = vsub.f32 %v23538_v25, %v13281_v24 }
0x223c   :  { %20259 = vpow2.f32 %v13298_v53 }
0x223d   :  { %v13304_v11 = vmul.f32 1.442695, %v13289_v40 }
0x223e   :  { %v13278_v19 = vpop.xlane.xlu1 %13277 }
0x223f   :  { %v13288_v46 = vsub.f32 %v13203_v52, %v13278_v19  ;;  %20261 = vpow2.f32 %v13304_v11 }
0x2240   :  { %v20254_v36 = vpop.eup %20253 }
0x2241   :  { %v13312_v6 = vsel %vm1149_vm2, %v20254_v36, 0.0  ;;  %v13302_v44 = vmul.f32 1.442695, %v13288_v46 }
0x2242   :  { %13313 = vadd.xlane.f32.xlu1 %v13312_v6  ;;  %v13355_v52 = vpop.permute.xlu1 %13354 }
0x2243   :  { %20263 = vpow2.f32 %v13302_v44 }
0x2244   :  { %v23549_v23 = vpop.eup %20255 }
0x2245   :  { %v13315_v22 = vsel %vm1149_vm2, %v23549_v23, 0.0 }
0x2246   :  { %13316 = vadd.xlane.f32.xlu0 %v13315_v22 }
0x2248   :  { %v23553_v48 = vpop.eup %20257 }
0x2249   :  { %v23555_v49 = vpop.eup %20259  ;;  %v13321_v4 = vsel %vm1149_vm2, %v23553_v48, 0.0 }
0x224a   :  { %13322 = vadd.xlane.f32.xlu0 %v13321_v4  ;;  %v13318_v45 = vsel %vm1149_vm2, %v23555_v49, 0.0 }
0x224b   :  { %13319 = vadd.xlane.f32.xlu1 %v13318_v45 }
0x224c   :  { %v23568_v12 = vpop.eup %20261 }
0x224d   :  { %v13327_v21 = vsel %vm1149_vm2, %v23568_v12, 0.0 }
0x2250   :  { %v23572_v63 = vpop.eup %20263 }
0x2251   :  { %v13324_v58 = vsel %vm1149_vm2, %v23572_v63, 0.0 }
0x225c   :  { %13450 = vrot.lane.b32.xlu1 %v20996_v27, %s20371_s22 }
0x2260   :  { %13498 = vrot.lane.b32.xlu1 %v21023_v42, %s20371_s22  ;;  %13402 = vrot.lane.b32.xlu0 %v21013_v16, %s20371_s22 }
0x227f   :  { %13328 = vadd.xlane.f32.xlu0 %v13327_v21 }
0x2284   :  { %13325 = vadd.xlane.f32.xlu1 %v13324_v58 }
0x2295   :  { %13594 = vrot.lane.b32.xlu1 %v21053_v3, %s20371_s22  ;;  %13546 = vrot.lane.b32.xlu0 %v21031_v5, %s20371_s22 }
0x2299   :  { %13690 = vrot.lane.b32.xlu1 %v21070_v18, %s20371_s22  ;;  %13642 = vrot.lane.b32.xlu0 %v21041_v20, %s20371_s22 }
0x22be   :  { %v13311_v25 = vpop.xlane.xlu0 %13310 }
0x22bf   :  { %20265 = vrcp.f32 %v13311_v25 }
0x22c3   :  { %v13308_v54 = vpop.xlane.xlu1 %13307 }
0x22c4   :  { %20267 = vrcp.f32 %v13308_v54 }
0x22cb   :  { %v13314_v0 = vpop.xlane.xlu1 %13313 }
0x22cc   :  { %v20266_v10 = vpop.eup %20265  ;;  %20269 = vrcp.f32 %v13314_v0 }
0x22cd   :  { %v13339_v1 = vmul.f32 %v20266_v10, %v20250_v61 }
0x22cf   :  { %v13317_v38 = vpop.xlane.xlu0 %13316  ;;  %v13347_v17 = vpack.c.bf16 %v13339_v1, %v13339_v1 }
0x22d0   :  { %20271 = vrcp.f32 %v13317_v38 }
0x22d1   :  { %v20268_v55 = vpop.eup %20267  ;;  %v13408_v14 = vsel %vm1149_vm2, %v13347_v17, 0 }
0x22d2   :  { %18821 = vmatpush3.bf16.xpose.msra.mxu0 %v13408_v14  ;;  %v13338_v53 = vmul.f32 %v20268_v55, %v20252_v62 }
0x22d3   :  { %v13323_v50 = vpop.xlane.xlu0 %13322  ;;  %18832 = vmatprep.subr.bf16.mxu0 %v25004_v30 }
0x22d4   :  { %20273 = vrcp.f32 %v13323_v50  ;;  %v13320_v6 = vpop.xlane.xlu1 %13319  ;;  %v13346_v22 = vpack.c.bf16 %v13338_v53, %v13338_v53 }
0x22d5   :  { %20275 = vrcp.f32 %v13320_v6 }
0x22d6   :  { %v13360_v4 = vsel %vm1149_vm2, %v13346_v22, 0  ;;  %v25217_v22 = vld [vmem:[#allocation50_spill] sm:$0xff] }
0x22d7   :  { %18815 = vmatpush3.bf16.xpose.msra.mxu1 %v13360_v4  ;;  %v13403_v45 = vpop.permute.xlu0 %13402  ;;  %v19455_v4 = vunpack.i.l.bf16 %v25217_v22 }
0x22d8   :  { %18826 = vmatprep.subr.bf16.mxu1 %v25004_v30  ;;  %v13451_v25 = vpop.permute.xlu1 %13450 }
0x22d9   :  { %v20270_v61 = vpop.eup %20269  ;;  %18823 = vmatmul.mubr.msk.bf16.vlgmr.msra.gmra.mxu0 %vm1149_vm2, %v13403_v45  ;;  %v25218_v45 = vld [vmem:[#allocation49_spill] sm:$0xff] }
0x22da   :  { %v13340_v24 = vmul.f32 %v20270_v61, %v20254_v36  ;;  %18834 = vmatprep.mubr.msk.bf16.mxu0 %vm20357_vm1, %v25004_v30  ;;  %v19450_v61 = vunpack.i.l.bf16 %v25218_v45 }
0x22dc   :  { %v13348_v62 = vpack.c.bf16 %v13340_v24, %v13340_v24  ;;  %v13499_v10 = vpop.permute.xlu1 %13498 }
0x22dd   :  { %v20272_v40 = vpop.eup %20271 }
0x22de   :  { %18817 = vmatmul.mubr.msk.bf16.vlgmr.msra.gmra.mxu1 %vm1149_vm2, %v13355_v52  ;;  %v13456_v19 = vsel %vm1149_vm2, %v13348_v62, 0  ;;  %v13341_v11 = vmul.f32 %v20272_v40, %v23549_v23  ;;  %v23623_v40 = vpack.c.bf16 %v19455_v4, %v19450_v61  ;;  %v25226_v4 = vld [vmem:[#allocation73_spill] sm:$0xff] }
0x22df   :  { %18827 = vmatpush3.bf16.xpose.msra.mxu1 %v13456_v19  ;;  %18828 = vmatprep.mubr.msk.bf16.mxu1 %vm20357_vm1, %v25004_v30 }
0x22e0   :  { %v13349_v46 = vpack.c.bf16 %v13341_v11, %v13341_v11  ;;  %18838 = vmatprep.subr.bf16.mxu1 %v25004_v30  ;;  %v25219_v11 = vld [vmem:[#allocation48_spill] sm:$0xff] }
0x22e1   :  { %v20274_v44 = vpop.eup %20273 }
0x22e2   :  { %v20276_v36 = vpop.eup %20275  ;;  %v13504_v21 = vsel %vm1149_vm2, %v13349_v46, 0  ;;  %v13343_v58 = vmul.f32 %v20274_v44, %v23553_v48  ;;  %v25220_v44 = vld [vmem:[#allocation46_spill] sm:$0xff] }
0x22e3   :  { %18833 = vmatpush3.bf16.xpose.msra.mxu0 %v13504_v21  ;;  %v13342_v52 = vmul.f32 %v20276_v36, %v23555_v49  ;;  %v19286_v36 = vunpack.i.l.bf16 %v25220_v44  ;;  %v25221_v21 = vld [vmem:[#allocation26_spill] sm:$0xff]  ;;  %v19289_v61 = vunpack.i.h.bf16 %v25220_v44  ;;  %v25227_v44 = vld [vmem:[#allocation72_spill] sm:$0xff] }
0x22e4   :  { %18844 = vmatprep.subr.bf16.mxu0 %v25004_v30  ;;  %v13351_v54 = vpack.c.bf16 %v13343_v58, %v13343_v58  ;;  %v19373_v58 = vunpack.i.l.bf16 %v25221_v21 }
0x22e5   :  { %v13350_v23 = vpack.c.bf16 %v13342_v52, %v13342_v52 }
0x22e6   :  { %18829 = vmatmul.mubr.msk.bf16.vlgmr.msra.gmra.mxu1 %vm1149_vm2, %v13451_v25  ;;  %v13600_v48 = vsel %vm1149_vm2, %v13351_v54, 0  ;;  %v25222_v25 = vld [vmem:[#allocation24_spill] sm:$0xff]  ;;  %v19453_v54 = vunpack.i.h.bf16 %v25218_v45  ;;  %v19696_v45 = vunpack.i.l.bf16 %v25226_v4 }
0x22e7   :  { %v13552_v0 = vsel %vm1149_vm2, %v13350_v23, 0  ;;  %18840 = vmatprep.mubr.msk.bf16.mxu1 %vm20357_vm1, %v25004_v30  ;;  %v19368_v52 = vunpack.i.l.bf16 %v25222_v25 }
0x22e8   :  { %18839 = vmatpush3.bf16.xpose.msra.mxu1 %v13552_v0  ;;  %v19458_v0 = vunpack.i.h.bf16 %v25217_v22 }
0x22e9   :  { %18850 = vmatprep.subr.bf16.mxu1 %v25004_v30 }
0x22ea   :  { %18835 = vmatmul.mubr.msk.bf16.vlgmr.msra.gmra.mxu0 %vm1149_vm2, %v13499_v10 }
0x22eb   :  { %18845 = vmatpush3.bf16.xpose.msra.mxu0 %v13600_v48  ;;  %18846 = vmatprep.mubr.msk.bf16.mxu0 %vm20357_vm1, %v25004_v30  ;;  %v23641_v48 = vpack.c.bf16 %v19373_v58, %v19368_v52  ;;  %v25228_v58 = vld [vmem:[#allocation70_spill] sm:$0xff] }
0x22ec   :  { %18856 = vmatprep.subr.bf16.mxu0 %v25004_v30 }
0x2308   :  { %v13329_v49 = vpop.xlane.xlu0 %13328 }
0x2309   :  { %20277 = vrcp.f32 %v13329_v49 }
0x230c   :  { %v13547_v1 = vpop.permute.xlu0 %13546 }
0x230d   :  { %v13326_v38 = vpop.xlane.xlu1 %13325  ;;  %18841 = vmatmul.mubr.msk.bf16.vlgmr.msra.gmra.mxu1 %vm1149_vm2, %v13547_v1  ;;  %v25223_v1 = vld [vmem:[#allocation23_spill] sm:$0xff] }
0x230e   :  { %20279 = vrcp.f32 %v13326_v38  ;;  %18852 = vmatprep.mubr.msk.bf16.mxu1 %vm20357_vm1, %v25004_v30  ;;  %v19209_v38 = vunpack.i.l.bf16 %v25223_v1 }
0x2310   :  { %v13643_v10 = vpop.permute.xlu0 %13642 }
0x2311   :  { %v13595_v17 = vpop.permute.xlu1 %13594 }
0x2312   :  { %18847 = vmatmul.mubr.msk.bf16.vlgmr.msra.gmra.mxu0 %vm1149_vm2, %v13595_v17  ;;  %v23647_v17 = vpack.c.bf16 %v19458_v0, %v19453_v54  ;;  %v25229_v54 = vld [vmem:[#allocation97_spill] sm:$0xff] }
0x2313   :  { %18858 = vmatprep.mubr.msk.bf16.mxu0 %vm20357_vm1, %v25004_v30  ;;  %v19622_v0 = vunpack.i.h.bf16 %v25229_v54 }
0x2315   :  { %v13691_v46 = vpop.permute.xlu1 %13690 }
0x2316   :  { %v20278_v55 = vpop.eup %20277 }
0x2317   :  { %v13345_v14 = vmul.f32 %v20278_v55, %v23568_v12  ;;  %v19291_v12 = vunpack.i.l.bf16 %v25219_v11  ;;  %v19294_v55 = vunpack.i.h.bf16 %v25219_v11 }
0x2319   :  { %v13353_v53 = vpack.c.bf16 %v13345_v14, %v13345_v14  ;;  %v23634_v23 = vpack.c.bf16 %v19291_v12, %v19286_v36  ;;  %v25224_v14 = vld [vmem:[#allocation20_spill] sm:$0xff]  ;;  %v23668_v11 = vpack.c.bf16 %v19294_v55, %v19289_v61  ;;  %v19537_v36 = vunpack.i.l.bf16 %v25227_v44 }
0x231b   :  { %v20280_v50 = vpop.eup %20279  ;;  %v13696_v6 = vsel %vm1149_vm2, %v13353_v53, 0  ;;  %v13783_v49 = vsel %vm1149_vm2, %v23634_v23, 0  ;;  %v19204_v53 = vunpack.i.l.bf16 %v25224_v14 }
0x231c   :  { %18857 = vmatpush3.bf16.xpose.msra.mxu0 %v13696_v6  ;;  %v13344_v24 = vmul.f32 %v20280_v50, %v23572_v63  ;;  %v13829_v63 = vsel %vm1149_vm2, %v23623_v40, 0  ;;  %v13921_v50 = vsel %vm1149_vm2, %v23641_v48, 0  ;;  %v25225_v6 = vld [vmem:[#allocation74_spill] sm:$0xff] }
0x231d   :  { %18868 = vmatprep.subr.bf16.mxu0 %v25004_v30  ;;  %v19701_v22 = vunpack.i.l.bf16 %v25225_v6 }
0x231e   :  { %v13352_v62 = vpack.c.bf16 %v13344_v24, %v13344_v24  ;;  %v23661_v24 = vpack.c.bf16 %v19209_v38, %v19204_v53  ;;  %v19207_v38 = vunpack.i.h.bf16 %v25224_v14  ;;  %v19704_v53 = vunpack.i.h.bf16 %v25225_v6 }
0x231f   :  { %v23670_v12 = vpack.c.bf16 %v19701_v22, %v19696_v45  ;;  %v19619_v45 = vunpack.i.l.bf16 %v25229_v54  ;;  %v19540_v6 = vunpack.i.h.bf16 %v25227_v44 }
0x2320   :  { %v13648_v19 = vsel %vm1149_vm2, %v13352_v62, 0  ;;  %v19371_v62 = vunpack.i.h.bf16 %v25222_v25  ;;  %v19532_v25 = vunpack.i.l.bf16 %v25228_v58 }
0x2321   :  { %18851 = vmatpush3.bf16.xpose.msra.mxu1 %v13648_v19  ;;  %v19376_v19 = vunpack.i.h.bf16 %v25221_v21  ;;  %v19212_v21 = vunpack.i.h.bf16 %v25223_v1  ;;  %v14013_v52 = vsel %vm1149_vm2, %v23670_v12, 0  ;;  %v19699_v1 = vunpack.i.h.bf16 %v25226_v4 }
0x2322   :  { %18862 = vmatprep.subr.bf16.mxu1 %v25004_v30  ;;  %v23691_v55 = vpack.c.bf16 %v19537_v36, %v19532_v25  ;;  %v25231_v36 = vld [vmem:[#allocation98_spill] sm:$0xff]  ;;  %v25232_v25 = vld [vmem:[#allocation99_spill] sm:$0xff] }
0x2323   :  { %18859 = vmatmul.mubr.msk.bf16.vlgmr.msra.gmra.mxu0 %vm1149_vm2, %v13691_v46  ;;  %v13875_v46 = vsel %vm1149_vm2, %v23661_v24, 0  ;;  %v19786_v44 = vunpack.i.h.bf16 %v25232_v25 }
0x2324   :  { %18869 = vmatpush3.bf16.xpose.msra.mxu0 %v13829_v63  ;;  %18870 = vmatprep.mubr.msk.bf16.mxu0 %vm20357_vm1, %v25004_v30  ;;  %v23677_v63 = vpack.c.bf16 %v19376_v19, %v19371_v62  ;;  %v13967_v14 = vsel %vm1149_vm2, %v23691_v55, 0  ;;  %v23708_v62 = vpack.c.bf16 %v19704_v53, %v19699_v1  ;;  %v19535_v19 = vunpack.i.h.bf16 %v25228_v58 }
0x2325   :  { %18880 = vmatprep.subr.bf16.mxu0 %v25004_v30 }
0x2328   :  { %18853 = vmatmul.mubr.msk.bf16.vlgmr.msra.gmra.mxu1 %vm1149_vm2, %v13643_v10  ;;  %v25230_v10 = vld [vmem:[#allocation95_spill] sm:$0xff] }
0x2329   :  { %18863 = vmatpush3.bf16.xpose.msra.mxu1 %v13783_v49  ;;  %18864 = vmatprep.mubr.msk.bf16.mxu1 %vm20357_vm1, %v25004_v30  ;;  %v19617_v49 = vunpack.i.h.bf16 %v25230_v10  ;;  %v19614_v61 = vunpack.i.l.bf16 %v25230_v10  ;;  %v19783_v10 = vunpack.i.l.bf16 %v25232_v25 }
0x232a   :  { %18874 = vmatprep.subr.bf16.mxu1 %v25004_v30 }
0x232b   :  { %18871 = vmatmul.mubr.msk.bf16.vlgmr.msra.gmra.mxu0 %vm1149_vm2, %v23647_v17  ;;  %v23700_v22 = vpack.c.bf16 %v19622_v0, %v19617_v49  ;;  %v19778_v0 = vunpack.i.l.bf16 %v25231_v36 }
0x232c   :  { %18881 = vmatpush3.bf16.xpose.msra.mxu0 %v13921_v50  ;;  %18882 = vmatprep.mubr.msk.bf16.mxu0 %vm20357_vm1, %v25004_v30  ;;  %v23698_v50 = vpack.c.bf16 %v19212_v21, %v19207_v38  ;;  %v19781_v21 = vunpack.i.h.bf16 %v25231_v36 }
0x232d   :  { %18892 = vmatprep.subr.bf16.mxu0 %v25004_v30  ;;  %v14105_v4 = vsel %vm1149_vm2, %v23700_v22, 0  ;;  %v23743_v49 = vpack.c.bf16 %v19783_v10, %v19778_v0 }
0x232e   :  { %v23732_v54 = vpack.c.bf16 %v19786_v44, %v19781_v21 }
0x2330   :  { %18865 = vmatmul.mubr.msk.bf16.vlgmr.msra.gmra.mxu1 %vm1149_vm2, %v23668_v11 }
0x2331   :  { %18875 = vmatpush3.bf16.xpose.msra.mxu1 %v13875_v46  ;;  %18876 = vmatprep.mubr.msk.bf16.mxu1 %vm20357_vm1, %v25004_v30  ;;  %v23719_v46 = vpack.c.bf16 %v19619_v45, %v19614_v61 }
0x2332   :  { %18886 = vmatprep.subr.bf16.mxu1 %v25004_v30 }
0x2333   :  { %18883 = vmatmul.mubr.msk.bf16.vlgmr.msra.gmra.mxu0 %vm1149_vm2, %v23677_v63  ;;  %v14059_v58 = vsel %vm1149_vm2, %v23719_v46, 0 }
0x2334   :  { %18893 = vmatpush3.bf16.xpose.msra.mxu0 %v14013_v52  ;;  %18894 = vmatprep.mubr.msk.bf16.mxu0 %vm20357_vm1, %v25004_v30  ;;  %v23726_v52 = vpack.c.bf16 %v19540_v6, %v19535_v19 }
0x2335   :  { %18904 = vmatprep.subr.bf16.mxu0 %v25004_v30 }
0x2338   :  { %18877 = vmatmul.mubr.msk.bf16.vlgmr.msra.gmra.mxu1 %vm1149_vm2, %v23698_v50 }
0x2339   :  { %18887 = vmatpush3.bf16.xpose.msra.mxu1 %v13967_v14  ;;  %18888 = vmatprep.mubr.msk.bf16.mxu1 %vm20357_vm1, %v25004_v30 }
0x233a   :  { %18898 = vmatprep.subr.bf16.mxu1 %v25004_v30 }
0x233b   :  { %18895 = vmatmul.mubr.msk.bf16.vlgmr.msra.gmra.mxu0 %vm1149_vm2, %v23708_v62 }
0x233c   :  { %18905 = vmatpush3.bf16.xpose.msra.mxu0 %v14105_v4  ;;  %18906 = vmatprep.mubr.msk.bf16.mxu0 %vm20357_vm1, %v25004_v30 }
0x233d   :  { %18916 = vmatprep.subr.bf16.mxu0 %v25004_v30 }
0x2340   :  { %18889 = vmatmul.mubr.msk.bf16.vlgmr.msra.gmra.mxu1 %vm1149_vm2, %v23726_v52 }
0x2341   :  { %18899 = vmatpush3.bf16.xpose.msra.mxu1 %v14059_v58  ;;  %18900 = vmatprep.mubr.msk.bf16.mxu1 %vm20357_vm1, %v25004_v30 }
0x2342   :  { %18910 = vmatprep.subr.bf16.mxu1 %v25004_v30 }
0x2343   :  { %18907 = vmatmul.mubr.msk.bf16.vlgmr.msra.gmra.mxu0 %vm1149_vm2, %v23732_v54 }
0x2344   :  { %18918 = vmatprep.mubr.msk.bf16.mxu0 %vm20357_vm1, %v25004_v30 }
0x2348   :  { %18901 = vmatmul.mubr.msk.bf16.vlgmr.msra.gmra.mxu1 %vm1149_vm2, %v23743_v49 }
0x2349   :  { %18912 = vmatprep.mubr.msk.bf16.mxu1 %vm20357_vm1, %v25004_v30 }
0x2399   :  { %v23749_v38 = vpop.f32.mrf.mxu0 }
0x239a   :  { %25233 = vst [vmem:[#allocation22_spill] sm:$0xff] %v23749_v38 }
0x239b   :  { %v18824_v1 = vpop.f32.mrf.mxu0 }
0x239d   :  { %v13447_v53 = vpop.f32.mrf.mxu0 }
0x239e   :  { %v23751_v14 = vpop.f32.mrf.mxu1 }
0x239f   :  { %25234 = vst [vmem:[#allocation93_spill] sm:$0xff] %v23751_v14  ;;  %v18825_v45 = vpop.f32.mrf.mxu0 }
0x23a0   :  { %v18818_v61 = vpop.f32.mrf.mxu1 }
0x23a2   :  { %v13399_v6 = vpop.f32.mrf.mxu1 }
0x23a4   :  { %v18819_v4 = vpop.f32.mrf.mxu1 }
0x23a6   :  { %v23753_v19 = vpop.f32.mrf.mxu1 }
0x23a7   :  { %25235 = vst [vmem:[#allocation91_spill] sm:$0xff] %v23753_v19 }
0x23a8   :  { %v18830_v36 = vpop.f32.mrf.mxu1 }
0x23aa   :  { %v13495_v21 = vpop.f32.mrf.mxu1  ;;  %v23755_v25 = vpop.f32.mrf.mxu0 }
0x23ab   :  { %25236 = vst [vmem:[#allocation18_spill] sm:$0xff] %v23755_v25 }
0x23ac   :  { %v18831_v44 = vpop.f32.mrf.mxu1  ;;  %v18836_v58 = vpop.f32.mrf.mxu0 }
0x23ae   :  { %v13543_v0 = vpop.f32.mrf.mxu0 }
0x23b0   :  { %v18837_v10 = vpop.f32.mrf.mxu0 }
0x23cd   :  { %v23757_v29 = vpop.f32.mrf.mxu1 }
0x23ce   :  { %25237 = vst [vmem:[#allocation94_spill] sm:$0xff] %v23757_v29 }
0x23cf   :  { %v18842_v1 = vpop.f32.mrf.mxu1 }
0x23d1   :  { %v13591_v53 = vpop.f32.mrf.mxu1 }
0x23d2   :  { %v23759_v38 = vpop.f32.mrf.mxu0 }
0x23d3   :  { %25238 = vst [vmem:[#allocation96_spill] sm:$0xff] %v23759_v38  ;;  %v18843_v45 = vpop.f32.mrf.mxu1 }
0x23d4   :  { %v18848_v61 = vpop.f32.mrf.mxu0 }
0x23d6   :  { %v13639_v6 = vpop.f32.mrf.mxu0 }
0x23d8   :  { %v18849_v4 = vpop.f32.mrf.mxu0 }
0x23e3   :  { %v23761_v14 = vpop.f32.mrf.mxu0 }
0x23e4   :  { %25239 = vst [vmem:[#allocation50_spill] sm:$0xff] %v23761_v14 }
0x23e5   :  { %v18860_v36 = vpop.f32.mrf.mxu0 }
0x23e7   :  { %v13735_v21 = vpop.f32.mrf.mxu0 }
0x23e8   :  { %v23763_v2 = vpop.f32.mrf.mxu1 }
0x23e9   :  { %25240 = vst [vmem:[#allocation49_spill] sm:$0xff] %v23763_v2  ;;  %v18861_v44 = vpop.f32.mrf.mxu0 }
0x23ea   :  { %v18854_v58 = vpop.f32.mrf.mxu1 }
0x23eb   :  { %v13865_v0 = vpop.f32.mrf.mxu0 }
0x23ec   :  { %v13687_v10 = vpop.f32.mrf.mxu1  ;;  %v13866_v19 = vadd.f32 %v13865_v0, %v20867_v43 }
0x23ed   :  { %v18872_v1 = vpop.f32.mrf.mxu0 }
0x23ee   :  { %v18855_v53 = vpop.f32.mrf.mxu1  ;;  %v14150_v25 = vsel %vm1149_vm2, %v13866_v19, -inf }
0x23ef   :  { %14151 = vmax.xlane.f32.xlu1 %v14150_v25  ;;  %v13868_v45 = vpop.f32.mrf.mxu0 }
0x23f0   :  { %v13819_v61 = vpop.f32.mrf.mxu1 }
0x23f1   :  { %v13820_v6 = vadd.f32 %v13819_v61, %v20867_v43  ;;  %v18873_v4 = vpop.f32.mrf.mxu0 }
0x23f2   :  { %v18866_v36 = vpop.f32.mrf.mxu1 }
0x23f3   :  { %v13957_v21 = vpop.f32.mrf.mxu0  ;;  %v14147_v28 = vsel %vm1149_vm2, %v13820_v6, -inf }
0x23f4   :  { %14148 = vmax.xlane.f32.xlu0 %v14147_v28  ;;  %v13822_v44 = vpop.f32.mrf.mxu1  ;;  %v13958_v25 = vadd.f32 %v13957_v21, %v20867_v43 }
0x23f5   :  { %v18884_v58 = vpop.f32.mrf.mxu0 }
0x23f6   :  { %v18867_v10 = vpop.f32.mrf.mxu1  ;;  %v14156_v58 = vsel %vm1149_vm2, %v13958_v25, -inf }
0x23f7   :  { %v13960_v34 = vpop.f32.mrf.mxu0 }
0x23f8   :  { %v13911_v0 = vpop.f32.mrf.mxu1 }
0x23f9   :  { %v13912_v1 = vadd.f32 %v13911_v0, %v20867_v43  ;;  %v18885_v53 = vpop.f32.mrf.mxu0 }
0x23fa   :  { %v18878_v29 = vpop.f32.mrf.mxu1 }
0x23fb   :  { %v14049_v45 = vpop.f32.mrf.mxu0  ;;  %v14153_v61 = vsel %vm1149_vm2, %v13912_v1, -inf }
0x23fc   :  { %14154 = vmax.xlane.f32.xlu0 %v14153_v61  ;;  %v13914_v4 = vpop.f32.mrf.mxu1  ;;  %v14050_v28 = vadd.f32 %v14049_v45, %v20867_v43 }
0x23fd   :  { %v18896_v36 = vpop.f32.mrf.mxu0 }
0x23fe   :  { %v18879_v38 = vpop.f32.mrf.mxu1  ;;  %v14162_v21 = vsel %vm1149_vm2, %v14050_v28, -inf }
0x23ff   :  { %v14052_v44 = vpop.f32.mrf.mxu0 }
0x2400   :  { %14157 = vmax.xlane.f32.xlu0 %v14156_v58  ;;  %v14003_v34 = vpop.f32.mrf.mxu1 }
0x2401   :  { %v14004_v10 = vadd.f32 %v14003_v34, %v20867_v43  ;;  %v18897_v0 = vpop.f32.mrf.mxu0 }
0x2402   :  { %v18890_v29 = vpop.f32.mrf.mxu1 }
0x2403   :  { %v14141_v53 = vpop.f32.mrf.mxu0  ;;  %v14159_v8 = vsel %vm1149_vm2, %v14004_v10, -inf }
0x2404   :  { %v23778_v61 = vadd.f32 %v14141_v53, %v20867_v43  ;;  %14163 = vmax.xlane.f32.xlu0 %v14162_v21  ;;  %14160 = vmax.xlane.f32.xlu1 %v14159_v8  ;;  %v14006_v38 = vpop.f32.mrf.mxu1 }
0x2405   :  { %v18908_v45 = vpop.f32.mrf.mxu0 }
0x2406   :  { %v18891_v4 = vpop.f32.mrf.mxu1  ;;  %v14168_v36 = vsel %vm1149_vm2, %v23778_v61, -inf }
0x2407   :  { %v14144_v44 = vpop.f32.mrf.mxu0 }
0x2408   :  { %14169 = vmax.xlane.f32.xlu0 %v14168_v36  ;;  %v14095_v58 = vpop.f32.mrf.mxu1 }
0x2409   :  { %v14096_v34 = vadd.f32 %v14095_v58, %v20867_v43  ;;  %v18909_v0 = vpop.f32.mrf.mxu0 }
0x240a   :  { %v18902_v29 = vpop.f32.mrf.mxu1 }
0x240b   :  { %v14165_v41 = vsel %vm1149_vm2, %v14096_v34, -inf }
0x240c   :  { %14166 = vmax.xlane.f32.xlu1 %v14165_v41  ;;  %v14098_v53 = vpop.f32.mrf.mxu1 }
0x240e   :  { %v18903_v2 = vpop.f32.mrf.mxu1 }
0x241d   :  { %14243 = vrot.lane.b32.xlu1 %v20984_v51, %s20372_s23 }
0x2478   :  { %v14152_v8 = vpop.xlane.xlu1 %14151 }
0x2479   :  { %v14172_v21 = vsub.f32 %v13866_v19, %v14152_v8 }
0x247b   :  { %v14181_v38 = vmul.f32 1.442695, %v14172_v21 }
0x247d   :  { %20281 = vpow2.f32 %v14181_v38  ;;  %v14149_v45 = vpop.xlane.xlu0 %14148 }
0x247e   :  { %v14171_v4 = vsub.f32 %v13820_v6, %v14149_v45 }
0x2480   :  { %v14179_v36 = vmul.f32 1.442695, %v14171_v4 }
0x2482   :  { %20283 = vpow2.f32 %v14179_v36 }
0x2485   :  { %v14155_v44 = vpop.xlane.xlu0 %14154 }
0x2486   :  { %v14173_v58 = vsub.f32 %v13912_v1, %v14155_v44 }
0x2488   :  { %v14183_v0 = vmul.f32 1.442695, %v14173_v58 }
0x2489   :  { %v14158_v29 = vpop.xlane.xlu0 %14157 }
0x248a   :  { %v20282_v14 = vpop.eup %20281  ;;  %20285 = vpow2.f32 %v14183_v0  ;;  %v14174_v41 = vsub.f32 %v13958_v25, %v14158_v29 }
0x248b   :  { %v14198_v2 = vsel %vm1149_vm2, %v20282_v14, 0.0 }
0x248c   :  { %v14185_v53 = vmul.f32 1.442695, %v14174_v41  ;;  %14199 = vadd.xlane.f32.xlu0 %v14198_v2 }
0x248d   :  { %v14164_v26 = vpop.xlane.xlu0 %14163  ;;  %v14161_v59 = vpop.xlane.xlu1 %14160 }
0x248e   :  { %20287 = vpow2.f32 %v14185_v53  ;;  %v14176_v19 = vsub.f32 %v14050_v28, %v14164_v26  ;;  %v14175_v8 = vsub.f32 %v14004_v10, %v14161_v59 }
0x248f   :  { %v20284_v21 = vpop.eup %20283 }
0x2490   :  { %v14189_v6 = vmul.f32 1.442695, %v14176_v19  ;;  %v14187_v38 = vmul.f32 1.442695, %v14175_v8  ;;  %v14195_v45 = vsel %vm1149_vm2, %v20284_v21, 0.0 }
0x2491   :  { %14196 = vadd.xlane.f32.xlu1 %v14195_v45  ;;  %v14170_v44 = vpop.xlane.xlu0 %14169 }
0x2492   :  { %20289 = vpow2.f32 %v14189_v6  ;;  %v14178_v58 = vsub.f32 %v23778_v61, %v14170_v44 }
0x2493   :  { %20291 = vpow2.f32 %v14187_v38 }
0x2494   :  { %v14193_v29 = vmul.f32 1.442695, %v14178_v58 }
0x2495   :  { %v14167_v0 = vpop.xlane.xlu1 %14166 }
0x2496   :  { %v14177_v41 = vsub.f32 %v14096_v34, %v14167_v0  ;;  %20293 = vpow2.f32 %v14193_v29 }
0x2497   :  { %v20286_v1 = vpop.eup %20285 }
0x2498   :  { %v14201_v25 = vsel %vm1149_vm2, %v20286_v1, 0.0  ;;  %v14191_v2 = vmul.f32 1.442695, %v14177_v41 }
0x2499   :  { %14202 = vadd.xlane.f32.xlu1 %v14201_v25  ;;  %v14244_v34 = vpop.permute.xlu1 %14243 }
0x249a   :  { %20295 = vpow2.f32 %v14191_v2 }
0x249b   :  { %v23789_v4 = vpop.eup %20287 }
0x249c   :  { %v14204_v36 = vsel %vm1149_vm2, %v23789_v4, 0.0 }
0x249d   :  { %14205 = vadd.xlane.f32.xlu0 %v14204_v36 }
0x249f   :  { %v23793_v26 = vpop.eup %20289 }
0x24a0   :  { %v23795_v59 = vpop.eup %20291  ;;  %v14210_v28 = vsel %vm1149_vm2, %v23793_v26, 0.0 }
0x24a1   :  { %14211 = vadd.xlane.f32.xlu0 %v14210_v28  ;;  %v14207_v10 = vsel %vm1149_vm2, %v23795_v59, 0.0 }
0x24a2   :  { %14208 = vadd.xlane.f32.xlu1 %v14207_v10 }
0x24a3   :  { %v23808_v53 = vpop.eup %20293 }
0x24a4   :  { %v14216_v19 = vsel %vm1149_vm2, %v23808_v53, 0.0 }
0x24a7   :  { %v23812_v8 = vpop.eup %20295 }
0x24a8   :  { %v14213_v6 = vsel %vm1149_vm2, %v23812_v8, 0.0 }
0x24b3   :  { %14339 = vrot.lane.b32.xlu1 %v20996_v27, %s20372_s23 }
0x24b7   :  { %14387 = vrot.lane.b32.xlu1 %v21023_v42, %s20372_s23  ;;  %14291 = vrot.lane.b32.xlu0 %v21013_v16, %s20372_s23 }
0x24d6   :  { %14217 = vadd.xlane.f32.xlu0 %v14216_v19 }
0x24db   :  { %14214 = vadd.xlane.f32.xlu1 %v14213_v6 }
0x24ec   :  { %14483 = vrot.lane.b32.xlu1 %v21053_v3, %s20372_s23  ;;  %14435 = vrot.lane.b32.xlu0 %v21031_v5, %s20372_s23 }
0x24f0   :  { %14579 = vrot.lane.b32.xlu1 %v21070_v18, %s20372_s23  ;;  %14531 = vrot.lane.b32.xlu0 %v21041_v20, %s20372_s23 }
0x2515   :  { %v14200_v61 = vpop.xlane.xlu0 %14199 }
0x2516   :  { %20297 = vrcp.f32 %v14200_v61 }
0x251a   :  { %v14197_v38 = vpop.xlane.xlu1 %14196 }
0x251b   :  { %20299 = vrcp.f32 %v14197_v38 }
0x2522   :  { %v14203_v45 = vpop.xlane.xlu1 %14202 }
0x2523   :  { %v20298_v25 = vpop.eup %20297  ;;  %20301 = vrcp.f32 %v14203_v45 }
0x2524   :  { %v14228_v36 = vmul.f32 %v20298_v25, %v20282_v14 }
0x2526   :  { %v14206_v28 = vpop.xlane.xlu0 %14205  ;;  %v14236_v10 = vpack.c.bf16 %v14228_v36, %v14228_v36 }
0x2527   :  { %20303 = vrcp.f32 %v14206_v28 }
0x2528   :  { %v20300_v44 = vpop.eup %20299  ;;  %v14297_v58 = vsel %vm1149_vm2, %v14236_v10, 0 }
0x2529   :  { %18917 = vmatpush3.bf16.xpose.msra.mxu0 %v14297_v58  ;;  %v14227_v0 = vmul.f32 %v20300_v44, %v20284_v21 }
0x252a   :  { %v14212_v29 = vpop.xlane.xlu0 %14211  ;;  %18928 = vmatprep.subr.bf16.mxu0 %v25004_v30 }
0x252b   :  { %20305 = vrcp.f32 %v14212_v29  ;;  %v14209_v41 = vpop.xlane.xlu1 %14208  ;;  %v14235_v2 = vpack.c.bf16 %v14227_v0, %v14227_v0 }
0x252c   :  { %20307 = vrcp.f32 %v14209_v41 }
0x252d   :  { %v14249_v19 = vsel %vm1149_vm2, %v14235_v2, 0 }
0x252e   :  { %18911 = vmatpush3.bf16.xpose.msra.mxu1 %v14249_v19  ;;  %v14292_v6 = vpop.permute.xlu0 %14291 }
0x252f   :  { %18922 = vmatprep.subr.bf16.mxu1 %v25004_v30  ;;  %v14340_v58 = vpop.permute.xlu1 %14339 }
0x2530   :  { %v20302_v14 = vpop.eup %20301  ;;  %18919 = vmatmul.mubr.msk.bf16.vlgmr.msra.gmra.mxu0 %vm1149_vm2, %v14292_v6 }
0x2531   :  { %v14229_v61 = vmul.f32 %v20302_v14, %v20286_v1  ;;  %18930 = vmatprep.mubr.msk.bf16.mxu0 %vm20357_vm1, %v25004_v30 }
0x2533   :  { %v14237_v21 = vpack.c.bf16 %v14229_v61, %v14229_v61  ;;  %v14388_v41 = vpop.permute.xlu1 %14387 }
0x2534   :  { %v20304_v38 = vpop.eup %20303 }
0x2535   :  { %18913 = vmatmul.mubr.msk.bf16.vlgmr.msra.gmra.mxu1 %vm1149_vm2, %v14244_v34  ;;  %v14345_v45 = vsel %vm1149_vm2, %v14237_v21, 0  ;;  %v14230_v25 = vmul.f32 %v20304_v38, %v23789_v4 }
0x2536   :  { %18923 = vmatpush3.bf16.xpose.msra.mxu1 %v14345_v45  ;;  %18924 = vmatprep.mubr.msk.bf16.mxu1 %vm20357_vm1, %v25004_v30 }
0x2537   :  { %v14238_v36 = vpack.c.bf16 %v14230_v25, %v14230_v25  ;;  %18934 = vmatprep.subr.bf16.mxu1 %v25004_v30 }
0x2538   :  { %v20306_v28 = vpop.eup %20305 }
0x2539   :  { %v20308_v1 = vpop.eup %20307  ;;  %v14393_v10 = vsel %vm1149_vm2, %v14238_v36, 0  ;;  %v14232_v44 = vmul.f32 %v20306_v28, %v23793_v26  ;;  %v14721_v28 = vrot.slane %v23623_v40, 4  ;;  %v14821_v40 = vrot.slane %v23641_v48, 4 }
0x253a   :  { %18929 = vmatpush3.bf16.xpose.msra.mxu0 %v14393_v10  ;;  %v14231_v34 = vmul.f32 %v20308_v1, %v23795_v59  ;;  %v14669_v48 = vrot.slane %v23668_v11, 4  ;;  %v14871_v11 = vrot.slane %v23691_v55, 4 }
0x253b   :  { %18940 = vmatprep.subr.bf16.mxu0 %v25004_v30  ;;  %v14240_v0 = vpack.c.bf16 %v14232_v44, %v14232_v44  ;;  %v14671_v44 = vrot.slane %v23634_v23, 4  ;;  %v14826_v23 = vsel %vm1149_vm2, %v14821_v40, 0 }
0x253c   :  { %v14239_v4 = vpack.c.bf16 %v14231_v34, %v14231_v34  ;;  %v14719_v34 = vrot.slane %v23647_v17, 4  ;;  %v14921_v17 = vrot.slane %v23670_v12, 4  ;;  %v14769_v12 = vrot.slane %v23698_v50, 4 }
0x253d   :  { %18925 = vmatmul.mubr.msk.bf16.vlgmr.msra.gmra.mxu1 %vm1149_vm2, %v14340_v58  ;;  %v14489_v26 = vsel %vm1149_vm2, %v14240_v0, 0  ;;  %v14676_v58 = vsel %vm1149_vm2, %v14671_v44, 0  ;;  %v14971_v50 = vrot.slane %v23719_v46, 4  ;;  %v14969_v46 = vrot.slane %v23743_v49, 4 }
0x253e   :  { %v14441_v29 = vsel %vm1149_vm2, %v14239_v4, 0  ;;  %18936 = vmatprep.mubr.msk.bf16.mxu1 %vm20357_vm1, %v25004_v30  ;;  %v14771_v4 = vrot.slane %v23661_v24, 4  ;;  %v14926_v24 = vsel %vm1149_vm2, %v14921_v17, 0 }
0x253f   :  { %18935 = vmatpush3.bf16.xpose.msra.mxu1 %v14441_v29  ;;  %v14819_v29 = vrot.slane %v23677_v63, 4  ;;  %v15021_v63 = vrot.slane %v23700_v22, 4  ;;  %v14869_v22 = vrot.slane %v23726_v52, 4 }
0x2540   :  { %18946 = vmatprep.subr.bf16.mxu1 %v25004_v30  ;;  %v14776_v0 = vsel %vm1149_vm2, %v14771_v4, 0 }
0x2541   :  { %18931 = vmatmul.mubr.msk.bf16.vlgmr.msra.gmra.mxu0 %vm1149_vm2, %v14388_v41  ;;  %v14876_v41 = vsel %vm1149_vm2, %v14871_v11, 0  ;;  %v15026_v55 = vsel %vm1149_vm2, %v15021_v63, 0 }
0x2542   :  { %18941 = vmatpush3.bf16.xpose.msra.mxu0 %v14489_v26  ;;  %18942 = vmatprep.mubr.msk.bf16.mxu0 %vm20357_vm1, %v25004_v30  ;;  %v14919_v26 = vrot.slane %v23708_v62, 4  ;;  %v14976_v62 = vsel %vm1149_vm2, %v14971_v50, 0 }
0x2543   :  { %18952 = vmatprep.subr.bf16.mxu0 %v25004_v30 }
0x255f   :  { %v14218_v59 = vpop.xlane.xlu0 %14217 }
0x2560   :  { %20309 = vrcp.f32 %v14218_v59  ;;  %v15019_v59 = vrot.slane %v23732_v54, 4 }
0x2563   :  { %v14436_v2 = vpop.permute.xlu0 %14435 }
0x2564   :  { %v14215_v19 = vpop.xlane.xlu1 %14214  ;;  %18937 = vmatmul.mubr.msk.bf16.vlgmr.msra.gmra.mxu1 %vm1149_vm2, %v14436_v2 }
0x2565   :  { %20311 = vrcp.f32 %v14215_v19  ;;  %18948 = vmatprep.mubr.msk.bf16.mxu1 %vm20357_vm1, %v25004_v30 }
0x2568   :  { %v14484_v6 = vpop.permute.xlu1 %14483 }
0x2569   :  { %18943 = vmatmul.mubr.msk.bf16.vlgmr.msra.gmra.mxu0 %vm1149_vm2, %v14484_v6 }
0x256a   :  { %18954 = vmatprep.mubr.msk.bf16.mxu0 %vm20357_vm1, %v25004_v30 }
0x256c   :  { %v14580_v10 = vpop.permute.xlu1 %14579 }
0x256d   :  { %v20310_v14 = vpop.eup %20309 }
0x256e   :  { %v14234_v61 = vmul.f32 %v20310_v14, %v23808_v53  ;;  %v14726_v53 = vsel %vm1149_vm2, %v14721_v28, 0 }
0x2570   :  { %v14242_v21 = vpack.c.bf16 %v14234_v61, %v14234_v61 }
0x2572   :  { %v20312_v38 = vpop.eup %20311  ;;  %v14585_v45 = vsel %vm1149_vm2, %v14242_v21, 0 }
0x2573   :  { %18953 = vmatpush3.bf16.xpose.msra.mxu0 %v14585_v45  ;;  %v14233_v25 = vmul.f32 %v20312_v38, %v23812_v8  ;;  %v14532_v8 = vpop.permute.xlu0 %14531 }
0x2574   :  { %18964 = vmatprep.subr.bf16.mxu0 %v25004_v30 }
0x2575   :  { %v14241_v36 = vpack.c.bf16 %v14233_v25, %v14233_v25 }
0x2577   :  { %v14537_v1 = vsel %vm1149_vm2, %v14241_v36, 0 }
0x2578   :  { %18947 = vmatpush3.bf16.xpose.msra.mxu1 %v14537_v1 }
0x2579   :  { %18958 = vmatprep.subr.bf16.mxu1 %v25004_v30 }
0x257a   :  { %18955 = vmatmul.mubr.msk.bf16.vlgmr.msra.gmra.mxu0 %vm1149_vm2, %v14580_v10 }
0x257b   :  { %18965 = vmatpush3.bf16.xpose.msra.mxu0 %v14726_v53  ;;  %18966 = vmatprep.mubr.msk.bf16.mxu0 %vm20357_vm1, %v25004_v30 }
0x257c   :  { %18976 = vmatprep.subr.bf16.mxu0 %v25004_v30 }
0x257f   :  { %18949 = vmatmul.mubr.msk.bf16.vlgmr.msra.gmra.mxu1 %vm1149_vm2, %v14532_v8 }
0x2580   :  { %18959 = vmatpush3.bf16.xpose.msra.mxu1 %v14676_v58  ;;  %18960 = vmatprep.mubr.msk.bf16.mxu1 %vm20357_vm1, %v25004_v30 }
0x2581   :  { %18970 = vmatprep.subr.bf16.mxu1 %v25004_v30 }
0x2582   :  { %18967 = vmatmul.mubr.msk.bf16.vlgmr.msra.gmra.mxu0 %vm1149_vm2, %v14719_v34 }
0x2583   :  { %18977 = vmatpush3.bf16.xpose.msra.mxu0 %v14826_v23  ;;  %18978 = vmatprep.mubr.msk.bf16.mxu0 %vm20357_vm1, %v25004_v30 }
0x2584   :  { %18988 = vmatprep.subr.bf16.mxu0 %v25004_v30 }
0x2587   :  { %18961 = vmatmul.mubr.msk.bf16.vlgmr.msra.gmra.mxu1 %vm1149_vm2, %v14669_v48 }
0x2588   :  { %18971 = vmatpush3.bf16.xpose.msra.mxu1 %v14776_v0  ;;  %18972 = vmatprep.mubr.msk.bf16.mxu1 %vm20357_vm1, %v25004_v30 }
0x2589   :  { %18982 = vmatprep.subr.bf16.mxu1 %v25004_v30 }
0x258a   :  { %18979 = vmatmul.mubr.msk.bf16.vlgmr.msra.gmra.mxu0 %vm1149_vm2, %v14819_v29 }
0x258b   :  { %18989 = vmatpush3.bf16.xpose.msra.mxu0 %v14926_v24  ;;  %18990 = vmatprep.mubr.msk.bf16.mxu0 %vm20357_vm1, %v25004_v30 }
0x258c   :  { %19000 = vmatprep.subr.bf16.mxu0 %v25004_v30 }
0x258f   :  { %18973 = vmatmul.mubr.msk.bf16.vlgmr.msra.gmra.mxu1 %vm1149_vm2, %v14769_v12 }
0x2590   :  { %18983 = vmatpush3.bf16.xpose.msra.mxu1 %v14876_v41  ;;  %18984 = vmatprep.mubr.msk.bf16.mxu1 %vm20357_vm1, %v25004_v30 }
0x2591   :  { %18994 = vmatprep.subr.bf16.mxu1 %v25004_v30 }
0x2592   :  { %18991 = vmatmul.mubr.msk.bf16.vlgmr.msra.gmra.mxu0 %vm1149_vm2, %v14919_v26 }
0x2593   :  { %19001 = vmatpush3.bf16.xpose.msra.mxu0 %v15026_v55  ;;  %19002 = vmatprep.mubr.msk.bf16.mxu0 %vm20357_vm1, %v25004_v30 }
0x2594   :  { %19012 = vmatprep.subr.bf16.mxu0 %v25004_v30 }
0x2597   :  { %18985 = vmatmul.mubr.msk.bf16.vlgmr.msra.gmra.mxu1 %vm1149_vm2, %v14869_v22 }
0x2598   :  { %18995 = vmatpush3.bf16.xpose.msra.mxu1 %v14976_v62  ;;  %18996 = vmatprep.mubr.msk.bf16.mxu1 %vm20357_vm1, %v25004_v30 }
0x2599   :  { %19006 = vmatprep.subr.bf16.mxu1 %v25004_v30 }
0x259a   :  { %19003 = vmatmul.mubr.msk.bf16.vlgmr.msra.gmra.mxu0 %vm1149_vm2, %v15019_v59 }
0x259b   :  { %19014 = vmatprep.mubr.msk.bf16.mxu0 %vm20357_vm1, %v25004_v30 }
0x259f   :  { %18997 = vmatmul.mubr.msk.bf16.vlgmr.msra.gmra.mxu1 %vm1149_vm2, %v14969_v46 }
0x25a0   :  { %19008 = vmatprep.mubr.msk.bf16.mxu1 %vm20357_vm1, %v25004_v30 }
0x25f0   :  { %v23925_v52 = vpop.f32.mrf.mxu0 }
0x25f2   :  { %v18920_v54 = vpop.f32.mrf.mxu0 }
0x25f4   :  { %v14336_v2 = vpop.f32.mrf.mxu0 }
0x25f5   :  { %v23927_v19 = vpop.f32.mrf.mxu1 }
0x25f6   :  { %v18921_v6 = vpop.f32.mrf.mxu0 }
0x25f7   :  { %v18914_v14 = vpop.f32.mrf.mxu1 }
0x25f9   :  { %v14288_v61 = vpop.f32.mrf.mxu1 }
0x25fb   :  { %v18915_v21 = vpop.f32.mrf.mxu1 }
0x25fd   :  { %v23929_v38 = vpop.f32.mrf.mxu1 }
0x25ff   :  { %v18926_v45 = vpop.f32.mrf.mxu1 }
0x2601   :  { %v14384_v25 = vpop.f32.mrf.mxu1  ;;  %v23931_v49 = vpop.f32.mrf.mxu0 }
0x2603   :  { %v18927_v36 = vpop.f32.mrf.mxu1  ;;  %v18932_v28 = vpop.f32.mrf.mxu0 }
0x2605   :  { %v14432_v1 = vpop.f32.mrf.mxu0 }
0x2607   :  { %v18933_v10 = vpop.f32.mrf.mxu0 }
0x2624   :  { %v23933_v53 = vpop.f32.mrf.mxu1 }
0x2626   :  { %v18938_v44 = vpop.f32.mrf.mxu1 }
0x2628   :  { %v14480_v8 = vpop.f32.mrf.mxu1 }
0x2629   :  { %v23935_v40 = vpop.f32.mrf.mxu0 }
0x262a   :  { %v18939_v58 = vpop.f32.mrf.mxu1 }
0x262b   :  { %v18944_v34 = vpop.f32.mrf.mxu0 }
0x262d   :  { %v14528_v23 = vpop.f32.mrf.mxu0 }
0x262f   :  { %v18945_v4 = vpop.f32.mrf.mxu0 }
0x263a   :  { %v23937_v48 = vpop.f32.mrf.mxu0 }
0x263c   :  { %v18956_v17 = vpop.f32.mrf.mxu0 }
0x263e   :  { %v14624_v0 = vpop.f32.mrf.mxu0 }
0x263f   :  { %v23939_v29 = vpop.f32.mrf.mxu1 }
0x2640   :  { %v18957_v24 = vpop.f32.mrf.mxu0 }
0x2641   :  { %v18950_v11 = vpop.f32.mrf.mxu1 }
0x2642   :  { %v14762_v12 = vpop.f32.mrf.mxu0 }
0x2643   :  { %v14576_v63 = vpop.f32.mrf.mxu1  ;;  %v14763_v41 = vadd.f32 %v14762_v12, %v20867_v43 }
0x2644   :  { %v18968_v26 = vpop.f32.mrf.mxu0 }
0x2645   :  { %v18951_v55 = vpop.f32.mrf.mxu1  ;;  %v15071_v50 = vsel %vm1149_vm2, %v14763_v41, -inf }
0x2646   :  { %15072 = vmax.xlane.f32.xlu1 %v15071_v50  ;;  %v14765_v22 = vpop.f32.mrf.mxu0 }
0x2647   :  { %v14712_v62 = vpop.f32.mrf.mxu1 }
0x2648   :  { %v14713_v59 = vadd.f32 %v14712_v62, %v20867_v43  ;;  %v18969_v46 = vpop.f32.mrf.mxu0 }
0x2649   :  { %v18962_v54 = vpop.f32.mrf.mxu1 }
0x264a   :  { %v14862_v2 = vpop.f32.mrf.mxu0  ;;  %v15068_v6 = vsel %vm1149_vm2, %v14713_v59, -inf }
0x264b   :  { %15069 = vmax.xlane.f32.xlu0 %v15068_v6  ;;  %v14715_v14 = vpop.f32.mrf.mxu1  ;;  %v14863_v10 = vadd.f32 %v14862_v2, %v20867_v43 }
0x264c   :  { %v18980_v61 = vpop.f32.mrf.mxu0 }
0x264d   :  { %v18963_v21 = vpop.f32.mrf.mxu1  ;;  %v15077_v0 = vsel %vm1149_vm2, %v14863_v10, -inf }
0x264e   :  { %v14865_v45 = vpop.f32.mrf.mxu0 }
0x264f   :  { %v14812_v25 = vpop.f32.mrf.mxu1 }
0x2650   :  { %v14813_v36 = vadd.f32 %v14812_v25, %v20867_v43  ;;  %v18981_v28 = vpop.f32.mrf.mxu0 }
0x2651   :  { %v18974_v1 = vpop.f32.mrf.mxu1 }
0x2652   :  { %v14962_v44 = vpop.f32.mrf.mxu0  ;;  %v15074_v8 = vsel %vm1149_vm2, %v14813_v36, -inf }
0x2653   :  { %15075 = vmax.xlane.f32.xlu0 %v15074_v8  ;;  %v14815_v58 = vpop.f32.mrf.mxu1  ;;  %v14963_v4 = vadd.f32 %v14962_v44, %v20867_v43 }
0x2654   :  { %v18992_v34 = vpop.f32.mrf.mxu0 }
0x2655   :  { %v18975_v23 = vpop.f32.mrf.mxu1  ;;  %v15083_v55 = vsel %vm1149_vm2, %v14963_v4, -inf }
0x2656   :  { %v14965_v17 = vpop.f32.mrf.mxu0 }
0x2657   :  { %15078 = vmax.xlane.f32.xlu0 %v15077_v0  ;;  %v14912_v24 = vpop.f32.mrf.mxu1 }
0x2658   :  { %v14913_v11 = vadd.f32 %v14912_v24, %v20867_v43  ;;  %v18993_v12 = vpop.f32.mrf.mxu0 }
0x2659   :  { %v18986_v63 = vpop.f32.mrf.mxu1 }
0x265a   :  { %v15062_v26 = vpop.f32.mrf.mxu0  ;;  %v15080_v50 = vsel %vm1149_vm2, %v14913_v11, -inf }
0x265b   :  { %v23954_v22 = vadd.f32 %v15062_v26, %v20867_v43  ;;  %15084 = vmax.xlane.f32.xlu0 %v15083_v55  ;;  %15081 = vmax.xlane.f32.xlu1 %v15080_v50  ;;  %v14915_v62 = vpop.f32.mrf.mxu1 }
0x265c   :  { %v19004_v46 = vpop.f32.mrf.mxu0 }
0x265d   :  { %v18987_v54 = vpop.f32.mrf.mxu1  ;;  %v15089_v2 = vsel %vm1149_vm2, %v23954_v22, -inf }
0x265e   :  { %v15065_v6 = vpop.f32.mrf.mxu0 }
0x265f   :  { %15090 = vmax.xlane.f32.xlu0 %v15089_v2  ;;  %v15012_v14 = vpop.f32.mrf.mxu1 }
0x2660   :  { %v15013_v61 = vadd.f32 %v15012_v14, %v20867_v43  ;;  %v19005_v21 = vpop.f32.mrf.mxu0 }
0x2661   :  { %v18998_v45 = vpop.f32.mrf.mxu1 }
0x2662   :  { %v15086_v25 = vsel %vm1149_vm2, %v15013_v61, -inf }
0x2663   :  { %15087 = vmax.xlane.f32.xlu1 %v15086_v25  ;;  %v15015_v28 = vpop.f32.mrf.mxu1 }
0x2665   :  { %v18999_v1 = vpop.f32.mrf.mxu1 }
0x2674   :  { %15164 = vrot.lane.b32.xlu1 %v20984_v51, %s20373_s24 }
0x26cf   :  { %v15073_v44 = vpop.xlane.xlu1 %15072 }
0x26d0   :  { %v15093_v8 = vsub.f32 %v14763_v41, %v15073_v44 }
0x26d2   :  { %v15102_v58 = vmul.f32 1.442695, %v15093_v8 }
0x26d4   :  { %20313 = vpow2.f32 %v15102_v58  ;;  %v15070_v34 = vpop.xlane.xlu0 %15069 }
0x26d5   :  { %v15092_v23 = vsub.f32 %v14713_v59, %v15070_v34 }
0x26d7   :  { %v15100_v17 = vmul.f32 1.442695, %v15092_v23 }
0x26d9   :  { %20315 = vpow2.f32 %v15100_v17 }
0x26dc   :  { %v15076_v43 = vpop.xlane.xlu0 %15075 }
0x26dd   :  { %v15094_v0 = vsub.f32 %v14813_v36, %v15076_v43  ;;  %v25253_v43 = vld [vmem:[#allocation33_spill] sm:$0xff] }
0x26df   :  { %v15104_v24 = vmul.f32 1.442695, %v15094_v0  ;;  %v25254_v0 = vld [vmem:[#allocation35_spill] sm:$0xff] }
0x26e0   :  { %v15079_v12 = vpop.xlane.xlu0 %15078 }
0x26e1   :  { %v23962_v63 = vpop.eup %20313  ;;  %20317 = vpow2.f32 %v15104_v24  ;;  %v15095_v26 = vsub.f32 %v14863_v10, %v15079_v12 }
0x26e2   :  { %v15119_v55 = vsel %vm1149_vm2, %v23962_v63, 0.0 }
0x26e3   :  { %v15106_v51 = vmul.f32 1.442695, %v15095_v26  ;;  %15120 = vadd.xlane.f32.xlu0 %v15119_v55 }
0x26e4   :  { %v15085_v41 = vpop.xlane.xlu0 %15084  ;;  %v15082_v50 = vpop.xlane.xlu1 %15081 }
0x26e5   :  { %20319 = vpow2.f32 %v15106_v51  ;;  %v15097_v62 = vsub.f32 %v14963_v4, %v15085_v41  ;;  %v15096_v59 = vsub.f32 %v14913_v11, %v15082_v50  ;;  %v25255_v51 = vld [vmem:[#allocation43_spill] sm:$0xff]  ;;  %v25256_v41 = vld [vmem:[#allocation41_spill] sm:$0xff] }
0x26e6   :  { %v23966_v46 = vpop.eup %20315 }
0x26e7   :  { %v15110_v54 = vmul.f32 1.442695, %v15097_v62  ;;  %v15108_v36 = vmul.f32 1.442695, %v15096_v59  ;;  %v15116_v2 = vsel %vm1149_vm2, %v23966_v46, 0.0 }
0x26e8   :  { %15117 = vadd.xlane.f32.xlu1 %v15116_v2  ;;  %v15091_v28 = vpop.xlane.xlu0 %15090 }
0x26e9   :  { %20321 = vpow2.f32 %v15110_v54  ;;  %v15099_v1 = vsub.f32 %v23954_v22, %v15091_v28  ;;  %v25258_v54 = vld [vmem:[#allocation105_spill] sm:$0xff] }
0x26ea   :  { %20323 = vpow2.f32 %v15108_v36 }
0x26eb   :  { %v15114_v8 = vmul.f32 1.442695, %v15099_v1 }
0x26ec   :  { %v15088_v44 = vpop.xlane.xlu1 %15087 }
0x26ed   :  { %v15098_v58 = vsub.f32 %v15013_v61, %v15088_v44  ;;  %20325 = vpow2.f32 %v15114_v8  ;;  %v25261_v44 = vld [vmem:[#allocation64_spill] sm:$0xff]  ;;  %v25262_v8 = vld [vmem:[#allocation62_spill] sm:$0xff] }
0x26ee   :  { %v23970_v10 = vpop.eup %20317 }
0x26ef   :  { %v15122_v6 = vsel %vm1149_vm2, %v23970_v10, 0.0  ;;  %v15112_v34 = vmul.f32 1.442695, %v15098_v58 }
0x26f0   :  { %15123 = vadd.xlane.f32.xlu1 %v15122_v6 }
0x26f1   :  { %20327 = vpow2.f32 %v15112_v34 }
0x26f2   :  { %v23974_v14 = vpop.eup %20319 }
0x26f3   :  { %v15125_v4 = vsel %vm1149_vm2, %v23974_v14, 0.0 }
0x26f4   :  { %15126 = vadd.xlane.f32.xlu0 %v15125_v4  ;;  %v25259_v4 = vld [vmem:[#allocation8_spill] sm:$0xff] }
0x26f6   :  { %v23978_v11 = vpop.eup %20321 }
0x26f7   :  { %v23980_v21 = vpop.eup %20323  ;;  %v15131_v45 = vsel %vm1149_vm2, %v23978_v11, 0.0 }
0x26f8   :  { %15132 = vadd.xlane.f32.xlu0 %v15131_v45  ;;  %v15128_v25 = vsel %vm1149_vm2, %v23980_v21, 0.0  ;;  %v25260_v45 = vld [vmem:[#allocation57_spill] sm:$0xff] }
0x26f9   :  { %15129 = vadd.xlane.f32.xlu1 %v15128_v25 }
0x26fa   :  { %v23993_v23 = vpop.eup %20325 }
0x26fe   :  { %v23997_v17 = vpop.eup %20327 }
0x270a   :  { %15260 = vrot.lane.b32.xlu1 %v20996_v27, %s20373_s24  ;;  %v15137_v27 = vsel %vm1149_vm2, %v23993_v23, 0.0 }
0x270e   :  { %15308 = vrot.lane.b32.xlu1 %v21023_v42, %s20373_s24  ;;  %15212 = vrot.lane.b32.xlu0 %v21013_v16, %s20373_s24  ;;  %v15134_v16 = vsel %vm1149_vm2, %v23997_v17, 0.0  ;;  %v25241_v42 = vld [vmem:[#allocation56_spill] sm:$0xff] }
0x272d   :  { %15138 = vadd.xlane.f32.xlu0 %v15137_v27 }
0x2732   :  { %15135 = vadd.xlane.f32.xlu1 %v15134_v16 }
0x2743   :  { %15404 = vrot.lane.b32.xlu1 %v21053_v3, %s20373_s24  ;;  %15356 = vrot.lane.b32.xlu0 %v21031_v5, %s20373_s24  ;;  %v25242_v5 = vld [vmem:[#allocation54_spill] sm:$0xff]  ;;  %v25244_v3 = vld [vmem:[#allocation7_spill] sm:$0xff] }
0x2747   :  { %15500 = vrot.lane.b32.xlu1 %v21070_v18, %s20373_s24  ;;  %15452 = vrot.lane.b32.xlu0 %v21041_v20, %s20373_s24  ;;  %v25243_v20 = vld [vmem:[#allocation55_spill] sm:$0xff] }
0x274b   :  { %2900 = vrot.lane.b32.xlu1 %v21351_v37, %s20373_s24  ;;  %2898 = vrot.lane.b32.xlu0 %v21349_v13, %s20373_s24  ;;  %v25246_v13 = vld [vmem:[#allocation37_spill] sm:$0xff] }
0x274f   :  { %3789 = vrot.lane.b32.xlu1 %v21527_v33, %s20372_s23  ;;  %3787 = vrot.lane.b32.xlu0 %v21525_v57, %s20372_s23  ;;  %v25249_v57 = vld [vmem:[#allocation60_spill] sm:$0xff]  ;;  %v25250_v33 = vld [vmem:[#allocation58_spill] sm:$0xff] }
0x2753   :  { %4710 = vrot.lane.b32.xlu1 %v21745_v7, %s20371_s22  ;;  %4708 = vrot.lane.b32.xlu0 %v21747_v35, %s20371_s22 }
0x2757   :  { %5599 = vrot.lane.b32.xlu1 %v21921_v47, %s20370_s21  ;;  %5597 = vrot.lane.b32.xlu0 %v21923_v31, %s20370_s21  ;;  %v25252_v47 = vld [vmem:[#allocation100_spill] sm:$0xff] }
0x275b   :  { %2896 = vrot.lane.b32.xlu1 %v21345_v9, %s20373_s24  ;;  %2894 = vrot.lane.b32.xlu0 %v21347_v60, %s20373_s24  ;;  %v15165_v9 = vpop.permute.xlu1 %15164  ;;  %v25245_v60 = vld [vmem:[#allocation39_spill] sm:$0xff] }
0x275f   :  { %6520 = vrot.lane.b32.xlu1 %v22145_v39, %s20369_s20  ;;  %6518 = vrot.lane.b32.xlu0 %v22147_v15, %s20369_s20  ;;  %v25251_v15 = vld [vmem:[#allocation102_spill] sm:$0xff] }
0x2763   :  { %3785 = vrot.lane.b32.xlu1 %v21521_v56, %s20372_s23  ;;  %3783 = vrot.lane.b32.xlu0 %v21523_v32, %s20372_s23  ;;  %v25247_v56 = vld [vmem:[#allocation77_spill] sm:$0xff] }
0x2764   :  { %v25248_v32 = vld [vmem:[#allocation5_spill] sm:$0xff] }
0x2767   :  { %7409 = vrot.lane.b32.xlu1 %v25241_v42, %s20368_s19  ;;  %7407 = vrot.lane.b32.xlu0 %v25242_v5, %s20368_s19  ;;  %v25263_v42 = vld [vmem:[#allocation27_spill] sm:$0xff]  ;;  %v25264_v5 = vld [vmem:[#allocation28_spill] sm:$0xff] }
0x276b   :  { %4706 = vrot.lane.b32.xlu1 %v25243_v20, %s20371_s22  ;;  %4704 = vrot.lane.b32.xlu0 %v25244_v3, %s20371_s22 }
0x276c   :  { %v15121_v18 = vpop.xlane.xlu0 %15120 }
0x276d   :  { %20329 = vrcp.f32 %v15121_v18 }
0x276f   :  { %8330 = vrot.lane.b32.xlu1 %v25245_v60, %s20367_s18  ;;  %8328 = vrot.lane.b32.xlu0 %v25246_v13, %s20367_s18  ;;  %v25267_v13 = vld [vmem:[#allocation47_spill] sm:$0xff] }
0x2771   :  { %v15118_v37 = vpop.xlane.xlu1 %15117 }
0x2772   :  { %20331 = vrcp.f32 %v15118_v37  ;;  %v25268_v37 = vld [vmem:[#allocation45_spill] sm:$0xff] }
0x2773   :  { %5595 = vrot.lane.b32.xlu1 %v25247_v56, %s20370_s21  ;;  %5593 = vrot.lane.b32.xlu0 %v25248_v32, %s20370_s21  ;;  %v25269_v56 = vld [vmem:[#allocation51_spill] sm:$0xff]  ;;  %v25270_v32 = vld [vmem:[#allocation52_spill] sm:$0xff] }
0x2777   :  { %9219 = vrot.lane.b32.xlu1 %v25249_v57, %s20366_s1  ;;  %9217 = vrot.lane.b32.xlu0 %v25250_v33, %s20366_s1  ;;  %v25271_v57 = vld [vmem:[#allocation12_spill] sm:$0xff]  ;;  %v25272_v33 = vld [vmem:[#allocation61_spill] sm:$0xff] }
0x2779   :  { %v15124_v7 = vpop.xlane.xlu1 %15123 }
0x277a   :  { %v20330_v35 = vpop.eup %20329  ;;  %20333 = vrcp.f32 %v15124_v7  ;;  %v25273_v7 = vld [vmem:[#allocation68_spill] sm:$0xff] }
0x277b   :  { %2892 = vrot.lane.b32.xlu1 %v25251_v15, %s20373_s24  ;;  %2890 = vrot.lane.b32.xlu0 %v25252_v47, %s20373_s24  ;;  %v15149_v31 = vmul.f32 %v20330_v35, %v23962_v63  ;;  %v25274_v35 = vld [vmem:[#allocation66_spill] sm:$0xff]  ;;  %v25275_v15 = vld [vmem:[#allocation101_spill] sm:$0xff]  ;;  %v25276_v47 = vld [vmem:[#allocation76_spill] sm:$0xff] }
0x277d   :  { %v15127_v39 = vpop.xlane.xlu0 %15126  ;;  %v15157_v22 = vpack.c.bf16 %v15149_v31, %v15149_v31  ;;  %v25277_v31 = vld [vmem:[#allocation80_spill] sm:$0xff] }
0x277e   :  { %20335 = vrcp.f32 %v15127_v39  ;;  %v25278_v39 = vld [vmem:[#allocation78_spill] sm:$0xff] }
0x277f   :  { %v20332_v61 = vpop.eup %20331  ;;  %6516 = vrot.lane.b32.xlu1 %v25253_v43, %s20369_s20  ;;  %6514 = vrot.lane.b32.xlu0 %v25254_v0, %s20369_s20  ;;  %v15218_v24 = vsel %vm1149_vm2, %v15157_v22, 0  ;;  %v25279_v22 = vld [vmem:[#allocation88_spill] sm:$0xff]  ;;  %v25281_v0 = vld [vmem:[#allocation50_spill] sm:$0xff] }
0x2780   :  { %19013 = vmatpush3.bf16.xpose.msra.mxu0 %v15218_v24  ;;  %v15148_v12 = vmul.f32 %v20332_v61, %v23966_v46  ;;  %v25257_v46 = vld [vmem:[#allocation106_spill] sm:$0xff]  ;;  %v25282_v24 = vld [vmem:[#allocation49_spill] sm:$0xff] }
0x2781   :  { %v15133_v26 = vpop.xlane.xlu0 %15132  ;;  %19024 = vmatprep.subr.bf16.mxu0 %v25004_v30  ;;  %v25280_v61 = vld [vmem:[#allocation86_spill] sm:$0xff] }
0x2782   :  { %20337 = vrcp.f32 %v15133_v26  ;;  %v15130_v63 = vpop.xlane.xlu1 %15129  ;;  %v15156_v55 = vpack.c.bf16 %v15148_v12, %v15148_v12  ;;  %v25283_v26 = vld [vmem:[#allocation104_spill] sm:$0xff] }
0x2783   :  { %20339 = vrcp.f32 %v15130_v63  ;;  %10140 = vrot.lane.b32.xlu1 %v25255_v51, %s20365_s17  ;;  %10138 = vrot.lane.b32.xlu0 %v25256_v41, %s20365_s17  ;;  %v25285_v41 = vld [vmem:[#allocation59_spill] sm:$0xff] }
0x2784   :  { %v15170_v50 = vsel %vm1149_vm2, %v15156_v55, 0  ;;  %v25284_v55 = vld [vmem:[#allocation103_spill] sm:$0xff] }
0x2785   :  { %19007 = vmatpush3.bf16.xpose.msra.mxu1 %v15170_v50  ;;  %v15213_v59 = vpop.permute.xlu0 %15212 }
0x2786   :  { %19018 = vmatprep.subr.bf16.mxu1 %v25004_v30 }
0x2787   :  { %v20334_v62 = vpop.eup %20333  ;;  %3781 = vrot.lane.b32.xlu1 %v25257_v46, %s20372_s23  ;;  %3779 = vrot.lane.b32.xlu0 %v25258_v54, %s20372_s23  ;;  %v25287_v46 = vld [vmem:[#allocation16_spill] sm:$0xff] }
0x2788   :  { %19015 = vmatmul.mubr.msk.bf16.vlgmr.msra.gmra.mxu0 %vm1149_vm2, %v15213_v59  ;;  %v15150_v36 = vmul.f32 %v20334_v62, %v23970_v10  ;;  %v25286_v62 = vld [vmem:[#allocation11_spill] sm:$0xff] }
0x2789   :  { %19026 = vmatprep.mubr.msk.bf16.mxu0 %vm20357_vm1, %v25004_v30 }
0x278a   :  { %v15158_v2 = vpack.c.bf16 %v15150_v36, %v15150_v36  ;;  %v25288_v36 = vld [vmem:[#allocation65_spill] sm:$0xff] }
0x278b   :  { %v20336_v6 = vpop.eup %20335  ;;  %7405 = vrot.lane.b32.xlu1 %v25259_v4, %s20368_s19  ;;  %7403 = vrot.lane.b32.xlu0 %v25260_v45, %s20368_s19 }
0x278c   :  { %19009 = vmatmul.mubr.msk.bf16.vlgmr.msra.gmra.mxu1 %vm1149_vm2, %v15165_v9  ;;  %v15266_v25 = vsel %vm1149_vm2, %v15158_v2, 0  ;;  %v15151_v28 = vmul.f32 %v20336_v6, %v23974_v14  ;;  %v15261_v14 = vpop.permute.xlu1 %15260  ;;  %v25266_v9 = vld [vmem:[#allocation82_spill] sm:$0xff] }
0x278d   :  { %19019 = vmatpush3.bf16.xpose.msra.mxu1 %v15266_v25  ;;  %19020 = vmatprep.mubr.msk.bf16.mxu1 %vm20357_vm1, %v25004_v30 }
0x278e   :  { %v15159_v10 = vpack.c.bf16 %v15151_v28, %v15151_v28  ;;  %19030 = vmatprep.subr.bf16.mxu1 %v25004_v30 }
0x278f   :  { %v20338_v1 = vpop.eup %20337  ;;  %11029 = vrot.lane.b32.xlu1 %v25261_v44, %s20364_s16  ;;  %11027 = vrot.lane.b32.xlu0 %v25262_v8, %s20364_s16  ;;  %v25290_v44 = vld [vmem:[#allocation31_spill] sm:$0xff] }
0x2790   :  { %v20340_v58 = vpop.eup %20339  ;;  %v15314_v34 = vsel %vm1149_vm2, %v15159_v10, 0  ;;  %v15153_v27 = vmul.f32 %v20338_v1, %v23978_v11  ;;  %v15309_v11 = vpop.permute.xlu1 %15308  ;;  %v25289_v1 = vld [vmem:[#allocation29_spill] sm:$0xff] }
0x2791   :  { %19025 = vmatpush3.bf16.xpose.msra.mxu0 %v15314_v34  ;;  %v15152_v16 = vmul.f32 %v20340_v58, %v23980_v21  ;;  %v25265_v21 = vld [vmem:[#allocation84_spill] sm:$0xff] }
0x2792   :  { %19036 = vmatprep.subr.bf16.mxu0 %v25004_v30  ;;  %v15161_v3 = vpack.c.bf16 %v15153_v27, %v15153_v27  ;;  %v25292_v27 = vld [vmem:[#allocation79_spill] sm:$0xff] }
0x2793   :  { %4702 = vrot.lane.b32.xlu1 %v25263_v42, %s20371_s22  ;;  %4700 = vrot.lane.b32.xlu0 %v25264_v5, %s20371_s22  ;;  %v15160_v20 = vpack.c.bf16 %v15152_v16, %v15152_v16  ;;  %v25293_v16 = vld [vmem:[#allocation92_spill] sm:$0xff]  ;;  %v25294_v5 = vld [vmem:[#allocation90_spill] sm:$0xff] }
0x2794   :  { %19021 = vmatmul.mubr.msk.bf16.vlgmr.msra.gmra.mxu1 %vm1149_vm2, %v15261_v14  ;;  %v15410_v60 = vsel %vm1149_vm2, %v15161_v3, 0  ;;  %v25295_v3 = vld [vmem:[#allocation53_spill] sm:$0xff] }
0x2795   :  { %v15362_v18 = vsel %vm1149_vm2, %v15160_v20, 0  ;;  %19032 = vmatprep.mubr.msk.bf16.mxu1 %vm20357_vm1, %v25004_v30 }
0x2796   :  { %19031 = vmatpush3.bf16.xpose.msra.mxu1 %v15362_v18 }
0x2797   :  { %8326 = vrot.lane.b32.xlu1 %v25265_v21, %s20367_s18  ;;  %8324 = vrot.lane.b32.xlu0 %v25266_v9, %s20367_s18  ;;  %v25297_v9 = vld [vmem:[#allocation63_spill] sm:$0xff] }
0x2798   :  { %19027 = vmatmul.mubr.msk.bf16.vlgmr.msra.gmra.mxu0 %vm1149_vm2, %v15309_v11  ;;  %19042 = vmatprep.subr.bf16.mxu1 %v25004_v30  ;;  %v25296_v11 = vld [vmem:[#allocation4_spill] sm:$0xff] }
0x2799   :  { %19037 = vmatpush3.bf16.xpose.msra.mxu0 %v15410_v60  ;;  %19038 = vmatprep.mubr.msk.bf16.mxu0 %vm20357_vm1, %v25004_v30 }
0x279a   :  { %19048 = vmatprep.subr.bf16.mxu0 %v25004_v30 }
0x279b   :  { %11950 = vrot.lane.b32.xlu1 %v25267_v13, %s20363_s15  ;;  %11948 = vrot.lane.b32.xlu0 %v25268_v37, %s20363_s15  ;;  %v25298_v13 = vld [vmem:[#allocation15_spill] sm:$0xff] }
0x279f   :  { %5591 = vrot.lane.b32.xlu1 %v25269_v56, %s20370_s21  ;;  %5589 = vrot.lane.b32.xlu0 %v25270_v32, %s20370_s21  ;;  %v25299_v56 = vld [vmem:[#allocation21_spill] sm:$0xff] }
0x27a3   :  { %9215 = vrot.lane.b32.xlu1 %v25271_v57, %s20366_s1  ;;  %9213 = vrot.lane.b32.xlu0 %v25272_v33, %s20366_s1  ;;  %v25300_v57 = vld [vmem:[#allocation69_spill] sm:$0xff] }
0x27a7   :  { %12839 = vrot.lane.b32.xlu1 %v25273_v7, %s20362_s14  ;;  %12837 = vrot.lane.b32.xlu0 %v25274_v35, %s20362_s14  ;;  %v25301_v7 = vld [vmem:[#allocation75_spill] sm:$0xff] }
0x27ab   :  { %2888 = vrot.lane.b32.xlu1 %v25275_v15, %s20373_s24  ;;  %2886 = vrot.lane.b32.xlu0 %v25276_v47, %s20373_s24  ;;  %v25302_v15 = vld [vmem:[#allocation3_spill] sm:$0xff] }
0x27af   :  { %6512 = vrot.lane.b32.xlu1 %v25277_v31, %s20369_s20  ;;  %6510 = vrot.lane.b32.xlu0 %v25278_v39, %s20369_s20  ;;  %v25303_v31 = vld [vmem:[#allocation10_spill] sm:$0xff] }
0x27b3   :  { %10136 = vrot.lane.b32.xlu1 %v25279_v22, %s20365_s17  ;;  %10134 = vrot.lane.b32.xlu0 %v25280_v61, %s20365_s17  ;;  %v25304_v22 = vld [vmem:[#allocation83_spill] sm:$0xff] }
0x27b6   :  { %v15139_v43 = vpop.xlane.xlu0 %15138 }
0x27b7   :  { %20341 = vrcp.f32 %v15139_v43  ;;  %13760 = vrot.lane.b32.xlu1 %v25281_v0, %s20361_s13  ;;  %13758 = vrot.lane.b32.xlu0 %v25282_v24, %s20361_s13  ;;  %v25305_v43 = vld [vmem:[#allocation96_spill] sm:$0xff]  ;;  %v25306_v24 = vld [vmem:[#allocation94_spill] sm:$0xff] }
0x27ba   :  { %v15357_v12 = vpop.permute.xlu0 %15356 }
0x27bb   :  { %3777 = vrot.lane.b32.xlu1 %v25283_v26, %s20372_s23  ;;  %v15136_v63 = vpop.xlane.xlu1 %15135  ;;  %3775 = vrot.lane.b32.xlu0 %v25284_v55, %s20372_s23  ;;  %v25307_v26 = vld [vmem:[#allocation32_spill] sm:$0xff]  ;;  %v25308_v55 = vld [vmem:[#allocation30_spill] sm:$0xff] }
0x27bc   :  { %20343 = vrcp.f32 %v15136_v63  ;;  %19033 = vmatmul.mubr.msk.bf16.vlgmr.msra.gmra.mxu1 %vm1149_vm2, %v15357_v12 }
0x27bd   :  { %19044 = vmatprep.mubr.msk.bf16.mxu1 %vm20357_vm1, %v25004_v30 }
0x27be   :  { %v15453_v51 = vpop.permute.xlu0 %15452 }
0x27bf   :  { %7401 = vrot.lane.b32.xlu1 %v25285_v41, %s20368_s19  ;;  %v15405_v50 = vpop.permute.xlu1 %15404  ;;  %7399 = vrot.lane.b32.xlu0 %v25286_v62, %s20368_s19  ;;  %v25309_v41 = vld [vmem:[#allocation67_spill] sm:$0xff] }
0x27c0   :  { %19039 = vmatmul.mubr.msk.bf16.vlgmr.msra.gmra.mxu0 %vm1149_vm2, %v15405_v50  ;;  %v25310_v62 = vld [vmem:[#allocation19_spill] sm:$0xff] }
0x27c1   :  { %19050 = vmatprep.mubr.msk.bf16.mxu0 %vm20357_vm1, %v25004_v30  ;;  %vm11960_vm1 = vcmask 786112  }
0x27c2   :  { %v2899_v59 = vpop.permute.xlu0 %2898 }
0x27c3   :  { %2917 = vst.msk [vmem:[#allocation2 + $0x30] sm:$0xff] %vm2910_vm6, %v2899_v59  ;;  %11025 = vrot.lane.b32.xlu1 %v25287_v46, %s20364_s16  ;;  %v15501_v54 = vpop.permute.xlu1 %15500  ;;  %11023 = vrot.lane.b32.xlu0 %v25288_v36, %s20364_s16  ;;  %v25311_v36 = vld [vmem:[#allocation9_spill] sm:$0xff] }
0x27c4   :  { %v20342_v2 = vpop.eup %20341 }
0x27c5   :  { %v15155_v6 = vmul.f32 %v20342_v2, %v23993_v23 }
0x27c6   :  { %v3788_v4 = vpop.permute.xlu0 %3787 }
0x27c7   :  { %3806 = vst.msk [vmem:[#allocation2 + $0x30] sm:$0xff] %vm3799_vm7, %v3788_v4  ;;  %14649 = vrot.lane.b32.xlu1 %v23937_v48, %s20360_s12  ;;  %v2901_v30 = vpop.permute.xlu1 %2900  ;;  %14647 = vrot.lane.b32.xlu0 %v23939_v29, %s20360_s12  ;;  %v15163_v45 = vpack.c.bf16 %v15155_v6, %v15155_v6  ;;  %v25312_v6 = vld [vmem:[#allocation81_spill] sm:$0xff]  ;;  %v25313_v4 = vld [vmem:[#allocation14_spill] sm:$0xff] }
0x27c8   :  { %2918 = vst.msk [vmem:[#allocation2 + $0x38] sm:$0xff] %vm2910_vm6, %v2901_v30  ;;  %v25314_v30 = vld [vmem:[#allocation87_spill] sm:$0xff] }
0x27c9   :  { %v20344_v25 = vpop.eup %20343  ;;  %v15506_v28 = vsel %vm1149_vm2, %v15163_v45, 0 }
0x27ca   :  { %v4709_v10 = vpop.permute.xlu0 %4708  ;;  %19049 = vmatpush3.bf16.xpose.msra.mxu0 %v15506_v28  ;;  %v15154_v23 = vmul.f32 %v20344_v25, %v23997_v17  ;;  %v25291_v17 = vld [vmem:[#allocation6_spill] sm:$0xff]  ;;  %v25315_v25 = vld [vmem:[#allocation36_spill] sm:$0xff] }
0x27cb   :  { %4727 = vst.msk [vmem:[#allocation2 + $0x30] sm:$0xff] %vm4720_vm8, %v4709_v10  ;;  %4698 = vrot.lane.b32.xlu1 %v25289_v1, %s20371_s22  ;;  %v3790_v48 = vpop.permute.xlu1 %3789  ;;  %4696 = vrot.lane.b32.xlu0 %v25290_v44, %s20371_s22  ;;  %v25316_v10 = vld [vmem:[#allocation34_spill] sm:$0xff]  ;;  %v25317_v1 = vld [vmem:[#allocation71_spill] sm:$0xff]  ;;  %v25318_v44 = vld [vmem:[#allocation25_spill] sm:$0xff] }
0x27cc   :  { %3807 = vst.msk [vmem:[#allocation2 + $0x38] sm:$0xff] %vm3799_vm7, %v3790_v48  ;;  %v15162_v29 = vpack.c.bf16 %v15154_v23, %v15154_v23 }
0x27ce   :  { %v5598_v8 = vpop.permute.xlu0 %5597  ;;  %v15458_v58 = vsel %vm1149_vm2, %v15162_v29, 0 }
0x27cf   :  { %5616 = vst.msk [vmem:[#allocation2 + $0x30] sm:$0xff] %vm5609_vm9, %v5598_v8  ;;  %8322 = vrot.lane.b32.xlu1 %v25291_v17, %s20367_s18  ;;  %19043 = vmatpush3.bf16.xpose.msra.mxu1 %v15458_v58  ;;  %v4711_v34 = vpop.permute.xlu1 %4710  ;;  %v25319_v8 = vld [vmem:[#allocation13_spill] sm:$0xff] }
0x27d0   :  { %4728 = vst.msk [vmem:[#allocation2 + $0x38] sm:$0xff] %vm4720_vm8, %v4711_v34  ;;  %8320 = vrot.lane.b32.xlu0 %v25292_v27, %s20367_s18  ;;  %v25320_v17 = vld [vmem:[#allocation85_spill] sm:$0xff]  ;;  %v25321_v27 = vld [vmem:[#allocation18_spill] sm:$0xff] }
0x27d1   :  { %19051 = vmatmul.mubr.msk.bf16.vlgmr.msra.gmra.mxu0 %vm1149_vm2, %v15501_v54 }
0x27d2   :  { %v2895_v14 = vpop.permute.xlu0 %2894 }
0x27d3   :  { %2915 = vst.msk [vmem:[#allocation2 + $0x20] sm:$0xff] %vm2910_vm6, %v2895_v14  ;;  %11946 = vrot.lane.b32.xlu1 %v25293_v16, %s20363_s15  ;;  %v5600_v42 = vpop.permute.xlu1 %5599  ;;  %v25322_v16 = vld [vmem:[#allocation91_spill] sm:$0xff] }
0x27d4   :  { %5617 = vst.msk [vmem:[#allocation2 + $0x38] sm:$0xff] %vm5609_vm9, %v5600_v42  ;;  %11944 = vrot.lane.b32.xlu0 %v25294_v5, %s20363_s15  ;;  %v25323_v5 = vld [vmem:[#allocation40_spill] sm:$0xff] }
0x27d6   :  { %19045 = vmatmul.mubr.msk.bf16.vlgmr.msra.gmra.mxu1 %vm1149_vm2, %v15453_v51  ;;  %v6519_v20 = vpop.permute.xlu0 %6518  ;;  %vm12849_vm2 = vcmask 851712  }
0x27d7   :  { %6537 = vst.msk [vmem:[#allocation2 + $0x30] sm:$0xff] %vm6530_vm10, %v6519_v20  ;;  %5587 = vrot.lane.b32.xlu1 %v25295_v3, %s20370_s21  ;;  %v2897_v18 = vpop.permute.xlu1 %2896  ;;  %v25324_v3 = vld [vmem:[#allocation38_spill] sm:$0xff] }
0x27d8   :  { %2916 = vst.msk [vmem:[#allocation2 + $0x28] sm:$0xff] %vm2910_vm6, %v2897_v18  ;;  %5585 = vrot.lane.b32.xlu0 %v25296_v11, %s20370_s21 }
0x27da   :  { %v3784_v21 = vpop.permute.xlu0 %3783 }
0x27db   :  { %3804 = vst.msk [vmem:[#allocation2 + $0x20] sm:$0xff] %vm3799_vm7, %v3784_v21  ;;  %9211 = vrot.lane.b32.xlu1 %v25297_v9, %s20366_s1  ;;  %v6521_v60 = vpop.permute.xlu1 %6520  ;;  %v25325_v9 = vld [vmem:[#allocation17_spill] sm:$0xff] }
0x27dc   :  { %6538 = vst.msk [vmem:[#allocation2 + $0x38] sm:$0xff] %vm6530_vm10, %v6521_v60  ;;  %9209 = vrot.lane.b32.xlu0 %v25298_v13, %s20366_s1  ;;  %v25326_v13 = vld [vmem:[#allocation89_spill] sm:$0xff] }
0x27de   :  { %v7408_v37 = vpop.permute.xlu0 %7407 }
0x27df   :  { %7426 = vst.msk [vmem:[#allocation2 + $0x30] sm:$0xff] %vm7419_vm11, %v7408_v37  ;;  %12835 = vrot.lane.b32.xlu1 %v25299_v56, %s20362_s14  ;;  %v3786_v32 = vpop.permute.xlu1 %3785  ;;  %v25327_v37 = vld [vmem:[#allocation44_spill] sm:$0xff]  ;;  %v25328_v56 = vld [vmem:[#allocation42_spill] sm:$0xff] }
0x27e0   :  { %3805 = vst.msk [vmem:[#allocation2 + $0x28] sm:$0xff] %vm3799_vm7, %v3786_v32  ;;  %12833 = vrot.lane.b32.xlu0 %v25300_v57, %s20362_s14 }
0x27e2   :  { %v4705_v33 = vpop.permute.xlu0 %4704 }
0x27e3   :  { %4725 = vst.msk [vmem:[#allocation2 + $0x20] sm:$0xff] %vm4720_vm8, %v4705_v33  ;;  %6508 = vrot.lane.b32.xlu1 %v25301_v7, %s20369_s20  ;;  %v7410_v35 = vpop.permute.xlu1 %7409 }
0x27e4   :  { %7427 = vst.msk [vmem:[#allocation2 + $0x38] sm:$0xff] %vm7419_vm11, %v7410_v35  ;;  %6506 = vrot.lane.b32.xlu0 %v25302_v15, %s20369_s20 }
0x27e6   :  { %v8329_v47 = vpop.permute.xlu0 %8328 }
0x27e7   :  { %8347 = vst.msk [vmem:[#allocation2 + $0x30] sm:$0xff] %vm8340_vm12, %v8329_v47  ;;  %10132 = vrot.lane.b32.xlu1 %v25303_v31, %s20365_s17  ;;  %v4707_v39 = vpop.permute.xlu1 %4706 }
0x27e8   :  { %4726 = vst.msk [vmem:[#allocation2 + $0x28] sm:$0xff] %vm4720_vm8, %v4707_v39  ;;  %10130 = vrot.lane.b32.xlu0 %v25304_v22, %s20365_s17 }
0x27ea   :  { %v5594_v61 = vpop.permute.xlu0 %5593 }
0x27eb   :  { %5614 = vst.msk [vmem:[#allocation2 + $0x20] sm:$0xff] %vm5609_vm9, %v5594_v61  ;;  %13756 = vrot.lane.b32.xlu1 %v25305_v43, %s20361_s13  ;;  %v8331_v0 = vpop.permute.xlu1 %8330 }
0x27ec   :  { %8348 = vst.msk [vmem:[#allocation2 + $0x38] sm:$0xff] %vm8340_vm12, %v8331_v0  ;;  %13754 = vrot.lane.b32.xlu0 %v25306_v24, %s20361_s13 }
0x27ee   :  { %v9218_v12 = vpop.permute.xlu0 %9217 }
0x27ef   :  { %9236 = vst.msk [vmem:[#allocation2 + $0x30] sm:$0xff] %vm9229_vm13, %v9218_v12  ;;  %7397 = vrot.lane.b32.xlu1 %v25307_v26, %s20368_s19  ;;  %v5596_v63 = vpop.permute.xlu1 %5595 }
0x27f0   :  { %5615 = vst.msk [vmem:[#allocation2 + $0x28] sm:$0xff] %vm5609_vm9, %v5596_v63  ;;  %7395 = vrot.lane.b32.xlu0 %v25308_v55, %s20368_s19 }
0x27f2   :  { %v2891_v51 = vpop.permute.xlu0 %2890 }
0x27f3   :  { %2913 = vst.msk [vmem:[#allocation2 + $0x10] sm:$0xff] %vm2910_vm6, %v2891_v51  ;;  %11021 = vrot.lane.b32.xlu1 %v25309_v41, %s20364_s16  ;;  %v9220_v50 = vpop.permute.xlu1 %9219 }
0x27f4   :  { %9237 = vst.msk [vmem:[#allocation2 + $0x38] sm:$0xff] %vm9229_vm13, %v9220_v50  ;;  %11019 = vrot.lane.b32.xlu0 %v25310_v62, %s20364_s16 }
0x27f6   :  { %v6515_v59 = vpop.permute.xlu0 %6514 }
0x27f7   :  { %6535 = vst.msk [vmem:[#allocation2 + $0x20] sm:$0xff] %vm6530_vm10, %v6515_v59  ;;  %14645 = vrot.lane.b32.xlu1 %v23935_v40, %s20360_s12  ;;  %v2893_v46 = vpop.permute.xlu1 %2892 }
0x27f8   :  { %2914 = vst.msk [vmem:[#allocation2 + $0x18] sm:$0xff] %vm2910_vm6, %v2893_v46  ;;  %14643 = vrot.lane.b32.xlu0 %v23933_v53, %s20360_s12 }
0x27fa   :  { %v10139_v54 = vpop.permute.xlu0 %10138 }
0x27fb   :  { %10157 = vst.msk [vmem:[#allocation2 + $0x30] sm:$0xff] %vm10150_vm14, %v10139_v54  ;;  %8318 = vrot.lane.b32.xlu1 %v25311_v36, %s20367_s18  ;;  %v6517_v2 = vpop.permute.xlu1 %6516 }
0x27fc   :  { %6536 = vst.msk [vmem:[#allocation2 + $0x28] sm:$0xff] %vm6530_vm10, %v6517_v2  ;;  %8316 = vrot.lane.b32.xlu0 %v25312_v6, %s20367_s18 }
0x27fe   :  { %v3780_v40 = vpop.permute.xlu0 %3779 }
0x27ff   :  { %3802 = vst.msk [vmem:[#allocation2 + $0x10] sm:$0xff] %vm3799_vm7, %v3780_v40  ;;  %11942 = vrot.lane.b32.xlu1 %v25313_v4, %s20363_s15  ;;  %v10141_v53 = vpop.permute.xlu1 %10140 }
0x2800   :  { %10158 = vst.msk [vmem:[#allocation2 + $0x38] sm:$0xff] %vm10150_vm14, %v10141_v53  ;;  %11940 = vrot.lane.b32.xlu0 %v25314_v30, %s20363_s15 }
0x2802   :  { %v7404_v45 = vpop.permute.xlu0 %7403 }
0x2803   :  { %7424 = vst.msk [vmem:[#allocation2 + $0x20] sm:$0xff] %vm7419_vm11, %v7404_v45  ;;  %9207 = vrot.lane.b32.xlu1 %v25315_v25, %s20366_s1  ;;  %v3782_v28 = vpop.permute.xlu1 %3781 }
0x2804   :  { %3803 = vst.msk [vmem:[#allocation2 + $0x18] sm:$0xff] %vm3799_vm7, %v3782_v28  ;;  %9205 = vrot.lane.b32.xlu0 %v25316_v10, %s20366_s1 }
0x2806   :  { %v11028_v23 = vpop.permute.xlu0 %11027 }
0x2807   :  { %11046 = vst.msk [vmem:[#allocation2 + $0x30] sm:$0xff] %vm11039_vm15, %v11028_v23  ;;  %12831 = vrot.lane.b32.xlu1 %v25317_v1, %s20362_s14  ;;  %v7406_v48 = vpop.permute.xlu1 %7405 }
0x2808   :  { %7425 = vst.msk [vmem:[#allocation2 + $0x28] sm:$0xff] %vm7419_vm11, %v7406_v48  ;;  %12829 = vrot.lane.b32.xlu0 %v25318_v44, %s20362_s14 }
0x280a   :  { %v4701_v29 = vpop.permute.xlu0 %4700 }
0x280b   :  { %4723 = vst.msk [vmem:[#allocation2 + $0x10] sm:$0xff] %vm4720_vm8, %v4701_v29  ;;  %10128 = vrot.lane.b32.xlu1 %v25319_v8, %s20365_s17  ;;  %v11030_v58 = vpop.permute.xlu1 %11029 }
0x280c   :  { %11047 = vst.msk [vmem:[#allocation2 + $0x38] sm:$0xff] %vm11039_vm15, %v11030_v58  ;;  %10126 = vrot.lane.b32.xlu0 %v25320_v17, %s20365_s17 }
0x280e   :  { %v8325_v34 = vpop.permute.xlu0 %8324 }
0x280f   :  { %8345 = vst.msk [vmem:[#allocation2 + $0x20] sm:$0xff] %vm8340_vm12, %v8325_v34  ;;  %13752 = vrot.lane.b32.xlu1 %v25321_v27, %s20361_s13  ;;  %v4703_v14 = vpop.permute.xlu1 %4702 }
0x2810   :  { %4724 = vst.msk [vmem:[#allocation2 + $0x18] sm:$0xff] %vm4720_vm8, %v4703_v14  ;;  %13750 = vrot.lane.b32.xlu0 %v25322_v16, %s20361_s13 }
0x2812   :  { %v11949_v42 = vpop.permute.xlu0 %11948 }
0x2813   :  { %11967 = vst.msk [vmem:[#allocation2 + $0x30] sm:$0xff] %vm11960_vm1, %v11949_v42  ;;  %11017 = vrot.lane.b32.xlu1 %v25323_v5, %s20364_s16  ;;  %v8327_v20 = vpop.permute.xlu1 %8326 }
0x2814   :  { %8346 = vst.msk [vmem:[#allocation2 + $0x28] sm:$0xff] %vm8340_vm12, %v8327_v20  ;;  %11015 = vrot.lane.b32.xlu0 %v25324_v3, %s20364_s16 }
0x2816   :  { %v5590_v18 = vpop.permute.xlu0 %5589 }
0x2817   :  { %5612 = vst.msk [vmem:[#allocation2 + $0x10] sm:$0xff] %vm5609_vm9, %v5590_v18  ;;  %14641 = vrot.lane.b32.xlu1 %v23931_v49, %s20360_s12  ;;  %v11951_v11 = vpop.permute.xlu1 %11950 }
0x2818   :  { %11968 = vst.msk [vmem:[#allocation2 + $0x38] sm:$0xff] %vm11960_vm1, %v11951_v11  ;;  %14639 = vrot.lane.b32.xlu0 %v23929_v38, %s20360_s12 }
0x281a   :  { %v9214_v21 = vpop.permute.xlu0 %9213 }
0x281b   :  { %9234 = vst.msk [vmem:[#allocation2 + $0x20] sm:$0xff] %vm9229_vm13, %v9214_v21  ;;  %11938 = vrot.lane.b32.xlu1 %v25325_v9, %s20363_s15  ;;  %v5592_v60 = vpop.permute.xlu1 %5591 }
0x281c   :  { %5613 = vst.msk [vmem:[#allocation2 + $0x18] sm:$0xff] %vm5609_vm9, %v5592_v60  ;;  %11936 = vrot.lane.b32.xlu0 %v25326_v13, %s20363_s15 }
0x281e   :  { %v12838_v49 = vpop.permute.xlu0 %12837 }
0x281f   :  { %12856 = vst.msk [vmem:[#allocation2 + $0x30] sm:$0xff] %vm12849_vm2, %v12838_v49  ;;  %12827 = vrot.lane.b32.xlu1 %v25327_v37, %s20362_s14  ;;  %v9216_v38 = vpop.permute.xlu1 %9215 }
0x2820   :  { %9235 = vst.msk [vmem:[#allocation2 + $0x28] sm:$0xff] %vm9229_vm13, %v9216_v38  ;;  %12825 = vrot.lane.b32.xlu0 %v25328_v56, %s20362_s14 }
0x2822   :  { %v2887_v32 = vpop.permute.xlu0 %2886 }
0x2823   :  { %2911 = vst.msk [vmem:[#allocation2] sm:$0xff] %vm2910_vm6, %v2887_v32  ;;  %v12840_v57 = vpop.permute.xlu1 %12839 }
0x2824   :  { %12857 = vst.msk [vmem:[#allocation2 + $0x38] sm:$0xff] %vm12849_vm2, %v12840_v57 }
0x2826   :  { %v6511_v33 = vpop.permute.xlu0 %6510 }
0x2827   :  { %6533 = vst.msk [vmem:[#allocation2 + $0x10] sm:$0xff] %vm6530_vm10, %v6511_v33  ;;  %v2889_v7 = vpop.permute.xlu1 %2888 }
0x2828   :  { %2912 = vst.msk [vmem:[#allocation2 + $0x8] sm:$0xff] %vm2910_vm6, %v2889_v7 }
0x282a   :  { %v10135_v35 = vpop.permute.xlu0 %10134 }
0x282b   :  { %10155 = vst.msk [vmem:[#allocation2 + $0x20] sm:$0xff] %vm10150_vm14, %v10135_v35  ;;  %v6513_v15 = vpop.permute.xlu1 %6512 }
0x282c   :  { %6534 = vst.msk [vmem:[#allocation2 + $0x18] sm:$0xff] %vm6530_vm10, %v6513_v15 }
0x282e   :  { %v13759_v47 = vpop.permute.xlu0 %13758 }
0x282f   :  { %13777 = vst.msk [vmem:[#allocation2 + $0x30] sm:$0xff] %vm13770_vm3, %v13759_v47  ;;  %v10137_v31 = vpop.permute.xlu1 %10136 }
0x2830   :  { %10156 = vst.msk [vmem:[#allocation2 + $0x28] sm:$0xff] %vm10150_vm14, %v10137_v31 }
0x2832   :  { %v3776_v39 = vpop.permute.xlu0 %3775 }
0x2833   :  { %3800 = vst.msk [vmem:[#allocation2] sm:$0xff] %vm3799_vm7, %v3776_v39  ;;  %v13761_v22 = vpop.permute.xlu1 %13760 }
0x2834   :  { %13778 = vst.msk [vmem:[#allocation2 + $0x38] sm:$0xff] %vm13770_vm3, %v13761_v22 }
0x2836   :  { %v7400_v61 = vpop.permute.xlu0 %7399 }
0x2837   :  { %7422 = vst.msk [vmem:[#allocation2 + $0x10] sm:$0xff] %vm7419_vm11, %v7400_v61  ;;  %v3778_v43 = vpop.permute.xlu1 %3777 }
0x2838   :  { %3801 = vst.msk [vmem:[#allocation2 + $0x8] sm:$0xff] %vm3799_vm7, %v3778_v43 }
0x283a   :  { %v11024_v0 = vpop.permute.xlu0 %11023 }
0x283b   :  { %11044 = vst.msk [vmem:[#allocation2 + $0x20] sm:$0xff] %vm11039_vm15, %v11024_v0  ;;  %v7402_v24 = vpop.permute.xlu1 %7401 }
0x283c   :  { %7423 = vst.msk [vmem:[#allocation2 + $0x18] sm:$0xff] %vm7419_vm11, %v7402_v24 }
0x283e   :  { %v14648_v12 = vpop.permute.xlu0 %14647 }
0x283f   :  { %14666 = vst.msk [vmem:[#allocation2 + $0x30] sm:$0xff] %vm14659_vm4, %v14648_v12  ;;  %v11026_v26 = vpop.permute.xlu1 %11025 }
0x2840   :  { %11045 = vst.msk [vmem:[#allocation2 + $0x28] sm:$0xff] %vm11039_vm15, %v11026_v26 }
0x2842   :  { %v4697_v63 = vpop.permute.xlu0 %4696 }
0x2843   :  { %4721 = vst.msk [vmem:[#allocation2] sm:$0xff] %vm4720_vm8, %v4697_v63  ;;  %v14650_v55 = vpop.permute.xlu1 %14649 }
0x2844   :  { %14667 = vst.msk [vmem:[#allocation2 + $0x38] sm:$0xff] %vm14659_vm4, %v14650_v55 }
0x2846   :  { %v8321_v51 = vpop.permute.xlu0 %8320 }
0x2847   :  { %8343 = vst.msk [vmem:[#allocation2 + $0x10] sm:$0xff] %vm8340_vm12, %v8321_v51  ;;  %v4699_v41 = vpop.permute.xlu1 %4698 }
0x2848   :  { %4722 = vst.msk [vmem:[#allocation2 + $0x8] sm:$0xff] %vm4720_vm8, %v4699_v41  ;;  %v24334_v50 = vpop.f32.mrf.mxu0 }
0x284a   :  { %v19016_v62 = vpop.f32.mrf.mxu0  ;;  %v11945_v59 = vpop.permute.xlu0 %11944 }
0x284b   :  { %11965 = vst.msk [vmem:[#allocation2 + $0x20] sm:$0xff] %vm11960_vm1, %v11945_v59  ;;  %v8323_v46 = vpop.permute.xlu1 %8322 }
0x284c   :  { %8344 = vst.msk [vmem:[#allocation2 + $0x18] sm:$0xff] %vm8340_vm12, %v8323_v46  ;;  %v24338_v54 = vpop.f32.mrf.mxu1  ;;  %v15257_v36 = vpop.f32.mrf.mxu0 }
0x284e   :  { %v19017_v2 = vpop.f32.mrf.mxu0  ;;  %v5586_v6 = vpop.permute.xlu0 %5585 }
0x284f   :  { %5610 = vst.msk [vmem:[#allocation2] sm:$0xff] %vm5609_vm9, %v5586_v6  ;;  %v11947_v40 = vpop.permute.xlu1 %11946  ;;  %v19010_v4 = vpop.f32.mrf.mxu1  ;;  %v25329_v2 = vld [vmem:[#allocation22_spill] sm:$0xff] }
0x2850   :  { %11966 = vst.msk [vmem:[#allocation2 + $0x28] sm:$0xff] %vm11960_vm1, %v11947_v40 }
0x2851   :  { %v15209_v53 = vpop.f32.mrf.mxu1 }
0x2852   :  { %v9210_v30 = vpop.permute.xlu0 %9209 }
0x2853   :  { %9232 = vst.msk [vmem:[#allocation2 + $0x10] sm:$0xff] %vm9229_vm13, %v9210_v30  ;;  %v5588_v45 = vpop.permute.xlu1 %5587  ;;  %v19011_v25 = vpop.f32.mrf.mxu1 }
0x2854   :  { %5611 = vst.msk [vmem:[#allocation2 + $0x8] sm:$0xff] %vm5609_vm9, %v5588_v45  ;;  %v25330_v25 = vld [vmem:[#allocation93_spill] sm:$0xff] }
0x2855   :  { %v15302_v28 = vpop.f32.mrf.mxu1 }
0x2856   :  { %15560 = vrot.lane.b32.xlu0 %v15302_v28, %s20359_s2  ;;  %v12834_v10 = vpop.permute.xlu0 %12833 }
0x2857   :  { %12854 = vst.msk [vmem:[#allocation2 + $0x20] sm:$0xff] %vm12849_vm2, %v12834_v10  ;;  %v9212_v23 = vpop.permute.xlu1 %9211  ;;  %v19022_v1 = vpop.f32.mrf.mxu1  ;;  %v15610_v10 = vld [vmem:[%s24844_s4 + $0x8] sm:$0xff] }
0x2858   :  { %9233 = vst.msk [vmem:[#allocation2 + $0x18] sm:$0xff] %vm9229_vm13, %v9212_v23  ;;  %v15350_v48 = vpop.f32.mrf.mxu0  ;;  %v15612_v23 = vld [vmem:[%s24844_s4 + $0x18] sm:$0xff]  ;;  %v15611_v1 = vld [vmem:[%s24844_s4 + $0x10] sm:$0xff] }
0x2859   :  { %v15305_v44 = vpop.f32.mrf.mxu1  ;;  %15562 = vrot.lane.b32.xlu1 %v15350_v48, %s20359_s2  ;;  %v15613_v48 = vld [vmem:[%s24844_s4 + $0x20] sm:$0xff] }
0x285a   :  { %v6507_v29 = vpop.permute.xlu0 %6506  ;;  %v19028_v8 = vpop.f32.mrf.mxu0  ;;  %v15883_v44 = vld [vmem:[%s24846_s6 + $0xf8] sm:$0xff] }
0x285b   :  { %6531 = vst.msk [vmem:[#allocation2] sm:$0xff] %vm6530_vm10, %v6507_v29  ;;  %v12836_v58 = vpop.permute.xlu1 %12835  ;;  %v19023_v17 = vpop.f32.mrf.mxu1  ;;  %v15615_v29 = vld [vmem:[%s24844_s4 + $0x30] sm:$0xff]  ;;  %v15867_v8 = vld [vmem:[%s24846_s6 + $0x78] sm:$0xff] }
0x285c   :  { %12855 = vst.msk [vmem:[#allocation2 + $0x28] sm:$0xff] %vm12849_vm2, %v12836_v58  ;;  %v15353_v34 = vpop.f32.mrf.mxu0  ;;  %v15882_v58 = vld [vmem:[%s24846_s6 + $0xf0] sm:$0xff]  ;;  %v15881_v17 = vld [vmem:[%s24846_s6 + $0xe8] sm:$0xff] }
0x285d   :  { %v15866_v34 = vld [vmem:[%s24846_s6 + $0x70] sm:$0xff] }
0x285e   :  { %v10131_v27 = vpop.permute.xlu0 %10130  ;;  %v19029_v14 = vpop.f32.mrf.mxu0 }
0x285f   :  { %10153 = vst.msk [vmem:[#allocation2 + $0x10] sm:$0xff] %vm10150_vm14, %v10131_v27  ;;  %v6509_v16 = vpop.permute.xlu1 %6508  ;;  %v15865_v27 = vld [vmem:[%s24846_s6 + $0x68] sm:$0xff]  ;;  %v15880_v14 = vld [vmem:[%s24846_s6 + $0xe0] sm:$0xff] }
0x2860   :  { %6532 = vst.msk [vmem:[#allocation2 + $0x8] sm:$0xff] %vm6530_vm10, %v6509_v16  ;;  %v15879_v16 = vld [vmem:[%s24846_s6 + $0xd8] sm:$0xff] }
0x2862   :  { %v13755_v42 = vpop.permute.xlu0 %13754 }
0x2863   :  { %13775 = vst.msk [vmem:[#allocation2 + $0x20] sm:$0xff] %vm13770_vm3, %v13755_v42  ;;  %v10133_v5 = vpop.permute.xlu1 %10132  ;;  %v15864_v42 = vld [vmem:[%s24846_s6 + $0x60] sm:$0xff] }
0x2864   :  { %10154 = vst.msk [vmem:[#allocation2 + $0x18] sm:$0xff] %vm10150_vm14, %v10133_v5  ;;  %v15863_v5 = vld [vmem:[%s24846_s6 + $0x58] sm:$0xff] }
0x2866   :  { %v7396_v20 = vpop.permute.xlu0 %7395 }
0x2867   :  { %7420 = vst.msk [vmem:[#allocation2] sm:$0xff] %vm7419_vm11, %v7396_v20  ;;  %v13757_v3 = vpop.permute.xlu1 %13756  ;;  %v15878_v20 = vld [vmem:[%s24846_s6 + $0xd0] sm:$0xff] }
0x2868   :  { %13776 = vst.msk [vmem:[#allocation2 + $0x28] sm:$0xff] %vm13770_vm3, %v13757_v3  ;;  %v15877_v3 = vld [vmem:[%s24846_s6 + $0xc8] sm:$0xff] }
0x286a   :  { %v11020_v18 = vpop.permute.xlu0 %11019 }
0x286b   :  { %11042 = vst.msk [vmem:[#allocation2 + $0x10] sm:$0xff] %vm11039_vm15, %v11020_v18  ;;  %v7398_v11 = vpop.permute.xlu1 %7397 }
0x286c   :  { %7421 = vst.msk [vmem:[#allocation2 + $0x8] sm:$0xff] %vm7419_vm11, %v7398_v11  ;;  %v15862_v11 = vld [vmem:[%s24846_s6 + $0x50] sm:$0xff] }
0x286e   :  { %v14644_v21 = vpop.permute.xlu0 %14643 }
0x286f   :  { %14664 = vst.msk [vmem:[#allocation2 + $0x20] sm:$0xff] %vm14659_vm4, %v14644_v21  ;;  %v11022_v9 = vpop.permute.xlu1 %11021 }
0x2870   :  { %11043 = vst.msk [vmem:[#allocation2 + $0x18] sm:$0xff] %vm11039_vm15, %v11022_v9  ;;  %v15861_v9 = vld [vmem:[%s24846_s6 + $0x48] sm:$0xff] }
0x2872   :  { %v8317_v60 = vpop.permute.xlu0 %8316 }
0x2873   :  { %8341 = vst.msk [vmem:[#allocation2] sm:$0xff] %vm8340_vm12, %v8317_v60  ;;  %v14646_v13 = vpop.permute.xlu1 %14645  ;;  %v15876_v60 = vld [vmem:[%s24846_s6 + $0xc0] sm:$0xff] }
0x2874   :  { %14665 = vst.msk [vmem:[#allocation2 + $0x28] sm:$0xff] %vm14659_vm4, %v14646_v13  ;;  %v15875_v13 = vld [vmem:[%s24846_s6 + $0xb8] sm:$0xff] }
0x2876   :  { %v11941_v49 = vpop.permute.xlu0 %11940 }
0x2877   :  { %11963 = vst.msk [vmem:[#allocation2 + $0x10] sm:$0xff] %vm11960_vm1, %v11941_v49  ;;  %v8319_v37 = vpop.permute.xlu1 %8318  ;;  %v15860_v49 = vld [vmem:[%s24846_s6 + $0x40] sm:$0xff] }
0x2878   :  { %8342 = vst.msk [vmem:[#allocation2 + $0x8] sm:$0xff] %vm8340_vm12, %v8319_v37  ;;  %v15859_v37 = vld [vmem:[%s24846_s6 + $0x38] sm:$0xff] }
0x287a   :  { %v9206_v38 = vpop.permute.xlu0 %9205 }
0x287b   :  { %9230 = vst.msk [vmem:[#allocation2] sm:$0xff] %vm9229_vm13, %v9206_v38  ;;  %v11943_v56 = vpop.permute.xlu1 %11942  ;;  %v15874_v38 = vld [vmem:[%s24846_s6 + $0xb0] sm:$0xff] }
0x287c   :  { %11964 = vst.msk [vmem:[#allocation2 + $0x18] sm:$0xff] %vm11960_vm1, %v11943_v56  ;;  %v15398_v32 = vpop.f32.mrf.mxu1  ;;  %v15873_v56 = vld [vmem:[%s24846_s6 + $0xa8] sm:$0xff] }
0x287d   :  { %15564 = vrot.lane.b32.xlu0 %v15398_v32, %s20359_s2  ;;  %v15858_v32 = vld [vmem:[%s24846_s6 + $0x30] sm:$0xff] }
0x287e   :  { %v19034_v57 = vpop.f32.mrf.mxu1  ;;  %v12830_v33 = vpop.permute.xlu0 %12829 }
0x287f   :  { %12852 = vst.msk [vmem:[#allocation2 + $0x10] sm:$0xff] %vm12849_vm2, %v12830_v33  ;;  %v9208_v7 = vpop.permute.xlu1 %9207  ;;  %v15857_v57 = vld [vmem:[%s24846_s6 + $0x28] sm:$0xff]  ;;  %v15872_v33 = vld [vmem:[%s24846_s6 + $0xa0] sm:$0xff] }
0x2880   :  { %9231 = vst.msk [vmem:[#allocation2 + $0x8] sm:$0xff] %vm9229_vm13, %v9208_v7  ;;  %v15401_v35 = vpop.f32.mrf.mxu1  ;;  %v15446_v15 = vpop.f32.mrf.mxu0  ;;  %v15871_v7 = vld [vmem:[%s24846_s6 + $0x98] sm:$0xff] }
0x2881   :  { %15566 = vrot.lane.b32.xlu1 %v15446_v15, %s20359_s2  ;;  %v15856_v35 = vld [vmem:[%s24846_s6 + $0x20] sm:$0xff]  ;;  %v15855_v15 = vld [vmem:[%s24846_s6 + $0x18] sm:$0xff] }
0x2882   :  { %v19035_v47 = vpop.f32.mrf.mxu1  ;;  %v19040_v31 = vpop.f32.mrf.mxu0 }
0x2883   :  { %v10127_v39 = vpop.permute.xlu0 %10126  ;;  %v12832_v22 = vpop.permute.xlu1 %12831  ;;  %v15870_v47 = vld [vmem:[%s24846_s6 + $0x90] sm:$0xff]  ;;  %v15869_v31 = vld [vmem:[%s24846_s6 + $0x88] sm:$0xff] }
0x2884   :  { %10151 = vst.msk [vmem:[#allocation2] sm:$0xff] %vm10150_vm14, %v10127_v39  ;;  %v15449_v61 = vpop.f32.mrf.mxu0  ;;  %v15854_v39 = vld [vmem:[%s24846_s6 + $0x10] sm:$0xff] }
0x2885   :  { %12853 = vst.msk [vmem:[#allocation2 + $0x18] sm:$0xff] %vm12849_vm2, %v12832_v22  ;;  %v15853_v22 = vld [vmem:[%s24846_s6 + $0x8] sm:$0xff]  ;;  %v15868_v61 = vld [vmem:[%s24846_s6 + $0x80] sm:$0xff] }
0x2886   :  { %v19041_v43 = vpop.f32.mrf.mxu0 }
0x2887   :  { %v13751_v0 = vpop.permute.xlu0 %13750  ;;  %v10129_v24 = vpop.permute.xlu1 %10128 }
0x2888   :  { %13773 = vst.msk [vmem:[#allocation2 + $0x10] sm:$0xff] %vm13770_vm3, %v13751_v0  ;;  %v16390_v0 = vld [vmem:[%s24847_s8 + $0x8] sm:$0xff] }
0x2889   :  { %10152 = vst.msk [vmem:[#allocation2 + $0x8] sm:$0xff] %vm10150_vm14, %v10129_v24  ;;  %v15852_v24 = vld [vmem:[%s24846_s6] sm:$0xff] }
0x288b   :  { %v11016_v12 = vpop.permute.xlu0 %11015  ;;  %v13753_v26 = vpop.permute.xlu1 %13752 }
0x288c   :  { %11040 = vst.msk [vmem:[#allocation2] sm:$0xff] %vm11039_vm15, %v11016_v12 }
0x288d   :  { %13774 = vst.msk [vmem:[#allocation2 + $0x18] sm:$0xff] %vm13770_vm3, %v13753_v26  ;;  %v16392_v26 = vld [vmem:[%s24847_s8 + $0x18] sm:$0xff] }
0x288f   :  { %v14640_v63 = vpop.permute.xlu0 %14639  ;;  %v11018_v55 = vpop.permute.xlu1 %11017 }
0x2890   :  { %14662 = vst.msk [vmem:[#allocation2 + $0x10] sm:$0xff] %vm14659_vm4, %v14640_v63  ;;  %v16389_v63 = vld [vmem:[%s24847_s8] sm:$0xff] }
0x2891   :  { %11041 = vst.msk [vmem:[#allocation2 + $0x8] sm:$0xff] %vm11039_vm15, %v11018_v55  ;;  %v15542_v51 = vpop.f32.mrf.mxu0  ;;  %v16394_v55 = vld [vmem:[%s24847_s8 + $0x28] sm:$0xff] }
0x2892   :  { %15570 = vrot.lane.b32.xlu1 %v15542_v51, %s20359_s2  ;;  %v16391_v51 = vld [vmem:[%s24847_s8 + $0x10] sm:$0xff] }
0x2893   :  { %v11937_v41 = vpop.permute.xlu0 %11936  ;;  %v14642_v62 = vpop.permute.xlu1 %14641 }
0x2894   :  { %11961 = vst.msk [vmem:[#allocation2] sm:$0xff] %vm11960_vm1, %v11937_v41  ;;  %v19052_v59 = vpop.f32.mrf.mxu0  ;;  %v16396_v41 = vld [vmem:[%s24847_s8 + $0x38] sm:$0xff] }
0x2895   :  { %14663 = vst.msk [vmem:[#allocation2 + $0x18] sm:$0xff] %vm14659_vm4, %v14642_v62  ;;  %v16393_v62 = vld [vmem:[%s24847_s8 + $0x20] sm:$0xff]  ;;  %v16395_v59 = vld [vmem:[%s24847_s8 + $0x30] sm:$0xff] }
0x2896   :  { %v15494_v46 = vpop.f32.mrf.mxu1  ;;  %v15545_v36 = vpop.f32.mrf.mxu0  ;;  %13748 = vrot.lane.b32.xlu1 %v25329_v2, %s20361_s13 }
0x2897   :  { %v12826_v6 = vpop.permute.xlu0 %12825  ;;  %v11939_v40 = vpop.permute.xlu1 %11938  ;;  %15568 = vrot.lane.b32.xlu0 %v15494_v46, %s20359_s2 }
0x2898   :  { %12850 = vst.msk [vmem:[#allocation2] sm:$0xff] %vm12849_vm2, %v12826_v6  ;;  %v19046_v4 = vpop.f32.mrf.mxu1  ;;  %v19053_v53 = vpop.f32.mrf.mxu0 }
0x2899   :  { %11962 = vst.msk [vmem:[#allocation2 + $0x8] sm:$0xff] %vm11960_vm1, %v11939_v40 }
0x289a   :  { %v15497_v30 = vpop.f32.mrf.mxu1  ;;  %14637 = vrot.lane.b32.xlu1 %v23925_v52, %s20360_s12  ;;  %v19799_v52 = vld [vmem:[%s24845_s3] sm:$0xff]  }
0x289b   :  { %v12828_v45 = vpop.permute.xlu1 %12827  ;;  %13746 = vrot.lane.b32.xlu0 %v25330_v25, %s20361_s13  ;;  %19062 = vmatprep.mubr.msk.bf16.mxu1 %vm327_vm0, %v19799_v52 }
0x289c   :  { %12851 = vst.msk [vmem:[#allocation2 + $0x8] sm:$0xff] %vm12849_vm2, %v12828_v45  ;;  %v19047_v28 = vpop.f32.mrf.mxu1 }
0x289e   :  { %15558 = vrot.lane.b32.xlu1 %v24334_v50, %s20359_s2  ;;  %v15614_v50 = vld [vmem:[%s24844_s4 + $0x28] sm:$0xff] }
0x289f   :  { %14635 = vrot.lane.b32.xlu0 %v23927_v19, %s20360_s12  ;;  %v15609_v19 = vld [vmem:[%s24844_s4] sm:$0xff] }
0x28a2   :  { %15624 = vperm.xlu1 %19130, %v15610_v10  }
0x28a3   :  { %15556 = vrot.lane.b32.xlu0 %v24338_v54, %s20359_s2  ;;  %v15616_v54 = vld [vmem:[%s24844_s4 + $0x38] sm:$0xff] }
0x28a6   :  { %15634 = vperm.xlu1 %19130, %v15612_v23  }
0x28a7   :  { %15619 = vperm.xlu0 %19129, %v15609_v19  }
0x28aa   :  { %15644 = vperm.xlu1 %19130, %v15614_v50  }
0x28ab   :  { %15629 = vperm.xlu0 %19129, %v15611_v1  }
0x28ae   :  { %15654 = vperm.xlu1 %19130, %v15616_v54  }
0x28af   :  { %15639 = vperm.xlu0 %19129, %v15613_v48  }
0x28b2   :  { %16041 = vperm.xlu1 %19130, %v15883_v44  }
0x28b3   :  { %15649 = vperm.xlu0 %19129, %v15615_v29   ;;  %v19800_v29 = vld [vmem:[%s24845_s3 + $0x8] sm:$0xff]  }
0x28b6   :  { %15961 = vperm.xlu1 %19130, %v15867_v8   ;;  %v19801_v8 = vld [vmem:[%s24845_s3 + $0x10] sm:$0xff]  }
0x28b7   :  { %16036 = vperm.xlu0 %19129, %v15882_v58   ;;  %v19802_v58 = vld [vmem:[%s24845_s3 + $0x18] sm:$0xff]  }
0x28ba   :  { %16031 = vperm.xlu1 %19130, %v15881_v17   ;;  %v19803_v17 = vld [vmem:[%s24848_s5] sm:$0xff]  }
0x28bb   :  { %15956 = vperm.xlu0 %19129, %v15866_v34   ;;  %19078 = vmatprep.mubr.msk.bf16.mxu0 %vm327_vm0, %v19803_v17 }
0x28be   :  { %15951 = vperm.xlu1 %19130, %v15865_v27  }
0x28bf   :  { %16026 = vperm.xlu0 %19129, %v15880_v14  }
0x28c2   :  { %16021 = vperm.xlu1 %19130, %v15879_v16  }
0x28c3   :  { %15946 = vperm.xlu0 %19129, %v15864_v42  }
0x28c6   :  { %15941 = vperm.xlu1 %19130, %v15863_v5  }
0x28c7   :  { %16016 = vperm.xlu0 %19129, %v15878_v20  }
0x28c8   :  { %v15561_v18 = vpop.permute.xlu0 %15560 }
0x28c9   :  { %15583 = vst.msk [vmem:[#allocation2 + $0x10] sm:$0xff] %vm15580_vm5, %v15561_v18 }
0x28ca   :  { %16011 = vperm.xlu1 %19130, %v15877_v3  }
0x28cb   :  { %15936 = vperm.xlu0 %19129, %v15862_v11   ;;  %v15563_v21 = vpop.permute.xlu1 %15562 }
0x28cc   :  { %15584 = vst.msk [vmem:[#allocation2 + $0x18] sm:$0xff] %vm15580_vm5, %v15563_v21 }
0x28ce   :  { %15931 = vperm.xlu1 %19130, %v15861_v9  }
0x28cf   :  { %16006 = vperm.xlu0 %19129, %v15876_v60  }
0x28d0   :  { %v15599_v50 = vld [vmem:[#allocation2 + $0x10] sm:$0xff] }
0x28d2   :  { %16001 = vperm.xlu1 %19130, %v15875_v13   ;;  %v20347_v13 = vld [vmem:[%s24841_s0] sm:$0xff] }
0x28d3   :  { %15926 = vperm.xlu0 %19129, %v15860_v49   ;;  %v15600_v19 = vld [vmem:[#allocation2 + $0x18] sm:$0xff] }
0x28d4   :  { %v15606_v1 = vpack.c.bf16 %v15600_v19, %v15599_v50 }
0x28d6   :  { %15921 = vperm.xlu1 %19130, %v15859_v37  }
0x28d7   :  { %15996 = vperm.xlu0 %19129, %v15874_v38   ;;  %v20348_v38 = vld [vmem:[%s24841_s0 + $0x8] sm:$0xff] }
0x28da   :  { %15991 = vperm.xlu1 %19130, %v15873_v56  }
0x28db   :  { %15916 = vperm.xlu0 %19129, %v15858_v32  }
0x28de   :  { %15911 = vperm.xlu1 %19130, %v15857_v57  }
0x28df   :  { %15986 = vperm.xlu0 %19129, %v15872_v33   ;;  %v20349_v33 = vld [vmem:[%s24841_s0 + $0x10] sm:$0xff] }
0x28e2   :  { %15981 = vperm.xlu1 %19130, %v15871_v7  }
0x28e3   :  { %15906 = vperm.xlu0 %19129, %v15856_v35  }
0x28e6   :  { %15901 = vperm.xlu1 %19130, %v15855_v15  }
0x28e7   :  { %15976 = vperm.xlu0 %19129, %v15870_v47  }
0x28ea   :  { %15971 = vperm.xlu1 %19130, %v15869_v31   ;;  %v20350_v31 = vld [vmem:[%s24841_s0 + $0x18] sm:$0xff] }
0x28eb   :  { %15896 = vperm.xlu0 %19129, %v15854_v39  }
0x28ee   :  { %15891 = vperm.xlu1 %19130, %v15853_v22  }
0x28ef   :  { %v15565_v43 = vpop.permute.xlu0 %15564  ;;  %15966 = vperm.xlu0 %19129, %v15868_v61  }
0x28f0   :  { %15585 = vst.msk [vmem:[#allocation2 + $0x20] sm:$0xff] %vm15580_vm5, %v15565_v43 }
0x28f2   :  { %16404 = vperm.xlu1 %19130, %v16390_v0  }
0x28f3   :  { %v15567_v12 = vpop.permute.xlu1 %15566  ;;  %15886 = vperm.xlu0 %19129, %v15852_v24   ;;  %v20351_v24 = vld [vmem:[%s24841_s0 + $0x20] sm:$0xff] }
0x28f4   :  { %15586 = vst.msk [vmem:[#allocation2 + $0x28] sm:$0xff] %vm15580_vm5, %v15567_v12 }
0x28f6   :  { %16414 = vperm.xlu1 %19130, %v16392_v26  }
0x28f7   :  { %16399 = vperm.xlu0 %19129, %v16389_v63   ;;  %v15601_v10 = vld [vmem:[#allocation2 + $0x20] sm:$0xff] }
0x28fa   :  { %16424 = vperm.xlu1 %19130, %v16394_v55  }
0x28fb   :  { %16409 = vperm.xlu0 %19129, %v16391_v51   ;;  %v15602_v25 = vld [vmem:[#allocation2 + $0x28] sm:$0xff] }
0x28fc   :  { %v15607_v52 = vpack.c.bf16 %v15602_v25, %v15601_v10 }
0x28fe   :  { %16434 = vperm.xlu1 %19130, %v16396_v41  }
0x28ff   :  { %16419 = vperm.xlu0 %19129, %v16393_v62   ;;  %v20352_v62 = vld [vmem:[%s24841_s0 + $0x28] sm:$0xff] }
0x2903   :  { %16429 = vperm.xlu0 %19129, %v16395_v59  }
0x2904   :  { %v15571_v46 = vpop.permute.xlu1 %15570 }
0x2905   :  { %15588 = vst.msk [vmem:[#allocation2 + $0x38] sm:$0xff] %vm15580_vm5, %v15571_v46  ;;  %v20353_v46 = vld [vmem:[%s24841_s0 + $0x30] sm:$0xff] }
0x2908   :  { %v13749_v36 = vpop.permute.xlu1 %13748 }
0x2909   :  { %13772 = vst.msk [vmem:[#allocation2 + $0x8] sm:$0xff] %vm13770_vm3, %v13749_v36  ;;  %v15569_v2 = vpop.permute.xlu0 %15568 }
0x290a   :  { %15587 = vst.msk [vmem:[#allocation2 + $0x30] sm:$0xff] %vm15580_vm5, %v15569_v2 }
0x290c   :  { %v14638_v6 = vpop.permute.xlu1 %14637  ;;  %v15604_v45 = vld [vmem:[#allocation2 + $0x38] sm:$0xff] }
0x290d   :  { %14661 = vst.msk [vmem:[#allocation2 + $0x8] sm:$0xff] %vm14659_vm4, %v14638_v6  ;;  %v13747_v40 = vpop.permute.xlu0 %13746  ;;  %v20354_v6 = vld [vmem:[%s24841_s0 + $0x38] sm:$0xff] }
0x290e   :  { %13771 = vst.msk [vmem:[#allocation2] sm:$0xff] %vm13770_vm3, %v13747_v40 }
0x2910   :  { %v15559_v4 = vpop.permute.xlu1 %15558 }
0x2911   :  { %15582 = vst.msk [vmem:[#allocation2 + $0x8] sm:$0xff] %vm15580_vm5, %v15559_v4  ;;  %v14636_v53 = vpop.permute.xlu0 %14635  ;;  %v15603_v30 = vld [vmem:[#allocation2 + $0x30] sm:$0xff] }
0x2912   :  { %14660 = vst.msk [vmem:[#allocation2] sm:$0xff] %vm14659_vm4, %v14636_v53  ;;  %v15608_v28 = vpack.c.bf16 %v15604_v45, %v15603_v30 }
0x2914   :  { %19054 = vmatprep.subr.bf16.mxu1 %v15608_v28 }
0x2915   :  { %19055 = vmatpush3.bf16.msra.mxu1 %v15608_v28  ;;  %v15557_v23 = vpop.permute.xlu0 %15556 }
0x2916   :  { %15581 = vst.msk [vmem:[#allocation2] sm:$0xff] %vm15580_vm5, %v15557_v23  ;;  %19056 = vmatprep.subr.bf16.mxu1 %v15607_v52 }
0x2918   :  { %v15598_v48 = vld [vmem:[#allocation2 + $0x8] sm:$0xff] }
0x2919   :  { %19057 = vmatpush3.bf16.msra.mxu1 %v15607_v52 }
0x291a   :  { %19058 = vmatprep.subr.bf16.mxu1 %v15606_v1 }
0x291d   :  { %19059 = vmatpush3.bf16.msra.mxu1 %v15606_v1  ;;  %v15597_v54 = vld [vmem:[#allocation2] sm:$0xff]  ;;  %v15625_v27 = vpop.permute.xlu1 %15624 }
0x291e   :  { %v15605_v44 = vpack.c.bf16 %v15598_v48, %v15597_v54 }
0x2920   :  { %19060 = vmatprep.subr.bf16.mxu1 %v15605_v44 }
0x2921   :  { %19061 = vmatpush3.bf16.msra.mxu1 %v15605_v44  ;;  %v15635_v5 = vpop.permute.xlu1 %15634 }
0x2922   :  { %v15620_v34 = vpop.permute.xlu0 %15619 }
0x2924   :  { %19063 = vmatmul.mubr.msk.bf16.vlgmr.msra.gmra.mxu1 %vm327_vm0, %v19800_v29 }
0x2925   :  { %19066 = vmatprep.mubr.msk.bf16.mxu1 %vm327_vm0, %v19801_v8  ;;  %v15645_v32 = vpop.permute.xlu1 %15644 }
0x2926   :  { %v15630_v16 = vpop.permute.xlu0 %15629 }
0x2929   :  { %v15655_v55 = vpop.permute.xlu1 %15654 }
0x292a   :  { %v15640_v9 = vpop.permute.xlu0 %15639 }
0x292c   :  { %19067 = vmatmul.mubr.msk.bf16.gmra.mxu1 %vm327_vm0, %v19802_v58 }
0x292e   :  { %v15650_v61 = vpop.permute.xlu0 %15649 }
0x29e4   :  { %v19064_v14 = vpop.f32.mrf.mxu1 }
0x29e5   :  { %v15732_v11 = vadd.f32 %v19064_v14, %v15630_v16 }
0x29e6   :  { %v15723_v42 = vpop.f32.mrf.mxu1 }
0x29e7   :  { %v15724_v3 = vadd.f32 %v15723_v42, %v15620_v34  ;;  %v24586_v7 = vadd.f32 %v20349_v33, %v15732_v11 }
0x29e8   :  { %v19065_v20 = vpop.f32.mrf.mxu1 }
0x29e9   :  { %v24576_v49 = vadd.f32 %v20347_v13, %v15724_v3  ;;  %v15735_v37 = vadd.f32 %v19065_v20, %v15635_v5  ;;  %25331 = vst [vmem:[#allocation48_spill] sm:$0xff] %v24586_v7 }
0x29ea   :  { %v15726_v18 = vpop.f32.mrf.mxu1 }
0x29eb   :  { %v15727_v21 = vadd.f32 %v15726_v18, %v15625_v27  ;;  %v24593_v39 = vadd.f32 %v20350_v31, %v15735_v37 }
0x29ec   :  { %v19068_v60 = vpop.f32.mrf.mxu1 }
0x29ed   :  { %v24581_v56 = vadd.f32 %v20348_v38, %v15727_v21  ;;  %25332 = vst [vmem:[#allocation46_spill] sm:$0xff] %v24593_v39  ;;  %v15748_v0 = vadd.f32 %v19068_v60, %v15650_v61 }
0x29ee   :  { %v15739_v57 = vpop.f32.mrf.mxu1 }
0x29ef   :  { %v15762_v35 = vadd.f32 %v24581_v56, %v24576_v49  ;;  %v15740_v15 = vadd.f32 %v15739_v57, %v15640_v9  ;;  %v24611_v36 = vadd.f32 %v20353_v46, %v15748_v0  ;;  %v19804_v46 = vld [vmem:[%s24848_s5 + $0x8] sm:$0xff]  }
0x29f0   :  { %v19069_v47 = vpop.f32.mrf.mxu1 }
0x29f1   :  { %v15763_v22 = vadd.f32 %v15762_v35, %v24586_v7  ;;  %v24599_v12 = vadd.f32 %v20351_v24, %v15740_v15  ;;  %v15751_v41 = vadd.f32 %v19069_v47, %v15655_v55  ;;  %25335 = vst [vmem:[#allocation23_spill] sm:$0xff] %v24611_v36 }
0x29f2   :  { %v15742_v43 = vpop.f32.mrf.mxu1 }
0x29f3   :  { %25333 = vst [vmem:[#allocation26_spill] sm:$0xff] %v24599_v12  ;;  %v15764_v26 = vadd.f32 %v15763_v22, %v24593_v39  ;;  %v15743_v63 = vadd.f32 %v15742_v43, %v15645_v32  ;;  %v24617_v40 = vadd.f32 %v20354_v6, %v15751_v41  ;;  %v19806_v6 = vld [vmem:[%s24848_s5 + $0x18] sm:$0xff]  }
0x29f5   :  { %v15765_v51 = vadd.f32 %v15764_v26, %v24599_v12  ;;  %v24606_v59 = vadd.f32 %v20352_v62, %v15743_v63  ;;  %25336 = vst [vmem:[#allocation20_spill] sm:$0xff] %v24617_v40 }
0x29f7   :  { %25334 = vst [vmem:[#allocation24_spill] sm:$0xff] %v24606_v59  ;;  %v15766_v2 = vadd.f32 %v15765_v51, %v24606_v59 }
0x29f9   :  { %v15767_v4 = vadd.f32 %v15766_v2, %v24611_v36  ;;  %v19805_v2 = vld [vmem:[%s24848_s5 + $0x10] sm:$0xff]  }
0x29fb   :  { %v15768_v53 = vadd.f32 %v15767_v4, %v24617_v40  ;;  %v19807_v4 = vld [vmem:[%s24848_s5 + $0x20] sm:$0xff]  }
0x29fd   :  { %v15769_v30 = vrot.slane %v15768_v53, 4 }
0x29ff   :  { %v15770_v45 = vadd.f32 %v15769_v30, %v15768_v53  ;;  %v19808_v53 = vld [vmem:[%s24848_s5 + $0x28] sm:$0xff]   ;;  %v19809_v30 = vld [vmem:[%s24848_s5 + $0x30] sm:$0xff]  }
0x2a01   :  { %v15771_v25 = vrot.slane %v15770_v45, 2 }
0x2a03   :  { %v15772_v28 = vadd.f32 %v15771_v25, %v15770_v45  ;;  %v19810_v45 = vld [vmem:[%s24848_s5 + $0x38] sm:$0xff]   ;;  %v19811_v25 = vld [vmem:[%s24848_s5 + $0x40] sm:$0xff]  }
0x2a05   :  { %v15773_v10 = vrot.slane %v15772_v28, 1 }
0x2a07   :  { %v15774_v52 = vadd.f32 %v15773_v10, %v15772_v28  ;;  %v19812_v28 = vld [vmem:[%s24848_s5 + $0x48] sm:$0xff]   ;;  %v19813_v10 = vld [vmem:[%s24848_s5 + $0x50] sm:$0xff]  }
0x2a09   :  { %v15775_v23 = vmul.f32 0.015625, %v15774_v52  ;;  %v19814_v52 = vld [vmem:[%s24848_s5 + $0x58] sm:$0xff]  }
0x2a0b   :  { %v15776_v19 = vsub.f32 %v24576_v49, %v15775_v23  ;;  %v15777_v50 = vsub.f32 %v24581_v56, %v15775_v23  ;;  %v15778_v1 = vsub.f32 %v24586_v7, %v15775_v23  ;;  %v15779_v54 = vsub.f32 %v24593_v39, %v15775_v23 }
0x2a0c   :  { %v15780_v29 = vsub.f32 %v24599_v12, %v15775_v23  ;;  %v15781_v17 = vsub.f32 %v24606_v59, %v15775_v23  ;;  %v15782_v42 = vsub.f32 %v24611_v36, %v15775_v23  ;;  %v15783_v3 = vsub.f32 %v24617_v40, %v15775_v23  ;;  %v19815_v23 = vld [vmem:[%s24848_s5 + $0x60] sm:$0xff]  }
0x2a0d   :  { %v15784_v48 = vmul.f32 %v15776_v19, %v15776_v19  ;;  %v15785_v44 = vmul.f32 %v15777_v50, %v15777_v50  ;;  %v15786_v8 = vmul.f32 %v15778_v1, %v15778_v1  ;;  %v15787_v34 = vmul.f32 %v15779_v54, %v15779_v54 }
0x2a0e   :  { %v15788_v14 = vmul.f32 %v15780_v29, %v15780_v29  ;;  %v15789_v5 = vmul.f32 %v15781_v17, %v15781_v17  ;;  %v15790_v11 = vmul.f32 %v15782_v42, %v15782_v42  ;;  %v15791_v21 = vmul.f32 %v15783_v3, %v15783_v3 }
0x2a0f   :  { %v15792_v58 = vadd.f32 %v15785_v44, %v15784_v48  ;;  %v24691_v48 = vpop.permute.xlu1 %16041 }
0x2a11   :  { %v15793_v27 = vadd.f32 %v15792_v58, %v15786_v8 }
0x2a13   :  { %v15794_v16 = vadd.f32 %v15793_v27, %v15787_v34 }
0x2a15   :  { %v15795_v20 = vadd.f32 %v15794_v16, %v15788_v14 }
0x2a17   :  { %v15796_v18 = vadd.f32 %v15795_v20, %v15789_v5 }
0x2a19   :  { %v15797_v9 = vadd.f32 %v15796_v18, %v15790_v11 }
0x2a1b   :  { %v15798_v60 = vadd.f32 %v15797_v9, %v15791_v21 }
0x2a1d   :  { %v15799_v13 = vrot.slane %v15798_v60, 4 }
0x2a1f   :  { %v15800_v37 = vadd.f32 %v15799_v13, %v15798_v60  ;;  %v19821_v13 = vld [vmem:[%s24849_s7 + $0x4] ss:$8 sps:$4 sm:$0xff]  }
0x2a20   :  { %16509 = vmatprep.mubr.bf16.mxu1 %v19821_v13 }
0x2a21   :  { %v15801_v38 = vrot.slane %v15800_v37, 2 }
0x2a23   :  { %v15802_v32 = vadd.f32 %v15801_v38, %v15800_v37 }
0x2a25   :  { %v15803_v57 = vrot.slane %v15802_v32, 1 }
0x2a27   :  { %v15804_v33 = vadd.f32 %v15803_v57, %v15802_v32 }
0x2a29   :  { %v15805_v35 = vmul.f32 0.015625, %v15804_v33 }
0x2a2b   :  { %v15806_v15 = vadd.f32 1e-05, %v15805_v35 }
0x2a2d   :  { %20345 = vrsqrt.f32 %v15806_v15 }
0x2a3a   :  { %v20346_v47 = vpop.eup %20345 }
0x2a3b   :  { %v15814_v31 = vmul.f32 %v20346_v47, %v15782_v42  ;;  %v15815_v22 = vmul.f32 %v20346_v47, %v15783_v3  ;;  %v15812_v61 = vmul.f32 %v20346_v47, %v15780_v29  ;;  %v15813_v43 = vmul.f32 %v20346_v47, %v15781_v17  ;;  %v24695_v29 = vpop.permute.xlu1 %15961 }
0x2a3c   :  { %v15810_v26 = vmul.f32 %v20346_v47, %v15778_v1  ;;  %v15811_v63 = vmul.f32 %v20346_v47, %v15779_v54  ;;  %v15808_v51 = vmul.f32 %v20346_v47, %v15776_v19  ;;  %v15809_v41 = vmul.f32 %v20346_v47, %v15777_v50  ;;  %v19816_v19 = vld [vmem:[%s24848_s5 + $0x68] sm:$0xff]   ;;  %v19817_v50 = vld [vmem:[%s24848_s5 + $0x70] sm:$0xff]   ;;  %v19818_v1 = vld [vmem:[%s24848_s5 + $0x78] sm:$0xff]   ;;  %v24689_v54 = vpop.permute.xlu0 %16036 }
0x2a3d   :  { %v15851_v0 = vpack.c.bf16 %v15815_v22, %v15814_v31  ;;  %v15850_v24 = vpack.c.bf16 %v15813_v43, %v15812_v61 }
0x2a3e   :  { %v15849_v55 = vpack.c.bf16 %v15811_v63, %v15810_v26  ;;  %v15848_v62 = vpack.c.bf16 %v15809_v41, %v15808_v51 }
0x2a3f   :  { %19070 = vmatprep.subr.bf16.mxu0 %v15851_v0  ;;  %v24699_v58 = vpop.permute.xlu1 %16031 }
0x2a40   :  { %19071 = vmatpush3.bf16.msra.mxu0 %v15851_v0  ;;  %v24693_v44 = vpop.permute.xlu0 %15956 }
0x2a41   :  { %19072 = vmatprep.subr.bf16.mxu0 %v15850_v24 }
0x2a43   :  { %v24703_v34 = vpop.permute.xlu1 %15951 }
0x2a44   :  { %19073 = vmatpush3.bf16.msra.mxu0 %v15850_v24  ;;  %v24697_v8 = vpop.permute.xlu0 %16026 }
0x2a45   :  { %19074 = vmatprep.subr.bf16.mxu0 %v15849_v55 }
0x2a47   :  { %v24707_v14 = vpop.permute.xlu1 %16021 }
0x2a48   :  { %19075 = vmatpush3.bf16.msra.mxu0 %v15849_v55  ;;  %v24701_v17 = vpop.permute.xlu0 %15946 }
0x2a49   :  { %19076 = vmatprep.subr.bf16.mxu0 %v15848_v62 }
0x2a4b   :  { %v24711_v42 = vpop.permute.xlu1 %15941 }
0x2a4c   :  { %19077 = vmatpush3.bf16.msra.mxu0 %v15848_v62  ;;  %v24705_v27 = vpop.permute.xlu0 %16016 }
0x2a4f   :  { %19079 = vmatmul.mubr.msk.bf16.vlgmr.msra.gmra.mxu0 %vm327_vm0, %v19804_v46  ;;  %v24715_v20 = vpop.permute.xlu1 %16011 }
0x2a50   :  { %19082 = vmatprep.mubr.msk.bf16.mxu0 %vm327_vm0, %v19805_v2  ;;  %v24709_v16 = vpop.permute.xlu0 %15936 }
0x2a53   :  { %v24719_v18 = vpop.permute.xlu1 %15931 }
0x2a54   :  { %v24713_v5 = vpop.permute.xlu0 %16006 }
0x2a57   :  { %19083 = vmatmul.mubr.msk.bf16.gmra.mxu0 %vm327_vm0, %v19806_v6  ;;  %v24723_v21 = vpop.permute.xlu1 %16001 }
0x2a58   :  { %19086 = vmatprep.mubr.msk.bf16.mxu0 %vm327_vm0, %v19807_v4  ;;  %v24717_v3 = vpop.permute.xlu0 %15926 }
0x2a5b   :  { %v15922_v60 = vpop.permute.xlu1 %15921 }
0x2a5c   :  { %v24721_v11 = vpop.permute.xlu0 %15996 }
0x2a5f   :  { %19087 = vmatmul.mubr.msk.bf16.gmra.mxu0 %vm327_vm0, %v19808_v53  ;;  %v24730_v38 = vpop.permute.xlu1 %15991 }
0x2a60   :  { %19090 = vmatprep.mubr.msk.bf16.mxu0 %vm327_vm0, %v19809_v30  ;;  %v15917_v9 = vpop.permute.xlu0 %15916 }
0x2a63   :  { %v15912_v57 = vpop.permute.xlu1 %15911 }
0x2a64   :  { %v24728_v37 = vpop.permute.xlu0 %15986 }
0x2a67   :  { %19091 = vmatmul.mubr.msk.bf16.gmra.mxu0 %vm327_vm0, %v19810_v45  ;;  %v24734_v35 = vpop.permute.xlu1 %15981 }
0x2a68   :  { %19094 = vmatprep.mubr.msk.bf16.mxu0 %vm327_vm0, %v19811_v25  ;;  %v15907_v32 = vpop.permute.xlu0 %15906 }
0x2a6b   :  { %v15902_v47 = vpop.permute.xlu1 %15901 }
0x2a6c   :  { %v24732_v33 = vpop.permute.xlu0 %15976 }
0x2a6f   :  { %19095 = vmatmul.mubr.msk.bf16.gmra.mxu0 %vm327_vm0, %v19812_v28  ;;  %v24738_v22 = vpop.permute.xlu1 %15971 }
0x2a70   :  { %19098 = vmatprep.mubr.msk.bf16.mxu0 %vm327_vm0, %v19813_v10  ;;  %v15897_v15 = vpop.permute.xlu0 %15896 }
0x2a73   :  { %v15892_v51 = vpop.permute.xlu1 %15891 }
0x2a74   :  { %v24736_v31 = vpop.permute.xlu0 %15966 }
0x2a77   :  { %19099 = vmatmul.mubr.msk.bf16.gmra.mxu0 %vm327_vm0, %v19814_v52 }
0x2a78   :  { %19102 = vmatprep.mubr.msk.bf16.mxu0 %vm327_vm0, %v19815_v23  ;;  %v15887_v24 = vpop.permute.xlu0 %15886 }
0x2a7f   :  { %19103 = vmatmul.mubr.msk.bf16.gmra.mxu0 %vm327_vm0, %v19816_v19 }
0x2a80   :  { %19106 = vmatprep.mubr.msk.bf16.mxu0 %vm327_vm0, %v19817_v50 }
0x2a87   :  { %19107 = vmatmul.mubr.msk.bf16.gmra.mxu0 %vm327_vm0, %v19818_v1 }
0x2b0f   :  { %v19080_v61 = vpop.f32.mrf.mxu0 }
0x2b10   :  { %v16215_v0 = vadd.f32 %v19080_v61, %v15897_v15 }
0x2b11   :  { %v16206_v43 = vpop.f32.mrf.mxu0 }
0x2b12   :  { %v16207_v63 = vadd.f32 %v16206_v43, %v15887_v24  ;;  %v16335_v62 = vmax.f32 %v16215_v0, 0.0 }
0x2b13   :  { %v19081_v26 = vpop.f32.mrf.mxu0 }
0x2b14   :  { %v16218_v55 = vadd.f32 %v19081_v26, %v15902_v47  ;;  %v16333_v4 = vmax.f32 %v16207_v63, 0.0 }
0x2b15   :  { %v16209_v41 = vpop.f32.mrf.mxu0 }
0x2b16   :  { %v16336_v46 = vmax.f32 %v16218_v55, 0.0  ;;  %v16210_v2 = vadd.f32 %v16209_v41, %v15892_v51 }
0x2b17   :  { %v19084_v6 = vpop.f32.mrf.mxu0 }
0x2b18   :  { %v24740_v53 = vpack.c.bf16 %v16336_v46, %v16335_v62  ;;  %v16334_v30 = vmax.f32 %v16210_v2, 0.0  ;;  %v16231_v28 = vadd.f32 %v19084_v6, %v15917_v9 }
0x2b19   :  { %v16222_v45 = vpop.f32.mrf.mxu0 }
0x2b1a   :  { %v24742_v25 = vpack.c.bf16 %v16334_v30, %v16333_v4  ;;  %v16223_v52 = vadd.f32 %v16222_v45, %v15907_v32  ;;  %v16339_v50 = vmax.f32 %v16231_v28, 0.0 }
0x2b1b   :  { %v19085_v10 = vpop.f32.mrf.mxu0 }
0x2b1c   :  { %v16234_v23 = vadd.f32 %v19085_v10, %v15922_v60  ;;  %v16337_v47 = vmax.f32 %v16223_v52, 0.0 }
0x2b1d   :  { %v16225_v19 = vpop.f32.mrf.mxu0 }
0x2b1e   :  { %v16340_v1 = vmax.f32 %v16234_v23, 0.0  ;;  %v16226_v13 = vadd.f32 %v16225_v19, %v15912_v57 }
0x2b1f   :  { %v19088_v15 = vpop.f32.mrf.mxu0 }
0x2b20   :  { %v24744_v61 = vpack.c.bf16 %v16340_v1, %v16339_v50  ;;  %v16338_v43 = vmax.f32 %v16226_v13, 0.0 }
0x2b21   :  { %v16238_v0 = vpop.f32.mrf.mxu0 }
0x2b22   :  { %v24746_v24 = vpack.c.bf16 %v16338_v43, %v16337_v47 }
0x2b23   :  { %v19089_v26 = vpop.f32.mrf.mxu0 }
0x2b25   :  { %v16241_v63 = vpop.f32.mrf.mxu0 }
0x2b27   :  { %v19092_v55 = vpop.f32.mrf.mxu0 }
0x2b28   :  { %v16263_v1 = vadd.f32 %v19092_v55, %v24693_v44 }
0x2b29   :  { %v16254_v51 = vpop.f32.mrf.mxu0 }
0x2b2b   :  { %v19093_v9 = vpop.f32.mrf.mxu0 }
0x2b2c   :  { %v16266_v23 = vadd.f32 %v19093_v9, %v24695_v29  ;;  %v16347_v9 = vmax.f32 %v16263_v1, 0.0 }
0x2b2d   :  { %v16257_v41 = vpop.f32.mrf.mxu0 }
0x2b2e   :  { %v16348_v40 = vmax.f32 %v16266_v23, 0.0  ;;  %v16258_v36 = vadd.f32 %v16257_v41, %v24703_v34 }
0x2b2f   :  { %v24748_v32 = vpop.f32.mrf.mxu0 }
0x2b30   :  { %v16380_v23 = vpack.c.bf16 %v16348_v40, %v16347_v9 }
0x2b31   :  { %v24750_v60 = vpop.f32.mrf.mxu0 }
0x2b33   :  { %v24752_v62 = vpop.f32.mrf.mxu0 }
0x2b35   :  { %v24754_v57 = vpop.f32.mrf.mxu0 }
0x2b37   :  { %v19100_v46 = vpop.f32.mrf.mxu0 }
0x2b39   :  { %v16286_v2 = vpop.f32.mrf.mxu0 }
0x2b3b   :  { %v19101_v6 = vpop.f32.mrf.mxu0 }
0x2b3c   :  { %v16298_v40 = vadd.f32 %v19101_v6, %v24723_v21  ;;  %v16287_v21 = vadd.f32 %v16286_v2, %v24728_v37  ;;  %v16271_v2 = vadd.f32 %v24750_v60, %v24736_v31  ;;  %v19824_v31 = vld [vmem:[%s24849_s7 + $0x14] ss:$8 sps:$4 sm:$0xff]  }
0x2b3d   :  { %v16289_v4 = vpop.f32.mrf.mxu0 }
0x2b3e   :  { %v16349_v1 = vmax.f32 %v16271_v2, 0.0  ;;  %v25342_v2 = vld [vmem:[#allocation20_spill] sm:$0xff] }
0x2b3f   :  { %v19104_v30 = vpop.f32.mrf.mxu0 }
0x2b40   :  { %v16311_v44 = vadd.f32 %v19104_v30, %v24705_v27  ;;  %v16290_v30 = vadd.f32 %v16289_v4, %v24730_v38  ;;  %v16274_v4 = vadd.f32 %v24754_v57, %v24738_v22  ;;  %v19819_v22 = vld [vmem:[%s24849_s7] ss:$8 sps:$4 sm:$0xff]  }
0x2b41   :  { %v16302_v45 = vpop.f32.mrf.mxu0 }
0x2b43   :  { %v19105_v28 = vpop.f32.mrf.mxu0 }
0x2b44   :  { %v16314_v12 = vadd.f32 %v19105_v28, %v24707_v14  ;;  %v16247_v28 = vadd.f32 %v19088_v15, %v24709_v16  ;;  %v16295_v16 = vadd.f32 %v19100_v46, %v24721_v11  ;;  %v16354_v11 = vmax.f32 %v16290_v30, 0.0 }
0x2b45   :  { %v16305_v10 = vpop.f32.mrf.mxu0  ;;  %v16279_v46 = vadd.f32 %v24748_v32, %v24732_v33  ;;  %v19828_v32 = vld [vmem:[%s24849_s7 + $0x30] ss:$8 sps:$4 sm:$0xff]  }
0x2b46   :  { %v16360_v34 = vmax.f32 %v16314_v12, 0.0  ;;  %v16306_v41 = vadd.f32 %v16305_v10, %v24715_v20  ;;  %v16239_v20 = vadd.f32 %v16238_v0, %v24717_v3  ;;  %v16282_v3 = vadd.f32 %v24752_v62, %v24734_v35 }
0x2b47   :  { %v19108_v52 = vpop.f32.mrf.mxu0  ;;  %v16353_v10 = vmax.f32 %v16287_v21, 0.0  ;;  %v16351_v37 = vmax.f32 %v16279_v46, 0.0  ;;  %v16350_v62 = vmax.f32 %v16274_v4, 0.0 }
0x2b48   :  { %v16327_v50 = vadd.f32 %v19108_v52, %v24689_v54  ;;  %v16255_v54 = vadd.f32 %v16254_v51, %v24701_v17  ;;  %v16303_v17 = vadd.f32 %v16302_v45, %v24713_v5  ;;  %v16358_v12 = vmax.f32 %v16306_v41, 0.0 }
0x2b49   :  { %v16318_v19 = vpop.f32.mrf.mxu0  ;;  %v16356_v5 = vmax.f32 %v16298_v40, 0.0  ;;  %v16352_v38 = vmax.f32 %v16282_v3, 0.0  ;;  %v16381_v33 = vpack.c.bf16 %v16350_v62, %v16349_v1 }
0x2b4a   :  { %v16319_v47 = vadd.f32 %v16318_v19, %v24697_v8  ;;  %v16363_v39 = vmax.f32 %v16327_v50, 0.0  ;;  %v16346_v19 = vmax.f32 %v16258_v36, 0.0  ;;  %v16357_v15 = vmax.f32 %v16303_v17, 0.0 }
0x2b4b   :  { %v19109_v13 = vpop.f32.mrf.mxu0  ;;  %v16383_v50 = vpack.c.bf16 %v16354_v11, %v16353_v10  ;;  %v16382_v35 = vpack.c.bf16 %v16352_v38, %v16351_v37  ;;  %v25341_v10 = vld [vmem:[#allocation23_spill] sm:$0xff] }
0x2b4c   :  { %v16330_v43 = vadd.f32 %v19109_v13, %v24691_v48  ;;  %v16361_v55 = vmax.f32 %v16319_v47, 0.0  ;;  %v16250_v48 = vadd.f32 %v19089_v26, %v24711_v42  ;;  %v16343_v42 = vmax.f32 %v16247_v28, 0.0  ;;  %v16400_v47 = vpop.permute.xlu0 %16399  ;;  %v25337_v28 = vld [vmem:[#allocation48_spill] sm:$0xff] }
0x2b4d   :  { %v16321_v59 = vpop.f32.mrf.mxu0  ;;  %v16385_v45 = vpack.c.bf16 %v16358_v12, %v16357_v15  ;;  %v25339_v15 = vld [vmem:[#allocation26_spill] sm:$0xff] }
0x2b4e   :  { %v16364_v7 = vmax.f32 %v16330_v43, 0.0  ;;  %v16322_v29 = vadd.f32 %v16321_v59, %v24699_v58  ;;  %v16345_v59 = vmax.f32 %v16255_v54, 0.0  ;;  %v16359_v58 = vmax.f32 %v16311_v44, 0.0 }
0x2b4f   :  { %v16344_v27 = vmax.f32 %v16250_v48, 0.0 }
0x2b50   :  { %v16388_v52 = vpack.c.bf16 %v16364_v7, %v16363_v39  ;;  %v16362_v8 = vmax.f32 %v16322_v29, 0.0  ;;  %v16242_v7 = vadd.f32 %v16241_v63, %v24719_v18  ;;  %v16379_v39 = vpack.c.bf16 %v16346_v19, %v16345_v59 }
0x2b51   :  { %v16386_v36 = vpack.c.bf16 %v16360_v34, %v16359_v58  ;;  %v16378_v26 = vpack.c.bf16 %v16344_v27, %v16343_v42  ;;  %v16341_v18 = vmax.f32 %v16239_v20, 0.0  ;;  %v16355_v63 = vmax.f32 %v16295_v16, 0.0  ;;  %v16410_v34 = vpop.permute.xlu0 %16409 }
0x2b52   :  { %v16387_v14 = vpack.c.bf16 %v16362_v8, %v16361_v55  ;;  %17446 = vmatprep.subr.bf16.mxu1 %v16388_v52  ;;  %v16342_v51 = vmax.f32 %v16242_v7, 0.0  ;;  %v16405_v55 = vpop.permute.xlu1 %16404 }
0x2b53   :  { %17447 = vmatpush3.bf16.msra.mxu1 %v16380_v23  ;;  %v16384_v0 = vpack.c.bf16 %v16356_v5, %v16355_v63  ;;  %v25340_v63 = vld [vmem:[#allocation24_spill] sm:$0xff] }
0x2b54   :  { %17448 = vmatprep.subr.bf16.mxu1 %v16387_v14  ;;  %v16377_v6 = vpack.c.bf16 %v16342_v51, %v16341_v18 }
0x2b55   :  { %v16420_v12 = vpop.permute.xlu0 %16419 }
0x2b56   :  { %v16415_v17 = vpop.permute.xlu1 %16414 }
0x2b57   :  { %17449 = vmatpush3.bf16.msra.mxu1 %v16379_v39  ;;  %v25338_v39 = vld [vmem:[#allocation46_spill] sm:$0xff] }
0x2b58   :  { %17450 = vmatprep.subr.bf16.mxu1 %v16386_v36 }
0x2b59   :  { %v16430_v3 = vpop.permute.xlu0 %16429 }
0x2b5a   :  { %v16425_v5 = vpop.permute.xlu1 %16424 }
0x2b5b   :  { %17451 = vmatpush3.bf16.msra.mxu1 %v16378_v26 }
0x2b5c   :  { %17452 = vmatprep.subr.bf16.mxu1 %v16385_v45 }
0x2b5f   :  { %17453 = vmatpush3.bf16.msra.mxu1 %v16377_v6 }
0x2b60   :  { %17454 = vmatprep.subr.bf16.mxu1 %v16384_v0 }
0x2b63   :  { %17455 = vmatpush3.bf16.msra.mxu1 %v24744_v61  ;;  %v19822_v61 = vld [vmem:[%s24849_s7 + $0x10] ss:$8 sps:$4 sm:$0xff]  }
0x2b64   :  { %17456 = vmatprep.subr.bf16.mxu1 %v16383_v50  ;;  %v16435_v50 = vpop.permute.xlu1 %16434 }
0x2b67   :  { %17457 = vmatpush3.bf16.msra.mxu1 %v24746_v24  ;;  %v19830_v24 = vld [vmem:[%s24849_s7 + $0x34] ss:$8 sps:$4 sm:$0xff]  }
0x2b68   :  { %17458 = vmatprep.subr.bf16.mxu1 %v16382_v35 }
0x2b6b   :  { %17459 = vmatpush3.bf16.msra.mxu1 %v24740_v53  ;;  %v19827_v53 = vld [vmem:[%s24849_s7 + $0x24] ss:$8 sps:$4 sm:$0xff]  }
0x2b6c   :  { %17460 = vmatprep.subr.bf16.mxu1 %v16381_v33 }
0x2b6f   :  { %17461 = vmatpush3.bf16.msra.mxu1 %v24742_v25  ;;  %v19825_v25 = vld [vmem:[%s24849_s7 + $0x20] ss:$8 sps:$4 sm:$0xff]  }
0x2b72   :  { %16510 = vmatmul.mubr.bf16.vlgmr.msra.gmra.mxu1 %v19819_v22 }
0x2b73   :  { %16517 = vmatprep.mubr.bf16.mxu1 %v19824_v31 }
0x2b7a   :  { %16518 = vmatmul.mubr.bf16.gmra.mxu1 %v19822_v61 }
0x2b7b   :  { %16525 = vmatprep.mubr.bf16.mxu1 %v19827_v53 }
0x2b82   :  { %16526 = vmatmul.mubr.bf16.gmra.mxu1 %v19825_v25 }
0x2b83   :  { %16533 = vmatprep.mubr.bf16.mxu1 %v19830_v24 }
0x2b8a   :  { %16534 = vmatmul.mubr.bf16.gmra.mxu1 %v19828_v32 }
0x2c32   :  { %v17462_v60 = vpop.f32.mrf.mxu1 }
0x2c34   :  { %v17463_v57 = vpop.f32.mrf.mxu1 }
0x2c35   :  { %v17464_v13 = vadd.f32 %v17463_v57, %v17462_v60 }
0x2c36   :  { %v17465_v43 = vpop.f32.mrf.mxu1 }
0x2c37   :  { %v16512_v29 = vadd.f32 %v17464_v13, %v16400_v47 }
0x2c38   :  { %v17466_v9 = vpop.f32.mrf.mxu1 }
0x2c39   :  { %v16542_v54 = vadd.f32 %v16512_v29, %v24576_v49  ;;  %v17467_v44 = vadd.f32 %v17466_v9, %v17465_v43 }
0x2c3a   :  { %v17468_v52 = vpop.f32.mrf.mxu1 }
0x2c3b   :  { %16550 = vst [vmem:[%s24850_s9] sm:$0xff] %v16542_v54  ;;  %v16515_v8 = vadd.f32 %v17467_v44, %v16405_v55 }
0x2c3c   :  { %v17469_v48 = vpop.f32.mrf.mxu1 }
0x2c3d   :  { %v16543_v23 = vadd.f32 %v16515_v8, %v24581_v56  ;;  %v17470_v19 = vadd.f32 %v17469_v48, %v17468_v52 }
0x2c3e   :  { %v17471_v41 = vpop.f32.mrf.mxu1 }
0x2c3f   :  { %16551 = vst [vmem:[%s24850_s9 + $0x8] sm:$0xff] %v16543_v23  ;;  %v16520_v14 = vadd.f32 %v17470_v19, %v16410_v34 }
0x2c40   :  { %v17472_v49 = vpop.f32.mrf.mxu1 }
0x2c41   :  { %v16544_v59 = vadd.f32 %v16520_v14, %v25337_v28  ;;  %v17473_v58 = vadd.f32 %v17472_v49, %v17471_v41 }
0x2c42   :  { %v17474_v27 = vpop.f32.mrf.mxu1 }
0x2c43   :  { %16552 = vst [vmem:[%s24850_s9 + $0x10] sm:$0xff] %v16544_v59  ;;  %v16523_v7 = vadd.f32 %v17473_v58, %v16415_v17 }
0x2c44   :  { %v17475_v56 = vpop.f32.mrf.mxu1 }
0x2c45   :  { %v16545_v40 = vadd.f32 %v16523_v7, %v25338_v39  ;;  %v17476_v36 = vadd.f32 %v17475_v56, %v17474_v27 }
0x2c46   :  { %v17477_v42 = vpop.f32.mrf.mxu1 }
0x2c47   :  { %16553 = vst [vmem:[%s24850_s9 + $0x18] sm:$0xff] %v16545_v40  ;;  %v16528_v20 = vadd.f32 %v17476_v36, %v16420_v12 }
0x2c48   :  { %v17478_v16 = vpop.f32.mrf.mxu1 }
0x2c49   :  { %v16546_v26 = vadd.f32 %v16528_v20, %v25339_v15  ;;  %v17479_v51 = vadd.f32 %v17478_v16, %v17477_v42 }
0x2c4a   :  { %v17480_v30 = vpop.f32.mrf.mxu1 }
0x2c4b   :  { %16554 = vst [vmem:[%s24850_s9 + $0x20] sm:$0xff] %v16546_v26  ;;  %v16531_v45 = vadd.f32 %v17479_v51, %v16425_v5 }
0x2c4c   :  { %v17481_v18 = vpop.f32.mrf.mxu1 }
0x2c4d   :  { %v16547_v21 = vadd.f32 %v16531_v45, %v25340_v63  ;;  %v17482_v6 = vadd.f32 %v17481_v18, %v17480_v30 }
0x2c4e   :  { %v17483_v0 = vpop.f32.mrf.mxu1 }
0x2c4f   :  { %16555 = vst [vmem:[%s24850_s9 + $0x28] sm:$0xff] %v16547_v21  ;;  %v16536_v11 = vadd.f32 %v17482_v6, %v16430_v3 }
0x2c50   :  { %v17484_v46 = vpop.f32.mrf.mxu1 }
0x2c51   :  { %v16548_v38 = vadd.f32 %v16536_v11, %v25341_v10  ;;  %v17485_v4 = vadd.f32 %v17484_v46, %v17483_v0 }
0x2c53   :  { %16556 = vst [vmem:[%s24850_s9 + $0x30] sm:$0xff] %v16548_v38  ;;  %v16539_v37 = vadd.f32 %v17485_v4, %v16435_v50 }
0x2c55   :  { %v16549_v35 = vadd.f32 %v16539_v37, %v25342_v2 }
0x2c57   :  { %16557 = vst [vmem:[%s24850_s9 + $0x38] sm:$0xff] %v16549_v35 }

</bundles_post_ra>
